<compile_context>
chip_gen: v5e
topology: v5e:2x2
jax: 0.10.0
libtpu: 0.0.40
codegen_flags: <defaults>
</compile_context>

<pallas_src>
import functools
import math

import jax
import jax.numpy as jnp
from jax.experimental import pallas as pl
from jax.experimental.pallas import tpu as pltpu

NUM_PANELS = 5


# --------------------------------------------------------------------------------------
# Pallas kernels
# --------------------------------------------------------------------------------------
def _conv3x3_kernel(x_ref, w_ref, s_ref, t_ref, a_ref, o_ref, stat_ref, xp_ref,
                    *, apply_act, hc):
    """Per-panel 3x3 'same' conv (zero pad) with fused input prologue and BN-stat partials.

    x_ref    : (1, 1, H, W, Cin)   bf16  one (batch, panel) UNPADDED image (channels-last)
    w_ref    : (1, 3, 3, Cin, TCo) bf16  this panel's weights, one Cout tile
    s_ref    : (1, Cin)            f32   BN scale for the fused prologue (conv2 only)
    t_ref    : (1, Cin)            f32   BN shift for the fused prologue (conv2 only)
    a_ref    : (1,)                f32   PReLU alpha (SMEM scalar)
    o_ref    : (1, 1, H, W, TCo)   bf16  raw conv output (pre-BN)
    stat_ref : (1, 1, 2, TCo)      f32   row 0 = sum over H*W, row 1 = sum of squares
    xp_ref   : ((H+2)*W, Cin)      bf16  VMEM scratch: height-zero-padded, row-flattened image
    """
    _, _, H, W, Co = o_ref.shape
    Cin = x_ref.shape[-1]

    # ---- prologue: optional fused BN1 affine + PReLU on the conv input tile (VPU) ----
    x = x_ref[0, 0, :, :, :].reshape(H * W, Cin)                  # layout-preserving (W % 8 == 0)
    if apply_act:
        y = x.astype(jnp.float32) * s_ref[0, :] + t_ref[0, :]
        alpha = a_ref[0]
        x = jnp.where(y >= 0.0, y, alpha * y).astype(jnp.bfloat16)

    # ---- in-kernel zero padding of the height border (no jnp.pad HBM pass) ----
    # TODO(synk): zero rows approximate the cube-sphere neighbour stitching.
    zrow = jnp.zeros((W, Cin), xp_ref.dtype)
    xp_ref[pl.ds(0, W), :] = zrow                                  # top padding row
    xp_ref[pl.ds((H + 1) * W, W), :] = zrow                        # bottom padding row
    xp_ref[pl.ds(W, H * W), :] = x.astype(xp_ref.dtype)            # interior (aligned store)

    s_sum = jnp.zeros((1, Co), jnp.float32)
    q_sum = jnp.zeros((1, Co), jnp.float32)

    # ---- main loop: row-chunked so live f32 acc/z tiles stay small (no vreg-file spills) ----
    for h0 in range(0, H, hc):
        m = hc * W                                                  # matmul M for this chunk
        col = jax.lax.broadcasted_iota(jnp.int32, (m, 1), 0) % W    # column index within a row
        acc = jnp.zeros((m, Co), jnp.float32)

        # taps grouped by dx: all reads are W-multiple-aligned rows of the flattened scratch;
        # the +/-1 column shift is applied on the f32 result via an XLU roll + boundary mask.
        for dx in range(3):
            z = jnp.zeros((m, Co), jnp.float32)
            for dy in range(3):
                start = (h0 + dy) * W                               # static, multiple of W
                patch = xp_ref[pl.ds(start, m), :]                  # (m, Cin) bf16, aligned
                z = z + jnp.dot(patch, w_ref[0, dy, dx, :, :],
                                preferred_element_type=jnp.float32)
            if dx == 0:
                # out[h, w] += z0[h, w-1]  (zero at w == 0)
                acc = acc + jnp.where(col == 0, 0.0, pltpu.roll(z, shift=1, axis=0))
            elif dx == 1:
                acc = acc + z
            else:
                # out[h, w] += z2[h, w+1]  (zero at w == W-1)
                acc = acc + jnp.where(col == W - 1, 0.0, pltpu.roll(z, shift=m - 1, axis=0))

        o_ref[0, 0, pl.ds(h0, hc), :, :] = acc.reshape(hc, W, Co).astype(o_ref.dtype)
        s_sum = s_sum + jnp.sum(acc, axis=0, keepdims=True)
        q_sum = q_sum + jnp.sum(acc * acc, axis=0, keepdims=True)

    stat_ref[0, 0, 0:1, :] = s_sum
    stat_ref[0, 0, 1:2, :] = q_sum


def _bn_add_kernel(x_ref, s_ref, t_ref, r_ref, o_ref):
    # y = x * scale + shift + residual   (final BN2 affine + residual add)
    y = x_ref[...].astype(jnp.float32) * s_ref[...] + t_ref[...]
    o_ref[...] = (y + r_ref[...].astype(jnp.float32)).astype(o_ref.dtype)


# --------------------------------------------------------------------------------------
# Pallas wrappers
# --------------------------------------------------------------------------------------
def _pick_hc(H, W, co_tile):
    """Rows of the image per in-kernel chunk: keep acc + z (two (hc*W, co) f32 tiles) small."""
    target = max(1, 16384 // max(1, W * co_tile))   # hc*W*co <= 16K elems -> acc <= 64 KiB
    hc = 1
    for d in range(1, H + 1):
        if H % d == 0 and d <= target:
            hc = d
    return hc


def cube_conv3x3(x_cl, w, scale, shift, alpha, *, apply_act):
    """CubeSphereConv2DSingleNode (3x3, stride 1, bias=False), channels-last, unpadded input.

    x_cl  : (N, P, H, W, Cin)  bf16     (padding + optional BN1/PReLU prologue done in-kernel)
    w     : (P, 3, 3, Cin, Cout) bf16
    scale, shift : (Cin,) f32  (used only when apply_act=True)
    alpha : (1,) f32           PReLU parameter
    returns conv (N, P, H, W, Cout) bf16 , stats (N, P, 2, Cout) f32 (sum / sumsq partials)
    """
    N, P, H, W, Cin = x_cl.shape
    Cout = w.shape[-1]
    if x_cl.dtype != jnp.bfloat16:
        x_cl = x_cl.astype(jnp.bfloat16)
    if w.dtype != jnp.bfloat16:
        w = w.astype(jnp.bfloat16)

    # Cout tile: full when small; 256 (MXU / lane friendly) when it divides evenly.
    tco = 256 if (Cout > 256 and Cout % 256 == 0) else Cout
    nco = Cout // tco
    hc = _pick_hc(H, W, tco)

    kernel = functools.partial(_conv3x3_kernel, apply_act=apply_act, hc=hc)

    flops = 2 * N * P * H * W * 9 * Cin * Cout
    bytes_accessed = (x_cl.size * 2 * nco + w.size * 2
                      + N * P * H * W * Cout * 2 + N * P * 2 * Cout * 4)

    conv_out, stats = pl.pallas_call(
        kernel,
        out_shape=(jax.ShapeDtypeStruct((N, P, H, W, Cout), jnp.bfloat16),
                   jax.ShapeDtypeStruct((N, P, 2, Cout), jnp.float32)),
        # N innermost: for fixed (panel, cout-tile) the weight block index is constant across
        # the batch sweep, so the weight DMA is skipped (weight-resident inner loop).
        grid=(P, nco, N),
        in_specs=[
            pl.BlockSpec((1, 1, H, W, Cin), lambda p, c, n: (n, p, 0, 0, 0)),
            pl.BlockSpec((1, 3, 3, Cin, tco), lambda p, c, n: (p, 0, 0, 0, c)),
            pl.BlockSpec((1, Cin), lambda p, c, n: (0, 0)),
            pl.BlockSpec((1, Cin), lambda p, c, n: (0, 0)),
            pl.BlockSpec(memory_space=pltpu.MemorySpace.SMEM),
        ],
        out_specs=(
            pl.BlockSpec((1, 1, H, W, tco), lambda p, c, n: (n, p, 0, 0, c)),
            pl.BlockSpec((1, 1, 2, tco), lambda p, c, n: (n, p, 0, c)),
        ),
        scratch_shapes=[pltpu.VMEM(((H + 2) * W, Cin), jnp.bfloat16)],
        compiler_params=pltpu.CompilerParams(
            dimension_semantics=("parallel", "parallel", "parallel"),
            vmem_limit_bytes=48 * 1024 * 1024),   # fits v7x's 64 MiB physical VMEM with headroom
        cost_estimate=pl.CostEstimate(flops=flops, transcendentals=0,
                                      bytes_accessed=bytes_accessed),
    )(x_cl, w,
      scale.reshape(1, Cin).astype(jnp.float32),
      shift.reshape(1, Cin).astype(jnp.float32),
      alpha.reshape(1).astype(jnp.float32))
    return conv_out, stats


def _row_tile(rows, channels, budget_bytes=8 << 20):
    """VMEM-budget-aware row tile for the elementwise pass.

    Per row: x bf16 + residual bf16 + out f32 = 8*C bytes; double-buffered -> 16*C bytes.
    """
    cap = max(8, min(1024, budget_bytes // (16 * channels)))
    t = min(rows, cap) - (min(rows, cap) % 8)
    while t >= 8:
        if rows % t == 0:
            return t
        t -= 8
    return rows   # fallback: single block (tiny problems / odd row counts)


def bn_add(x_cl, scale, shift, residual_cl):
    """Fused BatchNorm affine + residual add, row-tiled channels-last. Returns f32."""
    shape = x_cl.shape
    C = shape[-1]
    x2 = x_cl.reshape(-1, C)
    r2 = residual_cl.reshape(-1, C)
    R = x2.shape[0]
    tr = _row_tile(R, C)
    out = pl.pallas_call(
        _bn_add_kernel,
        out_shape=jax.ShapeDtypeStruct((R, C), jnp.float32),
        grid=(R // tr,),
        in_specs=[
            pl.BlockSpec((tr, C), lambda i: (i, 0)),
            pl.BlockSpec((1, C), lambda i: (0, 0)),
            pl.BlockSpec((1, C), lambda i: (0, 0)),
            pl.BlockSpec((tr, C), lambda i: (i, 0)),
        ],
        out_specs=pl.BlockSpec((tr, C), lambda i: (i, 0)),
        compiler_params=pltpu.CompilerParams(
            dimension_semantics=("parallel",),
            vmem_limit_bytes=32 * 1024 * 1024),
    )(x2, scale.reshape(1, C).astype(jnp.float32),
      shift.reshape(1, C).astype(jnp.float32), r2)
    return out.reshape(shape)


# --------------------------------------------------------------------------------------
# Plain-JAX glue (tiny per-channel BN reduction of the fused partials)
# --------------------------------------------------------------------------------------
def _bn_affine_from_stats(stats, gamma, beta, count, eps=1e-5):
    # training-mode BatchNorm3d: per-channel stats over (N, panels, H, W), biased variance.
    # TODO(synk): E[x^2]-E[x]^2 in f32 can cancel for large-mean activations; a shifted /
    #             Welford reduction would be more robust.
    s = jnp.sum(stats[:, :, 0, :], axis=(0, 1))
    sq = jnp.sum(stats[:, :, 1, :], axis=(0, 1))
    mean = s / count
    var = jnp.maximum(sq / count - mean * mean, 0.0)
    scale = gamma * jax.lax.rsqrt(var + eps)
    shift = beta - mean * scale
    return scale, shift


# --------------------------------------------------------------------------------------
# Parameters + forward (mirrors ResidualConvBlockSingleNode.forward)
# --------------------------------------------------------------------------------------
def init_params(key, channels):
    k1, k2 = jax.random.split(key)
    std = math.sqrt(2.0 / (channels * 9))  # kaiming_normal_ fan_in for a 3x3 conv
    w1 = jax.random.normal(k1, (NUM_PANELS, 3, 3, channels, channels), jnp.float32) * std
    w2 = jax.random.normal(k2, (NUM_PANELS, 3, 3, channels, channels), jnp.float32) * std
    return {
        # conv weights pre-cast to bf16 once (MXU input dtype) instead of per-forward.
        "w1": w1.astype(jnp.bfloat16), "w2": w2.astype(jnp.bfloat16),
        "bn1_gamma": jnp.ones((channels,), jnp.float32),
        "bn1_beta": jnp.zeros((channels,), jnp.float32),
        "bn2_gamma": jnp.ones((channels,), jnp.float32),
        "bn2_beta": jnp.zeros((channels,), jnp.float32),
        "alpha": jnp.array([0.25], jnp.float32),  # nn.PReLU() default single parameter
    }


def residual_conv_block_forward(params, x):
    """x: (N, C, panels, H, W) float32 (PyTorch NCDHW). Returns the same shape, float32."""
    N, C, P, H, W = x.shape
    x_cl = jnp.transpose(x, (0, 2, 3, 4, 1))           # -> (N, P, H, W, C), channels-last (once)
    x_bf = x_cl.astype(jnp.bfloat16)                    # single cast: conv1 input + residual
    count = N * P * H * W

    ones = jnp.ones((C,), jnp.float32)
    zeros = jnp.zeros((C,), jnp.float32)

    # pad -> conv1 (bias=False); padding is in-kernel, BN1 stats fused as partial sums.
    conv_a, stats_a = cube_conv3x3(x_bf, params["w1"], ones, zeros, params["alpha"],
                                   apply_act=False)
    scale_a, shift_a = _bn_affine_from_stats(stats_a, params["bn1_gamma"],
                                             params["bn1_beta"], count)

    # BN1 + PReLU fused into conv2's input prologue; pad -> conv2; BN2 stats fused.
    conv_b, stats_b = cube_conv3x3(conv_a, params["w2"], scale_a, shift_a, params["alpha"],
                                   apply_act=True)
    scale_b, shift_b = _bn_affine_from_stats(stats_b, params["bn2_gamma"],
                                             params["bn2_beta"], count)

    # BN2 affine + residual add (single remaining elementwise pass).
    out_cl = bn_add(conv_b, scale_b, shift_b, x_bf)

    return jnp.transpose(out_cl, (0, 4, 1, 2, 3))       # back to NCDHW (once)


# --------------------------------------------------------------------------------------
# Pure-JAX reference (same zero-pad approximation) used as a sanity check
# --------------------------------------------------------------------------------------
def _reference_forward(params, x):
    N, C, P, H, W = x.shape
    x_cl = jnp.transpose(x, (0, 2, 3, 4, 1)).astype(jnp.float32)

    def conv(inp, w):
        w = w.astype(jnp.float32)
        p_ = jnp.pad(inp, ((0, 0), (0, 0), (1, 1), (1, 1), (0, 0)))
        out = jnp.zeros(inp.shape[:-1] + (w.shape[-1],), jnp.float32)
        for dy in range(3):
            for dx in range(3):
                out = out + jnp.einsum("nphwc,pcd->nphwd",
                                       p_[:, :, dy:dy + H, dx:dx + W, :], w[:, dy, dx])
        return out

    def bn(t, gamma, beta, eps=1e-5):
        mean = jnp.mean(t, axis=(0, 1, 2, 3))
        var = jnp.var(t, axis=(0, 1, 2, 3))
        return (t - mean) / jnp.sqrt(var + eps) * gamma + beta

    t = conv(x_cl, params["w1"])
    t = bn(t, params["bn1_gamma"], params["bn1_beta"])
    a = params["alpha"][0]
    t = jnp.where(t >= 0.0, t, a * t)
    t = conv(t, params["w2"])
    t = bn(t, params["bn2_gamma"], params["bn2_beta"])
    out_cl = t + x_cl
    return jnp.transpose(out_cl, (0, 4, 1, 2, 3))


# --------------------------------------------------------------------------------------
if __name__ == "__main__":
    # small demo config: batch=2, channels=128 (lane-dense C; real model uses 512),
    # 5 cube-sphere panels, 16x16 spatial.
    N, C, H, W = 2, 128, 16, 16
    key = jax.random.PRNGKey(0)
    kx, kp = jax.random.split(key)
    x = jax.random.normal(kx, (N, C, NUM_PANELS, H, W), jnp.float32)
    params = init_params(kp, C)

    fwd = jax.jit(residual_conv_block_forward)
    out = fwd(params, x)
    jax.block_until_ready(out)

    assert out.shape == (N, C, NUM_PANELS, H, W)
    assert bool(jnp.all(jnp.isfinite(out)))

    # numerical sanity check vs pure-JAX f32 reference (bf16 activations/matmuls -> loose tol)
    ref = _reference_forward(params, x)
    max_err = float(jnp.max(jnp.abs(out - ref)))
    assert max_err < 2e-1, f"max abs error vs reference: {max_err}"

    print("KERNEL_OK")
</pallas_src>

<mosaic_0001>
module attributes {stable_mosaic.version = 11 : i64} {
  func.func @_conv3x3_kernel(%arg0: i32, %arg1: i32, %arg2: i32, %arg3: memref<1x1x16x16x128xbf16, #tpu.memory_space<vmem>>, %arg4: memref<1x3x3x128x128xbf16, #tpu.memory_space<vmem>>, %arg5: memref<1x128xf32, #tpu.memory_space<vmem>>, %arg6: memref<1x128xf32, #tpu.memory_space<vmem>>, %arg7: memref<1xf32, #tpu.memory_space<smem>>, %arg8: memref<1x1x16x16x128xbf16, #tpu.memory_space<vmem>>, %arg9: memref<1x1x2x128xf32, #tpu.memory_space<vmem>>, %arg10: memref<288x128xbf16, #tpu.memory_space<vmem>>) attributes {dimension_semantics = [#tpu.dimension_semantics<parallel>, #tpu.dimension_semantics<parallel>, #tpu.dimension_semantics<parallel>], iteration_bounds = array<i64: 5, 1, 2>, scalar_prefetch = 0 : i64, scratch_operands = 1 : i64, tpu.core_type = #tpu.core_type<tc>, window_params = [{transform_indices = @transform_0, window_bounds = array<i64: 1, 1, 16, 16, 128>}, {transform_indices = @transform_1, window_bounds = array<i64: 1, 3, 3, 128, 128>}, {pipeline_mode = #tpu.pipeline_mode<synchronous>, transform_indices = @transform_2, window_bounds = array<i64: 1, 128>}, {pipeline_mode = #tpu.pipeline_mode<synchronous>, transform_indices = @transform_3, window_bounds = array<i64: 1, 128>}, {transform_indices = @transform_4, window_bounds = array<i64: 1>}, {transform_indices = @transform_5, window_bounds = array<i64: 1, 1, 16, 16, 128>}, {transform_indices = @transform_6, window_bounds = array<i64: 1, 1, 2, 128>}]} {
    %c0 = arith.constant 0 : index
    %c0_0 = arith.constant 0 : index
    %c0_1 = arith.constant 0 : index
    %c0_2 = arith.constant 0 : index
    %c0_3 = arith.constant 0 : index
    %0 = vector.load %arg3[%c0, %c0_0, %c0_1, %c0_2, %c0_3] : memref<1x1x16x16x128xbf16, #tpu.memory_space<vmem>>, vector<1x1x16x16x128xbf16>
    %1 = vector.shape_cast %0 : vector<1x1x16x16x128xbf16> to vector<16x16x128xbf16>
    %2 = vector.shape_cast %1 : vector<16x16x128xbf16> to vector<256x128xbf16>
    %cst = arith.constant 0.000000e+00 : bf16
    %3 = vector.broadcast %cst : bf16 to vector<16x128xbf16>
    %c0_4 = arith.constant 0 : index
    %c0_5 = arith.constant 0 : index
    %4 = vector.load %arg10[%c0_4, %c0_5] : memref<288x128xbf16, #tpu.memory_space<vmem>>, vector<16x128xbf16>
    tpu.vector_store %arg10[%c0_4, %c0_5], %3 {strides = array<i32>} : memref<288x128xbf16, #tpu.memory_space<vmem>>, vector<16x128xbf16>,
    %c272 = arith.constant 272 : index
    %c0_6 = arith.constant 0 : index
    %5 = vector.load %arg10[%c272, %c0_6] : memref<288x128xbf16, #tpu.memory_space<vmem>>, vector<16x128xbf16>
    tpu.vector_store %arg10[%c272, %c0_6], %3 {strides = array<i32>} : memref<288x128xbf16, #tpu.memory_space<vmem>>, vector<16x128xbf16>,
    %c16 = arith.constant 16 : index
    %c0_7 = arith.constant 0 : index
    %6 = vector.load %arg10[%c16, %c0_7] : memref<288x128xbf16, #tpu.memory_space<vmem>>, vector<256x128xbf16>
    tpu.vector_store %arg10[%c16, %c0_7], %2 {strides = array<i32>} : memref<288x128xbf16, #tpu.memory_space<vmem>>, vector<256x128xbf16>,
    %cst_8 = arith.constant 0.000000e+00 : f32
    %7 = vector.broadcast %cst_8 : f32 to vector<1x128xf32>
    %cst_9 = arith.constant 0.000000e+00 : f32
    %8 = vector.broadcast %cst_9 : f32 to vector<1x128xf32>
    %9 = tpu.iota {dimensions = array<i32: 0>} : vector<128x1xi32>
    %c16_i32 = arith.constant 16 : i32
    %c0_i32 = arith.constant 0 : i32
    %10 = arith.cmpi eq, %c16_i32, %c0_i32 : i32
    %c1_i32 = arith.constant 1 : i32
    %11 = arith.select %10, %c1_i32, %c16_i32 : i32
    %12 = vector.broadcast %11 : i32 to vector<128x1xi32>
    %13 = arith.remsi %9, %12 : vector<128x1xi32>
    %c0_i32_10 = arith.constant 0 : i32
    %14 = vector.broadcast %c0_i32_10 : i32 to vector<128x1xi32>
    %15 = arith.cmpi ne, %13, %14 : vector<128x1xi32>
    %c0_i32_11 = arith.constant 0 : i32
    %16 = vector.broadcast %c0_i32_11 : i32 to vector<128x1xi32>
    %17 = arith.cmpi slt, %13, %16 : vector<128x1xi32>
    %c0_i32_12 = arith.constant 0 : i32
    %18 = arith.cmpi slt, %11, %c0_i32_12 : i32
    %19 = vector.broadcast %18 : i1 to vector<128x1xi1>
    %20 = vector.broadcast %19 : vector<128x1xi1> to vector<128x1xi1>
    %21 = arith.xori %17, %20 : vector<128x1xi1>
    %22 = arith.andi %21, %15 : vector<128x1xi1>
    %23 = vector.broadcast %11 : i32 to vector<128x1xi32>
    %24 = arith.addi %13, %23 : vector<128x1xi32>
    %25 = arith.select %22, %24, %13 : vector<128x1xi1>, vector<128x1xi32>
    %cst_13 = arith.constant 0.000000e+00 : f32
    %26 = vector.broadcast %cst_13 : f32 to vector<128x128xf32>
    %cst_14 = arith.constant 0.000000e+00 : f32
    %27 = vector.broadcast %cst_14 : f32 to vector<128x128xf32>
    %c0_15 = arith.constant 0 : index
    %c0_16 = arith.constant 0 : index
    %28 = vector.load %arg10[%c0_15, %c0_16] : memref<288x128xbf16, #tpu.memory_space<vmem>>, vector<128x128xbf16>
    %c0_17 = arith.constant 0 : index
    %c0_18 = arith.constant 0 : index
    %c0_19 = arith.constant 0 : index
    %c0_20 = arith.constant 0 : index
    %c0_21 = arith.constant 0 : index
    %29 = vector.load %arg4[%c0_17, %c0_18, %c0_19, %c0_20, %c0_21] : memref<1x3x3x128x128xbf16, #tpu.memory_space<vmem>>, vector<1x1x1x128x128xbf16>
    %30 = vector.shape_cast %29 : vector<1x1x1x128x128xbf16> to vector<128x128xbf16>
    %cst_22 = arith.constant dense<0.000000e+00> : vector<128x128xf32>
    %31 = tpu.matmul %28, %30, %cst_22 {dimension_numbers = #tpu.dot_dimension_numbers<[1], [0], [0], [1], [0, 0, 1, 1], [], []>} : vector<128x128xbf16>, vector<128x128xbf16>, vector<128x128xf32> -> vector<128x128xf32>
    %32 = arith.addf %27, %31 : vector<128x128xf32>
    %c16_23 = arith.constant 16 : index
    %c0_24 = arith.constant 0 : index
    %33 = vector.load %arg10[%c16_23, %c0_24] : memref<288x128xbf16, #tpu.memory_space<vmem>>, vector<128x128xbf16>
    %c0_25 = arith.constant 0 : index
    %c1 = arith.constant 1 : index
    %c0_26 = arith.constant 0 : index
    %c0_27 = arith.constant 0 : index
    %c0_28 = arith.constant 0 : index
    %34 = vector.load %arg4[%c0_25, %c1, %c0_26, %c0_27, %c0_28] : memref<1x3x3x128x128xbf16, #tpu.memory_space<vmem>>, vector<1x1x1x128x128xbf16>
    %35 = vector.shape_cast %34 : vector<1x1x1x128x128xbf16> to vector<128x128xbf16>
    %cst_29 = arith.constant dense<0.000000e+00> : vector<128x128xf32>
    %36 = tpu.matmul %33, %35, %cst_29 {dimension_numbers = #tpu.dot_dimension_numbers<[1], [0], [0], [1], [0, 0, 1, 1], [], []>} : vector<128x128xbf16>, vector<128x128xbf16>, vector<128x128xf32> -> vector<128x128xf32>
    %37 = arith.addf %32, %36 : vector<128x128xf32>
    %c32 = arith.constant 32 : index
    %c0_30 = arith.constant 0 : index
    %38 = vector.load %arg10[%c32, %c0_30] : memref<288x128xbf16, #tpu.memory_space<vmem>>, vector<128x128xbf16>
    %c0_31 = arith.constant 0 : index
    %c2 = arith.constant 2 : index
    %c0_32 = arith.constant 0 : index
    %c0_33 = arith.constant 0 : index
    %c0_34 = arith.constant 0 : index
    %39 = vector.load %arg4[%c0_31, %c2, %c0_32, %c0_33, %c0_34] : memref<1x3x3x128x128xbf16, #tpu.memory_space<vmem>>, vector<1x1x1x128x128xbf16>
    %40 = vector.shape_cast %39 : vector<1x1x1x128x128xbf16> to vector<128x128xbf16>
    %cst_35 = arith.constant dense<0.000000e+00> : vector<128x128xf32>
    %41 = tpu.matmul %38, %40, %cst_35 {dimension_numbers = #tpu.dot_dimension_numbers<[1], [0], [0], [1], [0, 0, 1, 1], [], []>} : vector<128x128xbf16>, vector<128x128xbf16>, vector<128x128xf32> -> vector<128x128xf32>
    %42 = arith.addf %37, %41 : vector<128x128xf32>
    %c0_i32_36 = arith.constant 0 : i32
    %43 = vector.broadcast %c0_i32_36 : i32 to vector<128x1xi32>
    %44 = arith.cmpi eq, %25, %43 : vector<128x1xi32>
    %c1_i32_37 = arith.constant 1 : i32
    %45 = tpu.dynamic_rotate %42 by %c1_i32_37 dim 0 : vector<128x128xf32>, i32 -> vector<128x128xf32>
    %cst_38 = arith.constant 0.000000e+00 : f32
    %46 = vector.shape_cast %44 : vector<128x1xi1> to vector<128x1xi1>
    %47 = vector.broadcast %46 : vector<128x1xi1> to vector<128x128xi1>
    %48 = vector.broadcast %cst_38 : f32 to vector<128x128xf32>
    %49 = arith.select %47, %48, %45 : vector<128x128xi1>, vector<128x128xf32>
    %50 = arith.addf %26, %49 : vector<128x128xf32>
    %cst_39 = arith.constant 0.000000e+00 : f32
    %51 = vector.broadcast %cst_39 : f32 to vector<128x128xf32>
    %c0_40 = arith.constant 0 : index
    %c0_41 = arith.constant 0 : index
    %52 = vector.load %arg10[%c0_40, %c0_41] : memref<288x128xbf16, #tpu.memory_space<vmem>>, vector<128x128xbf16>
    %c0_42 = arith.constant 0 : index
    %c0_43 = arith.constant 0 : index
    %c1_44 = arith.constant 1 : index
    %c0_45 = arith.constant 0 : index
    %c0_46 = arith.constant 0 : index
    %53 = vector.load %arg4[%c0_42, %c0_43, %c1_44, %c0_45, %c0_46] : memref<1x3x3x128x128xbf16, #tpu.memory_space<vmem>>, vector<1x1x1x128x128xbf16>
    %54 = vector.shape_cast %53 : vector<1x1x1x128x128xbf16> to vector<128x128xbf16>
    %cst_47 = arith.constant dense<0.000000e+00> : vector<128x128xf32>
    %55 = tpu.matmul %52, %54, %cst_47 {dimension_numbers = #tpu.dot_dimension_numbers<[1], [0], [0], [1], [0, 0, 1, 1], [], []>} : vector<128x128xbf16>, vector<128x128xbf16>, vector<128x128xf32> -> vector<128x128xf32>
    %56 = arith.addf %51, %55 : vector<128x128xf32>
    %c16_48 = arith.constant 16 : index
    %c0_49 = arith.constant 0 : index
    %57 = vector.load %arg10[%c16_48, %c0_49] : memref<288x128xbf16, #tpu.memory_space<vmem>>, vector<128x128xbf16>
    %c0_50 = arith.constant 0 : index
    %c1_51 = arith.constant 1 : index
    %c1_52 = arith.constant 1 : index
    %c0_53 = arith.constant 0 : index
    %c0_54 = arith.constant 0 : index
    %58 = vector.load %arg4[%c0_50, %c1_51, %c1_52, %c0_53, %c0_54] : memref<1x3x3x128x128xbf16, #tpu.memory_space<vmem>>, vector<1x1x1x128x128xbf16>
    %59 = vector.shape_cast %58 : vector<1x1x1x128x128xbf16> to vector<128x128xbf16>
    %cst_55 = arith.constant dense<0.000000e+00> : vector<128x128xf32>
    %60 = tpu.matmul %57, %59, %cst_55 {dimension_numbers = #tpu.dot_dimension_numbers<[1], [0], [0], [1], [0, 0, 1, 1], [], []>} : vector<128x128xbf16>, vector<128x128xbf16>, vector<128x128xf32> -> vector<128x128xf32>
    %61 = arith.addf %56, %60 : vector<128x128xf32>
    %c32_56 = arith.constant 32 : index
    %c0_57 = arith.constant 0 : index
    %62 = vector.load %arg10[%c32_56, %c0_57] : memref<288x128xbf16, #tpu.memory_space<vmem>>, vector<128x128xbf16>
    %c0_58 = arith.constant 0 : index
    %c2_59 = arith.constant 2 : index
    %c1_60 = arith.constant 1 : index
    %c0_61 = arith.constant 0 : index
    %c0_62 = arith.constant 0 : index
    %63 = vector.load %arg4[%c0_58, %c2_59, %c1_60, %c0_61, %c0_62] : memref<1x3x3x128x128xbf16, #tpu.memory_space<vmem>>, vector<1x1x1x128x128xbf16>
    %64 = vector.shape_cast %63 : vector<1x1x1x128x128xbf16> to vector<128x128xbf16>
    %cst_63 = arith.constant dense<0.000000e+00> : vector<128x128xf32>
    %65 = tpu.matmul %62, %64, %cst_63 {dimension_numbers = #tpu.dot_dimension_numbers<[1], [0], [0], [1], [0, 0, 1, 1], [], []>} : vector<128x128xbf16>, vector<128x128xbf16>, vector<128x128xf32> -> vector<128x128xf32>
    %66 = arith.addf %61, %65 : vector<128x128xf32>
    %67 = arith.addf %50, %66 : vector<128x128xf32>
    %cst_64 = arith.constant 0.000000e+00 : f32
    %68 = vector.broadcast %cst_64 : f32 to vector<128x128xf32>
    %c0_65 = arith.constant 0 : index
    %c0_66 = arith.constant 0 : index
    %69 = vector.load %arg10[%c0_65, %c0_66] : memref<288x128xbf16, #tpu.memory_space<vmem>>, vector<128x128xbf16>
    %c0_67 = arith.constant 0 : index
    %c0_68 = arith.constant 0 : index
    %c2_69 = arith.constant 2 : index
    %c0_70 = arith.constant 0 : index
    %c0_71 = arith.constant 0 : index
    %70 = vector.load %arg4[%c0_67, %c0_68, %c2_69, %c0_70, %c0_71] : memref<1x3x3x128x128xbf16, #tpu.memory_space<vmem>>, vector<1x1x1x128x128xbf16>
    %71 = vector.shape_cast %70 : vector<1x1x1x128x128xbf16> to vector<128x128xbf16>
    %cst_72 = arith.constant dense<0.000000e+00> : vector<128x128xf32>
    %72 = tpu.matmul %69, %71, %cst_72 {dimension_numbers = #tpu.dot_dimension_numbers<[1], [0], [0], [1], [0, 0, 1, 1], [], []>} : vector<128x128xbf16>, vector<128x128xbf16>, vector<128x128xf32> -> vector<128x128xf32>
    %73 = arith.addf %68, %72 : vector<128x128xf32>
    %c16_73 = arith.constant 16 : index
    %c0_74 = arith.constant 0 : index
    %74 = vector.load %arg10[%c16_73, %c0_74] : memref<288x128xbf16, #tpu.memory_space<vmem>>, vector<128x128xbf16>
    %c0_75 = arith.constant 0 : index
    %c1_76 = arith.constant 1 : index
    %c2_77 = arith.constant 2 : index
    %c0_78 = arith.constant 0 : index
    %c0_79 = arith.constant 0 : index
    %75 = vector.load %arg4[%c0_75, %c1_76, %c2_77, %c0_78, %c0_79] : memref<1x3x3x128x128xbf16, #tpu.memory_space<vmem>>, vector<1x1x1x128x128xbf16>
    %76 = vector.shape_cast %75 : vector<1x1x1x128x128xbf16> to vector<128x128xbf16>
    %cst_80 = arith.constant dense<0.000000e+00> : vector<128x128xf32>
    %77 = tpu.matmul %74, %76, %cst_80 {dimension_numbers = #tpu.dot_dimension_numbers<[1], [0], [0], [1], [0, 0, 1, 1], [], []>} : vector<128x128xbf16>, vector<128x128xbf16>, vector<128x128xf32> -> vector<128x128xf32>
    %78 = arith.addf %73, %77 : vector<128x128xf32>
    %c32_81 = arith.constant 32 : index
    %c0_82 = arith.constant 0 : index
    %79 = vector.load %arg10[%c32_81, %c0_82] : memref<288x128xbf16, #tpu.memory_space<vmem>>, vector<128x128xbf16>
    %c0_83 = arith.constant 0 : index
    %c2_84 = arith.constant 2 : index
    %c2_85 = arith.constant 2 : index
    %c0_86 = arith.constant 0 : index
    %c0_87 = arith.constant 0 : index
    %80 = vector.load %arg4[%c0_83, %c2_84, %c2_85, %c0_86, %c0_87] : memref<1x3x3x128x128xbf16, #tpu.memory_space<vmem>>, vector<1x1x1x128x128xbf16>
    %81 = vector.shape_cast %80 : vector<1x1x1x128x128xbf16> to vector<128x128xbf16>
    %cst_88 = arith.constant dense<0.000000e+00> : vector<128x128xf32>
    %82 = tpu.matmul %79, %81, %cst_88 {dimension_numbers = #tpu.dot_dimension_numbers<[1], [0], [0], [1], [0, 0, 1, 1], [], []>} : vector<128x128xbf16>, vector<128x128xbf16>, vector<128x128xf32> -> vector<128x128xf32>
    %83 = arith.addf %78, %82 : vector<128x128xf32>
    %c15_i32 = arith.constant 15 : i32
    %84 = vector.broadcast %c15_i32 : i32 to vector<128x1xi32>
    %85 = arith.cmpi eq, %25, %84 : vector<128x1xi32>
    %c127_i32 = arith.constant 127 : i32
    %86 = tpu.dynamic_rotate %83 by %c127_i32 dim 0 : vector<128x128xf32>, i32 -> vector<128x128xf32>
    %cst_89 = arith.constant 0.000000e+00 : f32
    %87 = vector.shape_cast %85 : vector<128x1xi1> to vector<128x1xi1>
    %88 = vector.broadcast %87 : vector<128x1xi1> to vector<128x128xi1>
    %89 = vector.broadcast %cst_89 : f32 to vector<128x128xf32>
    %90 = arith.select %88, %89, %86 : vector<128x128xi1>, vector<128x128xf32>
    %91 = arith.addf %67, %90 : vector<128x128xf32>
    %92 = vector.shape_cast %91 : vector<128x128xf32> to vector<8x16x128xf32>
    %93 = arith.truncf %92 : vector<8x16x128xf32> to vector<8x16x128xbf16>
    %c0_90 = arith.constant 0 : index
    %c0_91 = arith.constant 0 : index
    %c0_92 = arith.constant 0 : index
    %c0_93 = arith.constant 0 : index
    %c0_94 = arith.constant 0 : index
    %94 = vector.load %arg8[%c0_90, %c0_91, %c0_92, %c0_93, %c0_94] : memref<1x1x16x16x128xbf16, #tpu.memory_space<vmem>>, vector<1x1x8x16x128xbf16>
    %95 = vector.shape_cast %94 : vector<1x1x8x16x128xbf16> to vector<8x16x128xbf16>
    %96 = vector.shape_cast %93 : vector<8x16x128xbf16> to vector<1x1x8x16x128xbf16>
    tpu.vector_store %arg8[%c0_90, %c0_91, %c0_92, %c0_93, %c0_94], %96 {strides = array<i32>} : memref<1x1x16x16x128xbf16, #tpu.memory_space<vmem>>, vector<1x1x8x16x128xbf16>,
    %cst_95 = arith.constant dense<0.000000e+00> : vector<128xf32>
    %97 = vector.multi_reduction <add>, %91, %cst_95 [0] : vector<128x128xf32> to vector<128xf32>
    %98 = vector.shape_cast %97 : vector<128xf32> to vector<1x128xf32>
    %99 = arith.addf %7, %98 : vector<1x128xf32>
    %100 = arith.mulf %91, %91 : vector<128x128xf32>
    %cst_96 = arith.constant dense<0.000000e+00> : vector<128xf32>
    %101 = vector.multi_reduction <add>, %100, %cst_96 [0] : vector<128x128xf32> to vector<128xf32>
    %102 = vector.shape_cast %101 : vector<128xf32> to vector<1x128xf32>
    %103 = arith.addf %8, %102 : vector<1x128xf32>
    %104 = tpu.iota {dimensions = array<i32: 0>} : vector<128x1xi32>
    %c16_i32_97 = arith.constant 16 : i32
    %c0_i32_98 = arith.constant 0 : i32
    %105 = arith.cmpi eq, %c16_i32_97, %c0_i32_98 : i32
    %c1_i32_99 = arith.constant 1 : i32
    %106 = arith.select %105, %c1_i32_99, %c16_i32_97 : i32
    %107 = vector.broadcast %106 : i32 to vector<128x1xi32>
    %108 = arith.remsi %104, %107 : vector<128x1xi32>
    %c0_i32_100 = arith.constant 0 : i32
    %109 = vector.broadcast %c0_i32_100 : i32 to vector<128x1xi32>
    %110 = arith.cmpi ne, %108, %109 : vector<128x1xi32>
    %c0_i32_101 = arith.constant 0 : i32
    %111 = vector.broadcast %c0_i32_101 : i32 to vector<128x1xi32>
    %112 = arith.cmpi slt, %108, %111 : vector<128x1xi32>
    %c0_i32_102 = arith.constant 0 : i32
    %113 = arith.cmpi slt, %106, %c0_i32_102 : i32
    %114 = vector.broadcast %113 : i1 to vector<128x1xi1>
    %115 = vector.broadcast %114 : vector<128x1xi1> to vector<128x1xi1>
    %116 = arith.xori %112, %115 : vector<128x1xi1>
    %117 = arith.andi %116, %110 : vector<128x1xi1>
    %118 = vector.broadcast %106 : i32 to vector<128x1xi32>
    %119 = arith.addi %108, %118 : vector<128x1xi32>
    %120 = arith.select %117, %119, %108 : vector<128x1xi1>, vector<128x1xi32>
    %cst_103 = arith.constant 0.000000e+00 : f32
    %121 = vector.broadcast %cst_103 : f32 to vector<128x128xf32>
    %cst_104 = arith.constant 0.000000e+00 : f32
    %122 = vector.broadcast %cst_104 : f32 to vector<128x128xf32>
    %c128 = arith.constant 128 : index
    %c0_105 = arith.constant 0 : index
    %123 = vector.load %arg10[%c128, %c0_105] : memref<288x128xbf16, #tpu.memory_space<vmem>>, vector<128x128xbf16>
    %c0_106 = arith.constant 0 : index
    %c0_107 = arith.constant 0 : index
    %c0_108 = arith.constant 0 : index
    %c0_109 = arith.constant 0 : index
    %c0_110 = arith.constant 0 : index
    %124 = vector.load %arg4[%c0_106, %c0_107, %c0_108, %c0_109, %c0_110] : memref<1x3x3x128x128xbf16, #tpu.memory_space<vmem>>, vector<1x1x1x128x128xbf16>
    %125 = vector.shape_cast %124 : vector<1x1x1x128x128xbf16> to vector<128x128xbf16>
    %cst_111 = arith.constant dense<0.000000e+00> : vector<128x128xf32>
    %126 = tpu.matmul %123, %125, %cst_111 {dimension_numbers = #tpu.dot_dimension_numbers<[1], [0], [0], [1], [0, 0, 1, 1], [], []>} : vector<128x128xbf16>, vector<128x128xbf16>, vector<128x128xf32> -> vector<128x128xf32>
    %127 = arith.addf %122, %126 : vector<128x128xf32>
    %c144 = arith.constant 144 : index
    %c0_112 = arith.constant 0 : index
    %128 = vector.load %arg10[%c144, %c0_112] : memref<288x128xbf16, #tpu.memory_space<vmem>>, vector<128x128xbf16>
    %c0_113 = arith.constant 0 : index
    %c1_114 = arith.constant 1 : index
    %c0_115 = arith.constant 0 : index
    %c0_116 = arith.constant 0 : index
    %c0_117 = arith.constant 0 : index
    %129 = vector.load %arg4[%c0_113, %c1_114, %c0_115, %c0_116, %c0_117] : memref<1x3x3x128x128xbf16, #tpu.memory_space<vmem>>, vector<1x1x1x128x128xbf16>
    %130 = vector.shape_cast %129 : vector<1x1x1x128x128xbf16> to vector<128x128xbf16>
    %cst_118 = arith.constant dense<0.000000e+00> : vector<128x128xf32>
    %131 = tpu.matmul %128, %130, %cst_118 {dimension_numbers = #tpu.dot_dimension_numbers<[1], [0], [0], [1], [0, 0, 1, 1], [], []>} : vector<128x128xbf16>, vector<128x128xbf16>, vector<128x128xf32> -> vector<128x128xf32>
    %132 = arith.addf %127, %131 : vector<128x128xf32>
    %c160 = arith.constant 160 : index
    %c0_119 = arith.constant 0 : index
    %133 = vector.load %arg10[%c160, %c0_119] : memref<288x128xbf16, #tpu.memory_space<vmem>>, vector<128x128xbf16>
    %c0_120 = arith.constant 0 : index
    %c2_121 = arith.constant 2 : index
    %c0_122 = arith.constant 0 : index
    %c0_123 = arith.constant 0 : index
    %c0_124 = arith.constant 0 : index
    %134 = vector.load %arg4[%c0_120, %c2_121, %c0_122, %c0_123, %c0_124] : memref<1x3x3x128x128xbf16, #tpu.memory_space<vmem>>, vector<1x1x1x128x128xbf16>
    %135 = vector.shape_cast %134 : vector<1x1x1x128x128xbf16> to vector<128x128xbf16>
    %cst_125 = arith.constant dense<0.000000e+00> : vector<128x128xf32>
    %136 = tpu.matmul %133, %135, %cst_125 {dimension_numbers = #tpu.dot_dimension_numbers<[1], [0], [0], [1], [0, 0, 1, 1], [], []>} : vector<128x128xbf16>, vector<128x128xbf16>, vector<128x128xf32> -> vector<128x128xf32>
    %137 = arith.addf %132, %136 : vector<128x128xf32>
    %c0_i32_126 = arith.constant 0 : i32
    %138 = vector.broadcast %c0_i32_126 : i32 to vector<128x1xi32>
    %139 = arith.cmpi eq, %120, %138 : vector<128x1xi32>
    %c1_i32_127 = arith.constant 1 : i32
    %140 = tpu.dynamic_rotate %137 by %c1_i32_127 dim 0 : vector<128x128xf32>, i32 -> vector<128x128xf32>
    %cst_128 = arith.constant 0.000000e+00 : f32
    %141 = vector.shape_cast %139 : vector<128x1xi1> to vector<128x1xi1>
    %142 = vector.broadcast %141 : vector<128x1xi1> to vector<128x128xi1>
    %143 = vector.broadcast %cst_128 : f32 to vector<128x128xf32>
    %144 = arith.select %142, %143, %140 : vector<128x128xi1>, vector<128x128xf32>
    %145 = arith.addf %121, %144 : vector<128x128xf32>
    %cst_129 = arith.constant 0.000000e+00 : f32
    %146 = vector.broadcast %cst_129 : f32 to vector<128x128xf32>
    %c128_130 = arith.constant 128 : index
    %c0_131 = arith.constant 0 : index
    %147 = vector.load %arg10[%c128_130, %c0_131] : memref<288x128xbf16, #tpu.memory_space<vmem>>, vector<128x128xbf16>
    %c0_132 = arith.constant 0 : index
    %c0_133 = arith.constant 0 : index
    %c1_134 = arith.constant 1 : index
    %c0_135 = arith.constant 0 : index
    %c0_136 = arith.constant 0 : index
    %148 = vector.load %arg4[%c0_132, %c0_133, %c1_134, %c0_135, %c0_136] : memref<1x3x3x128x128xbf16, #tpu.memory_space<vmem>>, vector<1x1x1x128x128xbf16>
    %149 = vector.shape_cast %148 : vector<1x1x1x128x128xbf16> to vector<128x128xbf16>
    %cst_137 = arith.constant dense<0.000000e+00> : vector<128x128xf32>
    %150 = tpu.matmul %147, %149, %cst_137 {dimension_numbers = #tpu.dot_dimension_numbers<[1], [0], [0], [1], [0, 0, 1, 1], [], []>} : vector<128x128xbf16>, vector<128x128xbf16>, vector<128x128xf32> -> vector<128x128xf32>
    %151 = arith.addf %146, %150 : vector<128x128xf32>
    %c144_138 = arith.constant 144 : index
    %c0_139 = arith.constant 0 : index
    %152 = vector.load %arg10[%c144_138, %c0_139] : memref<288x128xbf16, #tpu.memory_space<vmem>>, vector<128x128xbf16>
    %c0_140 = arith.constant 0 : index
    %c1_141 = arith.constant 1 : index
    %c1_142 = arith.constant 1 : index
    %c0_143 = arith.constant 0 : index
    %c0_144 = arith.constant 0 : index
    %153 = vector.load %arg4[%c0_140, %c1_141, %c1_142, %c0_143, %c0_144] : memref<1x3x3x128x128xbf16, #tpu.memory_space<vmem>>, vector<1x1x1x128x128xbf16>
    %154 = vector.shape_cast %153 : vector<1x1x1x128x128xbf16> to vector<128x128xbf16>
    %cst_145 = arith.constant dense<0.000000e+00> : vector<128x128xf32>
    %155 = tpu.matmul %152, %154, %cst_145 {dimension_numbers = #tpu.dot_dimension_numbers<[1], [0], [0], [1], [0, 0, 1, 1], [], []>} : vector<128x128xbf16>, vector<128x128xbf16>, vector<128x128xf32> -> vector<128x128xf32>
    %156 = arith.addf %151, %155 : vector<128x128xf32>
    %c160_146 = arith.constant 160 : index
    %c0_147 = arith.constant 0 : index
    %157 = vector.load %arg10[%c160_146, %c0_147] : memref<288x128xbf16, #tpu.memory_space<vmem>>, vector<128x128xbf16>
    %c0_148 = arith.constant 0 : index
    %c2_149 = arith.constant 2 : index
    %c1_150 = arith.constant 1 : index
    %c0_151 = arith.constant 0 : index
    %c0_152 = arith.constant 0 : index
    %158 = vector.load %arg4[%c0_148, %c2_149, %c1_150, %c0_151, %c0_152] : memref<1x3x3x128x128xbf16, #tpu.memory_space<vmem>>, vector<1x1x1x128x128xbf16>
    %159 = vector.shape_cast %158 : vector<1x1x1x128x128xbf16> to vector<128x128xbf16>
    %cst_153 = arith.constant dense<0.000000e+00> : vector<128x128xf32>
    %160 = tpu.matmul %157, %159, %cst_153 {dimension_numbers = #tpu.dot_dimension_numbers<[1], [0], [0], [1], [0, 0, 1, 1], [], []>} : vector<128x128xbf16>, vector<128x128xbf16>, vector<128x128xf32> -> vector<128x128xf32>
    %161 = arith.addf %156, %160 : vector<128x128xf32>
    %162 = arith.addf %145, %161 : vector<128x128xf32>
    %cst_154 = arith.constant 0.000000e+00 : f32
    %163 = vector.broadcast %cst_154 : f32 to vector<128x128xf32>
    %c128_155 = arith.constant 128 : index
    %c0_156 = arith.constant 0 : index
    %164 = vector.load %arg10[%c128_155, %c0_156] : memref<288x128xbf16, #tpu.memory_space<vmem>>, vector<128x128xbf16>
    %c0_157 = arith.constant 0 : index
    %c0_158 = arith.constant 0 : index
    %c2_159 = arith.constant 2 : index
    %c0_160 = arith.constant 0 : index
    %c0_161 = arith.constant 0 : index
    %165 = vector.load %arg4[%c0_157, %c0_158, %c2_159, %c0_160, %c0_161] : memref<1x3x3x128x128xbf16, #tpu.memory_space<vmem>>, vector<1x1x1x128x128xbf16>
    %166 = vector.shape_cast %165 : vector<1x1x1x128x128xbf16> to vector<128x128xbf16>
    %cst_162 = arith.constant dense<0.000000e+00> : vector<128x128xf32>
    %167 = tpu.matmul %164, %166, %cst_162 {dimension_numbers = #tpu.dot_dimension_numbers<[1], [0], [0], [1], [0, 0, 1, 1], [], []>} : vector<128x128xbf16>, vector<128x128xbf16>, vector<128x128xf32> -> vector<128x128xf32>
    %168 = arith.addf %163, %167 : vector<128x128xf32>
    %c144_163 = arith.constant 144 : index
    %c0_164 = arith.constant 0 : index
    %169 = vector.load %arg10[%c144_163, %c0_164] : memref<288x128xbf16, #tpu.memory_space<vmem>>, vector<128x128xbf16>
    %c0_165 = arith.constant 0 : index
    %c1_166 = arith.constant 1 : index
    %c2_167 = arith.constant 2 : index
    %c0_168 = arith.constant 0 : index
    %c0_169 = arith.constant 0 : index
    %170 = vector.load %arg4[%c0_165, %c1_166, %c2_167, %c0_168, %c0_169] : memref<1x3x3x128x128xbf16, #tpu.memory_space<vmem>>, vector<1x1x1x128x128xbf16>
    %171 = vector.shape_cast %170 : vector<1x1x1x128x128xbf16> to vector<128x128xbf16>
    %cst_170 = arith.constant dense<0.000000e+00> : vector<128x128xf32>
    %172 = tpu.matmul %169, %171, %cst_170 {dimension_numbers = #tpu.dot_dimension_numbers<[1], [0], [0], [1], [0, 0, 1, 1], [], []>} : vector<128x128xbf16>, vector<128x128xbf16>, vector<128x128xf32> -> vector<128x128xf32>
    %173 = arith.addf %168, %172 : vector<128x128xf32>
    %c160_171 = arith.constant 160 : index
    %c0_172 = arith.constant 0 : index
    %174 = vector.load %arg10[%c160_171, %c0_172] : memref<288x128xbf16, #tpu.memory_space<vmem>>, vector<128x128xbf16>
    %c0_173 = arith.constant 0 : index
    %c2_174 = arith.constant 2 : index
    %c2_175 = arith.constant 2 : index
    %c0_176 = arith.constant 0 : index
    %c0_177 = arith.constant 0 : index
    %175 = vector.load %arg4[%c0_173, %c2_174, %c2_175, %c0_176, %c0_177] : memref<1x3x3x128x128xbf16, #tpu.memory_space<vmem>>, vector<1x1x1x128x128xbf16>
    %176 = vector.shape_cast %175 : vector<1x1x1x128x128xbf16> to vector<128x128xbf16>
    %cst_178 = arith.constant dense<0.000000e+00> : vector<128x128xf32>
    %177 = tpu.matmul %174, %176, %cst_178 {dimension_numbers = #tpu.dot_dimension_numbers<[1], [0], [0], [1], [0, 0, 1, 1], [], []>} : vector<128x128xbf16>, vector<128x128xbf16>, vector<128x128xf32> -> vector<128x128xf32>
    %178 = arith.addf %173, %177 : vector<128x128xf32>
    %c15_i32_179 = arith.constant 15 : i32
    %179 = vector.broadcast %c15_i32_179 : i32 to vector<128x1xi32>
    %180 = arith.cmpi eq, %120, %179 : vector<128x1xi32>
    %c127_i32_180 = arith.constant 127 : i32
    %181 = tpu.dynamic_rotate %178 by %c127_i32_180 dim 0 : vector<128x128xf32>, i32 -> vector<128x128xf32>
    %cst_181 = arith.constant 0.000000e+00 : f32
    %182 = vector.shape_cast %180 : vector<128x1xi1> to vector<128x1xi1>
    %183 = vector.broadcast %182 : vector<128x1xi1> to vector<128x128xi1>
    %184 = vector.broadcast %cst_181 : f32 to vector<128x128xf32>
    %185 = arith.select %183, %184, %181 : vector<128x128xi1>, vector<128x128xf32>
    %186 = arith.addf %162, %185 : vector<128x128xf32>
    %187 = vector.shape_cast %186 : vector<128x128xf32> to vector<8x16x128xf32>
    %188 = arith.truncf %187 : vector<8x16x128xf32> to vector<8x16x128xbf16>
    %c0_182 = arith.constant 0 : index
    %c0_183 = arith.constant 0 : index
    %c8 = arith.constant 8 : index
    %c0_184 = arith.constant 0 : index
    %c0_185 = arith.constant 0 : index
    %189 = vector.load %arg8[%c0_182, %c0_183, %c8, %c0_184, %c0_185] : memref<1x1x16x16x128xbf16, #tpu.memory_space<vmem>>, vector<1x1x8x16x128xbf16>
    %190 = vector.shape_cast %189 : vector<1x1x8x16x128xbf16> to vector<8x16x128xbf16>
    %191 = vector.shape_cast %188 : vector<8x16x128xbf16> to vector<1x1x8x16x128xbf16>
    tpu.vector_store %arg8[%c0_182, %c0_183, %c8, %c0_184, %c0_185], %191 {strides = array<i32>} : memref<1x1x16x16x128xbf16, #tpu.memory_space<vmem>>, vector<1x1x8x16x128xbf16>,
    %cst_186 = arith.constant dense<0.000000e+00> : vector<128xf32>
    %192 = vector.multi_reduction <add>, %186, %cst_186 [0] : vector<128x128xf32> to vector<128xf32>
    %193 = vector.shape_cast %192 : vector<128xf32> to vector<1x128xf32>
    %194 = arith.addf %99, %193 : vector<1x128xf32>
    %195 = arith.mulf %186, %186 : vector<128x128xf32>
    %cst_187 = arith.constant dense<0.000000e+00> : vector<128xf32>
    %196 = vector.multi_reduction <add>, %195, %cst_187 [0] : vector<128x128xf32> to vector<128xf32>
    %197 = vector.shape_cast %196 : vector<128xf32> to vector<1x128xf32>
    %198 = arith.addf %103, %197 : vector<1x128xf32>
    %c0_188 = arith.constant 0 : index
    %c0_189 = arith.constant 0 : index
    %c0_190 = arith.constant 0 : index
    %c0_191 = arith.constant 0 : index
    %199 = vector.load %arg9[%c0_188, %c0_189, %c0_190, %c0_191] : memref<1x1x2x128xf32, #tpu.memory_space<vmem>>, vector<1x1x1x128xf32>
    %200 = vector.shape_cast %199 : vector<1x1x1x128xf32> to vector<1x128xf32>
    %201 = vector.shape_cast %194 : vector<1x128xf32> to vector<1x1x1x128xf32>
    tpu.vector_store %arg9[%c0_188, %c0_189, %c0_190, %c0_191], %201 {strides = array<i32>} : memref<1x1x2x128xf32, #tpu.memory_space<vmem>>, vector<1x1x1x128xf32>,
    %c0_192 = arith.constant 0 : index
    %c0_193 = arith.constant 0 : index
    %c1_194 = arith.constant 1 : index
    %c0_195 = arith.constant 0 : index
    %202 = vector.load %arg9[%c0_192, %c0_193, %c1_194, %c0_195] : memref<1x1x2x128xf32, #tpu.memory_space<vmem>>, vector<1x1x1x128xf32>
    %203 = vector.shape_cast %202 : vector<1x1x1x128xf32> to vector<1x128xf32>
    %204 = vector.shape_cast %198 : vector<1x128xf32> to vector<1x1x1x128xf32>
    tpu.vector_store %arg9[%c0_192, %c0_193, %c1_194, %c0_195], %204 {strides = array<i32>} : memref<1x1x2x128xf32, #tpu.memory_space<vmem>>, vector<1x1x1x128xf32>,
    return
  }
  func.func @transform_0(%arg0: i32, %arg1: i32, %arg2: i32) -> (i32, i32, i32, i32, i32) {
    %c0_i32 = arith.constant 0 : i32
    %c0_i32_0 = arith.constant 0 : i32
    %c0_i32_1 = arith.constant 0 : i32
    %c0_i32_2 = arith.constant 0 : i32
    return %arg2, %arg0, %c0_i32, %c0_i32_0, %c0_i32_1 : i32, i32, i32, i32, i32
  }
  func.func @transform_1(%arg0: i32, %arg1: i32, %arg2: i32) -> (i32, i32, i32, i32, i32) {
    %c0_i32 = arith.constant 0 : i32
    %c0_i32_0 = arith.constant 0 : i32
    %c0_i32_1 = arith.constant 0 : i32
    %c0_i32_2 = arith.constant 0 : i32
    return %arg0, %c0_i32, %c0_i32_0, %c0_i32_1, %arg1 : i32, i32, i32, i32, i32
  }
  func.func @transform_2(%arg0: i32, %arg1: i32, %arg2: i32) -> (i32, i32) {
    %c0_i32 = arith.constant 0 : i32
    %c0_i32_0 = arith.constant 0 : i32
    %c0_i32_1 = arith.constant 0 : i32
    return %c0_i32, %c0_i32_0 : i32, i32
  }
  func.func @transform_3(%arg0: i32, %arg1: i32, %arg2: i32) -> (i32, i32) {
    %c0_i32 = arith.constant 0 : i32
    %c0_i32_0 = arith.constant 0 : i32
    %c0_i32_1 = arith.constant 0 : i32
    return %c0_i32, %c0_i32_0 : i32, i32
  }
  func.func @transform_4(%arg0: i32, %arg1: i32, %arg2: i32) -> i32 {
    %c0_i32 = arith.constant 0 : i32
    %c0_i32_0 = arith.constant 0 : i32
    return %c0_i32 : i32
  }
  func.func @transform_5(%arg0: i32, %arg1: i32, %arg2: i32) -> (i32, i32, i32, i32, i32) {
    %c0_i32 = arith.constant 0 : i32
    %c0_i32_0 = arith.constant 0 : i32
    %c0_i32_1 = arith.constant 0 : i32
    return %arg2, %arg0, %c0_i32, %c0_i32_0, %arg1 : i32, i32, i32, i32, i32
  }
  func.func @transform_6(%arg0: i32, %arg1: i32, %arg2: i32) -> (i32, i32, i32, i32) {
    %c0_i32 = arith.constant 0 : i32
    %c0_i32_0 = arith.constant 0 : i32
    return %arg2, %arg0, %c0_i32, %arg1 : i32, i32, i32, i32
  }
}

module attributes {stable_mosaic.version = 11 : i64} {
  func.func @_conv3x3_kernel(%arg0: i32, %arg1: i32, %arg2: i32, %arg3: memref<1x1x16x16x128xbf16, #tpu.memory_space<vmem>>, %arg4: memref<1x3x3x128x128xbf16, #tpu.memory_space<vmem>>, %arg5: memref<1x128xf32, #tpu.memory_space<vmem>>, %arg6: memref<1x128xf32, #tpu.memory_space<vmem>>, %arg7: memref<1xf32, #tpu.memory_space<smem>>, %arg8: memref<1x1x16x16x128xbf16, #tpu.memory_space<vmem>>, %arg9: memref<1x1x2x128xf32, #tpu.memory_space<vmem>>, %arg10: memref<288x128xbf16, #tpu.memory_space<vmem>>) attributes {dimension_semantics = [#tpu.dimension_semantics<parallel>, #tpu.dimension_semantics<parallel>, #tpu.dimension_semantics<parallel>], iteration_bounds = array<i64: 5, 1, 2>, scalar_prefetch = 0 : i64, scratch_operands = 1 : i64, tpu.core_type = #tpu.core_type<tc>, window_params = [{transform_indices = @transform_0, window_bounds = array<i64: 1, 1, 16, 16, 128>}, {transform_indices = @transform_1, window_bounds = array<i64: 1, 3, 3, 128, 128>}, {pipeline_mode = #tpu.pipeline_mode<synchronous>, transform_indices = @transform_2, window_bounds = array<i64: 1, 128>}, {pipeline_mode = #tpu.pipeline_mode<synchronous>, transform_indices = @transform_3, window_bounds = array<i64: 1, 128>}, {transform_indices = @transform_4, window_bounds = array<i64: 1>}, {transform_indices = @transform_5, window_bounds = array<i64: 1, 1, 16, 16, 128>}, {transform_indices = @transform_6, window_bounds = array<i64: 1, 1, 2, 128>}]} {
    %c0 = arith.constant 0 : index
    %c0_0 = arith.constant 0 : index
    %c0_1 = arith.constant 0 : index
    %c0_2 = arith.constant 0 : index
    %c0_3 = arith.constant 0 : index
    %0 = vector.load %arg3[%c0, %c0_0, %c0_1, %c0_2, %c0_3] : memref<1x1x16x16x128xbf16, #tpu.memory_space<vmem>>, vector<1x1x16x16x128xbf16>
    %1 = vector.shape_cast %0 : vector<1x1x16x16x128xbf16> to vector<16x16x128xbf16>
    %2 = vector.shape_cast %1 : vector<16x16x128xbf16> to vector<256x128xbf16>
    %3 = arith.extf %2 : vector<256x128xbf16> to vector<256x128xf32>
    %c0_4 = arith.constant 0 : index
    %c0_5 = arith.constant 0 : index
    %4 = vector.load %arg5[%c0_4, %c0_5] : memref<1x128xf32, #tpu.memory_space<vmem>>, vector<1x128xf32>
    %5 = vector.shape_cast %4 : vector<1x128xf32> to vector<128xf32>
    %6 = vector.shape_cast %5 : vector<128xf32> to vector<1x128xf32>
    %7 = vector.broadcast %6 : vector<1x128xf32> to vector<256x128xf32>
    %8 = arith.mulf %3, %7 : vector<256x128xf32>
    %c0_6 = arith.constant 0 : index
    %c0_7 = arith.constant 0 : index
    %9 = vector.load %arg6[%c0_6, %c0_7] : memref<1x128xf32, #tpu.memory_space<vmem>>, vector<1x128xf32>
    %10 = vector.shape_cast %9 : vector<1x128xf32> to vector<128xf32>
    %11 = vector.shape_cast %10 : vector<128xf32> to vector<1x128xf32>
    %12 = vector.broadcast %11 : vector<1x128xf32> to vector<256x128xf32>
    %13 = arith.addf %8, %12 : vector<256x128xf32>
    %c0_8 = arith.constant 0 : index
    %14 = memref.load %arg7[%c0_8] : memref<1xf32, #tpu.memory_space<smem>>
    %cst = arith.constant 0.000000e+00 : f32
    %15 = vector.broadcast %cst : f32 to vector<256x128xf32>
    %16 = arith.cmpf oge, %13, %15 : vector<256x128xf32>
    %17 = vector.broadcast %14 : f32 to vector<256x128xf32>
    %18 = arith.mulf %17, %13 : vector<256x128xf32>
    %19 = arith.select %16, %13, %18 : vector<256x128xi1>, vector<256x128xf32>
    %20 = arith.truncf %19 : vector<256x128xf32> to vector<256x128xbf16>
    %cst_9 = arith.constant 0.000000e+00 : bf16
    %21 = vector.broadcast %cst_9 : bf16 to vector<16x128xbf16>
    %c0_10 = arith.constant 0 : index
    %c0_11 = arith.constant 0 : index
    %22 = vector.load %arg10[%c0_10, %c0_11] : memref<288x128xbf16, #tpu.memory_space<vmem>>, vector<16x128xbf16>
    tpu.vector_store %arg10[%c0_10, %c0_11], %21 {strides = array<i32>} : memref<288x128xbf16, #tpu.memory_space<vmem>>, vector<16x128xbf16>,
    %c272 = arith.constant 272 : index
    %c0_12 = arith.constant 0 : index
    %23 = vector.load %arg10[%c272, %c0_12] : memref<288x128xbf16, #tpu.memory_space<vmem>>, vector<16x128xbf16>
    tpu.vector_store %arg10[%c272, %c0_12], %21 {strides = array<i32>} : memref<288x128xbf16, #tpu.memory_space<vmem>>, vector<16x128xbf16>,
    %c16 = arith.constant 16 : index
    %c0_13 = arith.constant 0 : index
    %24 = vector.load %arg10[%c16, %c0_13] : memref<288x128xbf16, #tpu.memory_space<vmem>>, vector<256x128xbf16>
    tpu.vector_store %arg10[%c16, %c0_13], %20 {strides = array<i32>} : memref<288x128xbf16, #tpu.memory_space<vmem>>, vector<256x128xbf16>,
    %cst_14 = arith.constant 0.000000e+00 : f32
    %25 = vector.broadcast %cst_14 : f32 to vector<1x128xf32>
    %cst_15 = arith.constant 0.000000e+00 : f32
    %26 = vector.broadcast %cst_15 : f32 to vector<1x128xf32>
    %27 = tpu.iota {dimensions = array<i32: 0>} : vector<128x1xi32>
    %c16_i32 = arith.constant 16 : i32
    %c0_i32 = arith.constant 0 : i32
    %28 = arith.cmpi eq, %c16_i32, %c0_i32 : i32
    %c1_i32 = arith.constant 1 : i32
    %29 = arith.select %28, %c1_i32, %c16_i32 : i32
    %30 = vector.broadcast %29 : i32 to vector<128x1xi32>
    %31 = arith.remsi %27, %30 : vector<128x1xi32>
    %c0_i32_16 = arith.constant 0 : i32
    %32 = vector.broadcast %c0_i32_16 : i32 to vector<128x1xi32>
    %33 = arith.cmpi ne, %31, %32 : vector<128x1xi32>
    %c0_i32_17 = arith.constant 0 : i32
    %34 = vector.broadcast %c0_i32_17 : i32 to vector<128x1xi32>
    %35 = arith.cmpi slt, %31, %34 : vector<128x1xi32>
    %c0_i32_18 = arith.constant 0 : i32
    %36 = arith.cmpi slt, %29, %c0_i32_18 : i32
    %37 = vector.broadcast %36 : i1 to vector<128x1xi1>
    %38 = vector.broadcast %37 : vector<128x1xi1> to vector<128x1xi1>
    %39 = arith.xori %35, %38 : vector<128x1xi1>
    %40 = arith.andi %39, %33 : vector<128x1xi1>
    %41 = vector.broadcast %29 : i32 to vector<128x1xi32>
    %42 = arith.addi %31, %41 : vector<128x1xi32>
    %43 = arith.select %40, %42, %31 : vector<128x1xi1>, vector<128x1xi32>
    %cst_19 = arith.constant 0.000000e+00 : f32
    %44 = vector.broadcast %cst_19 : f32 to vector<128x128xf32>
    %cst_20 = arith.constant 0.000000e+00 : f32
    %45 = vector.broadcast %cst_20 : f32 to vector<128x128xf32>
    %c0_21 = arith.constant 0 : index
    %c0_22 = arith.constant 0 : index
    %46 = vector.load %arg10[%c0_21, %c0_22] : memref<288x128xbf16, #tpu.memory_space<vmem>>, vector<128x128xbf16>
    %c0_23 = arith.constant 0 : index
    %c0_24 = arith.constant 0 : index
    %c0_25 = arith.constant 0 : index
    %c0_26 = arith.constant 0 : index
    %c0_27 = arith.constant 0 : index
    %47 = vector.load %arg4[%c0_23, %c0_24, %c0_25, %c0_26, %c0_27] : memref<1x3x3x128x128xbf16, #tpu.memory_space<vmem>>, vector<1x1x1x128x128xbf16>
    %48 = vector.shape_cast %47 : vector<1x1x1x128x128xbf16> to vector<128x128xbf16>
    %cst_28 = arith.constant dense<0.000000e+00> : vector<128x128xf32>
    %49 = tpu.matmul %46, %48, %cst_28 {dimension_numbers = #tpu.dot_dimension_numbers<[1], [0], [0], [1], [0, 0, 1, 1], [], []>} : vector<128x128xbf16>, vector<128x128xbf16>, vector<128x128xf32> -> vector<128x128xf32>
    %50 = arith.addf %45, %49 : vector<128x128xf32>
    %c16_29 = arith.constant 16 : index
    %c0_30 = arith.constant 0 : index
    %51 = vector.load %arg10[%c16_29, %c0_30] : memref<288x128xbf16, #tpu.memory_space<vmem>>, vector<128x128xbf16>
    %c0_31 = arith.constant 0 : index
    %c1 = arith.constant 1 : index
    %c0_32 = arith.constant 0 : index
    %c0_33 = arith.constant 0 : index
    %c0_34 = arith.constant 0 : index
    %52 = vector.load %arg4[%c0_31, %c1, %c0_32, %c0_33, %c0_34] : memref<1x3x3x128x128xbf16, #tpu.memory_space<vmem>>, vector<1x1x1x128x128xbf16>
    %53 = vector.shape_cast %52 : vector<1x1x1x128x128xbf16> to vector<128x128xbf16>
    %cst_35 = arith.constant dense<0.000000e+00> : vector<128x128xf32>
    %54 = tpu.matmul %51, %53, %cst_35 {dimension_numbers = #tpu.dot_dimension_numbers<[1], [0], [0], [1], [0, 0, 1, 1], [], []>} : vector<128x128xbf16>, vector<128x128xbf16>, vector<128x128xf32> -> vector<128x128xf32>
    %55 = arith.addf %50, %54 : vector<128x128xf32>
    %c32 = arith.constant 32 : index
    %c0_36 = arith.constant 0 : index
    %56 = vector.load %arg10[%c32, %c0_36] : memref<288x128xbf16, #tpu.memory_space<vmem>>, vector<128x128xbf16>
    %c0_37 = arith.constant 0 : index
    %c2 = arith.constant 2 : index
    %c0_38 = arith.constant 0 : index
    %c0_39 = arith.constant 0 : index
    %c0_40 = arith.constant 0 : index
    %57 = vector.load %arg4[%c0_37, %c2, %c0_38, %c0_39, %c0_40] : memref<1x3x3x128x128xbf16, #tpu.memory_space<vmem>>, vector<1x1x1x128x128xbf16>
    %58 = vector.shape_cast %57 : vector<1x1x1x128x128xbf16> to vector<128x128xbf16>
    %cst_41 = arith.constant dense<0.000000e+00> : vector<128x128xf32>
    %59 = tpu.matmul %56, %58, %cst_41 {dimension_numbers = #tpu.dot_dimension_numbers<[1], [0], [0], [1], [0, 0, 1, 1], [], []>} : vector<128x128xbf16>, vector<128x128xbf16>, vector<128x128xf32> -> vector<128x128xf32>
    %60 = arith.addf %55, %59 : vector<128x128xf32>
    %c0_i32_42 = arith.constant 0 : i32
    %61 = vector.broadcast %c0_i32_42 : i32 to vector<128x1xi32>
    %62 = arith.cmpi eq, %43, %61 : vector<128x1xi32>
    %c1_i32_43 = arith.constant 1 : i32
    %63 = tpu.dynamic_rotate %60 by %c1_i32_43 dim 0 : vector<128x128xf32>, i32 -> vector<128x128xf32>
    %cst_44 = arith.constant 0.000000e+00 : f32
    %64 = vector.shape_cast %62 : vector<128x1xi1> to vector<128x1xi1>
    %65 = vector.broadcast %64 : vector<128x1xi1> to vector<128x128xi1>
    %66 = vector.broadcast %cst_44 : f32 to vector<128x128xf32>
    %67 = arith.select %65, %66, %63 : vector<128x128xi1>, vector<128x128xf32>
    %68 = arith.addf %44, %67 : vector<128x128xf32>
    %cst_45 = arith.constant 0.000000e+00 : f32
    %69 = vector.broadcast %cst_45 : f32 to vector<128x128xf32>
    %c0_46 = arith.constant 0 : index
    %c0_47 = arith.constant 0 : index
    %70 = vector.load %arg10[%c0_46, %c0_47] : memref<288x128xbf16, #tpu.memory_space<vmem>>, vector<128x128xbf16>
    %c0_48 = arith.constant 0 : index
    %c0_49 = arith.constant 0 : index
    %c1_50 = arith.constant 1 : index
    %c0_51 = arith.constant 0 : index
    %c0_52 = arith.constant 0 : index
    %71 = vector.load %arg4[%c0_48, %c0_49, %c1_50, %c0_51, %c0_52] : memref<1x3x3x128x128xbf16, #tpu.memory_space<vmem>>, vector<1x1x1x128x128xbf16>
    %72 = vector.shape_cast %71 : vector<1x1x1x128x128xbf16> to vector<128x128xbf16>
    %cst_53 = arith.constant dense<0.000000e+00> : vector<128x128xf32>
    %73 = tpu.matmul %70, %72, %cst_53 {dimension_numbers = #tpu.dot_dimension_numbers<[1], [0], [0], [1], [0, 0, 1, 1], [], []>} : vector<128x128xbf16>, vector<128x128xbf16>, vector<128x128xf32> -> vector<128x128xf32>
    %74 = arith.addf %69, %73 : vector<128x128xf32>
    %c16_54 = arith.constant 16 : index
    %c0_55 = arith.constant 0 : index
    %75 = vector.load %arg10[%c16_54, %c0_55] : memref<288x128xbf16, #tpu.memory_space<vmem>>, vector<128x128xbf16>
    %c0_56 = arith.constant 0 : index
    %c1_57 = arith.constant 1 : index
    %c1_58 = arith.constant 1 : index
    %c0_59 = arith.constant 0 : index
    %c0_60 = arith.constant 0 : index
    %76 = vector.load %arg4[%c0_56, %c1_57, %c1_58, %c0_59, %c0_60] : memref<1x3x3x128x128xbf16, #tpu.memory_space<vmem>>, vector<1x1x1x128x128xbf16>
    %77 = vector.shape_cast %76 : vector<1x1x1x128x128xbf16> to vector<128x128xbf16>
    %cst_61 = arith.constant dense<0.000000e+00> : vector<128x128xf32>
    %78 = tpu.matmul %75, %77, %cst_61 {dimension_numbers = #tpu.dot_dimension_numbers<[1], [0], [0], [1], [0, 0, 1, 1], [], []>} : vector<128x128xbf16>, vector<128x128xbf16>, vector<128x128xf32> -> vector<128x128xf32>
    %79 = arith.addf %74, %78 : vector<128x128xf32>
    %c32_62 = arith.constant 32 : index
    %c0_63 = arith.constant 0 : index
    %80 = vector.load %arg10[%c32_62, %c0_63] : memref<288x128xbf16, #tpu.memory_space<vmem>>, vector<128x128xbf16>
    %c0_64 = arith.constant 0 : index
    %c2_65 = arith.constant 2 : index
    %c1_66 = arith.constant 1 : index
    %c0_67 = arith.constant 0 : index
    %c0_68 = arith.constant 0 : index
    %81 = vector.load %arg4[%c0_64, %c2_65, %c1_66, %c0_67, %c0_68] : memref<1x3x3x128x128xbf16, #tpu.memory_space<vmem>>, vector<1x1x1x128x128xbf16>
    %82 = vector.shape_cast %81 : vector<1x1x1x128x128xbf16> to vector<128x128xbf16>
    %cst_69 = arith.constant dense<0.000000e+00> : vector<128x128xf32>
    %83 = tpu.matmul %80, %82, %cst_69 {dimension_numbers = #tpu.dot_dimension_numbers<[1], [0], [0], [1], [0, 0, 1, 1], [], []>} : vector<128x128xbf16>, vector<128x128xbf16>, vector<128x128xf32> -> vector<128x128xf32>
    %84 = arith.addf %79, %83 : vector<128x128xf32>
    %85 = arith.addf %68, %84 : vector<128x128xf32>
    %cst_70 = arith.constant 0.000000e+00 : f32
    %86 = vector.broadcast %cst_70 : f32 to vector<128x128xf32>
    %c0_71 = arith.constant 0 : index
    %c0_72 = arith.constant 0 : index
    %87 = vector.load %arg10[%c0_71, %c0_72] : memref<288x128xbf16, #tpu.memory_space<vmem>>, vector<128x128xbf16>
    %c0_73 = arith.constant 0 : index
    %c0_74 = arith.constant 0 : index
    %c2_75 = arith.constant 2 : index
    %c0_76 = arith.constant 0 : index
    %c0_77 = arith.constant 0 : index
    %88 = vector.load %arg4[%c0_73, %c0_74, %c2_75, %c0_76, %c0_77] : memref<1x3x3x128x128xbf16, #tpu.memory_space<vmem>>, vector<1x1x1x128x128xbf16>
    %89 = vector.shape_cast %88 : vector<1x1x1x128x128xbf16> to vector<128x128xbf16>
    %cst_78 = arith.constant dense<0.000000e+00> : vector<128x128xf32>
    %90 = tpu.matmul %87, %89, %cst_78 {dimension_numbers = #tpu.dot_dimension_numbers<[1], [0], [0], [1], [0, 0, 1, 1], [], []>} : vector<128x128xbf16>, vector<128x128xbf16>, vector<128x128xf32> -> vector<128x128xf32>
    %91 = arith.addf %86, %90 : vector<128x128xf32>
    %c16_79 = arith.constant 16 : index
    %c0_80 = arith.constant 0 : index
    %92 = vector.load %arg10[%c16_79, %c0_80] : memref<288x128xbf16, #tpu.memory_space<vmem>>, vector<128x128xbf16>
    %c0_81 = arith.constant 0 : index
    %c1_82 = arith.constant 1 : index
    %c2_83 = arith.constant 2 : index
    %c0_84 = arith.constant 0 : index
    %c0_85 = arith.constant 0 : index
    %93 = vector.load %arg4[%c0_81, %c1_82, %c2_83, %c0_84, %c0_85] : memref<1x3x3x128x128xbf16, #tpu.memory_space<vmem>>, vector<1x1x1x128x128xbf16>
    %94 = vector.shape_cast %93 : vector<1x1x1x128x128xbf16> to vector<128x128xbf16>
    %cst_86 = arith.constant dense<0.000000e+00> : vector<128x128xf32>
    %95 = tpu.matmul %92, %94, %cst_86 {dimension_numbers = #tpu.dot_dimension_numbers<[1], [0], [0], [1], [0, 0, 1, 1], [], []>} : vector<128x128xbf16>, vector<128x128xbf16>, vector<128x128xf32> -> vector<128x128xf32>
    %96 = arith.addf %91, %95 : vector<128x128xf32>
    %c32_87 = arith.constant 32 : index
    %c0_88 = arith.constant 0 : index
    %97 = vector.load %arg10[%c32_87, %c0_88] : memref<288x128xbf16, #tpu.memory_space<vmem>>, vector<128x128xbf16>
    %c0_89 = arith.constant 0 : index
    %c2_90 = arith.constant 2 : index
    %c2_91 = arith.constant 2 : index
    %c0_92 = arith.constant 0 : index
    %c0_93 = arith.constant 0 : index
    %98 = vector.load %arg4[%c0_89, %c2_90, %c2_91, %c0_92, %c0_93] : memref<1x3x3x128x128xbf16, #tpu.memory_space<vmem>>, vector<1x1x1x128x128xbf16>
    %99 = vector.shape_cast %98 : vector<1x1x1x128x128xbf16> to vector<128x128xbf16>
    %cst_94 = arith.constant dense<0.000000e+00> : vector<128x128xf32>
    %100 = tpu.matmul %97, %99, %cst_94 {dimension_numbers = #tpu.dot_dimension_numbers<[1], [0], [0], [1], [0, 0, 1, 1], [], []>} : vector<128x128xbf16>, vector<128x128xbf16>, vector<128x128xf32> -> vector<128x128xf32>
    %101 = arith.addf %96, %100 : vector<128x128xf32>
    %c15_i32 = arith.constant 15 : i32
    %102 = vector.broadcast %c15_i32 : i32 to vector<128x1xi32>
    %103 = arith.cmpi eq, %43, %102 : vector<128x1xi32>
    %c127_i32 = arith.constant 127 : i32
    %104 = tpu.dynamic_rotate %101 by %c127_i32 dim 0 : vector<128x128xf32>, i32 -> vector<128x128xf32>
    %cst_95 = arith.constant 0.000000e+00 : f32
    %105 = vector.shape_cast %103 : vector<128x1xi1> to vector<128x1xi1>
    %106 = vector.broadcast %105 : vector<128x1xi1> to vector<128x128xi1>
    %107 = vector.broadcast %cst_95 : f32 to vector<128x128xf32>
    %108 = arith.select %106, %107, %104 : vector<128x128xi1>, vector<128x128xf32>
    %109 = arith.addf %85, %108 : vector<128x128xf32>
    %110 = vector.shape_cast %109 : vector<128x128xf32> to vector<8x16x128xf32>
    %111 = arith.truncf %110 : vector<8x16x128xf32> to vector<8x16x128xbf16>
    %c0_96 = arith.constant 0 : index
    %c0_97 = arith.constant 0 : index
    %c0_98 = arith.constant 0 : index
    %c0_99 = arith.constant 0 : index
    %c0_100 = arith.constant 0 : index
    %112 = vector.load %arg8[%c0_96, %c0_97, %c0_98, %c0_99, %c0_100] : memref<1x1x16x16x128xbf16, #tpu.memory_space<vmem>>, vector<1x1x8x16x128xbf16>
    %113 = vector.shape_cast %112 : vector<1x1x8x16x128xbf16> to vector<8x16x128xbf16>
    %114 = vector.shape_cast %111 : vector<8x16x128xbf16> to vector<1x1x8x16x128xbf16>
    tpu.vector_store %arg8[%c0_96, %c0_97, %c0_98, %c0_99, %c0_100], %114 {strides = array<i32>} : memref<1x1x16x16x128xbf16, #tpu.memory_space<vmem>>, vector<1x1x8x16x128xbf16>,
    %cst_101 = arith.constant dense<0.000000e+00> : vector<128xf32>
    %115 = vector.multi_reduction <add>, %109, %cst_101 [0] : vector<128x128xf32> to vector<128xf32>
    %116 = vector.shape_cast %115 : vector<128xf32> to vector<1x128xf32>
    %117 = arith.addf %25, %116 : vector<1x128xf32>
    %118 = arith.mulf %109, %109 : vector<128x128xf32>
    %cst_102 = arith.constant dense<0.000000e+00> : vector<128xf32>
    %119 = vector.multi_reduction <add>, %118, %cst_102 [0] : vector<128x128xf32> to vector<128xf32>
    %120 = vector.shape_cast %119 : vector<128xf32> to vector<1x128xf32>
    %121 = arith.addf %26, %120 : vector<1x128xf32>
    %122 = tpu.iota {dimensions = array<i32: 0>} : vector<128x1xi32>
    %c16_i32_103 = arith.constant 16 : i32
    %c0_i32_104 = arith.constant 0 : i32
    %123 = arith.cmpi eq, %c16_i32_103, %c0_i32_104 : i32
    %c1_i32_105 = arith.constant 1 : i32
    %124 = arith.select %123, %c1_i32_105, %c16_i32_103 : i32
    %125 = vector.broadcast %124 : i32 to vector<128x1xi32>
    %126 = arith.remsi %122, %125 : vector<128x1xi32>
    %c0_i32_106 = arith.constant 0 : i32
    %127 = vector.broadcast %c0_i32_106 : i32 to vector<128x1xi32>
    %128 = arith.cmpi ne, %126, %127 : vector<128x1xi32>
    %c0_i32_107 = arith.constant 0 : i32
    %129 = vector.broadcast %c0_i32_107 : i32 to vector<128x1xi32>
    %130 = arith.cmpi slt, %126, %129 : vector<128x1xi32>
    %c0_i32_108 = arith.constant 0 : i32
    %131 = arith.cmpi slt, %124, %c0_i32_108 : i32
    %132 = vector.broadcast %131 : i1 to vector<128x1xi1>
    %133 = vector.broadcast %132 : vector<128x1xi1> to vector<128x1xi1>
    %134 = arith.xori %130, %133 : vector<128x1xi1>
    %135 = arith.andi %134, %128 : vector<128x1xi1>
    %136 = vector.broadcast %124 : i32 to vector<128x1xi32>
    %137 = arith.addi %126, %136 : vector<128x1xi32>
    %138 = arith.select %135, %137, %126 : vector<128x1xi1>, vector<128x1xi32>
    %cst_109 = arith.constant 0.000000e+00 : f32
    %139 = vector.broadcast %cst_109 : f32 to vector<128x128xf32>
    %cst_110 = arith.constant 0.000000e+00 : f32
    %140 = vector.broadcast %cst_110 : f32 to vector<128x128xf32>
    %c128 = arith.constant 128 : index
    %c0_111 = arith.constant 0 : index
    %141 = vector.load %arg10[%c128, %c0_111] : memref<288x128xbf16, #tpu.memory_space<vmem>>, vector<128x128xbf16>
    %c0_112 = arith.constant 0 : index
    %c0_113 = arith.constant 0 : index
    %c0_114 = arith.constant 0 : index
    %c0_115 = arith.constant 0 : index
    %c0_116 = arith.constant 0 : index
    %142 = vector.load %arg4[%c0_112, %c0_113, %c0_114, %c0_115, %c0_116] : memref<1x3x3x128x128xbf16, #tpu.memory_space<vmem>>, vector<1x1x1x128x128xbf16>
    %143 = vector.shape_cast %142 : vector<1x1x1x128x128xbf16> to vector<128x128xbf16>
    %cst_117 = arith.constant dense<0.000000e+00> : vector<128x128xf32>
    %144 = tpu.matmul %141, %143, %cst_117 {dimension_numbers = #tpu.dot_dimension_numbers<[1], [0], [0], [1], [0, 0, 1, 1], [], []>} : vector<128x128xbf16>, vector<128x128xbf16>, vector<128x128xf32> -> vector<128x128xf32>
    %145 = arith.addf %140, %144 : vector<128x128xf32>
    %c144 = arith.constant 144 : index
    %c0_118 = arith.constant 0 : index
    %146 = vector.load %arg10[%c144, %c0_118] : memref<288x128xbf16, #tpu.memory_space<vmem>>, vector<128x128xbf16>
    %c0_119 = arith.constant 0 : index
    %c1_120 = arith.constant 1 : index
    %c0_121 = arith.constant 0 : index
    %c0_122 = arith.constant 0 : index
    %c0_123 = arith.constant 0 : index
    %147 = vector.load %arg4[%c0_119, %c1_120, %c0_121, %c0_122, %c0_123] : memref<1x3x3x128x128xbf16, #tpu.memory_space<vmem>>, vector<1x1x1x128x128xbf16>
    %148 = vector.shape_cast %147 : vector<1x1x1x128x128xbf16> to vector<128x128xbf16>
    %cst_124 = arith.constant dense<0.000000e+00> : vector<128x128xf32>
    %149 = tpu.matmul %146, %148, %cst_124 {dimension_numbers = #tpu.dot_dimension_numbers<[1], [0], [0], [1], [0, 0, 1, 1], [], []>} : vector<128x128xbf16>, vector<128x128xbf16>, vector<128x128xf32> -> vector<128x128xf32>
    %150 = arith.addf %145, %149 : vector<128x128xf32>
    %c160 = arith.constant 160 : index
    %c0_125 = arith.constant 0 : index
    %151 = vector.load %arg10[%c160, %c0_125] : memref<288x128xbf16, #tpu.memory_space<vmem>>, vector<128x128xbf16>
    %c0_126 = arith.constant 0 : index
    %c2_127 = arith.constant 2 : index
    %c0_128 = arith.constant 0 : index
    %c0_129 = arith.constant 0 : index
    %c0_130 = arith.constant 0 : index
    %152 = vector.load %arg4[%c0_126, %c2_127, %c0_128, %c0_129, %c0_130] : memref<1x3x3x128x128xbf16, #tpu.memory_space<vmem>>, vector<1x1x1x128x128xbf16>
    %153 = vector.shape_cast %152 : vector<1x1x1x128x128xbf16> to vector<128x128xbf16>
    %cst_131 = arith.constant dense<0.000000e+00> : vector<128x128xf32>
    %154 = tpu.matmul %151, %153, %cst_131 {dimension_numbers = #tpu.dot_dimension_numbers<[1], [0], [0], [1], [0, 0, 1, 1], [], []>} : vector<128x128xbf16>, vector<128x128xbf16>, vector<128x128xf32> -> vector<128x128xf32>
    %155 = arith.addf %150, %154 : vector<128x128xf32>
    %c0_i32_132 = arith.constant 0 : i32
    %156 = vector.broadcast %c0_i32_132 : i32 to vector<128x1xi32>
    %157 = arith.cmpi eq, %138, %156 : vector<128x1xi32>
    %c1_i32_133 = arith.constant 1 : i32
    %158 = tpu.dynamic_rotate %155 by %c1_i32_133 dim 0 : vector<128x128xf32>, i32 -> vector<128x128xf32>
    %cst_134 = arith.constant 0.000000e+00 : f32
    %159 = vector.shape_cast %157 : vector<128x1xi1> to vector<128x1xi1>
    %160 = vector.broadcast %159 : vector<128x1xi1> to vector<128x128xi1>
    %161 = vector.broadcast %cst_134 : f32 to vector<128x128xf32>
    %162 = arith.select %160, %161, %158 : vector<128x128xi1>, vector<128x128xf32>
    %163 = arith.addf %139, %162 : vector<128x128xf32>
    %cst_135 = arith.constant 0.000000e+00 : f32
    %164 = vector.broadcast %cst_135 : f32 to vector<128x128xf32>
    %c128_136 = arith.constant 128 : index
    %c0_137 = arith.constant 0 : index
    %165 = vector.load %arg10[%c128_136, %c0_137] : memref<288x128xbf16, #tpu.memory_space<vmem>>, vector<128x128xbf16>
    %c0_138 = arith.constant 0 : index
    %c0_139 = arith.constant 0 : index
    %c1_140 = arith.constant 1 : index
    %c0_141 = arith.constant 0 : index
    %c0_142 = arith.constant 0 : index
    %166 = vector.load %arg4[%c0_138, %c0_139, %c1_140, %c0_141, %c0_142] : memref<1x3x3x128x128xbf16, #tpu.memory_space<vmem>>, vector<1x1x1x128x128xbf16>
    %167 = vector.shape_cast %166 : vector<1x1x1x128x128xbf16> to vector<128x128xbf16>
    %cst_143 = arith.constant dense<0.000000e+00> : vector<128x128xf32>
    %168 = tpu.matmul %165, %167, %cst_143 {dimension_numbers = #tpu.dot_dimension_numbers<[1], [0], [0], [1], [0, 0, 1, 1], [], []>} : vector<128x128xbf16>, vector<128x128xbf16>, vector<128x128xf32> -> vector<128x128xf32>
    %169 = arith.addf %164, %168 : vector<128x128xf32>
    %c144_144 = arith.constant 144 : index
    %c0_145 = arith.constant 0 : index
    %170 = vector.load %arg10[%c144_144, %c0_145] : memref<288x128xbf16, #tpu.memory_space<vmem>>, vector<128x128xbf16>
    %c0_146 = arith.constant 0 : index
    %c1_147 = arith.constant 1 : index
    %c1_148 = arith.constant 1 : index
    %c0_149 = arith.constant 0 : index
    %c0_150 = arith.constant 0 : index
    %171 = vector.load %arg4[%c0_146, %c1_147, %c1_148, %c0_149, %c0_150] : memref<1x3x3x128x128xbf16, #tpu.memory_space<vmem>>, vector<1x1x1x128x128xbf16>
    %172 = vector.shape_cast %171 : vector<1x1x1x128x128xbf16> to vector<128x128xbf16>
    %cst_151 = arith.constant dense<0.000000e+00> : vector<128x128xf32>
    %173 = tpu.matmul %170, %172, %cst_151 {dimension_numbers = #tpu.dot_dimension_numbers<[1], [0], [0], [1], [0, 0, 1, 1], [], []>} : vector<128x128xbf16>, vector<128x128xbf16>, vector<128x128xf32> -> vector<128x128xf32>
    %174 = arith.addf %169, %173 : vector<128x128xf32>
    %c160_152 = arith.constant 160 : index
    %c0_153 = arith.constant 0 : index
    %175 = vector.load %arg10[%c160_152, %c0_153] : memref<288x128xbf16, #tpu.memory_space<vmem>>, vector<128x128xbf16>
    %c0_154 = arith.constant 0 : index
    %c2_155 = arith.constant 2 : index
    %c1_156 = arith.constant 1 : index
    %c0_157 = arith.constant 0 : index
    %c0_158 = arith.constant 0 : index
    %176 = vector.load %arg4[%c0_154, %c2_155, %c1_156, %c0_157, %c0_158] : memref<1x3x3x128x128xbf16, #tpu.memory_space<vmem>>, vector<1x1x1x128x128xbf16>
    %177 = vector.shape_cast %176 : vector<1x1x1x128x128xbf16> to vector<128x128xbf16>
    %cst_159 = arith.constant dense<0.000000e+00> : vector<128x128xf32>
    %178 = tpu.matmul %175, %177, %cst_159 {dimension_numbers = #tpu.dot_dimension_numbers<[1], [0], [0], [1], [0, 0, 1, 1], [], []>} : vector<128x128xbf16>, vector<128x128xbf16>, vector<128x128xf32> -> vector<128x128xf32>
    %179 = arith.addf %174, %178 : vector<128x128xf32>
    %180 = arith.addf %163, %179 : vector<128x128xf32>
    %cst_160 = arith.constant 0.000000e+00 : f32
    %181 = vector.broadcast %cst_160 : f32 to vector<128x128xf32>
    %c128_161 = arith.constant 128 : index
    %c0_162 = arith.constant 0 : index
    %182 = vector.load %arg10[%c128_161, %c0_162] : memref<288x128xbf16, #tpu.memory_space<vmem>>, vector<128x128xbf16>
    %c0_163 = arith.constant 0 : index
    %c0_164 = arith.constant 0 : index
    %c2_165 = arith.constant 2 : index
    %c0_166 = arith.constant 0 : index
    %c0_167 = arith.constant 0 : index
    %183 = vector.load %arg4[%c0_163, %c0_164, %c2_165, %c0_166, %c0_167] : memref<1x3x3x128x128xbf16, #tpu.memory_space<vmem>>, vector<1x1x1x128x128xbf16>
    %184 = vector.shape_cast %183 : vector<1x1x1x128x128xbf16> to vector<128x128xbf16>
    %cst_168 = arith.constant dense<0.000000e+00> : vector<128x128xf32>
    %185 = tpu.matmul %182, %184, %cst_168 {dimension_numbers = #tpu.dot_dimension_numbers<[1], [0], [0], [1], [0, 0, 1, 1], [], []>} : vector<128x128xbf16>, vector<128x128xbf16>, vector<128x128xf32> -> vector<128x128xf32>
    %186 = arith.addf %181, %185 : vector<128x128xf32>
    %c144_169 = arith.constant 144 : index
    %c0_170 = arith.constant 0 : index
    %187 = vector.load %arg10[%c144_169, %c0_170] : memref<288x128xbf16, #tpu.memory_space<vmem>>, vector<128x128xbf16>
    %c0_171 = arith.constant 0 : index
    %c1_172 = arith.constant 1 : index
    %c2_173 = arith.constant 2 : index
    %c0_174 = arith.constant 0 : index
    %c0_175 = arith.constant 0 : index
    %188 = vector.load %arg4[%c0_171, %c1_172, %c2_173, %c0_174, %c0_175] : memref<1x3x3x128x128xbf16, #tpu.memory_space<vmem>>, vector<1x1x1x128x128xbf16>
    %189 = vector.shape_cast %188 : vector<1x1x1x128x128xbf16> to vector<128x128xbf16>
    %cst_176 = arith.constant dense<0.000000e+00> : vector<128x128xf32>
    %190 = tpu.matmul %187, %189, %cst_176 {dimension_numbers = #tpu.dot_dimension_numbers<[1], [0], [0], [1], [0, 0, 1, 1], [], []>} : vector<128x128xbf16>, vector<128x128xbf16>, vector<128x128xf32> -> vector<128x128xf32>
    %191 = arith.addf %186, %190 : vector<128x128xf32>
    %c160_177 = arith.constant 160 : index
    %c0_178 = arith.constant 0 : index
    %192 = vector.load %arg10[%c160_177, %c0_178] : memref<288x128xbf16, #tpu.memory_space<vmem>>, vector<128x128xbf16>
    %c0_179 = arith.constant 0 : index
    %c2_180 = arith.constant 2 : index
    %c2_181 = arith.constant 2 : index
    %c0_182 = arith.constant 0 : index
    %c0_183 = arith.constant 0 : index
    %193 = vector.load %arg4[%c0_179, %c2_180, %c2_181, %c0_182, %c0_183] : memref<1x3x3x128x128xbf16, #tpu.memory_space<vmem>>, vector<1x1x1x128x128xbf16>
    %194 = vector.shape_cast %193 : vector<1x1x1x128x128xbf16> to vector<128x128xbf16>
    %cst_184 = arith.constant dense<0.000000e+00> : vector<128x128xf32>
    %195 = tpu.matmul %192, %194, %cst_184 {dimension_numbers = #tpu.dot_dimension_numbers<[1], [0], [0], [1], [0, 0, 1, 1], [], []>} : vector<128x128xbf16>, vector<128x128xbf16>, vector<128x128xf32> -> vector<128x128xf32>
    %196 = arith.addf %191, %195 : vector<128x128xf32>
    %c15_i32_185 = arith.constant 15 : i32
    %197 = vector.broadcast %c15_i32_185 : i32 to vector<128x1xi32>
    %198 = arith.cmpi eq, %138, %197 : vector<128x1xi32>
    %c127_i32_186 = arith.constant 127 : i32
    %199 = tpu.dynamic_rotate %196 by %c127_i32_186 dim 0 : vector<128x128xf32>, i32 -> vector<128x128xf32>
    %cst_187 = arith.constant 0.000000e+00 : f32
    %200 = vector.shape_cast %198 : vector<128x1xi1> to vector<128x1xi1>
    %201 = vector.broadcast %200 : vector<128x1xi1> to vector<128x128xi1>
    %202 = vector.broadcast %cst_187 : f32 to vector<128x128xf32>
    %203 = arith.select %201, %202, %199 : vector<128x128xi1>, vector<128x128xf32>
    %204 = arith.addf %180, %203 : vector<128x128xf32>
    %205 = vector.shape_cast %204 : vector<128x128xf32> to vector<8x16x128xf32>
    %206 = arith.truncf %205 : vector<8x16x128xf32> to vector<8x16x128xbf16>
    %c0_188 = arith.constant 0 : index
    %c0_189 = arith.constant 0 : index
    %c8 = arith.constant 8 : index
    %c0_190 = arith.constant 0 : index
    %c0_191 = arith.constant 0 : index
    %207 = vector.load %arg8[%c0_188, %c0_189, %c8, %c0_190, %c0_191] : memref<1x1x16x16x128xbf16, #tpu.memory_space<vmem>>, vector<1x1x8x16x128xbf16>
    %208 = vector.shape_cast %207 : vector<1x1x8x16x128xbf16> to vector<8x16x128xbf16>
    %209 = vector.shape_cast %206 : vector<8x16x128xbf16> to vector<1x1x8x16x128xbf16>
    tpu.vector_store %arg8[%c0_188, %c0_189, %c8, %c0_190, %c0_191], %209 {strides = array<i32>} : memref<1x1x16x16x128xbf16, #tpu.memory_space<vmem>>, vector<1x1x8x16x128xbf16>,
    %cst_192 = arith.constant dense<0.000000e+00> : vector<128xf32>
    %210 = vector.multi_reduction <add>, %204, %cst_192 [0] : vector<128x128xf32> to vector<128xf32>
    %211 = vector.shape_cast %210 : vector<128xf32> to vector<1x128xf32>
    %212 = arith.addf %117, %211 : vector<1x128xf32>
    %213 = arith.mulf %204, %204 : vector<128x128xf32>
    %cst_193 = arith.constant dense<0.000000e+00> : vector<128xf32>
    %214 = vector.multi_reduction <add>, %213, %cst_193 [0] : vector<128x128xf32> to vector<128xf32>
    %215 = vector.shape_cast %214 : vector<128xf32> to vector<1x128xf32>
    %216 = arith.addf %121, %215 : vector<1x128xf32>
    %c0_194 = arith.constant 0 : index
    %c0_195 = arith.constant 0 : index
    %c0_196 = arith.constant 0 : index
    %c0_197 = arith.constant 0 : index
    %217 = vector.load %arg9[%c0_194, %c0_195, %c0_196, %c0_197] : memref<1x1x2x128xf32, #tpu.memory_space<vmem>>, vector<1x1x1x128xf32>
    %218 = vector.shape_cast %217 : vector<1x1x1x128xf32> to vector<1x128xf32>
    %219 = vector.shape_cast %212 : vector<1x128xf32> to vector<1x1x1x128xf32>
    tpu.vector_store %arg9[%c0_194, %c0_195, %c0_196, %c0_197], %219 {strides = array<i32>} : memref<1x1x2x128xf32, #tpu.memory_space<vmem>>, vector<1x1x1x128xf32>,
    %c0_198 = arith.constant 0 : index
    %c0_199 = arith.constant 0 : index
    %c1_200 = arith.constant 1 : index
    %c0_201 = arith.constant 0 : index
    %220 = vector.load %arg9[%c0_198, %c0_199, %c1_200, %c0_201] : memref<1x1x2x128xf32, #tpu.memory_space<vmem>>, vector<1x1x1x128xf32>
    %221 = vector.shape_cast %220 : vector<1x1x1x128xf32> to vector<1x128xf32>
    %222 = vector.shape_cast %216 : vector<1x128xf32> to vector<1x1x1x128xf32>
    tpu.vector_store %arg9[%c0_198, %c0_199, %c1_200, %c0_201], %222 {strides = array<i32>} : memref<1x1x2x128xf32, #tpu.memory_space<vmem>>, vector<1x1x1x128xf32>,
    return
  }
  func.func @transform_0(%arg0: i32, %arg1: i32, %arg2: i32) -> (i32, i32, i32, i32, i32) {
    %c0_i32 = arith.constant 0 : i32
    %c0_i32_0 = arith.constant 0 : i32
    %c0_i32_1 = arith.constant 0 : i32
    %c0_i32_2 = arith.constant 0 : i32
    return %arg2, %arg0, %c0_i32, %c0_i32_0, %c0_i32_1 : i32, i32, i32, i32, i32
  }
  func.func @transform_1(%arg0: i32, %arg1: i32, %arg2: i32) -> (i32, i32, i32, i32, i32) {
    %c0_i32 = arith.constant 0 : i32
    %c0_i32_0 = arith.constant 0 : i32
    %c0_i32_1 = arith.constant 0 : i32
    %c0_i32_2 = arith.constant 0 : i32
    return %arg0, %c0_i32, %c0_i32_0, %c0_i32_1, %arg1 : i32, i32, i32, i32, i32
  }
  func.func @transform_2(%arg0: i32, %arg1: i32, %arg2: i32) -> (i32, i32) {
    %c0_i32 = arith.constant 0 : i32
    %c0_i32_0 = arith.constant 0 : i32
    %c0_i32_1 = arith.constant 0 : i32
    return %c0_i32, %c0_i32_0 : i32, i32
  }
  func.func @transform_3(%arg0: i32, %arg1: i32, %arg2: i32) -> (i32, i32) {
    %c0_i32 = arith.constant 0 : i32
    %c0_i32_0 = arith.constant 0 : i32
    %c0_i32_1 = arith.constant 0 : i32
    return %c0_i32, %c0_i32_0 : i32, i32
  }
  func.func @transform_4(%arg0: i32, %arg1: i32, %arg2: i32) -> i32 {
    %c0_i32 = arith.constant 0 : i32
    %c0_i32_0 = arith.constant 0 : i32
    return %c0_i32 : i32
  }
  func.func @transform_5(%arg0: i32, %arg1: i32, %arg2: i32) -> (i32, i32, i32, i32, i32) {
    %c0_i32 = arith.constant 0 : i32
    %c0_i32_0 = arith.constant 0 : i32
    %c0_i32_1 = arith.constant 0 : i32
    return %arg2, %arg0, %c0_i32, %c0_i32_0, %arg1 : i32, i32, i32, i32, i32
  }
  func.func @transform_6(%arg0: i32, %arg1: i32, %arg2: i32) -> (i32, i32, i32, i32) {
    %c0_i32 = arith.constant 0 : i32
    %c0_i32_0 = arith.constant 0 : i32
    return %arg2, %arg0, %c0_i32, %arg1 : i32, i32, i32, i32
  }
}

module attributes {stable_mosaic.version = 11 : i64} {
  func.func @_bn_add_kernel(%arg0: i32, %arg1: memref<640x128xbf16, #tpu.memory_space<vmem>>, %arg2: memref<1x128xf32, #tpu.memory_space<vmem>>, %arg3: memref<1x128xf32, #tpu.memory_space<vmem>>, %arg4: memref<640x128xbf16, #tpu.memory_space<vmem>>, %arg5: memref<640x128xf32, #tpu.memory_space<vmem>>) attributes {dimension_semantics = [#tpu.dimension_semantics<parallel>], iteration_bounds = array<i64: 4>, scalar_prefetch = 0 : i64, scratch_operands = 0 : i64, tpu.core_type = #tpu.core_type<tc>, window_params = [{transform_indices = @transform_0, window_bounds = array<i64: 640, 128>}, {pipeline_mode = #tpu.pipeline_mode<synchronous>, transform_indices = @transform_1, window_bounds = array<i64: 1, 128>}, {pipeline_mode = #tpu.pipeline_mode<synchronous>, transform_indices = @transform_2, window_bounds = array<i64: 1, 128>}, {transform_indices = @transform_3, window_bounds = array<i64: 640, 128>}, {transform_indices = @transform_4, window_bounds = array<i64: 640, 128>}]} {
    %c0 = arith.constant 0 : index
    %c0_0 = arith.constant 0 : index
    %0 = vector.load %arg1[%c0, %c0_0] : memref<640x128xbf16, #tpu.memory_space<vmem>>, vector<640x128xbf16>
    %1 = arith.extf %0 : vector<640x128xbf16> to vector<640x128xf32>
    %c0_1 = arith.constant 0 : index
    %c0_2 = arith.constant 0 : index
    %2 = vector.load %arg2[%c0_1, %c0_2] : memref<1x128xf32, #tpu.memory_space<vmem>>, vector<1x128xf32>
    %3 = vector.broadcast %2 : vector<1x128xf32> to vector<640x128xf32>
    %4 = arith.mulf %1, %3 : vector<640x128xf32>
    %c0_3 = arith.constant 0 : index
    %c0_4 = arith.constant 0 : index
    %5 = vector.load %arg3[%c0_3, %c0_4] : memref<1x128xf32, #tpu.memory_space<vmem>>, vector<1x128xf32>
    %6 = vector.broadcast %5 : vector<1x128xf32> to vector<640x128xf32>
    %7 = arith.addf %4, %6 : vector<640x128xf32>
    %c0_5 = arith.constant 0 : index
    %c0_6 = arith.constant 0 : index
    %8 = vector.load %arg4[%c0_5, %c0_6] : memref<640x128xbf16, #tpu.memory_space<vmem>>, vector<640x128xbf16>
    %9 = arith.extf %8 : vector<640x128xbf16> to vector<640x128xf32>
    %10 = arith.addf %7, %9 : vector<640x128xf32>
    %c0_7 = arith.constant 0 : index
    %c0_8 = arith.constant 0 : index
    %11 = vector.load %arg5[%c0_7, %c0_8] : memref<640x128xf32, #tpu.memory_space<vmem>>, vector<640x128xf32>
    tpu.vector_store %arg5[%c0_7, %c0_8], %10 {strides = array<i32>} : memref<640x128xf32, #tpu.memory_space<vmem>>, vector<640x128xf32>,
    return
  }
  func.func @transform_0(%arg0: i32) -> (i32, i32) {
    %c0_i32 = arith.constant 0 : i32
    %c0_i32_0 = arith.constant 0 : i32
    return %arg0, %c0_i32 : i32, i32
  }
  func.func @transform_1(%arg0: i32) -> (i32, i32) {
    %c0_i32 = arith.constant 0 : i32
    %c0_i32_0 = arith.constant 0 : i32
    %c0_i32_1 = arith.constant 0 : i32
    return %c0_i32, %c0_i32_0 : i32, i32
  }
  func.func @transform_2(%arg0: i32) -> (i32, i32) {
    %c0_i32 = arith.constant 0 : i32
    %c0_i32_0 = arith.constant 0 : i32
    %c0_i32_1 = arith.constant 0 : i32
    return %c0_i32, %c0_i32_0 : i32, i32
  }
  func.func @transform_3(%arg0: i32) -> (i32, i32) {
    %c0_i32 = arith.constant 0 : i32
    %c0_i32_0 = arith.constant 0 : i32
    return %arg0, %c0_i32 : i32, i32
  }
  func.func @transform_4(%arg0: i32) -> (i32, i32) {
    %c0_i32 = arith.constant 0 : i32
    %c0_i32_0 = arith.constant 0 : i32
    return %arg0, %c0_i32 : i32, i32
  }
}

</mosaic_0001>

<bundles_post_ra>
// kernel: residual_conv_block_forward.5
= control target key start
LH: loop header
LB: loop body
LE: loop exit
PB: predicated region body
PF: predicated region fallthrough
CT: control target
= control target key end

     0   :  { %9 = vsyncpa [#allocation3], 0  ;;  %s1925_s0 = inlined_call_operand.vmem [shape: bf16[2560,128], index: 0, kind: input, shape index: {}]   ;;  %s1926_s1 = inlined_call_operand.vmem [shape: f32[1,128], index: 1, kind: input, shape index: {}]   ;;  %s1927_s2 = inlined_call_operand.vmem [shape: f32[1,128], index: 2, kind: input, shape index: {}]   ;;  %s1928_s3 = inlined_call_operand.vmem [shape: bf16[2560,128], index: 3, kind: input, shape index: {}]   ;;  %s1929_s4 = inlined_call_operand.hbm [shape: f32[2560,128], index: 4, kind: output, shape index: {}]  }
   0x1   :  { %11 = vsyncpa [#allocation3 + $0x1], 0  ;;  %s1504_s15 = smov 0   ;;  %s1506_s16 = smov 0  }
   0x2   :  { %s1508_s17 = smov 0   ;;  %s1510_s18 = smov 0  }
   0x3 LB: > { %s1525_s19 = sadd.s32 4294967295, %s1475_s18   ;;  %s959_s20 = sadd.s32 4294967294, %s1475_s18   ;;  %s1475_s18 = sphi %s1510_s18, %s1935_s18   ;;  %s1471_s17 = sphi %s1508_s17, %s1934_s17   ;;  %s1467_s16 = sphi %s1506_s16, %s1933_s16   ;;  %s1463_s15 = sphi %s1504_s15, %s1932_s15  }
   0x4   : > { %s1529_s21 = sadd.s32 1, %s1475_s18   ;;  %s118_s22 = sadd.s32 1, %s1471_s17 }
   0x5   : > { %s115_s23 = ssub.s32 %s1475_s18, %s1529_s21  ;;  %p128_p0 = scmp.ne.s32.totalorder %s1471_s17, %s1467_s16 }
   0x6   : > { %p116_p1 = scmp.eq.s32.totalorder %s115_s23, 0  ;;  %p129_p2 = scmp.eq.s32.totalorder %s1525_s19, 3 }
   0x7   : > { %p134_p3 = scmp.ne.s32.totalorder %s1467_s16, %s1463_s15  ;;  %p135_p4 = scmp.eq.s32.totalorder %s959_s20, 3 }
   0x8   : > { %s1540_s24 = scalar_select %p116_p1, %s1471_s17, %s118_s22  }
   0x9   : > { %p1542_p5 = por %p129_p2, %p128_p0  ;;  %p1546_p6 = por %p135_p4, %p134_p3 }
   0xa   : > { %p962_p7 = scmp.ge.s32.totalorder %s1475_s18, 1  ;;  %p177_p8 = scmp.lt.s32.totalorder %s1475_s18, 5 }
   0xc   : > { %p178_p9 = pnand %p962_p7, %p177_p8 }
   0xd   : > { %s208_s27 = smul.u32 (!%p178_p9), 80, %s1525_s19  ;;  %s205_s28 = sand.u32 (!%p178_p9), 1, %s1467_s16  }
   0xe   : > { %181 = sbr.rel (%p178_p9) target bundleno = 132 (0x84), region = 36 }
   0xf   : > { %p209_p10 = scmp.lt.s32.totalorder (!%p178_p9), %s208_s27, 319  ;;  %s1582_s14 = smul.u32 (!%p178_p9), 640, %s205_s28 }
  0x10   : > { %s968_s30 = smul.u32 (!%p178_p9), 640, %s1525_s19 }
  0x11   : > { %s1603_s20 = scalar_lea.vmem (!%p178_p9), [#allocation2], %s1582_s14  ;;  %s1433_s14 = scalar_lea.hbm (!%p178_p9), %s1929_s4, 2560 }
  0x12   : > { %s882_s7 = sshll.u32 (!%p178_p9), %s1603_s20, 4  ;;  %s883_s7 = int_to_ptr.vmem [resolvable:$true] %s882_s7 }
  0x13   : > { %s1937_s27 = smov (!%p209_p10, %s208_s27), 319  ;;  %v1567_v0 = vld [vmem:[%s1926_s1] ss:$0 sm:$0xff] }
  0x14   : > { %s963_s29 = sshll.u32 %s1937_s27, 2  ;;  %v1572_v1 = vld [vmem:[%s1927_s2] ss:$0 sm:$0xff] }
  0x15   : > { %s1557_s6 = scalar_lea.vmem %s1925_s0, %s963_s29  ;;  %s1562_s9 = scalar_lea.vmem %s1928_s3, %s963_s29 }
  0x16   : > { %v970_v2 = vld [vmem:[%s1557_s6] sm:$0xff]   ;;  %v1289_v4 = vld [vmem:[%s1557_s6 + $0x8] sm:$0xff]   ;;  %v1290_v10 = vld [vmem:[%s1557_s6 + $0x10] sm:$0xff]  }
  0x17   : > { %v1130_v3 = vld [vmem:[%s1562_s9] sm:$0xff]   ;;  %v971_v5 = vunpack.c.l.bf16 %v970_v2  ;;  %v972_v7 = vunpack.c.h.bf16 %v970_v2  ;;  %v1328_v9 = vld [vmem:[%s1562_s9 + $0x8] sm:$0xff]   ;;  %v1329_v11 = vld [vmem:[%s1562_s9 + $0x10] sm:$0xff]   ;;  %v975_v12 = vunpack.c.l.bf16 %v1289_v4  ;;  %v976_v14 = vunpack.c.h.bf16 %v1289_v4 }
  0x18   : > { %v1131_v6 = vunpack.c.l.bf16 %v1130_v3  ;;  %v1132_v8 = vunpack.c.h.bf16 %v1130_v3  ;;  %v1135_v13 = vunpack.c.l.bf16 %v1328_v9  ;;  %v1136_v15 = vunpack.c.h.bf16 %v1328_v9  ;;  %v1291_v16 = vld [vmem:[%s1557_s6 + $0x18] sm:$0xff]   ;;  %v1292_v34 = vld [vmem:[%s1557_s6 + $0x20] sm:$0xff]   ;;  %v1293_v44 = vld [vmem:[%s1557_s6 + $0x28] sm:$0xff]  }
  0x19   : > { %v385_v17 = vmul.f32 %v1567_v0, %v971_v5  ;;  %v386_v18 = vmul.f32 %v1567_v0, %v972_v7  ;;  %v979_v19 = vunpack.c.l.bf16 %v1290_v10  ;;  %v1139_v20 = vunpack.c.l.bf16 %v1329_v11  ;;  %v1330_v21 = vld [vmem:[%s1562_s9 + $0x18] sm:$0xff]   ;;  %v1331_v39 = vld [vmem:[%s1562_s9 + $0x20] sm:$0xff]   ;;  %v1332_v49 = vld [vmem:[%s1562_s9 + $0x28] sm:$0xff]  }
  0x1a   : > { %v387_v22 = vmul.f32 %v1567_v0, %v975_v12  ;;  %v388_v23 = vmul.f32 %v1567_v0, %v976_v14  ;;  %v980_v24 = vunpack.c.h.bf16 %v1290_v10  ;;  %v1140_v25 = vunpack.c.h.bf16 %v1329_v11  ;;  %v1294_v54 = vld [vmem:[%s1557_s6 + $0x30] sm:$0xff]   ;;  %v1334_v11 = vld [vmem:[%s1562_s9 + $0x38] sm:$0xff]  }
  0x1b   : > { %v469_v26 = vadd.f32 %v1572_v1, %v385_v17  ;;  %v470_v27 = vadd.f32 %v1572_v1, %v386_v18  ;;  %v389_v28 = vmul.f32 %v1567_v0, %v979_v19  ;;  %v983_v29 = vunpack.c.l.bf16 %v1291_v16  ;;  %v1333_v59 = vld [vmem:[%s1562_s9 + $0x30] sm:$0xff]  }
  0x1c   : > { %v471_v30 = vadd.f32 %v1572_v1, %v387_v22  ;;  %v472_v31 = vadd.f32 %v1572_v1, %v388_v23  ;;  %v390_v32 = vmul.f32 %v1567_v0, %v980_v24  ;;  %v1143_v33 = vunpack.c.l.bf16 %v1330_v21 }
  0x1d   : > { %v709_v35 = vadd.f32 %v1131_v6, %v469_v26  ;;  %v710_v36 = vadd.f32 %v1132_v8, %v470_v27  ;;  %v473_v37 = vadd.f32 %v1572_v1, %v389_v28  ;;  %v391_v38 = vmul.f32 %v1567_v0, %v983_v29  ;;  %v1295_v6 = vld [vmem:[%s1557_s6 + $0x38] sm:$0xff]  }
  0x1e   : > { %v711_v40 = vadd.f32 %v1135_v13, %v471_v30  ;;  %v712_v41 = vadd.f32 %v1136_v15, %v472_v31  ;;  %v474_v42 = vadd.f32 %v1572_v1, %v390_v32  ;;  %v984_v43 = vunpack.c.h.bf16 %v1291_v16  ;;  %v1297_v30 = vld [vmem:[%s1557_s6 + $0x48] sm:$0xff]  }
  0x1f   : > { %789 = vst [vmem:[%s1603_s20] sm:$0xff] %v709_v35  ;;  %v713_v45 = vadd.f32 %v1139_v20, %v473_v37  ;;  %v475_v46 = vadd.f32 %v1572_v1, %v391_v38  ;;  %v1144_v47 = vunpack.c.h.bf16 %v1330_v21  ;;  %v987_v48 = vunpack.c.l.bf16 %v1292_v34  ;;  %v1296_v20 = vld [vmem:[%s1557_s6 + $0x40] sm:$0xff]   ;;  %v1336_v31 = vld [vmem:[%s1562_s9 + $0x48] sm:$0xff]  }
  0x20   : > { %790 = vst [vmem:[%s1603_s20 + $0x8] sm:$0xff] %v710_v36  ;;  %v714_v50 = vadd.f32 %v1140_v25, %v474_v42  ;;  %v392_v51 = vmul.f32 %v1567_v0, %v984_v43  ;;  %v1147_v52 = vunpack.c.l.bf16 %v1331_v39  ;;  %v988_v53 = vunpack.c.h.bf16 %v1292_v34  ;;  %v1335_v21 = vld [vmem:[%s1562_s9 + $0x40] sm:$0xff]  }
  0x21   : > { %791 = vst [vmem:[%s1603_s20 + $0x10] sm:$0xff] %v711_v40  ;;  %v715_v55 = vadd.f32 %v1143_v33, %v475_v46  ;;  %v393_v56 = vmul.f32 %v1567_v0, %v987_v48  ;;  %v1148_v57 = vunpack.c.h.bf16 %v1331_v39  ;;  %v991_v58 = vunpack.c.l.bf16 %v1293_v44  ;;  %v1298_v40 = vld [vmem:[%s1557_s6 + $0x50] sm:$0xff]  }
  0x22   : > { %792 = vst [vmem:[%s1603_s20 + $0x18] sm:$0xff] %v712_v41  ;;  %v476_v60 = vadd.f32 %v1572_v1, %v392_v51  ;;  %v394_v61 = vmul.f32 %v1567_v0, %v988_v53  ;;  %v1151_v62 = vunpack.c.l.bf16 %v1332_v49  ;;  %v992_v63 = vunpack.c.h.bf16 %v1293_v44 }
  0x23   : > { %793 = vst [vmem:[%s1603_s20 + $0x20] sm:$0xff] %v713_v45  ;;  %v477_v2 = vadd.f32 %v1572_v1, %v393_v56  ;;  %v395_v3 = vmul.f32 %v1567_v0, %v991_v58  ;;  %v1152_v4 = vunpack.c.h.bf16 %v1332_v49  ;;  %v995_v5 = vunpack.c.l.bf16 %v1294_v54  ;;  %v1337_v45 = vld [vmem:[%s1562_s9 + $0x50] sm:$0xff]  }
  0x24   : > { %794 = vst [vmem:[%s1603_s20 + $0x28] sm:$0xff] %v714_v50  ;;  %v716_v7 = vadd.f32 %v1144_v47, %v476_v60  ;;  %v478_v8 = vadd.f32 %v1572_v1, %v394_v61  ;;  %v396_v9 = vmul.f32 %v1567_v0, %v992_v63  ;;  %v1155_v10 = vunpack.c.l.bf16 %v1333_v59 }
  0x25   : > { %795 = vst [vmem:[%s1603_s20 + $0x30] sm:$0xff] %v715_v55  ;;  %v717_v12 = vadd.f32 %v1147_v52, %v477_v2  ;;  %v479_v13 = vadd.f32 %v1572_v1, %v395_v3  ;;  %v397_v14 = vmul.f32 %v1567_v0, %v995_v5  ;;  %v996_v15 = vunpack.c.h.bf16 %v1294_v54  ;;  %v1299_v54 = vld [vmem:[%s1557_s6 + $0x58] sm:$0xff]  }
  0x26   : > { %796 = vst [vmem:[%s1603_s20 + $0x38] sm:$0xff] %v716_v7  ;;  %v718_v16 = vadd.f32 %v1148_v57, %v478_v8  ;;  %v480_v17 = vadd.f32 %v1572_v1, %v396_v9  ;;  %v1156_v18 = vunpack.c.h.bf16 %v1333_v59  ;;  %v999_v19 = vunpack.c.l.bf16 %v1295_v6  ;;  %v1338_v59 = vld [vmem:[%s1562_s9 + $0x58] sm:$0xff]   ;;  %v1339_v7 = vld [vmem:[%s1562_s9 + $0x60] sm:$0xff]  }
  0x27   : > { %797 = vst [vmem:[%s1603_s20 + $0x40] sm:$0xff] %v717_v12  ;;  %v719_v22 = vadd.f32 %v1151_v62, %v479_v13  ;;  %v481_v23 = vadd.f32 %v1572_v1, %v397_v14  ;;  %v398_v24 = vmul.f32 %v1567_v0, %v996_v15  ;;  %v1159_v25 = vunpack.c.l.bf16 %v1334_v11 }
  0x28   : > { %798 = vst [vmem:[%s1603_s20 + $0x48] sm:$0xff] %v718_v16  ;;  %v720_v26 = vadd.f32 %v1152_v4, %v480_v17  ;;  %v399_v27 = vmul.f32 %v1567_v0, %v999_v19  ;;  %v1000_v28 = vunpack.c.h.bf16 %v1295_v6  ;;  %v1160_v29 = vunpack.c.h.bf16 %v1334_v11  ;;  %v1300_v6 = vld [vmem:[%s1557_s6 + $0x60] sm:$0xff]   ;;  %v1301_v16 = vld [vmem:[%s1557_s6 + $0x68] sm:$0xff]  }
  0x29   : > { %799 = vst [vmem:[%s1603_s20 + $0x50] sm:$0xff] %v719_v22  ;;  %v721_v32 = vadd.f32 %v1155_v10, %v481_v23  ;;  %v482_v33 = vadd.f32 %v1572_v1, %v398_v24  ;;  %v1003_v34 = vunpack.c.l.bf16 %v1296_v20  ;;  %v1163_v35 = vunpack.c.l.bf16 %v1335_v21  ;;  %v1340_v17 = vld [vmem:[%s1562_s9 + $0x68] sm:$0xff]  }
  0x2a   : > { %800 = vst [vmem:[%s1603_s20 + $0x58] sm:$0xff] %v720_v26  ;;  %v483_v36 = vadd.f32 %v1572_v1, %v399_v27  ;;  %v400_v37 = vmul.f32 %v1567_v0, %v1000_v28  ;;  %v1004_v38 = vunpack.c.h.bf16 %v1296_v20  ;;  %v1164_v39 = vunpack.c.h.bf16 %v1335_v21  ;;  %v1302_v26 = vld [vmem:[%s1557_s6 + $0x70] sm:$0xff]  }
  0x2b   : > { %801 = vst [vmem:[%s1603_s20 + $0x60] sm:$0xff] %v721_v32  ;;  %v722_v41 = vadd.f32 %v1156_v18, %v482_v33  ;;  %v401_v42 = vmul.f32 %v1567_v0, %v1003_v34  ;;  %v1007_v43 = vunpack.c.l.bf16 %v1297_v30  ;;  %v1167_v44 = vunpack.c.l.bf16 %v1336_v31 }
  0x2c   : > { %v723_v46 = vadd.f32 %v1159_v25, %v483_v36  ;;  %v484_v47 = vadd.f32 %v1572_v1, %v400_v37  ;;  %v402_v48 = vmul.f32 %v1567_v0, %v1004_v38  ;;  %v1008_v49 = vunpack.c.h.bf16 %v1297_v30 }
  0x2d   : > { %802 = vst [vmem:[%s1603_s20 + $0x68] sm:$0xff] %v722_v41  ;;  %v485_v50 = vadd.f32 %v1572_v1, %v401_v42  ;;  %v403_v51 = vmul.f32 %v1567_v0, %v1007_v43  ;;  %v1168_v52 = vunpack.c.h.bf16 %v1336_v31  ;;  %v1011_v53 = vunpack.c.l.bf16 %v1298_v40  ;;  %v1341_v31 = vld [vmem:[%s1562_s9 + $0x70] sm:$0xff]  }
  0x2e   : > { %803 = vst [vmem:[%s1603_s20 + $0x70] sm:$0xff] %v723_v46  ;;  %v724_v55 = vadd.f32 %v1160_v29, %v484_v47  ;;  %v486_v56 = vadd.f32 %v1572_v1, %v402_v48  ;;  %v404_v57 = vmul.f32 %v1567_v0, %v1008_v49  ;;  %v1171_v58 = vunpack.c.l.bf16 %v1337_v45 }
  0x2f   : > { %v725_v60 = vadd.f32 %v1163_v35, %v485_v50  ;;  %v487_v61 = vadd.f32 %v1572_v1, %v403_v51  ;;  %v405_v62 = vmul.f32 %v1567_v0, %v1011_v53  ;;  %v1012_v63 = vunpack.c.h.bf16 %v1298_v40  ;;  %v1303_v40 = vld [vmem:[%s1557_s6 + $0x78] sm:$0xff]  }
  0x30   : > { %804 = vst [vmem:[%s1603_s20 + $0x78] sm:$0xff] %v724_v55  ;;  %v726_v2 = vadd.f32 %v1164_v39, %v486_v56  ;;  %v488_v3 = vadd.f32 %v1572_v1, %v404_v57  ;;  %v1172_v4 = vunpack.c.h.bf16 %v1337_v45  ;;  %v1015_v5 = vunpack.c.l.bf16 %v1299_v54  ;;  %v1342_v45 = vld [vmem:[%s1562_s9 + $0x78] sm:$0xff]   ;;  %v1343_v55 = vld [vmem:[%s1562_s9 + $0x80] sm:$0xff]  }
  0x31   : > { %805 = vst [vmem:[%s1603_s20 + $0x80] sm:$0xff] %v725_v60  ;;  %v727_v8 = vadd.f32 %v1167_v44, %v487_v61  ;;  %v489_v9 = vadd.f32 %v1572_v1, %v405_v62  ;;  %v406_v10 = vmul.f32 %v1567_v0, %v1012_v63  ;;  %v1175_v11 = vunpack.c.l.bf16 %v1338_v59 }
  0x32   : > { %806 = vst [vmem:[%s1603_s20 + $0x88] sm:$0xff] %v726_v2  ;;  %v728_v12 = vadd.f32 %v1168_v52, %v488_v3  ;;  %v407_v13 = vmul.f32 %v1567_v0, %v1015_v5  ;;  %v1016_v14 = vunpack.c.h.bf16 %v1299_v54  ;;  %v1176_v15 = vunpack.c.h.bf16 %v1338_v59  ;;  %v1304_v54 = vld [vmem:[%s1557_s6 + $0x80] sm:$0xff]   ;;  %v1305_v2 = vld [vmem:[%s1557_s6 + $0x88] sm:$0xff]  }
  0x33   : > { %807 = vst [vmem:[%s1603_s20 + $0x90] sm:$0xff] %v727_v8  ;;  %v729_v18 = vadd.f32 %v1171_v58, %v489_v9  ;;  %v490_v19 = vadd.f32 %v1572_v1, %v406_v10  ;;  %v1019_v20 = vunpack.c.l.bf16 %v1300_v6  ;;  %v1179_v21 = vunpack.c.l.bf16 %v1339_v7  ;;  %v1344_v3 = vld [vmem:[%s1562_s9 + $0x88] sm:$0xff]  }
  0x34   : > { %808 = vst [vmem:[%s1603_s20 + $0x98] sm:$0xff] %v728_v12  ;;  %v491_v22 = vadd.f32 %v1572_v1, %v407_v13  ;;  %v408_v23 = vmul.f32 %v1567_v0, %v1016_v14  ;;  %v1020_v24 = vunpack.c.h.bf16 %v1300_v6  ;;  %v1180_v25 = vunpack.c.h.bf16 %v1339_v7  ;;  %v1306_v12 = vld [vmem:[%s1557_s6 + $0x90] sm:$0xff]  }
  0x35   : > { %809 = vst [vmem:[%s1603_s20 + $0xa0] sm:$0xff] %v729_v18  ;;  %v730_v27 = vadd.f32 %v1172_v4, %v490_v19  ;;  %v409_v28 = vmul.f32 %v1567_v0, %v1019_v20  ;;  %v1023_v29 = vunpack.c.l.bf16 %v1301_v16  ;;  %v1183_v30 = vunpack.c.l.bf16 %v1340_v17 }
  0x36   : > { %v731_v32 = vadd.f32 %v1175_v11, %v491_v22  ;;  %v492_v33 = vadd.f32 %v1572_v1, %v408_v23  ;;  %v410_v34 = vmul.f32 %v1567_v0, %v1020_v24  ;;  %v1024_v35 = vunpack.c.h.bf16 %v1301_v16 }
  0x37   : > { %810 = vst [vmem:[%s1603_s20 + $0xa8] sm:$0xff] %v730_v27  ;;  %v493_v36 = vadd.f32 %v1572_v1, %v409_v28  ;;  %v411_v37 = vmul.f32 %v1567_v0, %v1023_v29  ;;  %v1184_v38 = vunpack.c.h.bf16 %v1340_v17  ;;  %v1027_v39 = vunpack.c.l.bf16 %v1302_v26  ;;  %v1345_v17 = vld [vmem:[%s1562_s9 + $0x90] sm:$0xff]  }
  0x38   : > { %811 = vst [vmem:[%s1603_s20 + $0xb0] sm:$0xff] %v731_v32  ;;  %v732_v41 = vadd.f32 %v1176_v15, %v492_v33  ;;  %v494_v42 = vadd.f32 %v1572_v1, %v410_v34  ;;  %v412_v43 = vmul.f32 %v1567_v0, %v1024_v35  ;;  %v1187_v44 = vunpack.c.l.bf16 %v1341_v31 }
  0x39   : > { %v733_v46 = vadd.f32 %v1179_v21, %v493_v36  ;;  %v495_v47 = vadd.f32 %v1572_v1, %v411_v37  ;;  %v413_v48 = vmul.f32 %v1567_v0, %v1027_v39  ;;  %v1028_v49 = vunpack.c.h.bf16 %v1302_v26  ;;  %v1307_v26 = vld [vmem:[%s1557_s6 + $0x98] sm:$0xff]  }
  0x3a   : > { %812 = vst [vmem:[%s1603_s20 + $0xb8] sm:$0xff] %v732_v41  ;;  %v734_v50 = vadd.f32 %v1180_v25, %v494_v42  ;;  %v496_v51 = vadd.f32 %v1572_v1, %v412_v43  ;;  %v1188_v52 = vunpack.c.h.bf16 %v1341_v31  ;;  %v1031_v53 = vunpack.c.l.bf16 %v1303_v40  ;;  %v1346_v31 = vld [vmem:[%s1562_s9 + $0x98] sm:$0xff]   ;;  %v1347_v41 = vld [vmem:[%s1562_s9 + $0xa0] sm:$0xff]  }
  0x3b   : > { %813 = vst [vmem:[%s1603_s20 + $0xc0] sm:$0xff] %v733_v46  ;;  %v735_v56 = vadd.f32 %v1183_v30, %v495_v47  ;;  %v497_v57 = vadd.f32 %v1572_v1, %v413_v48  ;;  %v414_v58 = vmul.f32 %v1567_v0, %v1028_v49  ;;  %v1191_v59 = vunpack.c.l.bf16 %v1342_v45 }
  0x3c   : > { %814 = vst [vmem:[%s1603_s20 + $0xc8] sm:$0xff] %v734_v50  ;;  %v736_v60 = vadd.f32 %v1184_v38, %v496_v51  ;;  %v415_v61 = vmul.f32 %v1567_v0, %v1031_v53  ;;  %v1032_v62 = vunpack.c.h.bf16 %v1303_v40  ;;  %v1192_v63 = vunpack.c.h.bf16 %v1342_v45  ;;  %v1308_v40 = vld [vmem:[%s1557_s6 + $0xa0] sm:$0xff]   ;;  %v1309_v50 = vld [vmem:[%s1557_s6 + $0xa8] sm:$0xff]  }
  0x3d   : > { %815 = vst [vmem:[%s1603_s20 + $0xd0] sm:$0xff] %v735_v56  ;;  %v737_v4 = vadd.f32 %v1187_v44, %v497_v57  ;;  %v498_v5 = vadd.f32 %v1572_v1, %v414_v58  ;;  %v1035_v6 = vunpack.c.l.bf16 %v1304_v54  ;;  %v1195_v7 = vunpack.c.l.bf16 %v1343_v55  ;;  %v1348_v51 = vld [vmem:[%s1562_s9 + $0xa8] sm:$0xff]  }
  0x3e   : > { %816 = vst [vmem:[%s1603_s20 + $0xd8] sm:$0xff] %v736_v60  ;;  %v499_v8 = vadd.f32 %v1572_v1, %v415_v61  ;;  %v416_v9 = vmul.f32 %v1567_v0, %v1032_v62  ;;  %v1036_v10 = vunpack.c.h.bf16 %v1304_v54  ;;  %v1196_v11 = vunpack.c.h.bf16 %v1343_v55  ;;  %v1310_v60 = vld [vmem:[%s1557_s6 + $0xb0] sm:$0xff]  }
  0x3f   : > { %817 = vst [vmem:[%s1603_s20 + $0xe0] sm:$0xff] %v737_v4  ;;  %v738_v13 = vadd.f32 %v1188_v52, %v498_v5  ;;  %v417_v14 = vmul.f32 %v1567_v0, %v1035_v6  ;;  %v1039_v15 = vunpack.c.l.bf16 %v1305_v2  ;;  %v1199_v16 = vunpack.c.l.bf16 %v1344_v3 }
  0x40   : > { %v739_v18 = vadd.f32 %v1191_v59, %v499_v8  ;;  %v500_v19 = vadd.f32 %v1572_v1, %v416_v9  ;;  %v418_v20 = vmul.f32 %v1567_v0, %v1036_v10  ;;  %v1040_v21 = vunpack.c.h.bf16 %v1305_v2 }
  0x41   : > { %818 = vst [vmem:[%s1603_s20 + $0xe8] sm:$0xff] %v738_v13  ;;  %v501_v22 = vadd.f32 %v1572_v1, %v417_v14  ;;  %v419_v23 = vmul.f32 %v1567_v0, %v1039_v15  ;;  %v1200_v24 = vunpack.c.h.bf16 %v1344_v3  ;;  %v1043_v25 = vunpack.c.l.bf16 %v1306_v12  ;;  %v1349_v3 = vld [vmem:[%s1562_s9 + $0xb0] sm:$0xff]  }
  0x42   : > { %819 = vst [vmem:[%s1603_s20 + $0xf0] sm:$0xff] %v739_v18  ;;  %v740_v27 = vadd.f32 %v1192_v63, %v500_v19  ;;  %v502_v28 = vadd.f32 %v1572_v1, %v418_v20  ;;  %v420_v29 = vmul.f32 %v1567_v0, %v1040_v21  ;;  %v1203_v30 = vunpack.c.l.bf16 %v1345_v17 }
  0x43   : > { %v741_v32 = vadd.f32 %v1195_v7, %v501_v22  ;;  %v503_v33 = vadd.f32 %v1572_v1, %v419_v23  ;;  %v421_v34 = vmul.f32 %v1567_v0, %v1043_v25  ;;  %v1044_v35 = vunpack.c.h.bf16 %v1306_v12  ;;  %v1311_v12 = vld [vmem:[%s1557_s6 + $0xb8] sm:$0xff]  }
  0x44   : > { %820 = vst [vmem:[%s1603_s20 + $0xf8] sm:$0xff] %v740_v27  ;;  %v742_v36 = vadd.f32 %v1196_v11, %v502_v28  ;;  %v504_v37 = vadd.f32 %v1572_v1, %v420_v29  ;;  %v1204_v38 = vunpack.c.h.bf16 %v1345_v17  ;;  %v1047_v39 = vunpack.c.l.bf16 %v1307_v26  ;;  %v1350_v17 = vld [vmem:[%s1562_s9 + $0xb8] sm:$0xff]   ;;  %v1351_v27 = vld [vmem:[%s1562_s9 + $0xc0] sm:$0xff]  }
  0x45   : > { %821 = vst [vmem:[%s1603_s20 + $0x100] sm:$0xff] %v741_v32  ;;  %v743_v42 = vadd.f32 %v1199_v16, %v503_v33  ;;  %v505_v43 = vadd.f32 %v1572_v1, %v421_v34  ;;  %v422_v44 = vmul.f32 %v1567_v0, %v1044_v35  ;;  %v1207_v45 = vunpack.c.l.bf16 %v1346_v31 }
  0x46   : > { %822 = vst [vmem:[%s1603_s20 + $0x108] sm:$0xff] %v742_v36  ;;  %v744_v46 = vadd.f32 %v1200_v24, %v504_v37  ;;  %v423_v47 = vmul.f32 %v1567_v0, %v1047_v39  ;;  %v1048_v48 = vunpack.c.h.bf16 %v1307_v26  ;;  %v1208_v49 = vunpack.c.h.bf16 %v1346_v31  ;;  %v1312_v26 = vld [vmem:[%s1557_s6 + $0xc0] sm:$0xff]   ;;  %v1313_v36 = vld [vmem:[%s1557_s6 + $0xc8] sm:$0xff]  }
  0x47   : > { %823 = vst [vmem:[%s1603_s20 + $0x110] sm:$0xff] %v743_v42  ;;  %v745_v52 = vadd.f32 %v1203_v30, %v505_v43  ;;  %v506_v53 = vadd.f32 %v1572_v1, %v422_v44  ;;  %v1051_v54 = vunpack.c.l.bf16 %v1308_v40  ;;  %v1211_v55 = vunpack.c.l.bf16 %v1347_v41  ;;  %v1352_v37 = vld [vmem:[%s1562_s9 + $0xc8] sm:$0xff]  }
  0x48   : > { %824 = vst [vmem:[%s1603_s20 + $0x118] sm:$0xff] %v744_v46  ;;  %v507_v56 = vadd.f32 %v1572_v1, %v423_v47  ;;  %v424_v57 = vmul.f32 %v1567_v0, %v1048_v48  ;;  %v1052_v58 = vunpack.c.h.bf16 %v1308_v40  ;;  %v1212_v59 = vunpack.c.h.bf16 %v1347_v41  ;;  %v1314_v46 = vld [vmem:[%s1557_s6 + $0xd0] sm:$0xff]  }
  0x49   : > { %825 = vst [vmem:[%s1603_s20 + $0x120] sm:$0xff] %v745_v52  ;;  %v746_v61 = vadd.f32 %v1204_v38, %v506_v53  ;;  %v425_v62 = vmul.f32 %v1567_v0, %v1051_v54  ;;  %v1055_v63 = vunpack.c.l.bf16 %v1309_v50  ;;  %v1215_v2 = vunpack.c.l.bf16 %v1348_v51 }
  0x4a   : > { %v747_v4 = vadd.f32 %v1207_v45, %v507_v56  ;;  %v508_v5 = vadd.f32 %v1572_v1, %v424_v57  ;;  %v426_v6 = vmul.f32 %v1567_v0, %v1052_v58  ;;  %v1056_v7 = vunpack.c.h.bf16 %v1309_v50 }
  0x4b   : > { %826 = vst [vmem:[%s1603_s20 + $0x128] sm:$0xff] %v746_v61  ;;  %v509_v8 = vadd.f32 %v1572_v1, %v425_v62  ;;  %v427_v9 = vmul.f32 %v1567_v0, %v1055_v63  ;;  %v1216_v10 = vunpack.c.h.bf16 %v1348_v51  ;;  %v1059_v11 = vunpack.c.l.bf16 %v1310_v60  ;;  %v1353_v51 = vld [vmem:[%s1562_s9 + $0xd0] sm:$0xff]  }
  0x4c   : > { %827 = vst [vmem:[%s1603_s20 + $0x130] sm:$0xff] %v747_v4  ;;  %v748_v13 = vadd.f32 %v1208_v49, %v508_v5  ;;  %v510_v14 = vadd.f32 %v1572_v1, %v426_v6  ;;  %v428_v15 = vmul.f32 %v1567_v0, %v1056_v7  ;;  %v1219_v16 = vunpack.c.l.bf16 %v1349_v3 }
  0x4d   : > { %v749_v18 = vadd.f32 %v1211_v55, %v509_v8  ;;  %v511_v19 = vadd.f32 %v1572_v1, %v427_v9  ;;  %v429_v20 = vmul.f32 %v1567_v0, %v1059_v11  ;;  %v1060_v21 = vunpack.c.h.bf16 %v1310_v60  ;;  %v1315_v60 = vld [vmem:[%s1557_s6 + $0xd8] sm:$0xff]  }
  0x4e   : > { %828 = vst [vmem:[%s1603_s20 + $0x138] sm:$0xff] %v748_v13  ;;  %v750_v22 = vadd.f32 %v1212_v59, %v510_v14  ;;  %v512_v23 = vadd.f32 %v1572_v1, %v428_v15  ;;  %v1220_v24 = vunpack.c.h.bf16 %v1349_v3  ;;  %v1063_v25 = vunpack.c.l.bf16 %v1311_v12  ;;  %v1354_v3 = vld [vmem:[%s1562_s9 + $0xd8] sm:$0xff]   ;;  %v1355_v13 = vld [vmem:[%s1562_s9 + $0xe0] sm:$0xff]  }
  0x4f   : > { %829 = vst [vmem:[%s1603_s20 + $0x140] sm:$0xff] %v749_v18  ;;  %v751_v28 = vadd.f32 %v1215_v2, %v511_v19  ;;  %v513_v29 = vadd.f32 %v1572_v1, %v429_v20  ;;  %v430_v30 = vmul.f32 %v1567_v0, %v1060_v21  ;;  %v1223_v31 = vunpack.c.l.bf16 %v1350_v17 }
  0x50   : > { %830 = vst [vmem:[%s1603_s20 + $0x148] sm:$0xff] %v750_v22  ;;  %v752_v32 = vadd.f32 %v1216_v10, %v512_v23  ;;  %v431_v33 = vmul.f32 %v1567_v0, %v1063_v25  ;;  %v1064_v34 = vunpack.c.h.bf16 %v1311_v12  ;;  %v1224_v35 = vunpack.c.h.bf16 %v1350_v17  ;;  %v1316_v12 = vld [vmem:[%s1557_s6 + $0xe0] sm:$0xff]   ;;  %v1317_v22 = vld [vmem:[%s1557_s6 + $0xe8] sm:$0xff]  }
  0x51   : > { %831 = vst [vmem:[%s1603_s20 + $0x150] sm:$0xff] %v751_v28  ;;  %v753_v38 = vadd.f32 %v1219_v16, %v513_v29  ;;  %v514_v39 = vadd.f32 %v1572_v1, %v430_v30  ;;  %v1067_v40 = vunpack.c.l.bf16 %v1312_v26  ;;  %v1227_v41 = vunpack.c.l.bf16 %v1351_v27  ;;  %v1356_v23 = vld [vmem:[%s1562_s9 + $0xe8] sm:$0xff]  }
  0x52   : > { %832 = vst [vmem:[%s1603_s20 + $0x158] sm:$0xff] %v752_v32  ;;  %v515_v42 = vadd.f32 %v1572_v1, %v431_v33  ;;  %v432_v43 = vmul.f32 %v1567_v0, %v1064_v34  ;;  %v1068_v44 = vunpack.c.h.bf16 %v1312_v26  ;;  %v1228_v45 = vunpack.c.h.bf16 %v1351_v27  ;;  %v1318_v32 = vld [vmem:[%s1557_s6 + $0xf0] sm:$0xff]  }
  0x53   : > { %833 = vst [vmem:[%s1603_s20 + $0x160] sm:$0xff] %v753_v38  ;;  %v754_v47 = vadd.f32 %v1220_v24, %v514_v39  ;;  %v433_v48 = vmul.f32 %v1567_v0, %v1067_v40  ;;  %v1071_v49 = vunpack.c.l.bf16 %v1313_v36  ;;  %v1231_v50 = vunpack.c.l.bf16 %v1352_v37 }
  0x54   : > { %v755_v52 = vadd.f32 %v1223_v31, %v515_v42  ;;  %v516_v53 = vadd.f32 %v1572_v1, %v432_v43  ;;  %v434_v54 = vmul.f32 %v1567_v0, %v1068_v44  ;;  %v1072_v55 = vunpack.c.h.bf16 %v1313_v36 }
  0x55   : > { %834 = vst [vmem:[%s1603_s20 + $0x168] sm:$0xff] %v754_v47  ;;  %v517_v56 = vadd.f32 %v1572_v1, %v433_v48  ;;  %v435_v57 = vmul.f32 %v1567_v0, %v1071_v49  ;;  %v1232_v58 = vunpack.c.h.bf16 %v1352_v37  ;;  %v1075_v59 = vunpack.c.l.bf16 %v1314_v46  ;;  %v1357_v37 = vld [vmem:[%s1562_s9 + $0xf0] sm:$0xff]  }
  0x56   : > { %835 = vst [vmem:[%s1603_s20 + $0x170] sm:$0xff] %v755_v52  ;;  %v756_v61 = vadd.f32 %v1224_v35, %v516_v53  ;;  %v518_v62 = vadd.f32 %v1572_v1, %v434_v54  ;;  %v436_v63 = vmul.f32 %v1567_v0, %v1072_v55  ;;  %v1235_v2 = vunpack.c.l.bf16 %v1353_v51 }
  0x57   : > { %v757_v4 = vadd.f32 %v1227_v41, %v517_v56  ;;  %v519_v5 = vadd.f32 %v1572_v1, %v435_v57  ;;  %v437_v6 = vmul.f32 %v1567_v0, %v1075_v59  ;;  %v1076_v7 = vunpack.c.h.bf16 %v1314_v46  ;;  %v1319_v46 = vld [vmem:[%s1557_s6 + $0xf8] sm:$0xff]  }
  0x58   : > { %836 = vst [vmem:[%s1603_s20 + $0x178] sm:$0xff] %v756_v61  ;;  %v758_v8 = vadd.f32 %v1228_v45, %v518_v62  ;;  %v520_v9 = vadd.f32 %v1572_v1, %v436_v63  ;;  %v1236_v10 = vunpack.c.h.bf16 %v1353_v51  ;;  %v1079_v11 = vunpack.c.l.bf16 %v1315_v60  ;;  %v1358_v51 = vld [vmem:[%s1562_s9 + $0xf8] sm:$0xff]   ;;  %v1359_v61 = vld [vmem:[%s1562_s9 + $0x100] sm:$0xff]  }
  0x59   : > { %837 = vst [vmem:[%s1603_s20 + $0x180] sm:$0xff] %v757_v4  ;;  %v759_v14 = vadd.f32 %v1231_v50, %v519_v5  ;;  %v521_v15 = vadd.f32 %v1572_v1, %v437_v6  ;;  %v438_v16 = vmul.f32 %v1567_v0, %v1076_v7  ;;  %v1239_v17 = vunpack.c.l.bf16 %v1354_v3 }
  0x5a   : > { %838 = vst [vmem:[%s1603_s20 + $0x188] sm:$0xff] %v758_v8  ;;  %v760_v18 = vadd.f32 %v1232_v58, %v520_v9  ;;  %v439_v19 = vmul.f32 %v1567_v0, %v1079_v11  ;;  %v1080_v20 = vunpack.c.h.bf16 %v1315_v60  ;;  %v1240_v21 = vunpack.c.h.bf16 %v1354_v3  ;;  %v1320_v60 = vld [vmem:[%s1557_s6 + $0x100] sm:$0xff]   ;;  %v1321_v8 = vld [vmem:[%s1557_s6 + $0x108] sm:$0xff]  }
  0x5b   : > { %839 = vst [vmem:[%s1603_s20 + $0x190] sm:$0xff] %v759_v14  ;;  %v761_v24 = vadd.f32 %v1235_v2, %v521_v15  ;;  %v522_v25 = vadd.f32 %v1572_v1, %v438_v16  ;;  %v1083_v26 = vunpack.c.l.bf16 %v1316_v12  ;;  %v1243_v27 = vunpack.c.l.bf16 %v1355_v13  ;;  %v1360_v9 = vld [vmem:[%s1562_s9 + $0x108] sm:$0xff]  }
  0x5c   : > { %840 = vst [vmem:[%s1603_s20 + $0x198] sm:$0xff] %v760_v18  ;;  %v523_v28 = vadd.f32 %v1572_v1, %v439_v19  ;;  %v440_v29 = vmul.f32 %v1567_v0, %v1080_v20  ;;  %v1084_v30 = vunpack.c.h.bf16 %v1316_v12  ;;  %v1244_v31 = vunpack.c.h.bf16 %v1355_v13  ;;  %v1322_v18 = vld [vmem:[%s1557_s6 + $0x110] sm:$0xff]  }
  0x5d   : > { %841 = vst [vmem:[%s1603_s20 + $0x1a0] sm:$0xff] %v761_v24  ;;  %v762_v33 = vadd.f32 %v1236_v10, %v522_v25  ;;  %v441_v34 = vmul.f32 %v1567_v0, %v1083_v26  ;;  %v1087_v35 = vunpack.c.l.bf16 %v1317_v22  ;;  %v1247_v36 = vunpack.c.l.bf16 %v1356_v23 }
  0x5e   : > { %v763_v38 = vadd.f32 %v1239_v17, %v523_v28  ;;  %v524_v39 = vadd.f32 %v1572_v1, %v440_v29  ;;  %v442_v40 = vmul.f32 %v1567_v0, %v1084_v30  ;;  %v1088_v41 = vunpack.c.h.bf16 %v1317_v22 }
  0x5f   : > { %842 = vst [vmem:[%s1603_s20 + $0x1a8] sm:$0xff] %v762_v33  ;;  %v525_v42 = vadd.f32 %v1572_v1, %v441_v34  ;;  %v443_v43 = vmul.f32 %v1567_v0, %v1087_v35  ;;  %v1248_v44 = vunpack.c.h.bf16 %v1356_v23  ;;  %v1091_v45 = vunpack.c.l.bf16 %v1318_v32  ;;  %v1361_v23 = vld [vmem:[%s1562_s9 + $0x110] sm:$0xff]  }
  0x60   : > { %843 = vst [vmem:[%s1603_s20 + $0x1b0] sm:$0xff] %v763_v38  ;;  %v764_v47 = vadd.f32 %v1240_v21, %v524_v39  ;;  %v526_v48 = vadd.f32 %v1572_v1, %v442_v40  ;;  %v444_v49 = vmul.f32 %v1567_v0, %v1088_v41  ;;  %v1251_v50 = vunpack.c.l.bf16 %v1357_v37 }
  0x61   : > { %v765_v52 = vadd.f32 %v1243_v27, %v525_v42  ;;  %v527_v53 = vadd.f32 %v1572_v1, %v443_v43  ;;  %v445_v54 = vmul.f32 %v1567_v0, %v1091_v45  ;;  %v1092_v55 = vunpack.c.h.bf16 %v1318_v32  ;;  %v1323_v32 = vld [vmem:[%s1557_s6 + $0x118] sm:$0xff]  }
  0x62   : > { %844 = vst [vmem:[%s1603_s20 + $0x1b8] sm:$0xff] %v764_v47  ;;  %v766_v56 = vadd.f32 %v1244_v31, %v526_v48  ;;  %v528_v57 = vadd.f32 %v1572_v1, %v444_v49  ;;  %v1252_v58 = vunpack.c.h.bf16 %v1357_v37  ;;  %v1095_v59 = vunpack.c.l.bf16 %v1319_v46  ;;  %v1362_v37 = vld [vmem:[%s1562_s9 + $0x118] sm:$0xff]   ;;  %v1363_v47 = vld [vmem:[%s1562_s9 + $0x120] sm:$0xff]  }
  0x63   : > { %845 = vst [vmem:[%s1603_s20 + $0x1c0] sm:$0xff] %v765_v52  ;;  %v767_v62 = vadd.f32 %v1247_v36, %v527_v53  ;;  %v529_v63 = vadd.f32 %v1572_v1, %v445_v54  ;;  %v446_v2 = vmul.f32 %v1567_v0, %v1092_v55  ;;  %v1255_v3 = vunpack.c.l.bf16 %v1358_v51 }
  0x64   : > { %846 = vst [vmem:[%s1603_s20 + $0x1c8] sm:$0xff] %v766_v56  ;;  %v768_v4 = vadd.f32 %v1248_v44, %v528_v57  ;;  %v447_v5 = vmul.f32 %v1567_v0, %v1095_v59  ;;  %v1096_v6 = vunpack.c.h.bf16 %v1319_v46  ;;  %v1256_v7 = vunpack.c.h.bf16 %v1358_v51  ;;  %v1324_v46 = vld [vmem:[%s1557_s6 + $0x120] sm:$0xff]   ;;  %v1325_v56 = vld [vmem:[%s1557_s6 + $0x128] sm:$0xff]  }
  0x65   : > { %847 = vst [vmem:[%s1603_s20 + $0x1d0] sm:$0xff] %v767_v62  ;;  %v769_v10 = vadd.f32 %v1251_v50, %v529_v63  ;;  %v530_v11 = vadd.f32 %v1572_v1, %v446_v2  ;;  %v1099_v12 = vunpack.c.l.bf16 %v1320_v60  ;;  %v1259_v13 = vunpack.c.l.bf16 %v1359_v61  ;;  %v1364_v57 = vld [vmem:[%s1562_s9 + $0x128] sm:$0xff]  }
  0x66   : > { %848 = vst [vmem:[%s1603_s20 + $0x1d8] sm:$0xff] %v768_v4  ;;  %v531_v14 = vadd.f32 %v1572_v1, %v447_v5  ;;  %v448_v15 = vmul.f32 %v1567_v0, %v1096_v6  ;;  %v1100_v16 = vunpack.c.h.bf16 %v1320_v60  ;;  %v1260_v17 = vunpack.c.h.bf16 %v1359_v61  ;;  %v1326_v4 = vld [vmem:[%s1557_s6 + $0x130] sm:$0xff]  }
  0x67   : > { %849 = vst [vmem:[%s1603_s20 + $0x1e0] sm:$0xff] %v769_v10  ;;  %v770_v19 = vadd.f32 %v1252_v58, %v530_v11  ;;  %v449_v20 = vmul.f32 %v1567_v0, %v1099_v12  ;;  %v1103_v21 = vunpack.c.l.bf16 %v1321_v8  ;;  %v1263_v22 = vunpack.c.l.bf16 %v1360_v9  ;;  %v1412_v12 = vld [vmem:[%s1926_s1] ss:$0 sm:$0xff] }
  0x68   : > { %v771_v24 = vadd.f32 %v1255_v3, %v531_v14  ;;  %v532_v25 = vadd.f32 %v1572_v1, %v448_v15  ;;  %v450_v26 = vmul.f32 %v1567_v0, %v1100_v16  ;;  %v1104_v27 = vunpack.c.h.bf16 %v1321_v8 }
  0x69   : > { %850 = vst [vmem:[%s1603_s20 + $0x1e8] sm:$0xff] %v770_v19  ;;  %v533_v28 = vadd.f32 %v1572_v1, %v449_v20  ;;  %v451_v29 = vmul.f32 %v1567_v0, %v1103_v21  ;;  %v1264_v30 = vunpack.c.h.bf16 %v1360_v9  ;;  %v1107_v31 = vunpack.c.l.bf16 %v1322_v18  ;;  %v1365_v9 = vld [vmem:[%s1562_s9 + $0x130] sm:$0xff]  }
  0x6a   : > { %851 = vst [vmem:[%s1603_s20 + $0x1f0] sm:$0xff] %v771_v24  ;;  %v772_v33 = vadd.f32 %v1256_v7, %v532_v25  ;;  %v534_v34 = vadd.f32 %v1572_v1, %v450_v26  ;;  %v452_v35 = vmul.f32 %v1567_v0, %v1104_v27  ;;  %v1267_v36 = vunpack.c.l.bf16 %v1361_v23  ;;  %v1366_v27 = vld [vmem:[%s1562_s9 + $0x138] sm:$0xff]   ;;  %s870_s9 = scalar_lea.sflag [#allocation3], %s205_s28 }
  0x6b   : > { %v773_v38 = vadd.f32 %v1259_v13, %v533_v28  ;;  %v535_v39 = vadd.f32 %v1572_v1, %v451_v29  ;;  %v453_v40 = vmul.f32 %v1567_v0, %v1107_v31  ;;  %v1108_v41 = vunpack.c.h.bf16 %v1322_v18  ;;  %v1327_v18 = vld [vmem:[%s1557_s6 + $0x138] sm:$0xff]   ;;  %s881_s6 = scalar_lea.hbm %s1929_s4, %s968_s30 }
  0x6c   : > { %852 = vst [vmem:[%s1603_s20 + $0x1f8] sm:$0xff] %v772_v33  ;;  %v774_v42 = vadd.f32 %v1260_v17, %v534_v34  ;;  %v536_v43 = vadd.f32 %v1572_v1, %v452_v35  ;;  %v1268_v44 = vunpack.c.h.bf16 %v1361_v23  ;;  %v1111_v45 = vunpack.c.l.bf16 %v1323_v32  ;;  %s884_s8 = sshll.u32 %s881_s6, 4  ;;  %s885_s8 = int_to_ptr.hbm [resolvable:$true] %s884_s8 }
  0x6d   : > { %853 = vst [vmem:[%s1603_s20 + $0x200] sm:$0xff] %v773_v38  ;;  %v775_v48 = vadd.f32 %v1263_v22, %v535_v39  ;;  %v537_v49 = vadd.f32 %v1572_v1, %v453_v40  ;;  %v454_v50 = vmul.f32 %v1567_v0, %v1108_v41  ;;  %v1271_v51 = vunpack.c.l.bf16 %v1362_v37  ;;  %s1427_s10 = sshra.s32 %s885_s8, 4  ;;  %s1428_s10 = int_to_ptr.hbm [resolvable:$true] %s1427_s10 }
  0x6e   : > { %854 = vst [vmem:[%s1603_s20 + $0x208] sm:$0xff] %v774_v42  ;;  %v776_v52 = vadd.f32 %v1264_v30, %v536_v43  ;;  %v455_v53 = vmul.f32 %v1567_v0, %v1111_v45  ;;  %v1112_v54 = vunpack.c.h.bf16 %v1323_v32  ;;  %v1272_v55 = vunpack.c.h.bf16 %v1362_v37  ;;  %s1429_s11 = scalar_lea.hbm %s1428_s10, 640  ;;  %p1434_p0 = scmp.lt.s32.totalorder %s1428_s10, %s1929_s4 }
  0x6f   : > { %855 = vst [vmem:[%s1603_s20 + $0x210] sm:$0xff] %v775_v48  ;;  %v777_v58 = vadd.f32 %v1267_v36, %v537_v49  ;;  %v538_v59 = vadd.f32 %v1572_v1, %v454_v50  ;;  %v1115_v60 = vunpack.c.l.bf16 %v1324_v46  ;;  %v1275_v61 = vunpack.c.l.bf16 %v1363_v47  ;;  %p1430_p11 = scmp.ne.s32.totalorder %s1428_s10, %s1429_s11  ;;  %p1435_p1 = scmp.lt.s32.totalorder %s1433_s14, %s1429_s11 }
  0x70   : > { %856 = vst [vmem:[%s1603_s20 + $0x218] sm:$0xff] %v776_v52  ;;  %v539_v62 = vadd.f32 %v1572_v1, %v455_v53  ;;  %v456_v63 = vmul.f32 %v1567_v0, %v1112_v54  ;;  %v1116_v2 = vunpack.c.h.bf16 %v1324_v46  ;;  %v1276_v3 = vunpack.c.h.bf16 %v1363_v47  ;;  %v1411_v1 = vld [vmem:[%s1927_s2] ss:$0 sm:$0xff] }
  0x71   : > { %857 = vst [vmem:[%s1603_s20 + $0x220] sm:$0xff] %v777_v58  ;;  %v778_v5 = vadd.f32 %v1268_v44, %v538_v59  ;;  %v457_v6 = vmul.f32 %v1567_v0, %v1115_v60  ;;  %v1119_v7 = vunpack.c.l.bf16 %v1325_v56  ;;  %v1279_v8 = vunpack.c.l.bf16 %v1364_v57  ;;  %p1431_p12 = pnand %p1430_p11, %p1542_p5  ;;  %p1436_p2 = por %p1435_p1, %p1434_p0 }
  0x72   : > { %v779_v10 = vadd.f32 %v1271_v51, %v539_v62  ;;  %v540_v11 = vadd.f32 %v1411_v1, %v456_v63  ;;  %v458_v13 = vmul.f32 %v1412_v12, %v1116_v2  ;;  %v1120_v14 = vunpack.c.h.bf16 %v1325_v56 }
  0x73   : > { %858 = vst [vmem:[%s1603_s20 + $0x228] sm:$0xff] %v778_v5  ;;  %v541_v0 = vadd.f32 %v1411_v1, %v457_v6  ;;  %v459_v15 = vmul.f32 %v1412_v12, %v1119_v7  ;;  %v1280_v16 = vunpack.c.h.bf16 %v1364_v57  ;;  %v1123_v17 = vunpack.c.l.bf16 %v1326_v4  ;;  %p1432_p13 = pneg %p1431_p12 }
  0x74   : > { %859 = vst [vmem:[%s1603_s20 + $0x230] sm:$0xff] %v779_v10  ;;  %v780_v19 = vadd.f32 %v1272_v55, %v540_v11  ;;  %v542_v20 = vadd.f32 %v1411_v1, %v458_v13  ;;  %v460_v21 = vmul.f32 %v1412_v12, %v1120_v14  ;;  %v1283_v22 = vunpack.c.l.bf16 %v1365_v9 }
  0x75   : > { %v781_v23 = vadd.f32 %v1275_v61, %v541_v0  ;;  %v543_v24 = vadd.f32 %v1411_v1, %v459_v15  ;;  %v461_v25 = vmul.f32 %v1412_v12, %v1123_v17  ;;  %v1124_v26 = vunpack.c.h.bf16 %v1326_v4  ;;  %p1437_p3 = pnand %p1436_p2, %p1432_p13 }
  0x76   : > { %860 = vst [vmem:[%s1603_s20 + $0x238] sm:$0xff] %v780_v19  ;;  %v782_v28 = vadd.f32 %v1276_v3, %v542_v20  ;;  %v544_v29 = vadd.f32 %v1411_v1, %v460_v21  ;;  %v1127_v30 = vunpack.c.l.bf16 %v1327_v18  ;;  %v1284_v34 = vunpack.c.h.bf16 %v1365_v9 }
  0x77   : > { %861 = vst [vmem:[%s1603_s20 + $0x240] sm:$0xff] %v781_v23  ;;  %v783_v31 = vadd.f32 %v1279_v8, %v543_v24  ;;  %v545_v32 = vadd.f32 %v1411_v1, %v461_v25  ;;  %v462_v33 = vmul.f32 %v1412_v12, %v1124_v26  ;;  %v1287_v37 = vunpack.c.l.bf16 %v1366_v27 }
  0x78   : > { %862 = vst [vmem:[%s1603_s20 + $0x248] sm:$0xff] %v782_v28  ;;  %v784_v35 = vadd.f32 %v1280_v16, %v544_v29  ;;  %v463_v36 = vmul.f32 %v1412_v12, %v1127_v30  ;;  %v1128_v38 = vunpack.c.h.bf16 %v1327_v18  ;;  %v1288_v43 = vunpack.c.h.bf16 %v1366_v27 }
  0x79   : > { %863 = vst [vmem:[%s1603_s20 + $0x250] sm:$0xff] %v783_v31  ;;  %v785_v39 = vadd.f32 %v1283_v22, %v545_v32  ;;  %v546_v40 = vadd.f32 %v1411_v1, %v462_v33 }
  0x7a   : > { %864 = vst [vmem:[%s1603_s20 + $0x258] sm:$0xff] %v784_v35  ;;  %v547_v41 = vadd.f32 %v1411_v1, %v463_v36  ;;  %v464_v42 = vmul.f32 %v1412_v12, %v1128_v38 }
  0x7b   : > { %865 = vst [vmem:[%s1603_s20 + $0x260] sm:$0xff] %v785_v39  ;;  %v786_v44 = vadd.f32 %v1284_v34, %v546_v40 }
  0x7c   : > { %v787_v45 = vadd.f32 %v1287_v37, %v547_v41  ;;  %v548_v46 = vadd.f32 %v1411_v1, %v464_v42 }
  0x7d   : > { %866 = vst [vmem:[%s1603_s20 + $0x268] sm:$0xff] %v786_v44 }
  0x7e   : > { %867 = vst [vmem:[%s1603_s20 + $0x270] sm:$0xff] %v787_v45  ;;  %v788_v47 = vadd.f32 %v1288_v43, %v548_v46 }
  0x80   : > { %868 = vst [vmem:[%s1603_s20 + $0x278] sm:$0xff] %v788_v47 }
  0x81   : > { %1440 = shalt.err (!%p1437_p3)
}
  0x82   : > { %s1477_s28 = smov 128   ;;  %s1478_s20 = smov 8  }
  0x83   : > { %1368 = dma.vmem_to_hbm [thread:$0]  (%p1542_p5), %s883_s7, 10240, %s885_s8, %s870_s9, %s1477_s28, %s1477_s28, %s1478_s20  }
  0x84 PF: > { %p1374_p4 = scmp.ge.s32.totalorder %s1475_s18, 2  ;;  %s899_s27 = sand.u32 1, %s1463_s15  }
  0x85   : > { %s900_s29 = scalar_lea.sflag [#allocation3], %s899_s27 }
  0x86   : > { %p1371_p7 = pnand %p1374_p4, %p1546_p6 }
  0x88   : > { %p1372_p8 = pneg %p1371_p7 }
  0x8a   : > { %1458 = dma.done.wait (%p1372_p8), %s900_s29, 10240  }
  0x8b   : > { %1460 = vsyncadd (%p1372_p8), %s900_s29, 4294957056  ;;  %p14_p9 = scmp.ge.s32.totalorder %s1529_s21, 6   ;;  %s1932_s15 = smov %s1467_s16 }
  0x8c   : > { %s1933_s16 = smov %s1471_s17  ;;  %s1934_s17 = smov %s1540_s24 }
  0x8d   : > { %s1935_s18 = smov %s1529_s21  ;;  %16 = sbr.rel (!%p14_p9) target bundleno = 3 (0x3), region = 74 }
  0x92   :  { %906 = vsyncpa [#allocation3], 1 }
  0x93   :  { %908 = vsyncpa [#allocation3 + $0x1], 1 }

// kernel: residual_conv_block_forward.3
= control target key start
LH: loop header
LB: loop body
LE: loop exit
PB: predicated region body
PF: predicated region fallthrough
CT: control target
= control target key end

     0   :  { %s5222_s21 = smov 0   ;;  %s5224_s22 = smov 0   ;;  %s6223_s0 = inlined_call_operand.vmem [shape: bf16[2,5,16,16,128], index: 0, kind: input, shape index: {}]   ;;  %s6224_s1 = inlined_call_operand.vmem [shape: bf16[5,3,3,128,128], index: 1, kind: input, shape index: {}]   ;;  %s6225_s2 = inlined_call_operand.vmem [shape: f32[1,128], index: 2, kind: input, shape index: {}]   ;;  %s6226_s3 = inlined_call_operand.vmem [shape: f32[1,128], index: 3, kind: input, shape index: {}]   ;;  %s6227_s4 = inlined_call_operand.<no memory space> [shape: f32[1], index: 4, kind: input, shape index: {}]   ;;  %s6228_s5 = inlined_call_operand.vmem [shape: bf16[2,5,16,16,128], index: 5, kind: output, shape index: {0}]   ;;  %s6229_s6 = inlined_call_operand.vmem [shape: f32[2,5,2,128], index: 6, kind: output, shape index: {1}]  }
   0x1   :  { %s5226_s23 = smov 0   ;;  %s5228_s24 = smov 0  }
   0x2   :  { %s5230_s2 = smov 0  }
   0x3 LB: > { %s30_s3 = sadd.s32 1, %s5176_s23  ;;  %s37_s4 = sadd.s32 1, %s5180_s24  ;;  %s5184_s2 = sphi %s5230_s2, %s18_s2   ;;  %s5180_s24 = sphi %s5228_s24, %s6321_s24   ;;  %s5176_s23 = sphi %s5226_s23, %s6320_s23   ;;  %s5172_s22 = sphi %s5224_s22, %s6319_s22   ;;  %s5168_s21 = sphi %s5222_s21, %s6318_s21  }
   0x4   : > { %p31_p0 = scmp.ge.s32.totalorder %s30_s3, 2  ;;  %p3812_p1 = scmp.ge.s32.totalorder %s5184_s2, 1 }
   0x5   : > { %p264_p2 = scmp.lt.s32.totalorder %s5184_s2, 11 }
   0x6   : > { %s6323_s3 = smov (%p31_p0, %s30_s3), 0  ;;  %s6325_s4 = smov (!%p31_p0, %s37_s4), %s5180_s24 }
   0x7   : > { %p265_p3 = pnand %p3812_p1, %p264_p2  ;;  %p39_p4 = scmp.ge.s32.totalorder %s6325_s4, 5 }
   0x9   : > { %s6327_s4 = smov (%p39_p4, %s6325_s4), 0  ;;  %268 = sbr.rel (%p265_p3) target bundleno = 785 (0x311), region = 40 }
   0xe   : > { %p326_p5 = scmp.lt.s32.totalorder %s5172_s22, 4  ;;  %p324_p6 = scmp.lt.s32.totalorder %s5168_s21, 1  ;;  %v5186_v0 = vmov 0  }
   0xf   : > { %397 = vst [vmem:[#allocation2] sm:$0xf] %v5186_v0 }
  0x10   : > { %s6329_s22 = smov (!%p326_p5, %s5172_s22), 4  ;;  %398 = vst [vmem:[#allocation2 + $0x4] sm:$0xf] %v5186_v0  ;;  %s6331_s21 = smov (!%p324_p6, %s5168_s21), 1 }
  0x11   : > { %399 = vst [vmem:[#allocation2 + $0x88] sm:$0xf] %v5186_v0  ;;  %s5095_s25 = smul.u32 576, %s6329_s22  ;;  %s3813_s26 = sshll.u32 %s6329_s22, 5 }
  0x12   : > { %400 = vst [vmem:[#allocation2 + $0x8c] sm:$0xf] %v5186_v0  ;;  %s5094_s27 = smul.u32 160, %s6331_s21 }
  0x13   : > { %s5262_s30 = scalar_lea.vmem %s6224_s1, %s5095_s25  ;;  %s5096_s15 = smul.u32 5, %s6331_s21 }
  0x14   : > { %v4829_v1 = vld [vmem:[%s5262_s30 + $0xf8] sm:$0xff]  ;;  %s5266_s7 = sadd.s32 %s5094_s27, %s3813_s26  ;;  %v4828_v3 = vld [vmem:[%s5262_s30 + $0xf0] sm:$0xff]  ;;  %v4827_v7 = vld [vmem:[%s5262_s30 + $0xe8] sm:$0xff] }
  0x15   : > { %v4820_v2 = vld [vmem:[%s5262_s30 + $0x38] sm:$0xff]  ;;  %s3814_s8 = sshll.u32 %s5266_s7, 2  ;;  %789 = vmatpush.bf16.msra.mxu0 %v4829_v1  ;;  %5078 = vmatpush.bf16.msra.mxu2 %v4829_v1  ;;  %v4819_v4 = vld [vmem:[%s5262_s30 + $0x30] sm:$0xff]  ;;  %v4818_v9 = vld [vmem:[%s5262_s30 + $0x28] sm:$0xff]  ;;  %s361_s16 = sadd.s32 %s5096_s15, %s6329_s22 }
  0x16   : > { %s5275_s11 = scalar_lea.vmem %s6223_s0, %s3814_s8  ;;  %892 = vmatpush.bf16.msra.mxu1 %v4820_v2  ;;  %5086 = vmatpush.bf16.msra.mxu3 %v4820_v2  ;;  %v4826_v12 = vld [vmem:[%s5262_s30 + $0xe0] sm:$0xff]  ;;  %v4825_v14 = vld [vmem:[%s5262_s30 + $0xd8] sm:$0xff]  ;;  %v4824_v16 = vld [vmem:[%s5262_s30 + $0xd0] sm:$0xff]  ;;  %s5773_s14 = scalar_lea.vmem %s6228_s5, %s3814_s8 }
  0x17   : > { %v365_v5 = vld [vmem:[%s5275_s11] sm:$0xff]   ;;  %v371_v8 = vld [vmem:[%s5275_s11 + $0x18] sm:$0xff]   ;;  %v367_v10 = vld [vmem:[%s5275_s11 + $0x8] sm:$0xff]   ;;  %s3818_s17 = sshll.u32 %s361_s16, 1 }
  0x18   : > { %v373_v6 = vld [vmem:[%s5275_s11 + $0x20] sm:$0xff]   ;;  %401 = vst [vmem:[#allocation2 + $0x8] sm:$0xff] %v365_v5   ;;  %v375_v11 = vld [vmem:[%s5275_s11 + $0x28] sm:$0xff]   ;;  %v4816_v15 = vld [vmem:[%s5262_s30 + $0x18] sm:$0xff]  ;;  %s363_s20 = scalar_lea.vmem %s6229_s6, %s3818_s17 }
  0x19   : > { %790 = vmatpush.bf16.msra.mxu0 %v4828_v3  ;;  %5079 = vmatpush.bf16.msra.mxu2 %v4828_v3  ;;  %409 = vst [vmem:[#allocation2 + $0x28] sm:$0xff] %v373_v6   ;;  %v4817_v13 = vld [vmem:[%s5262_s30 + $0x20] sm:$0xff]  ;;  %v4815_v17 = vld [vmem:[%s5262_s30 + $0x10] sm:$0xff]  ;;  %v4823_v19 = vld [vmem:[%s5262_s30 + $0xc8] sm:$0xff] }
  0x1a   : > { %893 = vmatpush.bf16.msra.mxu1 %v4819_v4  ;;  %5087 = vmatpush.bf16.msra.mxu3 %v4819_v4  ;;  %407 = vst [vmem:[#allocation2 + $0x20] sm:$0xff] %v371_v8   ;;  %v369_v18 = vld [vmem:[%s5275_s11 + $0x10] sm:$0xff]   ;;  %v4814_v20 = vld [vmem:[%s5262_s30 + $0x8] sm:$0xff]  ;;  %v4822_v22 = vld [vmem:[%s5262_s30 + $0xc0] sm:$0xff] }
  0x1b   : > { %403 = vst [vmem:[#allocation2 + $0x10] sm:$0xff] %v367_v10   ;;  %v377_v21 = vld [vmem:[%s5275_s11 + $0x30] sm:$0xff]   ;;  %v4813_v23 = vld [vmem:[%s5262_s30] sm:$0xff]  ;;  %v4861_v24 = vld [vmem:[%s5262_s30 + $0x138] sm:$0xff] }
  0x1c   : > { %411 = vst [vmem:[#allocation2 + $0x30] sm:$0xff] %v375_v11   ;;  %v4845_v25 = vld [vmem:[%s5262_s30 + $0x1b8] sm:$0xff]  ;;  %v5303_v28 = vld [vmem:[#allocation2] sm:$0xff]  ;;  %v4860_v32 = vld [vmem:[%s5262_s30 + $0x130] sm:$0xff] }
  0x1d   : > { %791 = vmatpush.bf16.msra.mxu0 %v4827_v7  ;;  %5080 = vmatpush.bf16.msra.mxu2 %v4827_v7  ;;  %405 = vst [vmem:[#allocation2 + $0x18] sm:$0xff] %v369_v18   ;;  %v4853_v30 = vld [vmem:[%s5262_s30 + $0x78] sm:$0xff]  ;;  %v4844_v33 = vld [vmem:[%s5262_s30 + $0x1b0] sm:$0xff]  ;;  %v4859_v36 = vld [vmem:[%s5262_s30 + $0x128] sm:$0xff] }
  0x1e   : > { %894 = vmatpush.bf16.msra.mxu1 %v4818_v9  ;;  %5088 = vmatpush.bf16.msra.mxu3 %v4818_v9  ;;  %413 = vst [vmem:[#allocation2 + $0x38] sm:$0xff] %v377_v21   ;;  %v4869_v31 = vld [vmem:[%s5262_s30 + $0x1f8] sm:$0xff]  ;;  %v4852_v34 = vld [vmem:[%s5262_s30 + $0x70] sm:$0xff]  ;;  %v4843_v37 = vld [vmem:[%s5262_s30 + $0x1a8] sm:$0xff] }
  0x1f   : > { %v5299_v26 = vld [vmem:[#allocation2 + $0x8] sm:$0xff]  ;;  %v4868_v35 = vld [vmem:[%s5262_s30 + $0x1f0] sm:$0xff]  ;;  %v4858_v40 = vld [vmem:[%s5262_s30 + $0x120] sm:$0xff] }
  0x20   : > { %v5301_v27 = vld [vmem:[#allocation2 + $0x28] sm:$0xff]  ;;  %v4842_v41 = vld [vmem:[%s5262_s30 + $0x1a0] sm:$0xff]  ;;  %v379_v42 = vld [vmem:[%s5275_s11 + $0x38] sm:$0xff]  }
  0x21   : > { %792 = vmatpush.bf16.msra.mxu0 %v4826_v12  ;;  %5081 = vmatpush.bf16.msra.mxu2 %v4826_v12  ;;  %v5305_v29 = vld [vmem:[#allocation2 + $0x20] sm:$0xff]  ;;  %v4851_v38 = vld [vmem:[%s5262_s30 + $0x68] sm:$0xff]  ;;  %415 = vst [vmem:[#allocation2 + $0x40] sm:$0xff] %v379_v42   ;;  %v4857_v45 = vld [vmem:[%s5262_s30 + $0x118] sm:$0xff] }
  0x22   : > { %895 = vmatpush.bf16.msra.mxu1 %v4817_v13  ;;  %5089 = vmatpush.bf16.msra.mxu3 %v4817_v13  ;;  %v4867_v39 = vld [vmem:[%s5262_s30 + $0x1e8] sm:$0xff]  ;;  %v4850_v43 = vld [vmem:[%s5262_s30 + $0x60] sm:$0xff]  ;;  %v4841_v46 = vld [vmem:[%s5262_s30 + $0x198] sm:$0xff] }
  0x23   : > { %v4866_v44 = vld [vmem:[%s5262_s30 + $0x1e0] sm:$0xff]  ;;  %v5328_v47 = vld [vmem:[#allocation2 + $0x10] sm:$0xff]  ;;  %v4849_v49 = vld [vmem:[%s5262_s30 + $0x58] sm:$0xff] }
  0x24   : > { %v5330_v48 = vld [vmem:[#allocation2 + $0x30] sm:$0xff]  ;;  %v4865_v50 = vld [vmem:[%s5262_s30 + $0x1d8] sm:$0xff]  ;;  %v4855_v55 = vld [vmem:[%s5262_s30 + $0x108] sm:$0xff] }
  0x25   : > { %793 = vmatpush.bf16.msra.mxu0 %v4825_v14  ;;  %5082 = vmatpush.bf16.msra.mxu2 %v4825_v14  ;;  %v4856_v51 = vld [vmem:[%s5262_s30 + $0x110] sm:$0xff]  ;;  %v4839_v56 = vld [vmem:[%s5262_s30 + $0x188] sm:$0xff]  ;;  %v4854_v59 = vld [vmem:[%s5262_s30 + $0x100] sm:$0xff] }
  0x26   : > { %896 = vmatpush.bf16.msra.mxu1 %v4816_v15  ;;  %5090 = vmatpush.bf16.msra.mxu3 %v4816_v15  ;;  %v4840_v52 = vld [vmem:[%s5262_s30 + $0x190] sm:$0xff]  ;;  %v4847_v57 = vld [vmem:[%s5262_s30 + $0x48] sm:$0xff]  ;;  %v4838_v60 = vld [vmem:[%s5262_s30 + $0x180] sm:$0xff] }
  0x27   : > { %v4848_v53 = vld [vmem:[%s5262_s30 + $0x50] sm:$0xff]  ;;  %v4863_v58 = vld [vmem:[%s5262_s30 + $0x1c8] sm:$0xff]  ;;  %v4846_v61 = vld [vmem:[%s5262_s30 + $0x40] sm:$0xff] }
  0x28   : > { %v4864_v54 = vld [vmem:[%s5262_s30 + $0x1d0] sm:$0xff]  ;;  %v4862_v62 = vld [vmem:[%s5262_s30 + $0x1c0] sm:$0xff]  ;;  %v5350_v63 = vld [vmem:[#allocation2 + $0x18] sm:$0xff] }
  0x29   : > { %794 = vmatpush.bf16.msra.mxu0 %v4824_v16  ;;  %5083 = vmatpush.bf16.msra.mxu2 %v4824_v16  ;;  %v5352_v0 = vld [vmem:[#allocation2 + $0x38] sm:$0xff]  ;;  %v5362_v5 = vld [vmem:[#allocation2 + $0x40] sm:$0xff]  ;;  %v4876_v6 = vld [vmem:[%s5262_s30 + $0xb0] sm:$0xff] }
  0x2a   : > { %897 = vmatpush.bf16.msra.mxu1 %v4815_v17  ;;  %5091 = vmatpush.bf16.msra.mxu3 %v4815_v17  ;;  %v4877_v1 = vld [vmem:[%s5262_s30 + $0xb8] sm:$0xff]  ;;  %v4884_v7 = vld [vmem:[%s5262_s30 + $0x170] sm:$0xff]  ;;  %v4875_v11 = vld [vmem:[%s5262_s30 + $0xa8] sm:$0xff] }
  0x2b   : > { %v4885_v2 = vld [vmem:[%s5262_s30 + $0x178] sm:$0xff]  ;;  %v4892_v8 = vld [vmem:[%s5262_s30 + $0x230] sm:$0xff]  ;;  %v4883_v12 = vld [vmem:[%s5262_s30 + $0x168] sm:$0xff] }
  0x2c   : > { %v4893_v3 = vld [vmem:[%s5262_s30 + $0x238] sm:$0xff]  ;;  %v4917_v9 = vld [vmem:[%s5262_s30 + $0xf0] sm:$0xff]  ;;  %v4891_v13 = vld [vmem:[%s5262_s30 + $0x228] sm:$0xff] }
  0x2d   : > { %795 = vmatpush.bf16.msra.mxu0 %v4823_v19  ;;  %5084 = vmatpush.bf16.msra.mxu2 %v4823_v19  ;;  %v4918_v4 = vld [vmem:[%s5262_s30 + $0xf8] sm:$0xff]  ;;  %v5372_v10 = vld [vmem:[#allocation2 + $0x10] sm:$0xff]  ;;  %v4916_v14 = vld [vmem:[%s5262_s30 + $0xe8] sm:$0xff] }
  0x2e   : > { %898 = vmatpush.bf16.msra.mxu1 %v4814_v20  ;;  %5092 = vmatpush.bf16.msra.mxu3 %v4814_v20  ;;  %v5382_v15 = vld [vmem:[#allocation2 + $0x18] sm:$0xff]  ;;  %v4874_v16 = vld [vmem:[%s5262_s30 + $0xa0] sm:$0xff] }
  0x2f   : > { %v4882_v17 = vld [vmem:[%s5262_s30 + $0x160] sm:$0xff]  ;;  %v4873_v21 = vld [vmem:[%s5262_s30 + $0x98] sm:$0xff] }
  0x30   : > { %v4890_v18 = vld [vmem:[%s5262_s30 + $0x220] sm:$0xff] }
  0x31   : > { %796 = vmatpush.bf16.msra.mxu0 %v4822_v22  ;;  %5085 = vmatpush.bf16.msra.mxu2 %v4822_v22  ;;  %v4915_v19 = vld [vmem:[%s5262_s30 + $0xe0] sm:$0xff]  ;;  %v4881_v22 = vld [vmem:[%s5262_s30 + $0x158] sm:$0xff] }
  0x32   : > { %899 = vmatpush.bf16.msra.mxu1 %v4813_v23  ;;  %5093 = vmatpush.bf16.msra.mxu3 %v4813_v23  ;;  %v5392_v20 = vld [vmem:[#allocation2 + $0x20] sm:$0xff]  ;;  %v4889_v23 = vld [vmem:[%s5262_s30 + $0x218] sm:$0xff] }
  0x34   : > { %797 = vmatmul.bf16.vlgmr.msra.gmra.mxu0 %v5299_v26  ;;  %817 = vmatmul.bf16.vlgmr.msra.gmra.mxu2 %v5301_v27 }
  0x35   : > { %1070 = vmatpush.bf16.msrb.mxu2 %v4845_v25  ;;  %900 = vmatmul.bf16.vlgmr.msra.gmra.mxu1 %v5303_v28  ;;  %v5402_v25 = vld [vmem:[#allocation2 + $0x28] sm:$0xff] }
  0x36   : > { %1330 = vmatpush.bf16.msrb.mxu3 %v4861_v24  ;;  %1427 = vmatpush.bf16.msrb.mxu0 %v4853_v30  ;;  %v4914_v24 = vld [vmem:[%s5262_s30 + $0xd8] sm:$0xff]  ;;  %v4872_v30 = vld [vmem:[%s5262_s30 + $0x90] sm:$0xff] }
  0x37   : > { %920 = vmatmul.bf16.vlgmr.msra.gmra.mxu3 %v5305_v29  ;;  %1541 = vmatpush.bf16.msrb.mxu1 %v4869_v31  ;;  %v4880_v31 = vld [vmem:[%s5262_s30 + $0x150] sm:$0xff] }
  0x39   : > { %1071 = vmatpush.bf16.msrb.mxu2 %v4844_v33  ;;  %v4913_v33 = vld [vmem:[%s5262_s30 + $0xd0] sm:$0xff] }
  0x3a   : > { %1331 = vmatpush.bf16.msrb.mxu3 %v4860_v32  ;;  %1428 = vmatpush.bf16.msrb.mxu0 %v4852_v34  ;;  %v4888_v32 = vld [vmem:[%s5262_s30 + $0x210] sm:$0xff] }
  0x3b   : > { %1542 = vmatpush.bf16.msrb.mxu1 %v4868_v35  ;;  %v5412_v34 = vld [vmem:[#allocation2 + $0x30] sm:$0xff] }
  0x3d   : > { %1072 = vmatpush.bf16.msrb.mxu2 %v4843_v37 }
  0x3e   : > { %1332 = vmatpush.bf16.msrb.mxu3 %v4859_v36  ;;  %1429 = vmatpush.bf16.msrb.mxu0 %v4851_v38  ;;  %v4871_v38 = vld [vmem:[%s5262_s30 + $0x88] sm:$0xff] }
  0x3f   : > { %1543 = vmatpush.bf16.msrb.mxu1 %v4867_v39 }
  0x41   : > { %1073 = vmatpush.bf16.msrb.mxu2 %v4842_v41 }
  0x42   : > { %1333 = vmatpush.bf16.msrb.mxu3 %v4858_v40  ;;  %1430 = vmatpush.bf16.msrb.mxu0 %v4850_v43 }
  0x43   : > { %1544 = vmatpush.bf16.msrb.mxu1 %v4866_v44 }
  0x44   : > { %802 = vmatmul.bf16.gmra.mxu0 %v5328_v47  ;;  %822 = vmatmul.bf16.gmra.mxu2 %v5330_v48 }
  0x45   : > { %1074 = vmatpush.bf16.msrb.mxu2 %v4841_v46  ;;  %905 = vmatmul.bf16.gmra.mxu1 %v5299_v26  ;;  %v4887_v46 = vld [vmem:[%s5262_s30 + $0x208] sm:$0xff] }
  0x46   : > { %1334 = vmatpush.bf16.msrb.mxu3 %v4857_v45  ;;  %1431 = vmatpush.bf16.msrb.mxu0 %v4849_v49  ;;  %v4879_v45 = vld [vmem:[%s5262_s30 + $0x148] sm:$0xff] }
  0x47   : > { %925 = vmatmul.bf16.gmra.mxu3 %v5301_v27  ;;  %1545 = vmatpush.bf16.msrb.mxu1 %v4865_v50  ;;  %v4912_v49 = vld [vmem:[%s5262_s30 + $0xc8] sm:$0xff]  ;;  %v381_v50 = vld [vmem:[%s5275_s11 + $0x40] sm:$0xff]  }
  0x48   : > { %417 = vst [vmem:[#allocation2 + $0x48] sm:$0xff] %v381_v50  }
  0x49   : > { %1075 = vmatpush.bf16.msrb.mxu2 %v4840_v52 }
  0x4a   : > { %1335 = vmatpush.bf16.msrb.mxu3 %v4856_v51  ;;  %1432 = vmatpush.bf16.msrb.mxu0 %v4848_v53  ;;  %v5429_v53 = vld [vmem:[#allocation2 + $0x38] sm:$0xff] }
  0x4b   : > { %1546 = vmatpush.bf16.msrb.mxu1 %v4864_v54 }
  0x4d   : > { %1076 = vmatpush.bf16.msrb.mxu2 %v4839_v56 }
  0x4e   : > { %1336 = vmatpush.bf16.msrb.mxu3 %v4855_v55  ;;  %1433 = vmatpush.bf16.msrb.mxu0 %v4847_v57 }
  0x4f   : > { %1547 = vmatpush.bf16.msrb.mxu1 %v4863_v58  ;;  %v4870_v58 = vld [vmem:[%s5262_s30 + $0x80] sm:$0xff] }
  0x51   : > { %1077 = vmatpush.bf16.msrb.mxu2 %v4838_v60 }
  0x52   : > { %1337 = vmatpush.bf16.msrb.mxu3 %v4854_v59  ;;  %1434 = vmatpush.bf16.msrb.mxu0 %v4846_v61 }
  0x53   : > { %1548 = vmatpush.bf16.msrb.mxu1 %v4862_v62 }
  0x54   : > { %807 = vmatmul.bf16.gmra.mxu0 %v5350_v63  ;;  %827 = vmatmul.bf16.gmra.mxu2 %v5352_v0 }
  0x55   : > { %910 = vmatmul.bf16.gmra.mxu1 %v5328_v47  ;;  %1704 = vmatpush.bf16.msra.mxu2 %v4885_v2 }
  0x56   : > { %1801 = vmatpush.bf16.msra.mxu3 %v4877_v1  ;;  %1915 = vmatpush.bf16.msra.mxu0 %v4893_v3  ;;  %v4878_v3 = vld [vmem:[%s5262_s30 + $0x140] sm:$0xff] }
  0x57   : > { %930 = vmatmul.bf16.gmra.mxu3 %v5330_v48  ;;  %2331 = vmatpush.bf16.msra.mxu1 %v4918_v4  ;;  %v4886_v4 = vld [vmem:[%s5262_s30 + $0x200] sm:$0xff] }
  0x59   : > { %1705 = vmatpush.bf16.msra.mxu2 %v4884_v7 }
  0x5a   : > { %1802 = vmatpush.bf16.msra.mxu3 %v4876_v6  ;;  %1916 = vmatpush.bf16.msra.mxu0 %v4892_v8  ;;  %v4911_v6 = vld [vmem:[%s5262_s30 + $0xc0] sm:$0xff] }
  0x5b   : > { %2332 = vmatpush.bf16.msra.mxu1 %v4917_v9  ;;  %v5447_v9 = vld [vmem:[#allocation2 + $0x40] sm:$0xff] }
  0x5d   : > { %1706 = vmatpush.bf16.msra.mxu2 %v4883_v12 }
  0x5e   : > { %1803 = vmatpush.bf16.msra.mxu3 %v4875_v11  ;;  %1917 = vmatpush.bf16.msra.mxu0 %v4891_v13 }
  0x5f   : > { %2333 = vmatpush.bf16.msra.mxu1 %v4916_v14 }
  0x61   : > { %1707 = vmatpush.bf16.msra.mxu2 %v4882_v17 }
  0x62   : > { %1804 = vmatpush.bf16.msra.mxu3 %v4874_v16  ;;  %1918 = vmatpush.bf16.msra.mxu0 %v4890_v18  ;;  %v4934_v16 = vld [vmem:[%s5262_s30 + $0x1b8] sm:$0xff] }
  0x63   : > { %2334 = vmatpush.bf16.msra.mxu1 %v4915_v19 }
  0x64   : > { %812 = vmatmul.bf16.gmra.mxu0 %v5305_v29  ;;  %832 = vmatmul.bf16.gmra.mxu2 %v5362_v5 }
  0x65   : > { %915 = vmatmul.bf16.gmra.mxu1 %v5350_v63  ;;  %1708 = vmatpush.bf16.msra.mxu2 %v4881_v22 }
  0x66   : > { %1805 = vmatpush.bf16.msra.mxu3 %v4873_v21  ;;  %1919 = vmatpush.bf16.msra.mxu0 %v4889_v23 }
  0x67   : > { %935 = vmatmul.bf16.gmra.mxu3 %v5352_v0  ;;  %2335 = vmatpush.bf16.msra.mxu1 %v4914_v24  ;;  %v4909_v24 = vld [vmem:[%s5262_s30 + $0x38] sm:$0xff] }
  0x69   : > { %1709 = vmatpush.bf16.msra.mxu2 %v4880_v31  ;;  %v4942_v31 = vld [vmem:[%s5262_s30 + $0x78] sm:$0xff] }
  0x6a   : > { %1806 = vmatpush.bf16.msra.mxu3 %v4872_v30  ;;  %1920 = vmatpush.bf16.msra.mxu0 %v4888_v32  ;;  %v4950_v30 = vld [vmem:[%s5262_s30 + $0x138] sm:$0xff]  ;;  %v383_v32 = vld [vmem:[%s5275_s11 + $0x48] sm:$0xff]  }
  0x6b   : > { %2336 = vmatpush.bf16.msra.mxu1 %v4913_v33  ;;  %419 = vst [vmem:[#allocation2 + $0x50] sm:$0xff] %v383_v32  }
  0x6d   : > { %1710 = vmatpush.bf16.msra.mxu2 %v4879_v45 }
  0x6e   : > { %1807 = vmatpush.bf16.msra.mxu3 %v4871_v38  ;;  %1921 = vmatpush.bf16.msra.mxu0 %v4887_v46 }
  0x6f   : > { %2337 = vmatpush.bf16.msra.mxu1 %v4912_v49 }
  0x71   : > { %1711 = vmatpush.bf16.msra.mxu2 %v4878_v3 }
  0x72   : > { %1808 = vmatpush.bf16.msra.mxu3 %v4870_v58  ;;  %1922 = vmatpush.bf16.msra.mxu0 %v4886_v4  ;;  %v4949_v58 = vld [vmem:[%s5262_s30 + $0x130] sm:$0xff]  ;;  %v5487_v4 = vld [vmem:[#allocation2 + $0x48] sm:$0xff] }
  0x73   : > { %2338 = vmatpush.bf16.msra.mxu1 %v4911_v6 }
  0x74   : > { %1078 = vmatmul.bf16.vlgmr.msrb.gmra.mxu2 %v5372_v10  ;;  %1435 = vmatmul.bf16.vlgmr.msrb.gmra.mxu0 %v5303_v28 }
  0x75   : > { %1549 = vmatmul.bf16.vlgmr.msrb.gmra.mxu1 %v5372_v10  ;;  %2434 = vmatpush.bf16.msrb.mxu2 %v4909_v24  ;;  %v4907_v24 = vld [vmem:[%s5262_s30 + $0x28] sm:$0xff] }
  0x76   : > { %2820 = vmatpush.bf16.msrb.mxu0 %v4950_v30  ;;  %v4948_v30 = vld [vmem:[%s5262_s30 + $0x128] sm:$0xff] }
  0x77   : > { %1338 = vmatmul.bf16.vlgmr.msrb.gmra.mxu3 %v5299_v26  ;;  %2917 = vmatpush.bf16.msrb.mxu1 %v4942_v31  ;;  %v4940_v31 = vld [vmem:[%s5262_s30 + $0x68] sm:$0xff] }
  0x78   : > { %2611 = vmatpush.bf16.msrb.mxu3 %v4934_v16 }
  0x7a   : > { %2821 = vmatpush.bf16.msrb.mxu0 %v4949_v58 }
  0x7e   : > { %2822 = vmatpush.bf16.msrb.mxu0 %v4948_v30 }
  0x84   : > { %1083 = vmatmul.bf16.gmra.mxu2 %v5382_v15  ;;  %1440 = vmatmul.bf16.gmra.mxu0 %v5299_v26 }
  0x85   : > { %1554 = vmatmul.bf16.gmra.mxu1 %v5382_v15 }
  0x87   : > { %1343 = vmatmul.bf16.gmra.mxu3 %v5328_v47 }
  0x94   : > { %1088 = vmatmul.bf16.gmra.mxu2 %v5392_v20  ;;  %1445 = vmatmul.bf16.gmra.mxu0 %v5328_v47 }
  0x95   : > { %1559 = vmatmul.bf16.gmra.mxu1 %v5392_v20 }
  0x97   : > { %1348 = vmatmul.bf16.gmra.mxu3 %v5350_v63 }
  0xa4   : > { %1093 = vmatmul.bf16.gmra.mxu2 %v5402_v25  ;;  %1450 = vmatmul.bf16.gmra.mxu0 %v5350_v63 }
  0xa5   : > { %1564 = vmatmul.bf16.gmra.mxu1 %v5402_v25 }
  0xa7   : > { %1353 = vmatmul.bf16.gmra.mxu3 %v5305_v29 }
  0xb1   : > { %v798_v35 = vpop.f32.mrf.mxu0 }
  0xb2   : > { %v901_v36 = vpop.f32.mrf.mxu1 }
  0xb3   : > { %v5414_v37 = vadd.f32 %v901_v36, %v798_v35  ;;  %v5466_v36 = vld [vmem:[#allocation2 + $0x48] sm:$0xff] }
  0xb4   : > { %1098 = vmatmul.bf16.gmra.mxu2 %v5412_v34  ;;  %1455 = vmatmul.bf16.gmra.mxu0 %v5305_v29 }
  0xb5   : > { %1569 = vmatmul.bf16.gmra.mxu1 %v5412_v34 }
  0xb7   : > { %1358 = vmatmul.bf16.gmra.mxu3 %v5301_v27  ;;  %v818_v39 = vpop.f32.mrf.mxu2 }
  0xb9   : > { %v800_v42 = vpop.f32.mrf.mxu0 }
  0xba   : > { %v921_v40 = vpop.f32.mrf.mxu3  ;;  %v903_v43 = vpop.f32.mrf.mxu1 }
  0xbb   : > { %v5421_v41 = vadd.f32 %v921_v40, %v818_v39  ;;  %v5423_v44 = vadd.f32 %v903_v43, %v800_v42  ;;  %v4933_v43 = vld [vmem:[%s5262_s30 + $0x1b0] sm:$0xff] }
  0xbc   : > { %2612 = vmatpush.bf16.msrb.mxu3 %v4933_v43 }
  0xbf   : > { %v820_v51 = vpop.f32.mrf.mxu2 }
  0xc1   : > { %v803_v55 = vpop.f32.mrf.mxu0 }
  0xc2   : > { %v923_v52 = vpop.f32.mrf.mxu3  ;;  %v906_v56 = vpop.f32.mrf.mxu1 }
  0xc3   : > { %v5431_v54 = vadd.f32 %v923_v52, %v820_v51  ;;  %v5433_v57 = vadd.f32 %v906_v56, %v803_v55  ;;  %v385_v55 = vld [vmem:[%s5275_s11 + $0x50] sm:$0xff]  }
  0xc4   : > { %1103 = vmatmul.bf16.gmra.mxu2 %v5429_v53  ;;  %1460 = vmatmul.bf16.gmra.mxu0 %v5301_v27  ;;  %421 = vst [vmem:[#allocation2 + $0x58] sm:$0xff] %v385_v55   ;;  %v4908_v56 = vld [vmem:[%s5262_s30 + $0x30] sm:$0xff] }
  0xc5   : > { %1574 = vmatmul.bf16.gmra.mxu1 %v5429_v53  ;;  %2435 = vmatpush.bf16.msrb.mxu2 %v4908_v56  ;;  %v4931_v56 = vld [vmem:[%s5262_s30 + $0x1a0] sm:$0xff] }
  0xc7   : > { %1363 = vmatmul.bf16.gmra.mxu3 %v5330_v48  ;;  %v823_v59 = vpop.f32.mrf.mxu2 }
  0xc9   : > { %v805_v62 = vpop.f32.mrf.mxu0  ;;  %2436 = vmatpush.bf16.msrb.mxu2 %v4907_v24 }
  0xca   : > { %v926_v60 = vpop.f32.mrf.mxu3  ;;  %v908_v1 = vpop.f32.mrf.mxu1 }
  0xcb   : > { %v5440_v61 = vadd.f32 %v926_v60, %v823_v59  ;;  %v5442_v2 = vadd.f32 %v908_v1, %v805_v62  ;;  %v4941_v59 = vld [vmem:[%s5262_s30 + $0x70] sm:$0xff] }
  0xcc   : > { %2918 = vmatpush.bf16.msrb.mxu1 %v4941_v59 }
  0xcf   : > { %v825_v7 = vpop.f32.mrf.mxu2 }
  0xd0   : > { %2919 = vmatpush.bf16.msrb.mxu1 %v4940_v31 }
  0xd1   : > { %v808_v12 = vpop.f32.mrf.mxu0 }
  0xd2   : > { %v928_v8 = vpop.f32.mrf.mxu3  ;;  %v911_v13 = vpop.f32.mrf.mxu1 }
  0xd3   : > { %v5449_v11 = vadd.f32 %v928_v8, %v825_v7  ;;  %v5451_v14 = vadd.f32 %v911_v13, %v808_v12  ;;  %v4932_v7 = vld [vmem:[%s5262_s30 + $0x1a8] sm:$0xff] }
  0xd4   : > { %1108 = vmatmul.bf16.gmra.mxu2 %v5447_v9  ;;  %1465 = vmatmul.bf16.gmra.mxu0 %v5330_v48 }
  0xd5   : > { %1579 = vmatmul.bf16.gmra.mxu1 %v5447_v9  ;;  %2613 = vmatpush.bf16.msrb.mxu3 %v4932_v7 }
  0xd7   : > { %1368 = vmatmul.bf16.gmra.mxu3 %v5352_v0  ;;  %v828_v17 = vpop.f32.mrf.mxu2 }
  0xd9   : > { %v810_v21 = vpop.f32.mrf.mxu0  ;;  %2614 = vmatpush.bf16.msrb.mxu3 %v4931_v56 }
  0xda   : > { %v931_v18 = vpop.f32.mrf.mxu3  ;;  %v913_v22 = vpop.f32.mrf.mxu1 }
  0xdb   : > { %v5458_v19 = vadd.f32 %v931_v18, %v828_v17  ;;  %v5460_v23 = vadd.f32 %v913_v22, %v810_v21  ;;  %v433_v18 = vlaneseq }
  0xdf   : > { %v830_v33 = vpop.f32.mrf.mxu2 }
  0xe1   : > { %v813_v39 = vpop.f32.mrf.mxu0 }
  0xe2   : > { %v933_v35 = vpop.f32.mrf.mxu3  ;;  %v916_v40 = vpop.f32.mrf.mxu1 }
  0xe3   : > { %v5468_v38 = vadd.f32 %v933_v35, %v830_v33  ;;  %v5470_v42 = vadd.f32 %v916_v40, %v813_v39  ;;  %v5507_v40 = vld [vmem:[#allocation2 + $0x50] sm:$0xff] }
  0xe4   : > { %1113 = vmatmul.bf16.gmra.mxu2 %v5466_v36  ;;  %1470 = vmatmul.bf16.gmra.mxu0 %v5352_v0 }
  0xe5   : > { %1584 = vmatmul.bf16.gmra.mxu1 %v5466_v36 }
  0xe7   : > { %1373 = vmatmul.bf16.gmra.mxu3 %v5362_v5  ;;  %v833_v45 = vpop.f32.mrf.mxu2 }
  0xe9   : > { %v815_v50 = vpop.f32.mrf.mxu0 }
  0xea   : > { %v936_v46 = vpop.f32.mrf.mxu3  ;;  %v918_v51 = vpop.f32.mrf.mxu1 }
  0xeb   : > { %v5477_v49 = vadd.f32 %v936_v46, %v833_v45  ;;  %v5479_v52 = vadd.f32 %v918_v51, %v815_v50 }
  0xef   : > { %v835_v60 = vpop.f32.mrf.mxu2 }
  0xf1   : > { %v1436_v3 = vpop.f32.mrf.mxu0 }
  0xf2   : > { %v938_v62 = vpop.f32.mrf.mxu3  ;;  %v1550_v6 = vpop.f32.mrf.mxu1 }
  0xf3   : > { %v5485_v1 = vadd.f32 %v938_v62, %v835_v60 }
  0xf4   : > { %1712 = vmatmul.bf16.vlgmr.msra.gmra.mxu2 %v5299_v26  ;;  %1923 = vmatmul.bf16.vlgmr.msra.gmra.mxu0 %v5372_v10  ;;  %v387_v10 = vld [vmem:[%s5275_s11 + $0x58] sm:$0xff]  }
  0xf5   : > { %2339 = vmatmul.bf16.vlgmr.msra.gmra.mxu1 %v5487_v4  ;;  %423 = vst [vmem:[#allocation2 + $0x60] sm:$0xff] %v387_v10   ;;  %v4939_v10 = vld [vmem:[%s5262_s30 + $0x60] sm:$0xff] }
  0xf6   : > { %2920 = vmatpush.bf16.msrb.mxu1 %v4939_v10 }
  0xf7   : > { %1809 = vmatmul.bf16.vlgmr.msra.gmra.mxu3 %v5303_v28  ;;  %v1079_v8 = vpop.f32.mrf.mxu2  ;;  %v5500_v28 = vshrl.u32 %v433_v18, 7 }
  0xf8   : > { %v5495_v12 = vadd.f32 %v1079_v8, %v5414_v37 }
  0xf9   : > { %v1438_v17 = vpop.f32.mrf.mxu0  ;;  %vm6232_vm0 = vcmp.lt.s32.totalorder %v5500_v28, 1  ;;  %v436_v50 = vadd.s32 16, %v5500_v28  ;;  %vm6234_vm9 = vcmp.lt.s32.totalorder %v5500_v28, 7 }
  0xfa   : > { %v1339_v13 = vpop.f32.mrf.mxu3  ;;  %v1552_v21 = vpop.f32.mrf.mxu1  ;;  %v1151_v43 = vrot.slane %v5495_v12, 7 }
  0xfb   : > { %v1437_v16 = vadd.f32 %v1436_v3, %v1339_v13  ;;  %v468_v58 = vand.u32 15, %v436_v50  ;;  %v389_v13 = vld [vmem:[%s5275_s11 + $0x60] sm:$0xff]  }
  0xfc   : > { %425 = vst [vmem:[#allocation2 + $0x68] sm:$0xff] %v389_v13  }
  0xfd   : > { %v5497_v22 = vadd.f32 %v1550_v6, %v1437_v16  ;;  %vm5523_vm1 = vcmp.eq.s32.totalorder %v468_v58, 0 }
  0xff   : > { %v1081_v32 = vpop.f32.mrf.mxu2 }
 0x100   : > { %v1120_v33 = vadd.f32 %v1081_v32, %v5423_v44 }
 0x101   : > { %v1441_v39 = vpop.f32.mrf.mxu0 }
 0x102   : > { %v1341_v35 = vpop.f32.mrf.mxu3  ;;  %v1152_v45 = vrot.slane %v1120_v33, 7  ;;  %v1555_v46 = vpop.f32.mrf.mxu1 }
 0x103   : > { %v1439_v37 = vadd.f32 %v1438_v17, %v1341_v35  ;;  %v5538_v35 = vld [vmem:[#allocation2 + $0x58] sm:$0xff] }
 0x104   : > { %v1182_v44 = vsel %vm6232_vm0, %v1151_v43, %v1152_v45  ;;  %1717 = vmatmul.bf16.gmra.mxu2 %v5328_v47  ;;  %1928 = vmatmul.bf16.gmra.mxu0 %v5382_v15 }
 0x105   : > { %v1591_v51 = vadd.f32 %v1552_v21, %v1439_v37  ;;  %2344 = vmatmul.bf16.gmra.mxu1 %v5507_v40  ;;  %v4947_v21 = vld [vmem:[%s5262_s30 + $0x120] sm:$0xff] }
 0x106   : > { %2823 = vmatpush.bf16.msrb.mxu0 %v4947_v21 }
 0x107   : > { %v5517_v55 = vadd.f32 %v1591_v51, %v1182_v44  ;;  %1814 = vmatmul.bf16.gmra.mxu3 %v5299_v26  ;;  %v1084_v59 = vpop.f32.mrf.mxu2  ;;  %v4930_v51 = vld [vmem:[%s5262_s30 + $0x198] sm:$0xff] }
 0x108   : > { %v1121_v60 = vadd.f32 %v1084_v59, %v5433_v57  ;;  %v4906_v57 = vld [vmem:[%s5262_s30 + $0x20] sm:$0xff]  ;;  %2615 = vmatpush.bf16.msrb.mxu3 %v4930_v51 }
 0x109   : > { %v1443_v6 = vpop.f32.mrf.mxu0  ;;  %2437 = vmatpush.bf16.msrb.mxu2 %v4906_v57 }
 0x10a   : > { %v1344_v62 = vpop.f32.mrf.mxu3  ;;  %v1153_v15 = vrot.slane %v1121_v60, 7  ;;  %v1557_v26 = vpop.f32.mrf.mxu1 }
 0x10b   : > { %v1442_v3 = vadd.f32 %v1441_v39, %v1344_v62 }
 0x10c   : > { %v1181_v16 = vsel %vm6232_vm0, %v1152_v45, %v1153_v15  ;;  %v438_v45 = vadd.s32 32, %v5500_v28 }
 0x10d   : > { %v1592_v8 = vadd.f32 %v1555_v46, %v1442_v3  ;;  %v1218_v17 = vsel %vm5523_vm1, 0.0, %v1181_v16  ;;  %v4946_v16 = vld [vmem:[%s5262_s30 + $0x118] sm:$0xff] }
 0x10e   : > { %v482_v44 = vand.u32 15, %v438_v45  ;;  %2824 = vmatpush.bf16.msrb.mxu0 %v4946_v16 }
 0x10f   : > { %v5532_v18 = vadd.f32 %v1592_v8, %v1218_v17  ;;  %v1086_v24 = vpop.f32.mrf.mxu2  ;;  %v4938_v17 = vld [vmem:[%s5262_s30 + $0x58] sm:$0xff] }
 0x110   : > { %v1122_v30 = vadd.f32 %v1086_v24, %v5442_v2  ;;  %vm5551_vm2 = vcmp.eq.s32.totalorder %v482_v44, 0  ;;  %2921 = vmatpush.bf16.msrb.mxu1 %v4938_v17 }
 0x111   : > { %v1446_v33 = vpop.f32.mrf.mxu0 }
 0x112   : > { %v1346_v31 = vpop.f32.mrf.mxu3  ;;  %v1154_v37 = vrot.slane %v1122_v30, 7  ;;  %v1560_v39 = vpop.f32.mrf.mxu1 }
 0x113   : > { %v1444_v32 = vadd.f32 %v1443_v6, %v1346_v31  ;;  %v5566_v31 = vld [vmem:[#allocation2 + $0x60] sm:$0xff] }
 0x114   : > { %v1180_v50 = vsel %vm6232_vm0, %v1153_v15, %v1154_v37  ;;  %1722 = vmatmul.bf16.gmra.mxu2 %v5350_v63  ;;  %1933 = vmatmul.bf16.gmra.mxu0 %v5392_v20  ;;  %v391_v15 = vld [vmem:[%s5275_s11 + $0x68] sm:$0xff]  }
 0x115   : > { %v1593_v46 = vadd.f32 %v1557_v26, %v1444_v32  ;;  %2349 = vmatmul.bf16.gmra.mxu1 %v5538_v35  ;;  %427 = vst [vmem:[#allocation2 + $0x70] sm:$0xff] %v391_v15  }
 0x117   : > { %v5545_v2 = vadd.f32 %v1593_v46, %v1180_v50  ;;  %1819 = vmatmul.bf16.gmra.mxu3 %v5328_v47  ;;  %v1089_v56 = vpop.f32.mrf.mxu2  ;;  %v4929_v46 = vld [vmem:[%s5262_s30 + $0x190] sm:$0xff] }
 0x118   : > { %v1123_v58 = vadd.f32 %v1089_v56, %v5451_v14  ;;  %v4905_v14 = vld [vmem:[%s5262_s30 + $0x18] sm:$0xff]  ;;  %2616 = vmatpush.bf16.msrb.mxu3 %v4929_v46 }
 0x119   : > { %v1448_v62 = vpop.f32.mrf.mxu0  ;;  %2438 = vmatpush.bf16.msrb.mxu2 %v4905_v14 }
 0x11a   : > { %v1349_v59 = vpop.f32.mrf.mxu3  ;;  %v1155_v20 = vrot.slane %v1123_v58, 7  ;;  %v1562_v47 = vpop.f32.mrf.mxu1 }
 0x11b   : > { %v1447_v60 = vadd.f32 %v1446_v33, %v1349_v59 }
 0x11c   : > { %v1179_v26 = vsel %vm6232_vm0, %v1154_v37, %v1155_v20  ;;  %v440_v37 = vadd.s32 48, %v5500_v28 }
 0x11d   : > { %v1594_v6 = vadd.f32 %v1560_v39, %v1447_v60  ;;  %v1220_v8 = vsel %vm5551_vm2, 0.0, %v1179_v26  ;;  %v4945_v26 = vld [vmem:[%s5262_s30 + $0x110] sm:$0xff] }
 0x11e   : > { %v496_v50 = vand.u32 15, %v440_v37  ;;  %2825 = vmatpush.bf16.msrb.mxu0 %v4945_v26 }
 0x11f   : > { %v5560_v13 = vadd.f32 %v1594_v6, %v1220_v8  ;;  %v1091_v57 = vpop.f32.mrf.mxu2  ;;  %v4937_v8 = vld [vmem:[%s5262_s30 + $0x50] sm:$0xff] }
 0x120   : > { %v1124_v21 = vadd.f32 %v1091_v57, %v5460_v23  ;;  %vm5579_vm3 = vcmp.eq.s32.totalorder %v496_v50, 0  ;;  %2922 = vmatpush.bf16.msrb.mxu1 %v4937_v8 }
 0x121   : > { %v1451_v30 = vpop.f32.mrf.mxu0 }
 0x122   : > { %v1351_v10 = vpop.f32.mrf.mxu3  ;;  %v1156_v32 = vrot.slane %v1124_v21, 7  ;;  %v1565_v33 = vpop.f32.mrf.mxu1 }
 0x123   : > { %v1449_v24 = vadd.f32 %v1448_v62, %v1351_v10  ;;  %v5594_v10 = vld [vmem:[#allocation2 + $0x68] sm:$0xff] }
 0x124   : > { %v1178_v45 = vsel %vm6232_vm0, %v1155_v20, %v1156_v32  ;;  %1727 = vmatmul.bf16.gmra.mxu2 %v5305_v29  ;;  %1938 = vmatmul.bf16.gmra.mxu0 %v5402_v25  ;;  %v393_v20 = vld [vmem:[%s5275_s11 + $0x70] sm:$0xff]  }
 0x125   : > { %v1595_v39 = vadd.f32 %v1562_v47, %v1449_v24  ;;  %2354 = vmatmul.bf16.gmra.mxu1 %v5566_v31  ;;  %429 = vst [vmem:[#allocation2 + $0x78] sm:$0xff] %v393_v20  }
 0x127   : > { %v5573_v23 = vadd.f32 %v1595_v39, %v1178_v45  ;;  %1824 = vmatmul.bf16.gmra.mxu3 %v5350_v63  ;;  %v1094_v51 = vpop.f32.mrf.mxu2  ;;  %v4928_v39 = vld [vmem:[%s5262_s30 + $0x188] sm:$0xff] }
 0x128   : > { %v1125_v44 = vadd.f32 %v1094_v51, %v5470_v42  ;;  %v4904_v42 = vld [vmem:[%s5262_s30 + $0x10] sm:$0xff]  ;;  %2617 = vmatpush.bf16.msrb.mxu3 %v4928_v39 }
 0x129   : > { %v1453_v59 = vpop.f32.mrf.mxu0  ;;  %2439 = vmatpush.bf16.msrb.mxu2 %v4904_v42 }
 0x12a   : > { %v1354_v56 = vpop.f32.mrf.mxu3  ;;  %v1157_v25 = vrot.slane %v1125_v44, 7  ;;  %v1567_v63 = vpop.f32.mrf.mxu1 }
 0x12b   : > { %v1452_v58 = vadd.f32 %v1451_v30, %v1354_v56 }
 0x12c   : > { %v1177_v47 = vsel %vm6232_vm0, %v1156_v32, %v1157_v25  ;;  %v442_v32 = vadd.s32 64, %v5500_v28 }
 0x12d   : > { %v1596_v62 = vadd.f32 %v1565_v33, %v1452_v58  ;;  %v1222_v6 = vsel %vm5579_vm3, 0.0, %v1177_v47  ;;  %v4944_v47 = vld [vmem:[%s5262_s30 + $0x108] sm:$0xff] }
 0x12e   : > { %v510_v45 = vand.u32 15, %v442_v32  ;;  %2826 = vmatpush.bf16.msrb.mxu0 %v4944_v47 }
 0x12f   : > { %v5588_v15 = vadd.f32 %v1596_v62, %v1222_v6  ;;  %v1096_v14 = vpop.f32.mrf.mxu2  ;;  %v4936_v6 = vld [vmem:[%s5262_s30 + $0x48] sm:$0xff] }
 0x130   : > { %v1126_v16 = vadd.f32 %v1096_v14, %v5479_v52  ;;  %vm5607_vm4 = vcmp.eq.s32.totalorder %v510_v45, 0  ;;  %2923 = vmatpush.bf16.msrb.mxu1 %v4936_v6 }
 0x131   : > { %v1456_v21 = vpop.f32.mrf.mxu0 }
 0x132   : > { %v1356_v17 = vpop.f32.mrf.mxu3  ;;  %v1158_v24 = vrot.slane %v1126_v16, 7  ;;  %v1570_v30 = vpop.f32.mrf.mxu1 }
 0x133   : > { %v1454_v57 = vadd.f32 %v1453_v59, %v1356_v17  ;;  %v5622_v17 = vld [vmem:[#allocation2 + $0x70] sm:$0xff] }
 0x134   : > { %v1176_v37 = vsel %vm6232_vm0, %v1157_v25, %v1158_v24  ;;  %1732 = vmatmul.bf16.gmra.mxu2 %v5301_v27  ;;  %1943 = vmatmul.bf16.gmra.mxu0 %v5412_v34  ;;  %v395_v25 = vld [vmem:[%s5275_s11 + $0x78] sm:$0xff]  }
 0x135   : > { %v1597_v33 = vadd.f32 %v1567_v63, %v1454_v57  ;;  %2359 = vmatmul.bf16.gmra.mxu1 %v5594_v10  ;;  %431 = vst [vmem:[#allocation2 + $0x80] sm:$0xff] %v395_v25   ;;  %v4902_v25 = vld [vmem:[%s5262_s30] sm:$0xff] }
 0x137   : > { %v5601_v52 = vadd.f32 %v1597_v33, %v1176_v37  ;;  %1829 = vmatmul.bf16.gmra.mxu3 %v5305_v29  ;;  %v1099_v46 = vpop.f32.mrf.mxu2  ;;  %v4927_v33 = vld [vmem:[%s5262_s30 + $0x180] sm:$0xff] }
 0x138   : > { %v1127_v50 = vadd.f32 %v1099_v46, %v5421_v41  ;;  %v4903_v41 = vld [vmem:[%s5262_s30 + $0x8] sm:$0xff]  ;;  %2618 = vmatpush.bf16.msrb.mxu3 %v4927_v33 }
 0x139   : > { %v1458_v56 = vpop.f32.mrf.mxu0  ;;  %2440 = vmatpush.bf16.msrb.mxu2 %v4903_v41 }
 0x13a   : > { %v1359_v51 = vpop.f32.mrf.mxu3  ;;  %v1159_v34 = vrot.slane %v1127_v50, 7  ;;  %v1572_v29 = vpop.f32.mrf.mxu1 }
 0x13b   : > { %v1457_v44 = vadd.f32 %v1456_v21, %v1359_v51 }
 0x13c   : > { %v1175_v63 = vsel %vm6232_vm0, %v1158_v24, %v1159_v34  ;;  %v444_v24 = vadd.s32 80, %v5500_v28 }
 0x13d   : > { %v1598_v59 = vadd.f32 %v1570_v30, %v1457_v44  ;;  %v1224_v62 = vsel %vm5607_vm4, 0.0, %v1175_v63  ;;  %v4935_v63 = vld [vmem:[%s5262_s30 + $0x40] sm:$0xff]  ;;  %2441 = vmatpush.bf16.msrb.mxu2 %v4902_v25 }
 0x13e   : > { %v524_v37 = vand.u32 15, %v444_v24  ;;  %2924 = vmatpush.bf16.msrb.mxu1 %v4935_v63  ;;  %v4974_v24 = vld [vmem:[%s5262_s30 + $0x178] sm:$0xff] }
 0x13f   : > { %v5616_v20 = vadd.f32 %v1598_v59, %v1224_v62  ;;  %v1101_v42 = vpop.f32.mrf.mxu2  ;;  %3191 = vmatpush.bf16.msra.mxu3 %v4974_v24 }
 0x140   : > { %v1128_v26 = vadd.f32 %v1101_v42, %v5431_v54  ;;  %vm5635_vm5 = vcmp.eq.s32.totalorder %v524_v37, 0 }
 0x141   : > { %v1461_v16 = vpop.f32.mrf.mxu0 }
 0x142   : > { %v1361_v8 = vpop.f32.mrf.mxu3  ;;  %v1160_v57 = vrot.slane %v1128_v26, 7  ;;  %v1575_v21 = vpop.f32.mrf.mxu1  ;;  %v5649_v26 = vld [vmem:[#allocation2 + $0x78] sm:$0xff] }
 0x143   : > { %v1459_v14 = vadd.f32 %v1458_v56, %v1361_v8 }
 0x144   : > { %v1174_v32 = vsel %vm6232_vm0, %v1159_v34, %v1160_v57  ;;  %1737 = vmatmul.bf16.gmra.mxu2 %v5330_v48  ;;  %1948 = vmatmul.bf16.gmra.mxu0 %v5429_v53 }
 0x145   : > { %v1599_v30 = vadd.f32 %v1572_v29, %v1459_v14  ;;  %2364 = vmatmul.bf16.gmra.mxu1 %v5622_v17 }
 0x147   : > { %v5629_v54 = vadd.f32 %v1599_v30, %v1174_v32  ;;  %1834 = vmatmul.bf16.gmra.mxu3 %v5301_v27  ;;  %v1104_v39 = vpop.f32.mrf.mxu2 }
 0x148   : > { %v1129_v45 = vadd.f32 %v1104_v39, %v5440_v61  ;;  %v4943_v61 = vld [vmem:[%s5262_s30 + $0x100] sm:$0xff] }
 0x149   : > { %v1463_v51 = vpop.f32.mrf.mxu0  ;;  %2827 = vmatpush.bf16.msrb.mxu0 %v4943_v61 }
 0x14a   : > { %v1364_v46 = vpop.f32.mrf.mxu3  ;;  %v1161_v44 = vrot.slane %v1129_v45, 7  ;;  %v1577_v27 = vpop.f32.mrf.mxu1 }
 0x14b   : > { %v1462_v50 = vadd.f32 %v1461_v16, %v1364_v46  ;;  %v446_v16 = vadd.s32 96, %v5500_v28 }
 0x14c   : > { %v1173_v34 = vsel %vm6232_vm0, %v1160_v57, %v1161_v44 }
 0x14d   : > { %v1600_v56 = vadd.f32 %v1575_v21, %v1462_v50  ;;  %v1226_v29 = vsel %vm5635_vm5, 0.0, %v1173_v34  ;;  %v538_v30 = vand.u32 15, %v446_v16  ;;  %v4982_v34 = vld [vmem:[%s5262_s30 + $0x238] sm:$0xff] }
 0x14e   : > { %3401 = vmatpush.bf16.msra.mxu1 %v4982_v34  ;;  %v5703_v34 = vld [vmem:[#allocation2 + $0x50] sm:$0xff] }
 0x14f   : > { %v5643_v59 = vadd.f32 %v1600_v56, %v1226_v29  ;;  %v1106_v62 = vpop.f32.mrf.mxu2  ;;  %vm5662_vm6 = vcmp.eq.s32.totalorder %v538_v30, 0  ;;  %v4966_v56 = vld [vmem:[%s5262_s30 + $0xb8] sm:$0xff] }
 0x150   : > { %v1130_v41 = vadd.f32 %v1106_v62, %v5449_v11  ;;  %3288 = vmatpush.bf16.msra.mxu0 %v4966_v56 }
 0x151   : > { %v1466_v42 = vpop.f32.mrf.mxu0 }
 0x152   : > { %v1366_v47 = vpop.f32.mrf.mxu3  ;;  %v1162_v8 = vrot.slane %v1130_v41, 7  ;;  %v1580_v14 = vpop.f32.mrf.mxu1  ;;  %v5676_v41 = vld [vmem:[#allocation2 + $0x80] sm:$0xff] }
 0x153   : > { %v1464_v6 = vadd.f32 %v1463_v51, %v1366_v47 }
 0x154   : > { %v1172_v21 = vsel %vm6232_vm0, %v1161_v44, %v1162_v8  ;;  %1742 = vmatmul.bf16.gmra.mxu2 %v5352_v0  ;;  %1953 = vmatmul.bf16.gmra.mxu0 %v5447_v9 }
 0x155   : > { %v1601_v57 = vadd.f32 %v1577_v27, %v1464_v6  ;;  %2369 = vmatmul.bf16.gmra.mxu1 %v5649_v26  ;;  %v4958_v27 = vld [vmem:[%s5262_s30 + $0x1f8] sm:$0xff] }
 0x156   : > { %3030 = vmatpush.bf16.msra.mxu2 %v4958_v27 }
 0x157   : > { %v5656_v11 = vadd.f32 %v1601_v57, %v1172_v21  ;;  %1839 = vmatmul.bf16.gmra.mxu3 %v5330_v48  ;;  %v1109_v32 = vpop.f32.mrf.mxu2  ;;  %v4973_v21 = vld [vmem:[%s5262_s30 + $0x170] sm:$0xff] }
 0x158   : > { %v1131_v33 = vadd.f32 %v1109_v32, %v5458_v19  ;;  %3192 = vmatpush.bf16.msra.mxu3 %v4973_v21 }
 0x159   : > { %v1468_v45 = vpop.f32.mrf.mxu0 }
 0x15a   : > { %v1369_v37 = vpop.f32.mrf.mxu3  ;;  %v1163_v46 = vrot.slane %v1131_v33, 7  ;;  %v1582_v48 = vpop.f32.mrf.mxu1 }
 0x15b   : > { %v1467_v39 = vadd.f32 %v1466_v42, %v1369_v37  ;;  %v448_v42 = vadd.s32 112, %v5500_v28 }
 0x15c   : > { %v1171_v51 = vsel %vm6232_vm0, %v1162_v8, %v1163_v46 }
 0x15d   : > { %v1602_v50 = vadd.f32 %v1580_v14, %v1467_v39  ;;  %v1228_v44 = vsel %vm5662_vm6, 0.0, %v1171_v51  ;;  %v552_v16 = vand.u32 15, %v448_v42 }
 0x15f   : > { %v5673_v19 = vadd.f32 %v1602_v50, %v1228_v44  ;;  %v1111_v29 = vpop.f32.mrf.mxu2  ;;  %vm5689_vm7 = vcmp.eq.s32.totalorder %v552_v16, 0  ;;  %v5701_v44 = vld [vmem:[#allocation2 + $0x40] sm:$0xff] }
 0x160   : > { %v1132_v25 = vadd.f32 %v1111_v29, %v5468_v38 }
 0x161   : > { %v1471_v62 = vpop.f32.mrf.mxu0 }
 0x162   : > { %v1371_v61 = vpop.f32.mrf.mxu3  ;;  %v1164_v47 = vrot.slane %v1132_v25, 7  ;;  %v1585_v6 = vpop.f32.mrf.mxu1 }
 0x163   : > { %v1469_v63 = vadd.f32 %v1468_v45, %v1371_v61 }
 0x164   : > { %v1170_v14 = vsel %vm6232_vm0, %v1163_v46, %v1164_v47  ;;  %1747 = vmatmul.bf16.gmra.mxu2 %v5362_v5  ;;  %1958 = vmatmul.bf16.gmra.mxu0 %v5466_v36  ;;  %v6254_v5 = vmov 0  ;;  %v454_v46 = vand.u32 15, %v5500_v28 }
 0x165   : > { %v1603_v8 = vadd.f32 %v1582_v48, %v1469_v63  ;;  %2374 = vmatmul.bf16.gmra.mxu1 %v5676_v41  ;;  %v6255_v5 = vsel %vm5689_vm7, 4294967295, %v6254_v5 }
 0x166   : > { %6256 = vst [vmem:[#allocation4_spill] sm:$0xff] %v6255_v5  ;;  %vm5707_vm8 = vcmp.eq.s32.totalorder %v454_v46, 0  ;;  %v435_v46 = vadd.s32 8, %v5500_v28 }
 0x167   : > { %v5683_v38 = vadd.f32 %v1603_v8, %v1170_v14  ;;  %1844 = vmatmul.bf16.gmra.mxu3 %v5352_v0  ;;  %v1114_v57 = vpop.f32.mrf.mxu2 }
 0x168   : > { %v1133_v24 = vadd.f32 %v1114_v57, %v5477_v49 }
 0x169   : > { %v1473_v33 = vpop.f32.mrf.mxu0 }
 0x16a   : > { %v1374_v30 = vpop.f32.mrf.mxu3  ;;  %v1165_v37 = vrot.slane %v1133_v24, 7  ;;  %v1587_v36 = vpop.f32.mrf.mxu1 }
 0x16b   : > { %v1472_v32 = vadd.f32 %v1471_v62, %v1374_v30  ;;  %v4957_v62 = vld [vmem:[%s5262_s30 + $0x1f0] sm:$0xff] }
 0x16c   : > { %v1169_v0 = vsel %vm6232_vm0, %v1164_v47, %v1165_v37  ;;  %v4965_v47 = vld [vmem:[%s5262_s30 + $0xb0] sm:$0xff]  ;;  %3031 = vmatpush.bf16.msra.mxu2 %v4957_v62  ;;  %v461_v62 = vand.u32 15, %v435_v46  ;;  %v5764_v46 = vld [vmem:[#allocation2 + $0x60] sm:$0xff] }
 0x16d   : > { %v1604_v39 = vadd.f32 %v1585_v6, %v1472_v32  ;;  %v1230_v45 = vsel %vm5689_vm7, 0.0, %v1169_v0  ;;  %v4981_v6 = vld [vmem:[%s5262_s30 + $0x230] sm:$0xff]  ;;  %3289 = vmatpush.bf16.msra.mxu0 %v4965_v47 }
 0x16e   : > { %3402 = vmatpush.bf16.msra.mxu1 %v4981_v6  ;;  %vm5755_vm10 = vcmp.eq.s32.totalorder %v461_v62, 15  ;;  %v4955_v62 = vld [vmem:[%s5262_s30 + $0x1e0] sm:$0xff] }
 0x16f   : > { %v5697_v49 = vadd.f32 %v1604_v39, %v1230_v45  ;;  %v1116_v48 = vpop.f32.mrf.mxu2  ;;  %v5732_v39 = vld [vmem:[#allocation2 + $0x58] sm:$0xff] }
 0x170   : > { %v1134_v50 = vadd.f32 %v1116_v48, %v5485_v1  ;;  %v4956_v48 = vld [vmem:[%s5262_s30 + $0x1e8] sm:$0xff] }
 0x171   : > { %v1924_v56 = vpop.f32.mrf.mxu0  ;;  %3032 = vmatpush.bf16.msra.mxu2 %v4956_v48 }
 0x172   : > { %v1376_v51 = vpop.f32.mrf.mxu3  ;;  %v1166_v29 = vrot.slane %v1134_v50, 7  ;;  %v5705_v25 = vpop.f32.mrf.mxu1  ;;  %v4964_v50 = vld [vmem:[%s5262_s30 + $0xa8] sm:$0xff] }
 0x173   : > { %v1474_v27 = vadd.f32 %v1473_v33, %v1376_v51  ;;  %v4980_v51 = vld [vmem:[%s5262_s30 + $0x228] sm:$0xff]  ;;  %3290 = vmatpush.bf16.msra.mxu0 %v4964_v50 }
 0x174   : > { %v1168_v1 = vsel %vm6232_vm0, %v1165_v37, %v1166_v29  ;;  %2442 = vmatmul.bf16.vlgmr.msrb.gmra.mxu2 %v5701_v44  ;;  %2828 = vmatmul.bf16.vlgmr.msrb.gmra.mxu0 %v5487_v4  ;;  %v1183_v42 = vsel %vm6232_vm0, %v1166_v29, %v1151_v43  ;;  %v4972_v43 = vld [vmem:[%s5262_s30 + $0x168] sm:$0xff] }
 0x175   : > { %v1605_v63 = vadd.f32 %v1587_v36, %v1474_v27  ;;  %2925 = vmatmul.bf16.vlgmr.msrb.gmra.mxu1 %v5701_v44  ;;  %v1216_v14 = vsel %vm5707_vm8, 0.0, %v1183_v42  ;;  %3193 = vmatpush.bf16.msra.mxu3 %v4972_v43 }
 0x176   : > { %v1606_v16 = vadd.f32 %v5497_v22, %v1216_v14  ;;  %3403 = vmatpush.bf16.msra.mxu1 %v4980_v51  ;;  %3033 = vmatpush.bf16.msra.mxu2 %v4955_v62 }
 0x177   : > { %v5722_v8 = vadd.f32 %v1605_v63, %v1168_v1  ;;  %2619 = vmatmul.bf16.vlgmr.msrb.gmra.mxu3 %v5703_v34  ;;  %v1713_v57 = vpop.f32.mrf.mxu2  ;;  %v4971_v1 = vld [vmem:[%s5262_s30 + $0x160] sm:$0xff] }
 0x179   : > { %v1926_v12 = vpop.f32.mrf.mxu0  ;;  %3194 = vmatpush.bf16.msra.mxu3 %v4971_v1  ;;  %v4979_v1 = vld [vmem:[%s5262_s30 + $0x220] sm:$0xff] }
 0x17a   : > { %v1810_v21 = vpop.f32.mrf.mxu3  ;;  %v5729_v24 = vpop.f32.mrf.mxu1  ;;  %3404 = vmatpush.bf16.msra.mxu1 %v4979_v1 }
 0x17b   : > { %v1811_v33 = vadd.f32 %v1810_v21, %v1713_v57 }
 0x17d   : > { %v5738_v45 = vadd.f32 %v1924_v56, %v1811_v33 }
 0x17f   : > { %v1715_v30 = vpop.f32.mrf.mxu2  ;;  %v6230_v56 = vrot.slane %v5738_v45, 1 }
 0x181   : > { %v1929_v36 = vpop.f32.mrf.mxu0 }
 0x182   : > { %v1812_v32 = vpop.f32.mrf.mxu3  ;;  %v5734_v0 = vpop.f32.mrf.mxu1 }
 0x183   : > { %v1813_v37 = vadd.f32 %v1812_v32, %v1715_v30 }
 0x184   : > { %2447 = vmatmul.bf16.gmra.mxu2 %v5487_v4  ;;  %2833 = vmatmul.bf16.gmra.mxu0 %v5507_v40 }
 0x185   : > { %v1965_v22 = vadd.f32 %v1926_v12, %v1813_v37  ;;  %2930 = vmatmul.bf16.gmra.mxu1 %v5487_v4 }
 0x187   : > { %2624 = vmatmul.bf16.gmra.mxu3 %v5732_v39  ;;  %v1997_v27 = vrot.slane %v1965_v22, 1  ;;  %v1718_v29 = vpop.f32.mrf.mxu2 }
 0x189   : > { %v1931_v6 = vpop.f32.mrf.mxu0  ;;  %v2027_v42 = vsel %vm6234_vm9, %v6230_v56, %v1997_v27 }
 0x18a   : > { %v1815_v63 = vpop.f32.mrf.mxu3  ;;  %v5748_v4 = vpop.f32.mrf.mxu1  ;;  %v2077_v12 = vadd.f32 %v2027_v42, %v1606_v16 }
 0x18b   : > { %v1816_v47 = vadd.f32 %v1815_v63, %v1718_v29  ;;  %v437_v63 = vadd.s32 24, %v5500_v28 }
 0x18c   : > { %v2147_v16 = vmul.f32 %v2077_v12, %v2077_v12 }
 0x18d   : > { %v1966_v14 = vadd.f32 %v1929_v36, %v1816_v47  ;;  %v4963_v47 = vld [vmem:[%s5262_s30 + $0xa0] sm:$0xff] }
 0x18e   : > { %3291 = vmatpush.bf16.msra.mxu0 %v4963_v47 }
 0x18f   : > { %v1998_v21 = vrot.slane %v1966_v14, 1  ;;  %v1720_v30 = vpop.f32.mrf.mxu2 }
 0x191   : > { %v2026_v43 = vsel %vm6234_vm9, %v1997_v27, %v1998_v21  ;;  %v1934_v36 = vpop.f32.mrf.mxu0 }
 0x192   : > { %v2062_v32 = vsel %vm5755_vm10, 0.0, %v2026_v43  ;;  %v1817_v33 = vpop.f32.mrf.mxu3  ;;  %v5766_v48 = vpop.f32.mrf.mxu1 }
 0x193   : > { %v2078_v37 = vadd.f32 %v2062_v32, %v5517_v55  ;;  %v1818_v22 = vadd.f32 %v1817_v33, %v1720_v30  ;;  %v475_v30 = vand.u32 15, %v437_v63 }
 0x194   : > { %2452 = vmatmul.bf16.gmra.mxu2 %v5507_v40  ;;  %2838 = vmatmul.bf16.gmra.mxu0 %v5538_v35 }
 0x195   : > { %v2148_v50 = vmul.f32 %v2078_v37, %v2078_v37  ;;  %v1967_v51 = vadd.f32 %v1931_v6, %v1818_v22  ;;  %v4986_v55 = vpack.c.bf16 %v2078_v37, %v2077_v12  ;;  %v2125_v27 = vadd.f32 %v2078_v37, %v2077_v12  ;;  %2935 = vmatmul.bf16.gmra.mxu1 %v5507_v40  ;;  %v4970_v22 = vld [vmem:[%s5262_s30 + $0x158] sm:$0xff] }
 0x196   : > { %3195 = vmatpush.bf16.msra.mxu3 %v4970_v22  ;;  %vm5790_vm11 = vcmp.eq.s32.totalorder %v475_v30, 15  ;;  %v4962_v22 = vld [vmem:[%s5262_s30 + $0x98] sm:$0xff] }
 0x197   : > { %v1999_v29 = vrot.slane %v1967_v51, 1  ;;  %2629 = vmatmul.bf16.gmra.mxu3 %v5764_v46  ;;  %4987 = vst [vmem:[%s5773_s14] sm:$0xff] %v4986_v55   ;;  %v2163_v42 = vadd.f32 %v2148_v50, %v2147_v16  ;;  %v1723_v14 = vpop.f32.mrf.mxu2  ;;  %3292 = vmatpush.bf16.msra.mxu0 %v4962_v22 }
 0x199   : > { %v2025_v6 = vsel %vm6234_vm9, %v1998_v21, %v1999_v29  ;;  %v1936_v32 = vpop.f32.mrf.mxu0 }
 0x19a   : > { %v2079_v12 = vadd.f32 %v2025_v6, %v5532_v18  ;;  %v1820_v43 = vpop.f32.mrf.mxu3  ;;  %v5787_v37 = vpop.f32.mrf.mxu1 }
 0x19b   : > { %v1821_v40 = vadd.f32 %v1820_v43, %v1723_v14 }
 0x19c   : > { %v2149_v33 = vmul.f32 %v2079_v12, %v2079_v12  ;;  %v2126_v51 = vadd.f32 %v2125_v27, %v2079_v12 }
 0x19d   : > { %v1968_v55 = vadd.f32 %v1934_v36, %v1821_v40 }
 0x19e   : > { %v2164_v16 = vadd.f32 %v2163_v42, %v2149_v33  ;;  %v5799_v42 = vld [vmem:[#allocation2 + $0x68] sm:$0xff]  ;;  %v4954_v33 = vld [vmem:[%s5262_s30 + $0x1d8] sm:$0xff] }
 0x19f   : > { %v2000_v50 = vrot.slane %v1968_v55, 1  ;;  %v1725_v63 = vpop.f32.mrf.mxu2  ;;  %v4978_v55 = vld [vmem:[%s5262_s30 + $0x218] sm:$0xff]  ;;  %3034 = vmatpush.bf16.msra.mxu2 %v4954_v33 }
 0x1a0   : > { %3405 = vmatpush.bf16.msra.mxu1 %v4978_v55 }
 0x1a1   : > { %v2024_v18 = vsel %vm6234_vm9, %v1999_v29, %v2000_v50  ;;  %v1939_v27 = vpop.f32.mrf.mxu0 }
 0x1a2   : > { %v2064_v62 = vsel %vm5790_vm11, 0.0, %v2024_v18  ;;  %v1822_v47 = vpop.f32.mrf.mxu3  ;;  %v5801_v6 = vpop.f32.mrf.mxu1 }
 0x1a3   : > { %v2080_v1 = vadd.f32 %v2064_v62, %v5545_v2  ;;  %v1823_v36 = vadd.f32 %v1822_v47, %v1725_v63  ;;  %v439_v2 = vadd.s32 40, %v5500_v28 }
 0x1a4   : > { %2457 = vmatmul.bf16.gmra.mxu2 %v5538_v35  ;;  %2843 = vmatmul.bf16.gmra.mxu0 %v5566_v31 }
 0x1a5   : > { %v4991_v14 = vpack.c.bf16 %v2080_v1, %v2079_v12  ;;  %v2150_v43 = vmul.f32 %v2080_v1, %v2080_v1  ;;  %v1969_v30 = vadd.f32 %v1936_v32, %v1823_v36  ;;  %v2127_v29 = vadd.f32 %v2126_v51, %v2080_v1  ;;  %2940 = vmatmul.bf16.gmra.mxu1 %v5538_v35 }
 0x1a6   : > { %v489_v62 = vand.u32 15, %v439_v2 }
 0x1a7   : > { %5063 = vst [vmem:[%s5773_s14 + $0x8] sm:$0xff] %v4991_v14   ;;  %v2001_v40 = vrot.slane %v1969_v30, 1  ;;  %2634 = vmatmul.bf16.gmra.mxu3 %v5799_v42  ;;  %v2165_v12 = vadd.f32 %v2164_v16, %v2150_v43  ;;  %v1728_v51 = vpop.f32.mrf.mxu2  ;;  %v4969_v14 = vld [vmem:[%s5262_s30 + $0x150] sm:$0xff] }
 0x1a8   : > { %3196 = vmatpush.bf16.msra.mxu3 %v4969_v14  ;;  %vm5818_vm12 = vcmp.eq.s32.totalorder %v489_v62, 15  ;;  %v4977_v14 = vld [vmem:[%s5262_s30 + $0x210] sm:$0xff] }
 0x1a9   : > { %v2023_v32 = vsel %vm6234_vm9, %v2000_v50, %v2001_v40  ;;  %v1941_v35 = vpop.f32.mrf.mxu0  ;;  %3406 = vmatpush.bf16.msra.mxu1 %v4977_v14 }
 0x1aa   : > { %v2081_v18 = vadd.f32 %v2023_v32, %v5560_v13  ;;  %v1825_v63 = vpop.f32.mrf.mxu3  ;;  %v5815_v36 = vpop.f32.mrf.mxu1 }
 0x1ab   : > { %v1826_v47 = vadd.f32 %v1825_v63, %v1728_v51 }
 0x1ac   : > { %v2151_v1 = vmul.f32 %v2081_v18, %v2081_v18  ;;  %v2128_v30 = vadd.f32 %v2127_v29, %v2081_v18 }
 0x1ad   : > { %v1970_v56 = vadd.f32 %v1939_v27, %v1826_v47  ;;  %v4953_v47 = vld [vmem:[%s5262_s30 + $0x1d0] sm:$0xff] }
 0x1ae   : > { %v2166_v16 = vadd.f32 %v2165_v12, %v2151_v1  ;;  %v5827_v12 = vld [vmem:[#allocation2 + $0x70] sm:$0xff]  ;;  %3035 = vmatpush.bf16.msra.mxu2 %v4953_v47 }
 0x1af   : > { %v2002_v43 = vrot.slane %v1970_v56, 1  ;;  %v1730_v2 = vpop.f32.mrf.mxu2  ;;  %v4961_v1 = vld [vmem:[%s5262_s30 + $0x90] sm:$0xff] }
 0x1b0   : > { %3293 = vmatpush.bf16.msra.mxu0 %v4961_v1 }
 0x1b1   : > { %v2022_v13 = vsel %vm6234_vm9, %v2001_v40, %v2002_v43  ;;  %v1944_v29 = vpop.f32.mrf.mxu0 }
 0x1b2   : > { %v2066_v33 = vsel %vm5818_vm12, 0.0, %v2022_v13  ;;  %v1827_v22 = vpop.f32.mrf.mxu3  ;;  %v5829_v32 = vpop.f32.mrf.mxu1 }
 0x1b3   : > { %v2082_v55 = vadd.f32 %v2066_v33, %v5573_v23  ;;  %v1828_v27 = vadd.f32 %v1827_v22, %v1730_v2  ;;  %v441_v23 = vadd.s32 56, %v5500_v28 }
 0x1b4   : > { %2462 = vmatmul.bf16.gmra.mxu2 %v5566_v31  ;;  %2848 = vmatmul.bf16.gmra.mxu0 %v5594_v10 }
 0x1b5   : > { %v4996_v56 = vpack.c.bf16 %v2082_v55, %v2081_v18  ;;  %v2152_v51 = vmul.f32 %v2082_v55, %v2082_v55  ;;  %v1971_v63 = vadd.f32 %v1941_v35, %v1828_v27  ;;  %v2129_v40 = vadd.f32 %v2128_v30, %v2082_v55  ;;  %2945 = vmatmul.bf16.gmra.mxu1 %v5566_v31 }
 0x1b6   : > { %v503_v33 = vand.u32 15, %v441_v23 }
 0x1b7   : > { %5064 = vst [vmem:[%s5773_s14 + $0x10] sm:$0xff] %v4996_v56   ;;  %v2003_v62 = vrot.slane %v1971_v63, 1  ;;  %2639 = vmatmul.bf16.gmra.mxu3 %v5827_v12  ;;  %v2167_v18 = vadd.f32 %v2166_v16, %v2152_v51  ;;  %v1733_v30 = vpop.f32.mrf.mxu2  ;;  %v4968_v56 = vld [vmem:[%s5262_s30 + $0x148] sm:$0xff] }
 0x1b8   : > { %3197 = vmatpush.bf16.msra.mxu3 %v4968_v56  ;;  %vm5846_vm13 = vcmp.eq.s32.totalorder %v503_v33, 15  ;;  %v4976_v56 = vld [vmem:[%s5262_s30 + $0x208] sm:$0xff] }
 0x1b9   : > { %v2021_v35 = vsel %vm6234_vm9, %v2002_v43, %v2003_v62  ;;  %v1946_v31 = vpop.f32.mrf.mxu0  ;;  %3407 = vmatpush.bf16.msra.mxu1 %v4976_v56 }
 0x1ba   : > { %v2083_v13 = vadd.f32 %v2021_v35, %v5588_v15  ;;  %v1830_v2 = vpop.f32.mrf.mxu3  ;;  %v5843_v27 = vpop.f32.mrf.mxu1 }
 0x1bb   : > { %v1831_v22 = vadd.f32 %v1830_v2, %v1733_v30 }
 0x1bc   : > { %v2153_v55 = vmul.f32 %v2083_v13, %v2083_v13  ;;  %v2130_v63 = vadd.f32 %v2129_v40, %v2083_v13 }
 0x1bd   : > { %v1972_v5 = vadd.f32 %v1944_v29, %v1831_v22  ;;  %v4952_v22 = vld [vmem:[%s5262_s30 + $0x1c8] sm:$0xff] }
 0x1be   : > { %v2168_v16 = vadd.f32 %v2167_v18, %v2153_v55  ;;  %v5855_v18 = vld [vmem:[#allocation2 + $0x78] sm:$0xff]  ;;  %v4960_v55 = vld [vmem:[%s5262_s30 + $0x88] sm:$0xff]  ;;  %3036 = vmatpush.bf16.msra.mxu2 %v4952_v22 }
 0x1bf   : > { %v2004_v51 = vrot.slane %v1972_v5, 1  ;;  %v1735_v23 = vpop.f32.mrf.mxu2  ;;  %3294 = vmatpush.bf16.msra.mxu0 %v4960_v55 }
 0x1c1   : > { %v2020_v15 = vsel %vm6234_vm9, %v2003_v62, %v2004_v51  ;;  %v1949_v40 = vpop.f32.mrf.mxu0 }
 0x1c2   : > { %v2068_v47 = vsel %vm5846_vm13, 0.0, %v2020_v15  ;;  %v1832_v1 = vpop.f32.mrf.mxu3  ;;  %v5857_v35 = vpop.f32.mrf.mxu1 }
 0x1c3   : > { %v2084_v14 = vadd.f32 %v2068_v47, %v5601_v52  ;;  %v1833_v29 = vadd.f32 %v1832_v1, %v1735_v23  ;;  %v443_v52 = vadd.s32 72, %v5500_v28 }
 0x1c4   : > { %2467 = vmatmul.bf16.gmra.mxu2 %v5594_v10  ;;  %2853 = vmatmul.bf16.gmra.mxu0 %v5622_v17 }
 0x1c5   : > { %v5001_v5 = vpack.c.bf16 %v2084_v14, %v2083_v13  ;;  %v2154_v30 = vmul.f32 %v2084_v14, %v2084_v14  ;;  %v1973_v2 = vadd.f32 %v1946_v31, %v1833_v29  ;;  %v2131_v62 = vadd.f32 %v2130_v63, %v2084_v14  ;;  %2950 = vmatmul.bf16.gmra.mxu1 %v5594_v10 }
 0x1c6   : > { %v517_v47 = vand.u32 15, %v443_v52 }
 0x1c7   : > { %5065 = vst [vmem:[%s5773_s14 + $0x18] sm:$0xff] %v5001_v5   ;;  %v2005_v33 = vrot.slane %v1973_v2, 1  ;;  %2644 = vmatmul.bf16.gmra.mxu3 %v5855_v18  ;;  %v2169_v13 = vadd.f32 %v2168_v16, %v2154_v30  ;;  %v1738_v63 = vpop.f32.mrf.mxu2  ;;  %v4967_v16 = vld [vmem:[%s5262_s30 + $0x140] sm:$0xff] }
 0x1c8   : > { %3198 = vmatpush.bf16.msra.mxu3 %v4967_v16  ;;  %vm5874_vm14 = vcmp.eq.s32.totalorder %v517_v47, 15  ;;  %v5886_v47 = vld [vmem:[#allocation2 + $0x80] sm:$0xff] }
 0x1c9   : > { %v2019_v31 = vsel %vm6234_vm9, %v2004_v51, %v2005_v33  ;;  %v1951_v1 = vpop.f32.mrf.mxu0 }
 0x1ca   : > { %v2085_v15 = vadd.f32 %v2019_v31, %v5616_v20  ;;  %v1835_v23 = vpop.f32.mrf.mxu3  ;;  %v5871_v29 = vpop.f32.mrf.mxu1  ;;  %v4951_v31 = vld [vmem:[%s5262_s30 + $0x1c0] sm:$0xff] }
 0x1cb   : > { %v1836_v10 = vadd.f32 %v1835_v23, %v1738_v63  ;;  %v4959_v63 = vld [vmem:[%s5262_s30 + $0x80] sm:$0xff]  ;;  %3037 = vmatpush.bf16.msra.mxu2 %v4951_v31 }
 0x1cc   : > { %v2155_v14 = vmul.f32 %v2085_v15, %v2085_v15  ;;  %v2132_v5 = vadd.f32 %v2131_v62, %v2085_v15  ;;  %v4975_v62 = vld [vmem:[%s5262_s30 + $0x200] sm:$0xff]  ;;  %3295 = vmatpush.bf16.msra.mxu0 %v4959_v63 }
 0x1cd   : > { %v1974_v30 = vadd.f32 %v1949_v40, %v1836_v10  ;;  %3408 = vmatpush.bf16.msra.mxu1 %v4975_v62 }
 0x1ce   : > { %v2170_v51 = vadd.f32 %v2169_v13, %v2155_v14 }
 0x1cf   : > { %v2006_v20 = vrot.slane %v1974_v30, 1  ;;  %v1740_v22 = vpop.f32.mrf.mxu2 }
 0x1d1   : > { %v2018_v52 = vsel %vm6234_vm9, %v2005_v33, %v2006_v20  ;;  %v1954_v23 = vpop.f32.mrf.mxu0 }
 0x1d2   : > { %v2070_v55 = vsel %vm5874_vm14, 0.0, %v2018_v52  ;;  %v1837_v56 = vpop.f32.mrf.mxu3  ;;  %v5888_v10 = vpop.f32.mrf.mxu1 }
 0x1d3   : > { %v2086_v40 = vadd.f32 %v2070_v55, %v5629_v54  ;;  %v1838_v13 = vadd.f32 %v1837_v56, %v1740_v22  ;;  %v445_v54 = vadd.s32 88, %v5500_v28 }
 0x1d4   : > { %2472 = vmatmul.bf16.gmra.mxu2 %v5622_v17  ;;  %2858 = vmatmul.bf16.gmra.mxu0 %v5649_v26 }
 0x1d5   : > { %v5006_v33 = vpack.c.bf16 %v2086_v40, %v2085_v15  ;;  %v2156_v14 = vmul.f32 %v2086_v40, %v2086_v40  ;;  %v1975_v16 = vadd.f32 %v1951_v1, %v1838_v13  ;;  %v2133_v30 = vadd.f32 %v2132_v5, %v2086_v40  ;;  %2955 = vmatmul.bf16.gmra.mxu1 %v5622_v17 }
 0x1d6   : > { %v531_v56 = vand.u32 15, %v445_v54 }
 0x1d7   : > { %5066 = vst [vmem:[%s5773_s14 + $0x20] sm:$0xff] %v5006_v33   ;;  %v2007_v52 = vrot.slane %v1975_v16, 1  ;;  %2649 = vmatmul.bf16.gmra.mxu3 %v5886_v47  ;;  %v2171_v22 = vadd.f32 %v2170_v51, %v2156_v14  ;;  %v1743_v55 = vpop.f32.mrf.mxu2 }
 0x1d8   : > { %vm5901_vm15 = vcmp.eq.s32.totalorder %v531_v56, 15 }
 0x1d9   : > { %v2017_v15 = vsel %vm6234_vm9, %v2006_v20, %v2007_v52  ;;  %v1956_v63 = vpop.f32.mrf.mxu0 }
 0x1da   : > { %v2087_v1 = vadd.f32 %v2017_v15, %v5643_v59  ;;  %v1840_v5 = vpop.f32.mrf.mxu3  ;;  %v5899_v40 = vpop.f32.mrf.mxu1 }
 0x1db   : > { %v1841_v31 = vadd.f32 %v1840_v5, %v1743_v55 }
 0x1dc   : > { %v2157_v62 = vmul.f32 %v2087_v1, %v2087_v1  ;;  %v2134_v13 = vadd.f32 %v2133_v30, %v2087_v1 }
 0x1dd   : > { %v1976_v33 = vadd.f32 %v1954_v23, %v1841_v31  ;;  %v5910_v23 = vld [vmem:[#allocation2 + $0x88] sm:$0xff] }
 0x1de   : > { %v2172_v16 = vadd.f32 %v2171_v22, %v2157_v62 }
 0x1df   : > { %v2008_v51 = vrot.slane %v1976_v33, 1  ;;  %v1745_v59 = vpop.f32.mrf.mxu2 }
 0x1e1   : > { %v2016_v20 = vsel %vm6234_vm9, %v2007_v52, %v2008_v51  ;;  %v1959_v30 = vpop.f32.mrf.mxu0 }
 0x1e2   : > { %v2072_v14 = vsel %vm5901_vm15, 0.0, %v2016_v20  ;;  %v1842_v54 = vpop.f32.mrf.mxu3  ;;  %v5912_v22 = vpop.f32.mrf.mxu1 }
 0x1e3   : > { %v2088_v15 = vadd.f32 %v2072_v14, %v5656_v11  ;;  %v1843_v55 = vadd.f32 %v1842_v54, %v1745_v59  ;;  %v447_v11 = vadd.s32 104, %v5500_v28 }
 0x1e4   : > { %2477 = vmatmul.bf16.gmra.mxu2 %v5649_v26  ;;  %2863 = vmatmul.bf16.gmra.mxu0 %v5676_v41 }
 0x1e5   : > { %v5011_v5 = vpack.c.bf16 %v2088_v15, %v2087_v1  ;;  %v2158_v56 = vmul.f32 %v2088_v15, %v2088_v15  ;;  %v1977_v31 = vadd.f32 %v1956_v63, %v1843_v55  ;;  %v2135_v62 = vadd.f32 %v2134_v13, %v2088_v15  ;;  %2960 = vmatmul.bf16.gmra.mxu1 %v5649_v26 }
 0x1e6   : > { %v545_v59 = vand.u32 15, %v447_v11  ;;  %v6271_v26 = vmov 0 }
 0x1e7   : > { %5067 = vst [vmem:[%s5773_s14 + $0x28] sm:$0xff] %v5011_v5   ;;  %v2009_v52 = vrot.slane %v1977_v31, 1  ;;  %2654 = vmatmul.bf16.gmra.mxu3 %v5910_v23  ;;  %v2173_v33 = vadd.f32 %v2172_v16, %v2158_v56  ;;  %v1748_v1 = vpop.f32.mrf.mxu2 }
 0x1e8   : > { %vm5925_vm0 = vcmp.eq.s32.totalorder %v545_v59, 15 }
 0x1e9   : > { %v2015_v20 = vsel %vm6234_vm9, %v2008_v51, %v2009_v52  ;;  %v1961_v54 = vpop.f32.mrf.mxu0  ;;  %v6272_v26 = vsel %vm5925_vm0, 4294967295, %v6271_v26  ;;  %v449_v51 = vadd.s32 120, %v5500_v28 }
 0x1ea   : > { %v2089_v63 = vadd.f32 %v2015_v20, %v5673_v19  ;;  %v1845_v13 = vpop.f32.mrf.mxu3  ;;  %v5923_v15 = vpop.f32.mrf.mxu1  ;;  %6273 = vst [vmem:[#allocation5_spill] sm:$0xff] %v6272_v26 }
 0x1eb   : > { %v1846_v14 = vadd.f32 %v1845_v13, %v1748_v1  ;;  %v559_v1 = vand.u32 15, %v449_v51  ;;  %v6274_v51 = vmov 0 }
 0x1ec   : > { %v2159_v41 = vmul.f32 %v2089_v63, %v2089_v63  ;;  %v2136_v55 = vadd.f32 %v2135_v62, %v2089_v63 }
 0x1ed   : > { %v1978_v5 = vadd.f32 %v1959_v30, %v1846_v14 }
 0x1ee   : > { %v2174_v31 = vadd.f32 %v2173_v33, %v2159_v41 }
 0x1ef   : > { %v2010_v16 = vrot.slane %v1978_v5, 1  ;;  %v1750_v56 = vpop.f32.mrf.mxu2 }
 0x1f1   : > { %v2014_v19 = vsel %vm6234_vm9, %v2009_v52, %v2010_v16  ;;  %v2829_v33 = vpop.f32.mrf.mxu0  ;;  %vm5941_vm9 = vcmp.eq.s32.totalorder %v559_v1, 15 }
 0x1f2   : > { %v2074_v11 = vsel %vm5925_vm0, 0.0, %v2014_v19  ;;  %v1847_v20 = vpop.f32.mrf.mxu3  ;;  %v2926_v13 = vpop.f32.mrf.mxu1  ;;  %v5138_v19 = vld [vmem:[#allocation2 + $0x48] sm:$0xff]  ;;  %v6275_v51 = vsel %vm5941_vm9, 4294967295, %v6274_v51  ;;  %vm6277_vm0 = vcmp.lt.s32.totalorder %v5500_v28, 7 }
 0x1f3   : > { %v2090_v62 = vadd.f32 %v2074_v11, %v5683_v38  ;;  %v1848_v30 = vadd.f32 %v1847_v20, %v1750_v56  ;;  %v5935_v5 = vadd.f32 %v2926_v13, %v2829_v33  ;;  %6276 = vst [vmem:[#allocation6_spill] sm:$0xff] %v6275_v51  ;;  %vm6279_vm7 = vmmov %vm6277_vm0 }
 0x1f4   : > { %3038 = vmatmul.bf16.vlgmr.msra.gmra.mxu2 %v5703_v34  ;;  %3296 = vmatmul.bf16.vlgmr.msra.gmra.mxu0 %v5701_v44 }
 0x1f5   : > { %v5016_v59 = vpack.c.bf16 %v2090_v62, %v2089_v63  ;;  %v2160_v14 = vmul.f32 %v2090_v62, %v2090_v62  ;;  %v1979_v41 = vadd.f32 %v1961_v54, %v1848_v30  ;;  %v2137_v52 = vadd.f32 %v2136_v55, %v2090_v62  ;;  %3409 = vmatmul.bf16.vlgmr.msra.gmra.mxu1 %v5703_v34 }
 0x1f6   : > { %v6278_v54 = vrot.slane %v5738_v45, 1 }
 0x1f7   : > { %5068 = vst [vmem:[%s5773_s14 + $0x30] sm:$0xff] %v5016_v59   ;;  %v2011_v26 = vrot.slane %v1979_v41, 1  ;;  %3199 = vmatmul.bf16.vlgmr.msra.gmra.mxu3 %v5138_v19  ;;  %v2175_v38 = vadd.f32 %v2174_v31, %v2160_v14  ;;  %v2443_v55 = vpop.f32.mrf.mxu2 }
 0x1f8   : > { %v2444_v11 = vadd.f32 %v2443_v55, %v5705_v25 }
 0x1f9   : > { %v2013_v63 = vsel %vm6277_vm0, %v2010_v16, %v2011_v26  ;;  %v2028_v44 = vsel %vm6279_vm7, %v2011_v26, %v6278_v54  ;;  %v2831_v20 = vpop.f32.mrf.mxu0  ;;  %vm6282_vm0 = vcmp.lt.s32.totalorder %v5500_v28, 1 }
 0x1fa   : > { %v2091_v56 = vadd.f32 %v2013_v63, %v5697_v49  ;;  %v2620_v34 = vpop.f32.mrf.mxu3  ;;  %v2076_v31 = vsel %vm5941_vm9, 0.0, %v2028_v44  ;;  %v2928_v45 = vpop.f32.mrf.mxu1  ;;  %vm6283_vm7 = vmmov %vm6282_vm0 }
 0x1fb   : > { %v2092_v62 = vadd.f32 %v2076_v31, %v5722_v8  ;;  %v5956_v16 = vadd.f32 %v2620_v34, %v2444_v11  ;;  %v5958_v1 = vadd.f32 %v2928_v45, %v2831_v20  ;;  %vm6291_vm9 = vmmov %vm6282_vm0 }
 0x1fc   : > { %v2161_v30 = vmul.f32 %v2091_v56, %v2091_v56  ;;  %v2138_v33 = vadd.f32 %v2137_v52, %v2091_v56 }
 0x1fd   : > { %v5021_v26 = vpack.c.bf16 %v2092_v62, %v2091_v56  ;;  %v2162_v13 = vmul.f32 %v2092_v62, %v2092_v62  ;;  %v6237_v52 = vrot.slane %v5956_v16, 7 }
 0x1fe   : > { %v2176_v59 = vadd.f32 %v2175_v38, %v2161_v30  ;;  %v5960_v49 = vadd.f32 %v2138_v33, %v2092_v62  ;;  %v5139_v38 = vld [vmem:[#allocation2 + $0x50] sm:$0xff] }
 0x1ff   : > { %5069 = vst [vmem:[%s5773_s14 + $0x38] sm:$0xff] %v5021_v26   ;;  %v2445_v14 = vpop.f32.mrf.mxu2 }
 0x200   : > { %6280 = vst [vmem:[#allocation7_spill] sm:$0xff] %v5960_v49  ;;  %v5963_v25 = vadd.f32 %v2176_v59, %v2162_v13  ;;  %v2446_v41 = vadd.f32 %v2445_v14, %v5729_v24 }
 0x201   : > { %v2834_v8 = vpop.f32.mrf.mxu0 }
 0x202   : > { %6281 = vst [vmem:[#allocation8_spill] sm:$0xff] %v5963_v25  ;;  %v2622_v63 = vpop.f32.mrf.mxu3  ;;  %v2931_v44 = vpop.f32.mrf.mxu1 }
 0x203   : > { %v2661_v54 = vadd.f32 %v2622_v63, %v2446_v41  ;;  %v5966_v55 = vadd.f32 %v2931_v44, %v2834_v8  ;;  %v5140_v8 = vld [vmem:[#allocation2 + $0x58] sm:$0xff] }
 0x204   : > { %3043 = vmatmul.bf16.gmra.mxu2 %v5732_v39  ;;  %3301 = vmatmul.bf16.gmra.mxu0 %v5138_v19 }
 0x205   : > { %v2677_v11 = vrot.slane %v2661_v54, 7  ;;  %3414 = vmatmul.bf16.gmra.mxu1 %v5732_v39 }
 0x207   : > { %3204 = vmatmul.bf16.gmra.mxu3 %v5139_v38  ;;  %v5975_v24 = vsel %vm6282_vm0, %v6237_v52, %v2677_v11  ;;  %v2448_v56 = vpop.f32.mrf.mxu2 }
 0x208   : > { %v2449_v34 = vadd.f32 %v2448_v56, %v5734_v0 }
 0x209   : > { %v2836_v20 = vpop.f32.mrf.mxu0 }
 0x20a   : > { %v2625_v31 = vpop.f32.mrf.mxu3  ;;  %v2933_v30 = vpop.f32.mrf.mxu1 }
 0x20b   : > { %v2662_v62 = vadd.f32 %v2625_v31, %v2449_v34  ;;  %v5978_v45 = vadd.f32 %v2933_v30, %v2836_v20 }
 0x20d   : > { %v2678_v19 = vrot.slane %v2662_v62, 7 }
 0x20f   : > { %v5982_v33 = vsel %vm6283_vm7, %v2677_v11, %v2678_v19  ;;  %v2450_v39 = vpop.f32.mrf.mxu2  ;;  %vm6284_vm7 = vmmov %vm6282_vm0 }
 0x210   : > { %v2451_v26 = vadd.f32 %v2450_v39, %v5748_v4 }
 0x211   : > { %v2839_v59 = vpop.f32.mrf.mxu0 }
 0x212   : > { %v2627_v13 = vpop.f32.mrf.mxu3  ;;  %v2936_v41 = vpop.f32.mrf.mxu1 }
 0x213   : > { %v2663_v14 = vadd.f32 %v2627_v13, %v2451_v26  ;;  %v5985_v63 = vadd.f32 %v2936_v41, %v2839_v59 }
 0x214   : > { %3048 = vmatmul.bf16.gmra.mxu2 %v5764_v46  ;;  %3306 = vmatmul.bf16.gmra.mxu0 %v5139_v38 }
 0x215   : > { %v2679_v0 = vrot.slane %v2663_v14, 7  ;;  %3419 = vmatmul.bf16.gmra.mxu1 %v5764_v46  ;;  %v5141_v14 = vld [vmem:[#allocation2 + $0x60] sm:$0xff] }
 0x217   : > { %3209 = vmatmul.bf16.gmra.mxu3 %v5140_v8  ;;  %v5991_v54 = vsel %vm6282_vm0, %v2678_v19, %v2679_v0  ;;  %v2453_v44 = vpop.f32.mrf.mxu2 }
 0x218   : > { %v2454_v4 = vadd.f32 %v2453_v44, %v5766_v48 }
 0x219   : > { %v2841_v56 = vpop.f32.mrf.mxu0 }
 0x21a   : > { %v2630_v11 = vpop.f32.mrf.mxu3  ;;  %v2938_v31 = vpop.f32.mrf.mxu1 }
 0x21b   : > { %v2664_v34 = vadd.f32 %v2630_v11, %v2454_v4  ;;  %v5994_v20 = vadd.f32 %v2938_v31, %v2841_v56 }
 0x21d   : > { %v2680_v62 = vrot.slane %v2664_v34, 7 }
 0x21f   : > { %v5998_v38 = vsel %vm6284_vm7, %v2679_v0, %v2680_v62  ;;  %v2455_v30 = vpop.f32.mrf.mxu2  ;;  %vm6285_vm7 = vmmov %vm6282_vm0 }
 0x220   : > { %v2456_v46 = vadd.f32 %v2455_v30, %v5787_v37 }
 0x221   : > { %v2844_v19 = vpop.f32.mrf.mxu0 }
 0x222   : > { %v2632_v39 = vpop.f32.mrf.mxu3  ;;  %v2941_v13 = vpop.f32.mrf.mxu1 }
 0x223   : > { %v2665_v26 = vadd.f32 %v2632_v39, %v2456_v46  ;;  %v6001_v59 = vadd.f32 %v2941_v13, %v2844_v19  ;;  %v5142_v13 = vld [vmem:[#allocation2 + $0x68] sm:$0xff] }
 0x224   : > { %3053 = vmatmul.bf16.gmra.mxu2 %v5799_v42  ;;  %3311 = vmatmul.bf16.gmra.mxu0 %v5140_v8 }
 0x225   : > { %v2681_v48 = vrot.slane %v2665_v26, 7  ;;  %3424 = vmatmul.bf16.gmra.mxu1 %v5799_v42 }
 0x227   : > { %3214 = vmatmul.bf16.gmra.mxu3 %v5141_v14  ;;  %v6007_v41 = vsel %vm6282_vm0, %v2680_v62, %v2681_v48  ;;  %v2458_v0 = vpop.f32.mrf.mxu2 }
 0x228   : > { %v2459_v37 = vadd.f32 %v2458_v0, %v5801_v6 }
 0x229   : > { %v2846_v4 = vpop.f32.mrf.mxu0 }
 0x22a   : > { %v2635_v44 = vpop.f32.mrf.mxu3  ;;  %v2943_v56 = vpop.f32.mrf.mxu1 }
 0x22b   : > { %v2666_v11 = vadd.f32 %v2635_v44, %v2459_v37  ;;  %v6010_v34 = vadd.f32 %v2943_v56, %v2846_v4 }
 0x22d   : > { %v2682_v31 = vrot.slane %v2666_v11, 7 }
 0x22f   : > { %v6014_v8 = vsel %vm6285_vm7, %v2681_v48, %v2682_v31  ;;  %v2460_v30 = vpop.f32.mrf.mxu2  ;;  %vm6286_vm7 = vmmov %vm6282_vm0 }
 0x230   : > { %v2461_v42 = vadd.f32 %v2460_v30, %v5815_v36 }
 0x231   : > { %v2849_v62 = vpop.f32.mrf.mxu0 }
 0x232   : > { %v2637_v46 = vpop.f32.mrf.mxu3  ;;  %v2946_v19 = vpop.f32.mrf.mxu1 }
 0x233   : > { %v2667_v39 = vadd.f32 %v2637_v46, %v2461_v42  ;;  %v6017_v26 = vadd.f32 %v2946_v19, %v2849_v62 }
 0x234   : > { %3058 = vmatmul.bf16.gmra.mxu2 %v5827_v12  ;;  %3316 = vmatmul.bf16.gmra.mxu0 %v5141_v14 }
 0x235   : > { %v2683_v6 = vrot.slane %v2667_v39, 7  ;;  %3429 = vmatmul.bf16.gmra.mxu1 %v5827_v12 }
 0x237   : > { %3219 = vmatmul.bf16.gmra.mxu3 %v5142_v13  ;;  %v6023_v48 = vsel %vm6282_vm0, %v2682_v31, %v2683_v6  ;;  %v2463_v0 = vpop.f32.mrf.mxu2 }
 0x238   : > { %v2464_v36 = vadd.f32 %v2463_v0, %v5829_v32  ;;  %v5143_v0 = vld [vmem:[#allocation2 + $0x70] sm:$0xff] }
 0x239   : > { %v2851_v44 = vpop.f32.mrf.mxu0 }
 0x23a   : > { %v2640_v37 = vpop.f32.mrf.mxu3  ;;  %v2948_v11 = vpop.f32.mrf.mxu1 }
 0x23b   : > { %v2668_v4 = vadd.f32 %v2640_v37, %v2464_v36  ;;  %v6026_v56 = vadd.f32 %v2948_v11, %v2851_v44 }
 0x23d   : > { %v2684_v30 = vrot.slane %v2668_v4, 7 }
 0x23f   : > { %v6030_v14 = vsel %vm6286_vm7, %v2683_v6, %v2684_v30  ;;  %v2465_v42 = vpop.f32.mrf.mxu2  ;;  %vm6287_vm7 = vmmov %vm6282_vm0 }
 0x240   : > { %v2466_v12 = vadd.f32 %v2465_v42, %v5843_v27 }
 0x241   : > { %v2854_v31 = vpop.f32.mrf.mxu0 }
 0x242   : > { %v2642_v46 = vpop.f32.mrf.mxu3  ;;  %v2951_v39 = vpop.f32.mrf.mxu1 }
 0x243   : > { %v2669_v62 = vadd.f32 %v2642_v46, %v2466_v12  ;;  %v6033_v19 = vadd.f32 %v2951_v39, %v2854_v31 }
 0x244   : > { %3063 = vmatmul.bf16.gmra.mxu2 %v5855_v18  ;;  %3321 = vmatmul.bf16.gmra.mxu0 %v5142_v13 }
 0x245   : > { %v2685_v32 = vrot.slane %v2669_v62, 7  ;;  %3434 = vmatmul.bf16.gmra.mxu1 %v5855_v18 }
 0x247   : > { %3224 = vmatmul.bf16.gmra.mxu3 %v5143_v0  ;;  %v6039_v6 = vsel %vm6282_vm0, %v2684_v30, %v2685_v32  ;;  %v2468_v36 = vpop.f32.mrf.mxu2 }
 0x248   : > { %v2469_v27 = vadd.f32 %v2468_v36, %v5857_v35  ;;  %v5144_v36 = vld [vmem:[#allocation2 + $0x78] sm:$0xff] }
 0x249   : > { %v2856_v44 = vpop.f32.mrf.mxu0 }
 0x24a   : > { %v2645_v37 = vpop.f32.mrf.mxu3  ;;  %v2953_v11 = vpop.f32.mrf.mxu1 }
 0x24b   : > { %v2670_v4 = vadd.f32 %v2645_v37, %v2469_v27  ;;  %v6042_v42 = vadd.f32 %v2953_v11, %v2856_v44 }
 0x24d   : > { %v2686_v12 = vrot.slane %v2670_v4, 7 }
 0x24f   : > { %v6046_v13 = vsel %vm6287_vm7, %v2685_v32, %v2686_v12  ;;  %v2470_v46 = vpop.f32.mrf.mxu2  ;;  %vm6288_vm7 = vmmov %vm6282_vm0 }
 0x250   : > { %v2471_v18 = vadd.f32 %v2470_v46, %v5871_v29 }
 0x251   : > { %v2859_v30 = vpop.f32.mrf.mxu0 }
 0x252   : > { %v2647_v31 = vpop.f32.mrf.mxu3  ;;  %v2956_v39 = vpop.f32.mrf.mxu1 }
 0x253   : > { %v2671_v62 = vadd.f32 %v2647_v31, %v2471_v18  ;;  %v6049_v52 = vadd.f32 %v2956_v39, %v2859_v30 }
 0x254   : > { %3068 = vmatmul.bf16.gmra.mxu2 %v5886_v47  ;;  %3326 = vmatmul.bf16.gmra.mxu0 %v5143_v0 }
 0x255   : > { %v2687_v35 = vrot.slane %v2671_v62, 7  ;;  %3439 = vmatmul.bf16.gmra.mxu1 %v5886_v47 }
 0x257   : > { %3229 = vmatmul.bf16.gmra.mxu3 %v5144_v36  ;;  %v6055_v32 = vsel %vm6282_vm0, %v2686_v12, %v2687_v35  ;;  %v2473_v27 = vpop.f32.mrf.mxu2 }
 0x258   : > { %v2474_v29 = vadd.f32 %v2473_v27, %v5888_v10  ;;  %v5145_v27 = vld [vmem:[#allocation2 + $0x80] sm:$0xff] }
 0x259   : > { %v2861_v44 = vpop.f32.mrf.mxu0 }
 0x25a   : > { %v2650_v37 = vpop.f32.mrf.mxu3  ;;  %v2958_v11 = vpop.f32.mrf.mxu1 }
 0x25b   : > { %v2672_v4 = vadd.f32 %v2650_v37, %v2474_v29  ;;  %v6058_v46 = vadd.f32 %v2958_v11, %v2861_v44 }
 0x25d   : > { %v2688_v18 = vrot.slane %v2672_v4, 7 }
 0x25f   : > { %v6062_v0 = vsel %vm6288_vm7, %v2687_v35, %v2688_v18  ;;  %v2475_v31 = vpop.f32.mrf.mxu2  ;;  %vm6289_vm7 = vmmov %vm6282_vm0 }
 0x260   : > { %v2476_v47 = vadd.f32 %v2475_v31, %v5899_v40 }
 0x261   : > { %v2864_v12 = vpop.f32.mrf.mxu0 }
 0x262   : > { %v2652_v30 = vpop.f32.mrf.mxu3  ;;  %v2961_v39 = vpop.f32.mrf.mxu1 }
 0x263   : > { %v2673_v62 = vadd.f32 %v2652_v30, %v2476_v47  ;;  %v6065_v51 = vadd.f32 %v2961_v39, %v2864_v12 }
 0x264   : > { %3073 = vmatmul.bf16.gmra.mxu2 %v5910_v23  ;;  %3331 = vmatmul.bf16.gmra.mxu0 %v5144_v36 }
 0x265   : > { %v2689_v10 = vrot.slane %v2673_v62, 7  ;;  %3444 = vmatmul.bf16.gmra.mxu1 %v5910_v23 }
 0x267   : > { %3234 = vmatmul.bf16.gmra.mxu3 %v5145_v27  ;;  %v6071_v35 = vsel %vm6282_vm0, %v2688_v18, %v2689_v10  ;;  %v2478_v29 = vpop.f32.mrf.mxu2 }
 0x268   : > { %v2479_v40 = vadd.f32 %v2478_v29, %v5912_v22  ;;  %v6290_v22 = vrot.slane %v5956_v16, 7 }
 0x269   : > { %v2866_v44 = vpop.f32.mrf.mxu0 }
 0x26a   : > { %v2655_v37 = vpop.f32.mrf.mxu3  ;;  %v2963_v11 = vpop.f32.mrf.mxu1 }
 0x26b   : > { %v2674_v4 = vadd.f32 %v2655_v37, %v2479_v40  ;;  %v6074_v31 = vadd.f32 %v2963_v11, %v2866_v44 }
 0x26d   : > { %v2690_v47 = vrot.slane %v2674_v4, 7 }
 0x26f   : > { %v6078_v36 = vsel %vm6289_vm7, %v2689_v10, %v2690_v47  ;;  %v2480_v30 = vpop.f32.mrf.mxu2 }
 0x270   : > { %v2481_v23 = vadd.f32 %v2480_v30, %v5923_v15 }
 0x271   : > { %v3297_v18 = vpop.f32.mrf.mxu0 }
 0x272   : > { %v2657_v12 = vpop.f32.mrf.mxu3  ;;  %v3410_v39 = vpop.f32.mrf.mxu1 }
 0x273   : > { %v2675_v62 = vadd.f32 %v2657_v12, %v2481_v23 }
 0x275   : > { %v2691_v27 = vrot.slane %v2675_v62, 7 }
 0x277   : > { %v2707_v29 = vsel %vm6282_vm0, %v2691_v27, %v6290_v22  ;;  %v6087_v40 = vsel %vm6291_vm9, %v2690_v47, %v2691_v27  ;;  %v3039_v37 = vpop.f32.mrf.mxu2 }
 0x278   : > { %6292 = vst [vmem:[#allocation9_spill] sm:$0xff] %v6087_v40  ;;  %v3079_v10 = vadd.f32 %v3039_v37, %v5935_v5  ;;  %v2708_v15 = vsel %vm5707_vm8, 0.0, %v2707_v29  ;;  %vm6293_vm8 = vcmp.lt.s32.totalorder %v5500_v28, 7 }
 0x279   : > { %v3299_v4 = vpop.f32.mrf.mxu0  ;;  %vm6294_vm9 = vmmov %vm6293_vm8 }
 0x27a   : > { %v3200_v44 = vpop.f32.mrf.mxu3  ;;  %v3095_v11 = vadd.f32 %v3079_v10, %v2708_v15  ;;  %v3412_v30 = vpop.f32.mrf.mxu1 }
 0x27b   : > { %v3298_v62 = vadd.f32 %v3297_v18, %v3200_v44 }
 0x27d   : > { %v6094_v40 = vadd.f32 %v3410_v39, %v3298_v62 }
 0x27f   : > { %v3041_v23 = vpop.f32.mrf.mxu2  ;;  %v3466_v10 = vrot.slane %v6094_v40, 1 }
 0x280   : > { %v3080_v16 = vadd.f32 %v3041_v23, %v5958_v1  ;;  %v2710_v1 = vsel %vm5523_vm1, 0.0, %v5982_v33  ;;  %vm6295_vm1 = vmmov %vm6293_vm8 }
 0x281   : > { %v3302_v25 = vpop.f32.mrf.mxu0  ;;  %vm6308_vm7 = vmmov %vm6295_vm1 }
 0x282   : > { %v3202_v12 = vpop.f32.mrf.mxu3  ;;  %v3096_v47 = vadd.f32 %v3080_v16, %v5975_v24  ;;  %v3415_v27 = vpop.f32.mrf.mxu1 }
 0x283   : > { %v3300_v22 = vadd.f32 %v3299_v4, %v3202_v12 }
 0x285   : > { %v3451_v49 = vadd.f32 %v3412_v30, %v3300_v22 }
 0x287   : > { %v3467_v5 = vrot.slane %v3451_v49, 1  ;;  %v3044_v37 = vpop.f32.mrf.mxu2 }
 0x288   : > { %v3081_v61 = vadd.f32 %v3044_v37, %v5966_v55 }
 0x289   : > { %v3304_v44 = vpop.f32.mrf.mxu0  ;;  %v3496_v24 = vsel %vm6293_vm8, %v3466_v10, %v3467_v5  ;;  %vm6314_vm8 = vmmov %vm6295_vm1 }
 0x28a   : > { %v3205_v29 = vpop.f32.mrf.mxu3  ;;  %v3097_v15 = vadd.f32 %v3081_v61, %v2710_v1  ;;  %v3417_v4 = vpop.f32.mrf.mxu1  ;;  %v3514_v30 = vadd.f32 %v3496_v24, %v3095_v11 }
 0x28b   : > { %v3303_v18 = vadd.f32 %v3302_v25, %v3205_v29 }
 0x28c   : > { %v3585_v22 = vmul.f32 %v3514_v30, %v3514_v30 }
 0x28d   : > { %v3452_v49 = vadd.f32 %v3415_v27, %v3303_v18 }
 0x28f   : > { %v3468_v39 = vrot.slane %v3452_v49, 1  ;;  %v3046_v23 = vpop.f32.mrf.mxu2 }
 0x290   : > { %v3082_v25 = vadd.f32 %v3046_v23, %v5978_v45 }
 0x291   : > { %v3495_v55 = vsel %vm6294_vm9, %v3467_v5, %v3468_v39  ;;  %v3307_v62 = vpop.f32.mrf.mxu0  ;;  %vm6315_vm9 = vmmov %vm6295_vm1 }
 0x292   : > { %v3499_v7 = vsel %vm5755_vm10, 0.0, %v3495_v55  ;;  %v3207_v33 = vpop.f32.mrf.mxu3  ;;  %v3098_v37 = vadd.f32 %v3082_v25, %v5991_v54  ;;  %v3420_v27 = vpop.f32.mrf.mxu1  ;;  %v2712_v54 = vsel %vm5551_vm2, 0.0, %v5998_v38  ;;  %vm6296_vm10 = vmmov %vm6295_vm1 }
 0x293   : > { %v3515_v16 = vadd.f32 %v3499_v7, %v3096_v47  ;;  %v3305_v12 = vadd.f32 %v3304_v44, %v3207_v33  ;;  %vm6297_vm2 = vmmov %vm6295_vm1 }
 0x295   : > { %v5026_v61 = vpack.c.bf16 %v3515_v16, %v3514_v30  ;;  %v3563_v11 = vadd.f32 %v3515_v16, %v3514_v30  ;;  %v3586_v29 = vmul.f32 %v3515_v16, %v3515_v16  ;;  %v3453_v1 = vadd.f32 %v3417_v4, %v3305_v12 }
 0x297   : > { %5070 = vst [vmem:[%s5773_s14 + $0x40] sm:$0xff] %v5026_v61   ;;  %v3601_v5 = vadd.f32 %v3586_v29, %v3585_v22  ;;  %v3469_v18 = vrot.slane %v3453_v1, 1  ;;  %v3049_v24 = vpop.f32.mrf.mxu2 }
 0x298   : > { %v3083_v47 = vadd.f32 %v3049_v24, %v5985_v63 }
 0x299   : > { %v3494_v57 = vsel %vm6295_vm1, %v3468_v39, %v3469_v18  ;;  %v3309_v55 = vpop.f32.mrf.mxu0 }
 0x29a   : > { %v3516_v45 = vadd.f32 %v3494_v57, %v3097_v15  ;;  %v3210_v44 = vpop.f32.mrf.mxu3  ;;  %v3099_v4 = vadd.f32 %v3083_v47, %v2712_v54  ;;  %v3422_v7 = vpop.f32.mrf.mxu1 }
 0x29b   : > { %v3308_v49 = vadd.f32 %v3307_v62, %v3210_v44 }
 0x29c   : > { %v3564_v30 = vadd.f32 %v3563_v11, %v3516_v45  ;;  %v3587_v23 = vmul.f32 %v3516_v45, %v3516_v45 }
 0x29d   : > { %v3454_v25 = vadd.f32 %v3420_v27, %v3308_v49 }
 0x29e   : > { %v3602_v33 = vadd.f32 %v3601_v5, %v3587_v23 }
 0x29f   : > { %v3470_v16 = vrot.slane %v3454_v25, 1  ;;  %v3051_v39 = vpop.f32.mrf.mxu2 }
 0x2a0   : > { %v3084_v3 = vadd.f32 %v3051_v39, %v5994_v20 }
 0x2a1   : > { %v3493_v15 = vsel %vm6296_vm10, %v3469_v18, %v3470_v16  ;;  %v3312_v22 = vpop.f32.mrf.mxu0 }
 0x2a2   : > { %v3501_v63 = vsel %vm5790_vm11, 0.0, %v3493_v15  ;;  %v3212_v38 = vpop.f32.mrf.mxu3  ;;  %v3100_v61 = vadd.f32 %v3084_v3, %v6007_v41  ;;  %v3425_v11 = vpop.f32.mrf.mxu1  ;;  %v2714_v41 = vsel %vm5579_vm3, 0.0, %v6014_v8  ;;  %vm6298_vm11 = vmmov %vm6295_vm1 }
 0x2a3   : > { %v3517_v12 = vadd.f32 %v3501_v63, %v3098_v37  ;;  %v3310_v62 = vadd.f32 %v3309_v55, %v3212_v38  ;;  %vm6299_vm3 = vmmov %vm6295_vm1 }
 0x2a5   : > { %v5031_v27 = vpack.c.bf16 %v3517_v12, %v3516_v45  ;;  %v3565_v29 = vadd.f32 %v3564_v30, %v3517_v12  ;;  %v3588_v1 = vmul.f32 %v3517_v12, %v3517_v12  ;;  %v3455_v5 = vadd.f32 %v3422_v7, %v3310_v62 }
 0x2a7   : > { %5071 = vst [vmem:[%s5773_s14 + $0x48] sm:$0xff] %v5031_v27   ;;  %v3603_v57 = vadd.f32 %v3602_v33, %v3588_v1  ;;  %v3471_v18 = vrot.slane %v3455_v5, 1  ;;  %v3054_v24 = vpop.f32.mrf.mxu2 }
 0x2a8   : > { %v3085_v20 = vadd.f32 %v3054_v24, %v6001_v59 }
 0x2a9   : > { %v3492_v21 = vsel %vm6297_vm2, %v3470_v16, %v3471_v18  ;;  %v3314_v45 = vpop.f32.mrf.mxu0 }
 0x2aa   : > { %v3518_v47 = vadd.f32 %v3492_v21, %v3099_v4  ;;  %v3215_v37 = vpop.f32.mrf.mxu3  ;;  %v3101_v55 = vadd.f32 %v3085_v20, %v2714_v41  ;;  %v3427_v30 = vpop.f32.mrf.mxu1 }
 0x2ab   : > { %v3313_v44 = vadd.f32 %v3312_v22, %v3215_v37 }
 0x2ac   : > { %v3566_v54 = vadd.f32 %v3565_v29, %v3518_v47  ;;  %v3589_v49 = vmul.f32 %v3518_v47, %v3518_v47 }
 0x2ad   : > { %v3456_v23 = vadd.f32 %v3425_v11, %v3313_v44 }
 0x2ae   : > { %v3604_v7 = vadd.f32 %v3603_v57, %v3589_v49 }
 0x2af   : > { %v3472_v25 = vrot.slane %v3456_v23, 1  ;;  %v3056_v33 = vpop.f32.mrf.mxu2 }
 0x2b0   : > { %v3086_v60 = vadd.f32 %v3056_v33, %v6010_v34 }
 0x2b1   : > { %v3491_v4 = vsel %vm6298_vm11, %v3471_v18, %v3472_v25  ;;  %v3317_v39 = vpop.f32.mrf.mxu0 }
 0x2b2   : > { %v3503_v59 = vsel %vm5818_vm12, 0.0, %v3491_v4  ;;  %v3217_v8 = vpop.f32.mrf.mxu3  ;;  %v3102_v63 = vadd.f32 %v3086_v60, %v6023_v48  ;;  %v3430_v3 = vpop.f32.mrf.mxu1  ;;  %v2716_v48 = vsel %vm5607_vm4, 0.0, %v6030_v14  ;;  %vm6300_vm12 = vmmov %vm6295_vm1 }
 0x2b3   : > { %v3519_v16 = vadd.f32 %v3503_v59, %v3100_v61  ;;  %v3315_v15 = vadd.f32 %v3314_v45, %v3217_v8  ;;  %vm6301_vm4 = vmmov %vm6295_vm1 }
 0x2b5   : > { %v5036_v38 = vpack.c.bf16 %v3519_v16, %v3518_v47  ;;  %v3567_v12 = vadd.f32 %v3566_v54, %v3519_v16  ;;  %v3590_v62 = vmul.f32 %v3519_v16, %v3519_v16  ;;  %v3457_v22 = vadd.f32 %v3427_v30, %v3315_v15 }
 0x2b7   : > { %5072 = vst [vmem:[%s5773_s14 + $0x50] sm:$0xff] %v5036_v38   ;;  %v3605_v11 = vadd.f32 %v3604_v7, %v3590_v62  ;;  %v3473_v27 = vrot.slane %v3457_v22, 1  ;;  %v3059_v29 = vpop.f32.mrf.mxu2 }
 0x2b8   : > { %v3087_v34 = vadd.f32 %v3059_v29, %v6017_v26 }
 0x2b9   : > { %v3490_v50 = vsel %vm6299_vm3, %v3472_v25, %v3473_v27  ;;  %v3319_v57 = vpop.f32.mrf.mxu0 }
 0x2ba   : > { %v3520_v1 = vadd.f32 %v3490_v50, %v3101_v55  ;;  %v3220_v61 = vpop.f32.mrf.mxu3  ;;  %v3103_v24 = vadd.f32 %v3087_v34, %v2716_v48  ;;  %v3432_v47 = vpop.f32.mrf.mxu1 }
 0x2bb   : > { %v3318_v5 = vadd.f32 %v3317_v39, %v3220_v61 }
 0x2bc   : > { %v3568_v18 = vadd.f32 %v3567_v12, %v3520_v1  ;;  %v3591_v21 = vmul.f32 %v3520_v1, %v3520_v1 }
 0x2bd   : > { %v3458_v20 = vadd.f32 %v3430_v3, %v3318_v5 }
 0x2be   : > { %v3606_v37 = vadd.f32 %v3605_v11, %v3591_v21 }
 0x2bf   : > { %v3474_v41 = vrot.slane %v3458_v20, 1  ;;  %v3061_v45 = vpop.f32.mrf.mxu2 }
 0x2c0   : > { %v3088_v58 = vadd.f32 %v3061_v45, %v6026_v56 }
 0x2c1   : > { %v3489_v44 = vsel %vm6300_vm12, %v3473_v27, %v3474_v41  ;;  %v3322_v55 = vpop.f32.mrf.mxu0 }
 0x2c2   : > { %v3505_v26 = vsel %vm5846_vm13, 0.0, %v3489_v44  ;;  %v3222_v14 = vpop.f32.mrf.mxu3  ;;  %v3104_v30 = vadd.f32 %v3088_v58, %v6039_v6  ;;  %v3435_v23 = vpop.f32.mrf.mxu1  ;;  %v2718_v6 = vsel %vm5635_vm5, 0.0, %v6046_v13  ;;  %vm6302_vm13 = vmmov %vm6295_vm1 }
 0x2c3   : > { %v3521_v54 = vadd.f32 %v3505_v26, %v3102_v63  ;;  %v3320_v49 = vadd.f32 %v3319_v57, %v3222_v14  ;;  %vm6303_vm5 = vmmov %vm6295_vm1 }
 0x2c5   : > { %v5041_v7 = vpack.c.bf16 %v3521_v54, %v3520_v1  ;;  %v3569_v25 = vadd.f32 %v3568_v18, %v3521_v54  ;;  %v3592_v4 = vmul.f32 %v3521_v54, %v3521_v54  ;;  %v3459_v33 = vadd.f32 %v3432_v47, %v3320_v49 }
 0x2c7   : > { %5073 = vst [vmem:[%s5773_s14 + $0x58] sm:$0xff] %v5041_v7   ;;  %v3607_v59 = vadd.f32 %v3606_v37, %v3592_v4  ;;  %v3475_v60 = vrot.slane %v3459_v33, 1  ;;  %v3064_v8 = vpop.f32.mrf.mxu2 }
 0x2c8   : > { %v3089_v56 = vadd.f32 %v3064_v8, %v6033_v19 }
 0x2c9   : > { %v3488_v43 = vsel %vm6301_vm4, %v3474_v41, %v3475_v60  ;;  %v3324_v63 = vpop.f32.mrf.mxu0 }
 0x2ca   : > { %v3522_v16 = vadd.f32 %v3488_v43, %v3103_v24  ;;  %v3225_v15 = vpop.f32.mrf.mxu3  ;;  %v3105_v12 = vadd.f32 %v3089_v56, %v2718_v6  ;;  %v3437_v62 = vpop.f32.mrf.mxu1 }
 0x2cb   : > { %v3323_v39 = vadd.f32 %v3322_v55, %v3225_v15 }
 0x2cc   : > { %v3570_v3 = vadd.f32 %v3569_v25, %v3522_v16  ;;  %v3593_v38 = vmul.f32 %v3522_v16, %v3522_v16 }
 0x2cd   : > { %v3460_v22 = vadd.f32 %v3435_v23, %v3323_v39 }
 0x2ce   : > { %v3608_v11 = vadd.f32 %v3607_v59, %v3593_v38 }
 0x2cf   : > { %v3476_v27 = vrot.slane %v3460_v22, 1  ;;  %v3066_v29 = vpop.f32.mrf.mxu2 }
 0x2d0   : > { %v3090_v53 = vadd.f32 %v3066_v29, %v6042_v42 }
 0x2d1   : > { %v3487_v50 = vsel %vm6302_vm13, %v3475_v60, %v3476_v27  ;;  %v3327_v48 = vpop.f32.mrf.mxu0 }
 0x2d2   : > { %v3507_v19 = vsel %vm5874_vm14, 0.0, %v3487_v50  ;;  %v3227_v13 = vpop.f32.mrf.mxu3  ;;  %v3106_v61 = vadd.f32 %v3090_v53, %v6055_v32  ;;  %v3440_v24 = vpop.f32.mrf.mxu1  ;;  %v2720_v32 = vsel %vm5662_vm6, 0.0, %v6062_v0  ;;  %vm6304_vm14 = vmmov %vm6295_vm1 }
 0x2d3   : > { %v3523_v1 = vadd.f32 %v3507_v19, %v3104_v30  ;;  %v3325_v34 = vadd.f32 %v3324_v63, %v3227_v13  ;;  %vm6305_vm6 = vmmov %vm6295_vm1 }
 0x2d5   : > { %v5046_v5 = vpack.c.bf16 %v3523_v1, %v3522_v16  ;;  %v3571_v57 = vadd.f32 %v3570_v3, %v3523_v1  ;;  %v3594_v18 = vmul.f32 %v3523_v1, %v3523_v1  ;;  %v3461_v21 = vadd.f32 %v3437_v62, %v3325_v34  ;;  %v6309_v1 = vld [vmem:[#allocation5_spill] sm:$0xff] }
 0x2d6   : > { %vm6310_vm0 = vnez %v6309_v1 }
 0x2d7   : > { %5074 = vst [vmem:[%s5773_s14 + $0x60] sm:$0xff] %v5046_v5   ;;  %v3609_v47 = vadd.f32 %v3608_v11, %v3594_v18  ;;  %v3477_v20 = vrot.slane %v3461_v21, 1  ;;  %v3069_v37 = vpop.f32.mrf.mxu2  ;;  %v6311_v18 = vld [vmem:[#allocation9_spill] sm:$0xff] }
 0x2d8   : > { %v3091_v42 = vadd.f32 %v3069_v37, %v6049_v52  ;;  %v6312_v37 = vld [vmem:[#allocation7_spill] sm:$0xff] }
 0x2d9   : > { %v3486_v2 = vsel %vm6303_vm5, %v3476_v27, %v3477_v20  ;;  %v3329_v55 = vpop.f32.mrf.mxu0 }
 0x2da   : > { %v3524_v41 = vadd.f32 %v3486_v2, %v3105_v12  ;;  %v3230_v44 = vpop.f32.mrf.mxu3  ;;  %v3107_v14 = vadd.f32 %v3091_v42, %v2720_v32  ;;  %v3442_v23 = vpop.f32.mrf.mxu1  ;;  %v6306_v12 = vld [vmem:[#allocation4_spill] sm:$0xff] }
 0x2db   : > { %v3328_v45 = vadd.f32 %v3327_v48, %v3230_v44  ;;  %v6313_v32 = vld [vmem:[#allocation8_spill] sm:$0xff] }
 0x2dc   : > { %v3572_v26 = vadd.f32 %v3571_v57, %v3524_v41  ;;  %v3595_v58 = vmul.f32 %v3524_v41, %v3524_v41 }
 0x2dd   : > { %v3462_v54 = vadd.f32 %v3440_v24, %v3328_v45  ;;  %v2178_v45 = vrot.slane %v6313_v32, 4 }
 0x2de   : > { %v3610_v49 = vadd.f32 %v3609_v47, %v3595_v58 }
 0x2df   : > { %v3478_v30 = vrot.slane %v3462_v54, 1  ;;  %v3071_v25 = vpop.f32.mrf.mxu2 }
 0x2e0   : > { %v3092_v9 = vadd.f32 %v3071_v25, %v6058_v46 }
 0x2e1   : > { %v3485_v7 = vsel %vm6304_vm14, %v3477_v20, %v3478_v30  ;;  %v3332_v6 = vpop.f32.mrf.mxu0 }
 0x2e2   : > { %v3509_v52 = vsel %vm5901_vm15, 0.0, %v3485_v7  ;;  %v3232_v0 = vpop.f32.mrf.mxu3  ;;  %v3108_v59 = vadd.f32 %v3092_v9, %v6071_v35  ;;  %v3445_v3 = vpop.f32.mrf.mxu1  ;;  %vm6307_vm15 = vnez %v6306_v12 }
 0x2e3   : > { %v3525_v4 = vadd.f32 %v3509_v52, %v3106_v61  ;;  %v3330_v33 = vadd.f32 %v3329_v55, %v3232_v0  ;;  %v2722_v35 = vsel %vm6307_vm15, 0.0, %v6078_v36 }
 0x2e5   : > { %v5051_v60 = vpack.c.bf16 %v3525_v4, %v3524_v41  ;;  %v3573_v43 = vadd.f32 %v3572_v26, %v3525_v4  ;;  %v3596_v8 = vmul.f32 %v3525_v4, %v3525_v4  ;;  %v3463_v16 = vadd.f32 %v3442_v23, %v3330_v33 }
 0x2e6   : > { %v2140_v41 = vrot.slane %v6312_v37, 4 }
 0x2e7   : > { %5075 = vst [vmem:[%s5773_s14 + $0x68] sm:$0xff] %v5051_v60   ;;  %v3611_v56 = vadd.f32 %v3610_v49, %v3596_v8  ;;  %v3479_v15 = vrot.slane %v3463_v16, 1  ;;  %v3074_v17 = vpop.f32.mrf.mxu2 }
 0x2e8   : > { %v3093_v46 = vadd.f32 %v3074_v17, %v6065_v51  ;;  %v2141_v58 = vadd.f32 %v2140_v41, %v6312_v37 }
 0x2e9   : > { %v3484_v39 = vsel %vm6305_vm6, %v3478_v30, %v3479_v15  ;;  %v3334_v34 = vpop.f32.mrf.mxu0  ;;  %v2179_v30 = vadd.f32 %v2178_v45, %v6313_v32 }
 0x2ea   : > { %v3526_v63 = vadd.f32 %v3484_v39, %v3107_v14  ;;  %v3235_v38 = vpop.f32.mrf.mxu3  ;;  %v3109_v27 = vadd.f32 %v3093_v46, %v2722_v35  ;;  %v3447_v57 = vpop.f32.mrf.mxu1  ;;  %v6316_v14 = vld [vmem:[#allocation6_spill] sm:$0xff]  ;;  %v2142_v9 = vrot.slane %v2141_v58, 2 }
 0x2eb   : > { %v3333_v62 = vadd.f32 %v3332_v6, %v3235_v38  ;;  %vm6317_vm1 = vnez %v6316_v14  ;;  %v2180_v28 = vrot.slane %v2179_v30, 2 }
 0x2ec   : > { %v3574_v22 = vadd.f32 %v3573_v43, %v3526_v63  ;;  %v3597_v11 = vmul.f32 %v3526_v63, %v3526_v63  ;;  %v2143_v33 = vadd.f32 %v2142_v9, %v2141_v58 }
 0x2ed   : > { %v3464_v50 = vadd.f32 %v3445_v3, %v3333_v62  ;;  %v2181_v43 = vadd.f32 %v2180_v28, %v2179_v30 }
 0x2ee   : > { %v3612_v29 = vadd.f32 %v3611_v56, %v3597_v11  ;;  %v2144_v56 = vrot.slane %v2143_v33, 1 }
 0x2ef   : > { %v3480_v19 = vrot.slane %v3464_v50, 1  ;;  %v3076_v13 = vpop.f32.mrf.mxu2  ;;  %v2182_v39 = vrot.slane %v2181_v43, 1 }
 0x2f0   : > { %v3094_v61 = vadd.f32 %v3076_v13, %v6074_v31  ;;  %v2145_v3 = vadd.f32 %v2144_v56, %v2143_v33 }
 0x2f1   : > { %v3483_v53 = vsel %vm6308_vm7, %v3479_v15, %v3480_v19  ;;  %v2183_v12 = vadd.f32 %v2182_v39, %v2181_v43 }
 0x2f2   : > { %v3511_v51 = vsel %vm6310_vm0, 0.0, %v3483_v53  ;;  %v3237_v48 = vpop.f32.mrf.mxu3  ;;  %v3110_v21 = vadd.f32 %v3094_v61, %v6311_v18 }
 0x2f3   : > { %v3527_v36 = vadd.f32 %v3511_v51, %v3108_v59  ;;  %v3335_v5 = vadd.f32 %v3334_v34, %v3237_v48 }
 0x2f5   : > { %v5056_v24 = vpack.c.bf16 %v3527_v36, %v3526_v63  ;;  %v3575_v47 = vadd.f32 %v3574_v22, %v3527_v36  ;;  %v3598_v20 = vmul.f32 %v3527_v36, %v3527_v36  ;;  %v3465_v2 = vadd.f32 %v3447_v57, %v3335_v5 }
 0x2f7   : > { %5076 = vst [vmem:[%s5773_s14 + $0x70] sm:$0xff] %v5056_v24   ;;  %v3613_v42 = vadd.f32 %v3612_v29, %v3598_v20  ;;  %v3481_v44 = vrot.slane %v3465_v2, 1 }
 0x2f9   : > { %v3482_v31 = vsel %vm6314_vm8, %v3480_v19, %v3481_v44  ;;  %v3497_v26 = vsel %vm6315_vm9, %v3481_v44, %v3466_v10 }
 0x2fa   : > { %v3513_v54 = vsel %vm6317_vm1, 0.0, %v3497_v26  ;;  %v3528_v49 = vadd.f32 %v3482_v31, %v3109_v27 }
 0x2fb   : > { %v3529_v55 = vadd.f32 %v3513_v54, %v3110_v21 }
 0x2fc   : > { %v3576_v23 = vadd.f32 %v3575_v47, %v3528_v49  ;;  %v3599_v7 = vmul.f32 %v3528_v49, %v3528_v49 }
 0x2fd   : > { %v5061_v25 = vpack.c.bf16 %v3529_v55, %v3528_v49  ;;  %v3600_v52 = vmul.f32 %v3529_v55, %v3529_v55 }
 0x2fe   : > { %v3577_v40 = vadd.f32 %v3576_v23, %v3529_v55  ;;  %v3614_v0 = vadd.f32 %v3613_v42, %v3599_v7 }
 0x2ff   : > { %5077 = vst [vmem:[%s5773_s14 + $0x78] sm:$0xff] %v5061_v25  }
 0x300   : > { %v3578_v10 = vrot.slane %v3577_v40, 4  ;;  %v3615_v4 = vadd.f32 %v3614_v0, %v3600_v52 }
 0x302   : > { %v3579_v59 = vadd.f32 %v3578_v10, %v3577_v40  ;;  %v3616_v60 = vrot.slane %v3615_v4, 4 }
 0x304   : > { %v3580_v8 = vrot.slane %v3579_v59, 2  ;;  %v3617_v16 = vadd.f32 %v3616_v60, %v3615_v4 }
 0x306   : > { %v3581_v15 = vadd.f32 %v3580_v8, %v3579_v59  ;;  %v3618_v6 = vrot.slane %v3617_v16, 2 }
 0x308   : > { %v3582_v17 = vrot.slane %v3581_v15, 1  ;;  %v3619_v63 = vadd.f32 %v3618_v6, %v3617_v16 }
 0x30a   : > { %v3583_v46 = vadd.f32 %v3582_v17, %v3581_v15  ;;  %v3620_v38 = vrot.slane %v3619_v63, 1 }
 0x30c   : > { %v3584_v35 = vadd.f32 %v3583_v46, %v2145_v3  ;;  %v3621_v62 = vadd.f32 %v3620_v38, %v3619_v63 }
 0x30e   : > { %v3622_v22 = vadd.f32 %v3621_v62, %v2183_v12  ;;  %3623 = vst [vmem:[%s363_s20] sm:$0x1] %v3584_v35 }
 0x310   : > { %3624 = vst [vmem:[%s363_s20 + $0x1] sm:$0x1] %v3622_v22 }
 0x311 PF: > { %s18_s2 = sadd.s32 1, %s5184_s2   ;;  %s6318_s21 = smov %s5176_s23 }
 0x312   : > { %p15_p7 = scmp.ge.s32.totalorder %s18_s2, 12   ;;  %s6319_s22 = smov %s5180_s24 }
 0x313   : > { %s6320_s23 = smov %s6323_s3  ;;  %s6321_s24 = smov %s6327_s4 }
 0x314   :  { %17 = sbr.rel (!%p15_p7) target bundleno = 3 (0x3), region = 94 }

// kernel: residual_conv_block_forward.4
= control target key start
LH: loop header
LB: loop body
LE: loop exit
PB: predicated region body
PF: predicated region fallthrough
CT: control target
= control target key end

     0   :  { %s5643_s23 = smov 0   ;;  %s5645_s24 = smov 0   ;;  %s6758_s0 = inlined_call_operand.vmem [shape: bf16[2,5,16,16,128], index: 0, kind: input, shape index: {}]   ;;  %s6759_s1 = inlined_call_operand.vmem [shape: bf16[5,3,3,128,128], index: 1, kind: input, shape index: {}]   ;;  %s6760_s2 = inlined_call_operand.vmem [shape: f32[1,128], index: 2, kind: input, shape index: {}]   ;;  %s6761_s3 = inlined_call_operand.vmem [shape: f32[1,128], index: 3, kind: input, shape index: {}]   ;;  %s6762_s4 = inlined_call_operand.<no memory space> [shape: f32[1], index: 4, kind: input, shape index: {}]   ;;  %s6763_s5 = inlined_call_operand.vmem [shape: bf16[2,5,16,16,128], index: 5, kind: output, shape index: {0}]   ;;  %s6764_s6 = inlined_call_operand.vmem [shape: f32[2,5,2,128], index: 6, kind: output, shape index: {1}]  }
   0x1   :  { %12 = sst [smem:[#allocation3]] %s6762_s4  ;;  %s5647_s25 = smov 0  }
   0x2   :  { %s5649_s26 = smov 0   ;;  %s5651_s27 = smov 0  }
   0x3 LB: > { %s30_s4 = sadd.s32 1, %s5594_s25  ;;  %s37_s28 = sadd.s32 1, %s5598_s26  ;;  %s5602_s27 = sphi %s5651_s27, %s18_s27   ;;  %s5598_s26 = sphi %s5649_s26, %s6857_s26   ;;  %s5594_s25 = sphi %s5647_s25, %s6856_s25   ;;  %s5590_s24 = sphi %s5645_s24, %s6855_s24   ;;  %s5586_s23 = sphi %s5643_s23, %s6854_s23  }
   0x4   : > { %p31_p0 = scmp.ge.s32.totalorder %s30_s4, 2  ;;  %p4046_p1 = scmp.ge.s32.totalorder %s5602_s27, 1 }
   0x5   : > { %p264_p2 = scmp.lt.s32.totalorder %s5602_s27, 11 }
   0x6   : > { %s6859_s4 = smov (%p31_p0, %s30_s4), 0  ;;  %s6861_s28 = smov (!%p31_p0, %s37_s28), %s5598_s26 }
   0x7   : > { %p265_p3 = pnand %p4046_p1, %p264_p2  ;;  %p39_p4 = scmp.ge.s32.totalorder %s6861_s28, 5 }
   0x9   : > { %s6863_s28 = smov (%p39_p4, %s6861_s28), 0  ;;  %268 = sbr.rel (%p265_p3) target bundleno = 785 (0x311), region = 40 }
   0xe   : > { %p326_p5 = scmp.lt.s32.totalorder %s5590_s24, 4  ;;  %p324_p6 = scmp.lt.s32.totalorder %s5586_s23, 1  ;;  %v5604_v0 = vmov 0   ;;  %v5702_v5 = vld [vmem:[%s6760_s2] ss:$0 sm:$0xff] }
   0xf   : > { %631 = vst [vmem:[#allocation2] sm:$0xf] %v5604_v0  ;;  %s501_s13 = sld [smem:[#allocation3]]  ;;  %v5710_v11 = vld [vmem:[%s6761_s3] ss:$0 sm:$0xff] }
  0x10   : > { %s6865_s24 = smov (!%p326_p5, %s5590_s24), 4  ;;  %s6867_s23 = smov (!%p324_p6, %s5586_s23), 1  ;;  %632 = vst [vmem:[#allocation2 + $0x4] sm:$0xf] %v5604_v0 }
  0x11   : > { %s5504_s29 = smul.u32 576, %s6865_s24  ;;  %s4047_s30 = sshll.u32 %s6865_s24, 5  ;;  %633 = vst [vmem:[#allocation2 + $0x88] sm:$0xf] %v5604_v0 }
  0x12   : > { %s5503_s7 = smul.u32 160, %s6867_s23  ;;  %634 = vst [vmem:[#allocation2 + $0x8c] sm:$0xf] %v5604_v0 }
  0x13   : > { %s5683_s10 = scalar_lea.vmem %s6759_s1, %s5504_s29 }
  0x14   : > { %v5063_v1 = vld [vmem:[%s5683_s10 + $0xf8] sm:$0xff]  ;;  %s5687_s11 = sadd.s32 %s5503_s7, %s4047_s30  ;;  %v5062_v3 = vld [vmem:[%s5683_s10 + $0xf0] sm:$0xff]  ;;  %v5061_v8 = vld [vmem:[%s5683_s10 + $0xe8] sm:$0xff] }
  0x15   : > { %v5054_v2 = vld [vmem:[%s5683_s10 + $0x38] sm:$0xff]  ;;  %s4048_s12 = sshll.u32 %s5687_s11, 2  ;;  %1023 = vmatpush.bf16.msra.mxu0 %v5063_v1  ;;  %5487 = vmatpush.bf16.msra.mxu2 %v5063_v1  ;;  %v5053_v4 = vld [vmem:[%s5683_s10 + $0x30] sm:$0xff]  ;;  %v5052_v15 = vld [vmem:[%s5683_s10 + $0x28] sm:$0xff]  ;;  %v5718_v22 = vstv %s501_s13 }
  0x16   : > { %s5696_s16 = scalar_lea.vmem %s6758_s0, %s4048_s12  ;;  %1126 = vmatpush.bf16.msra.mxu1 %v5054_v2  ;;  %5495 = vmatpush.bf16.msra.mxu3 %v5054_v2  ;;  %v5060_v26 = vld [vmem:[%s5683_s10 + $0xe0] sm:$0xff]  ;;  %v5059_v41 = vld [vmem:[%s5683_s10 + $0xd8] sm:$0xff]  ;;  %v5058_v58 = vld [vmem:[%s5683_s10 + $0xd0] sm:$0xff]  ;;  %s6308_s9 = scalar_lea.vmem %s6763_s5, %s4048_s12 }
  0x17   : > { %v5218_v6 = vld [vmem:[%s5696_s16] sm:$0xff]   ;;  %v5443_v14 = vld [vmem:[%s5696_s16 + $0x18] sm:$0xff]   ;;  %v5441_v25 = vld [vmem:[%s5696_s16 + $0x8] sm:$0xff]  }
  0x18   : > { %v5444_v7 = vld [vmem:[%s5696_s16 + $0x20] sm:$0xff]   ;;  %v5219_v9 = vunpack.c.l.bf16 %v5218_v6  ;;  %v5220_v10 = vunpack.c.h.bf16 %v5218_v6  ;;  %v5231_v16 = vunpack.c.l.bf16 %v5443_v14  ;;  %v5232_v17 = vunpack.c.h.bf16 %v5443_v14  ;;  %v5445_v38 = vld [vmem:[%s5696_s16 + $0x28] sm:$0xff]   ;;  %v5442_v44 = vld [vmem:[%s5696_s16 + $0x10] sm:$0xff]  }
  0x19   : > { %1024 = vmatpush.bf16.msra.mxu0 %v5062_v3  ;;  %5488 = vmatpush.bf16.msra.mxu2 %v5062_v3  ;;  %v5235_v12 = vunpack.c.l.bf16 %v5444_v7  ;;  %v5236_v13 = vunpack.c.h.bf16 %v5444_v7  ;;  %v5223_v30 = vunpack.c.l.bf16 %v5441_v25  ;;  %v5051_v31 = vld [vmem:[%s5683_s10 + $0x20] sm:$0xff]  ;;  %v5224_v35 = vunpack.c.h.bf16 %v5441_v25  ;;  %v5050_v45 = vld [vmem:[%s5683_s10 + $0x18] sm:$0xff]  ;;  %v5049_v62 = vld [vmem:[%s5683_s10 + $0x10] sm:$0xff] }
  0x1a   : > { %1127 = vmatpush.bf16.msra.mxu1 %v5053_v4  ;;  %5496 = vmatpush.bf16.msra.mxu3 %v5053_v4  ;;  %v433_v18 = vmul.f32 %v5702_v5, %v5219_v9  ;;  %v434_v19 = vmul.f32 %v5702_v5, %v5220_v10  ;;  %v439_v23 = vmul.f32 %v5702_v5, %v5231_v16  ;;  %v5239_v49 = vunpack.c.l.bf16 %v5445_v38  ;;  %v5057_v10 = vld [vmem:[%s5683_s10 + $0xc8] sm:$0xff] }
  0x1b   : > { %v441_v20 = vmul.f32 %v5702_v5, %v5235_v12  ;;  %v442_v21 = vmul.f32 %v5702_v5, %v5236_v13  ;;  %v440_v24 = vmul.f32 %v5702_v5, %v5232_v17  ;;  %v435_v53 = vmul.f32 %v5702_v5, %v5223_v30  ;;  %v5048_v16 = vld [vmem:[%s5683_s10 + $0x8] sm:$0xff] }
  0x1c   : > { %v469_v27 = vadd.f32 %v5710_v11, %v433_v18  ;;  %v470_v28 = vadd.f32 %v5710_v11, %v434_v19  ;;  %v475_v33 = vadd.f32 %v5710_v11, %v439_v23  ;;  %v436_v54 = vmul.f32 %v5702_v5, %v5224_v35  ;;  %v5079_v35 = vld [vmem:[%s5683_s10 + $0x1b8] sm:$0xff] }
  0x1d   : > { %1025 = vmatpush.bf16.msra.mxu0 %v5061_v8  ;;  %5489 = vmatpush.bf16.msra.mxu2 %v5061_v8  ;;  %v477_v29 = vadd.f32 %v5710_v11, %v441_v20  ;;  %v478_v32 = vadd.f32 %v5710_v11, %v442_v21  ;;  %v476_v34 = vadd.f32 %v5710_v11, %v440_v24  ;;  %v5240_v55 = vunpack.c.h.bf16 %v5445_v38 }
  0x1e   : > { %1128 = vmatpush.bf16.msra.mxu1 %v5052_v15  ;;  %5497 = vmatpush.bf16.msra.mxu3 %v5052_v15  ;;  %vm502_vm0 = vcmp.ge.f32.partialorder %v469_v27, 0.0  ;;  %vm503_vm1 = vcmp.ge.f32.partialorder %v470_v28, 0.0  ;;  %v535_v36 = vmul.f32 %v5718_v22, %v469_v27  ;;  %v536_v37 = vmul.f32 %v5718_v22, %v470_v28  ;;  %v5446_v15 = vld [vmem:[%s5696_s16 + $0x30] sm:$0xff]  }
  0x1f   : > { %vm510_vm2 = vcmp.ge.f32.partialorder %v477_v29, 0.0  ;;  %vm511_vm3 = vcmp.ge.f32.partialorder %v478_v32, 0.0  ;;  %v543_v39 = vmul.f32 %v5718_v22, %v477_v29  ;;  %v544_v40 = vmul.f32 %v5718_v22, %v478_v32 }
  0x20   : > { %v567_v42 = vsel %vm502_vm0, %v469_v27, %v535_v36  ;;  %v568_v43 = vsel %vm503_vm1, %v470_v28, %v536_v37  ;;  %vm508_vm4 = vcmp.ge.f32.partialorder %v475_v33, 0.0  ;;  %vm509_vm5 = vcmp.ge.f32.partialorder %v476_v34, 0.0  ;;  %v5056_v27 = vld [vmem:[%s5683_s10 + $0xc0] sm:$0xff] }
  0x21   : > { %1026 = vmatpush.bf16.msra.mxu0 %v5060_v26  ;;  %5490 = vmatpush.bf16.msra.mxu2 %v5060_v26  ;;  %v5284_v46 = vpack.c.bf16 %v568_v43, %v567_v42  ;;  %v575_v47 = vsel %vm510_vm2, %v477_v29, %v543_v39  ;;  %v576_v48 = vsel %vm511_vm3, %v478_v32, %v544_v40  ;;  %v5227_v57 = vunpack.c.l.bf16 %v5442_v44  ;;  %v5780_v42 = vld [vmem:[#allocation2] sm:$0xff] }
  0x22   : > { %1129 = vmatpush.bf16.msra.mxu1 %v5051_v31  ;;  %5498 = vmatpush.bf16.msra.mxu3 %v5051_v31  ;;  %v5304_v50 = vpack.c.bf16 %v576_v48, %v575_v47  ;;  %v541_v51 = vmul.f32 %v5718_v22, %v475_v33  ;;  %v542_v52 = vmul.f32 %v5718_v22, %v476_v34  ;;  %v5228_v2 = vunpack.c.h.bf16 %v5442_v44  ;;  %v5047_v31 = vld [vmem:[%s5683_s10] sm:$0xff]  ;;  %v5087_v47 = vld [vmem:[%s5683_s10 + $0x78] sm:$0xff] }
  0x23   : > { %5456 = vst [vmem:[#allocation2 + $0x8] sm:$0xff] %v5284_v46   ;;  %v443_v56 = vmul.f32 %v5702_v5, %v5239_v49  ;;  %v471_v61 = vadd.f32 %v5710_v11, %v435_v53  ;;  %v472_v0 = vadd.f32 %v5710_v11, %v436_v54  ;;  %v444_v1 = vmul.f32 %v5702_v5, %v5240_v55  ;;  %v5103_v48 = vld [vmem:[%s5683_s10 + $0x1f8] sm:$0xff] }
  0x24   : > { %5460 = vst [vmem:[#allocation2 + $0x28] sm:$0xff] %v5304_v50   ;;  %v573_v59 = vsel %vm508_vm4, %v475_v33, %v541_v51  ;;  %v574_v60 = vsel %vm509_vm5, %v476_v34, %v542_v52  ;;  %v437_v6 = vmul.f32 %v5702_v5, %v5227_v57  ;;  %v438_v9 = vmul.f32 %v5702_v5, %v5228_v2  ;;  %v5095_v34 = vld [vmem:[%s5683_s10 + $0x138] sm:$0xff]  ;;  %v5094_v50 = vld [vmem:[%s5683_s10 + $0x130] sm:$0xff] }
  0x25   : > { %1027 = vmatpush.bf16.msra.mxu0 %v5059_v41  ;;  %5491 = vmatpush.bf16.msra.mxu2 %v5059_v41  ;;  %v5299_v63 = vpack.c.bf16 %v574_v60, %v573_v59  ;;  %vm504_vm6 = vcmp.ge.f32.partialorder %v471_v61, 0.0  ;;  %v537_v3 = vmul.f32 %v5718_v22, %v471_v61  ;;  %v479_v4 = vadd.f32 %v5710_v11, %v443_v56  ;;  %v5447_v41 = vld [vmem:[%s5696_s16 + $0x38] sm:$0xff]   ;;  %v5078_v51 = vld [vmem:[%s5683_s10 + $0x1b0] sm:$0xff] }
  0x26   : > { %1130 = vmatpush.bf16.msra.mxu1 %v5050_v45  ;;  %5499 = vmatpush.bf16.msra.mxu3 %v5050_v45  ;;  %vm505_vm7 = vcmp.ge.f32.partialorder %v472_v0, 0.0  ;;  %v538_v7 = vmul.f32 %v5718_v22, %v472_v0  ;;  %v480_v8 = vadd.f32 %v5710_v11, %v444_v1  ;;  %v473_v14 = vadd.f32 %v5710_v11, %v437_v6  ;;  %v5086_v59 = vld [vmem:[%s5683_s10 + $0x70] sm:$0xff]  ;;  %v5101_v6 = vld [vmem:[%s5683_s10 + $0x1e8] sm:$0xff] }
  0x27   : > { %5459 = vst [vmem:[#allocation2 + $0x20] sm:$0xff] %v5299_v63   ;;  %v569_v12 = vsel %vm504_vm6, %v471_v61, %v537_v3  ;;  %vm512_vm8 = vcmp.ge.f32.partialorder %v479_v4, 0.0  ;;  %v545_v13 = vmul.f32 %v5718_v22, %v479_v4  ;;  %v474_v19 = vadd.f32 %v5710_v11, %v438_v9  ;;  %v5102_v60 = vld [vmem:[%s5683_s10 + $0x1f0] sm:$0xff]  ;;  %v5077_v63 = vld [vmem:[%s5683_s10 + $0x1a8] sm:$0xff]  ;;  %v5076_v9 = vld [vmem:[%s5683_s10 + $0x1a0] sm:$0xff] }
  0x28   : > { %v570_v17 = vsel %vm505_vm7, %v472_v0, %v538_v7  ;;  %vm513_vm9 = vcmp.ge.f32.partialorder %v480_v8, 0.0  ;;  %v546_v18 = vmul.f32 %v5718_v22, %v480_v8  ;;  %vm506_vm10 = vcmp.ge.f32.partialorder %v473_v14, 0.0 }
  0x29   : > { %1028 = vmatpush.bf16.msra.mxu0 %v5058_v58  ;;  %5492 = vmatpush.bf16.msra.mxu2 %v5058_v58  ;;  %v5289_v20 = vpack.c.bf16 %v570_v17, %v569_v12  ;;  %v577_v21 = vsel %vm512_vm8, %v479_v4, %v545_v13  ;;  %v539_v23 = vmul.f32 %v5718_v22, %v473_v14  ;;  %vm507_vm11 = vcmp.ge.f32.partialorder %v474_v19, 0.0  ;;  %v5085_v4 = vld [vmem:[%s5683_s10 + $0x68] sm:$0xff]  ;;  %v5100_v12 = vld [vmem:[%s5683_s10 + $0x1e0] sm:$0xff]  ;;  %v5091_v13 = vld [vmem:[%s5683_s10 + $0x118] sm:$0xff] }
  0x2a   : > { %1131 = vmatpush.bf16.msra.mxu1 %v5049_v62  ;;  %5500 = vmatpush.bf16.msra.mxu3 %v5049_v62  ;;  %v578_v24 = vsel %vm513_vm9, %v480_v8, %v546_v18  ;;  %v540_v25 = vmul.f32 %v5718_v22, %v474_v19  ;;  %v5243_v26 = vunpack.c.l.bf16 %v5446_v15  ;;  %v5244_v30 = vunpack.c.h.bf16 %v5446_v15  ;;  %v5774_v38 = vld [vmem:[#allocation2 + $0x8] sm:$0xff]  ;;  %v5092_v8 = vld [vmem:[%s5683_s10 + $0x120] sm:$0xff]  ;;  %v5083_v17 = vld [vmem:[%s5683_s10 + $0x58] sm:$0xff] }
  0x2b   : > { %5457 = vst [vmem:[#allocation2 + $0x10] sm:$0xff] %v5289_v20   ;;  %v5309_v28 = vpack.c.bf16 %v578_v24, %v577_v21  ;;  %v571_v29 = vsel %vm506_vm10, %v473_v14, %v539_v23  ;;  %v5776_v39 = vld [vmem:[#allocation2 + $0x28] sm:$0xff]  ;;  %v5247_v45 = vunpack.c.l.bf16 %v5447_v41  ;;  %v5248_v46 = vunpack.c.h.bf16 %v5447_v41  ;;  %v5075_v14 = vld [vmem:[%s5683_s10 + $0x198] sm:$0xff]  ;;  %v5074_v20 = vld [vmem:[%s5683_s10 + $0x190] sm:$0xff] }
  0x2c   : > { %v572_v32 = vsel %vm507_vm11, %v474_v19, %v540_v25  ;;  %v445_v33 = vmul.f32 %v5702_v5, %v5243_v26  ;;  %v446_v37 = vmul.f32 %v5702_v5, %v5244_v30  ;;  %v5093_v62 = vld [vmem:[%s5683_s10 + $0x128] sm:$0xff]  ;;  %v5099_v18 = vld [vmem:[%s5683_s10 + $0x1d8] sm:$0xff]  ;;  %v5090_v19 = vld [vmem:[%s5683_s10 + $0x110] sm:$0xff] }
  0x2d   : > { %1029 = vmatpush.bf16.msra.mxu0 %v5057_v10  ;;  %5493 = vmatpush.bf16.msra.mxu2 %v5057_v10  ;;  %5461 = vst [vmem:[#allocation2 + $0x30] sm:$0xff] %v5309_v28   ;;  %v5294_v36 = vpack.c.bf16 %v572_v32, %v571_v29  ;;  %v447_v53 = vmul.f32 %v5702_v5, %v5247_v45  ;;  %v5084_v10 = vld [vmem:[%s5683_s10 + $0x60] sm:$0xff]  ;;  %v5082_v21 = vld [vmem:[%s5683_s10 + $0x50] sm:$0xff]  ;;  %v5089_v24 = vld [vmem:[%s5683_s10 + $0x108] sm:$0xff] }
  0x2e   : > { %1132 = vmatpush.bf16.msra.mxu1 %v5048_v16  ;;  %5501 = vmatpush.bf16.msra.mxu3 %v5048_v16  ;;  %v481_v40 = vadd.f32 %v5710_v11, %v445_v33  ;;  %v5782_v43 = vld [vmem:[#allocation2 + $0x20] sm:$0xff]  ;;  %v482_v44 = vadd.f32 %v5710_v11, %v446_v37  ;;  %v448_v54 = vmul.f32 %v5702_v5, %v5248_v46  ;;  %v5098_v23 = vld [vmem:[%s5683_s10 + $0x1d0] sm:$0xff]  ;;  %v5073_v25 = vld [vmem:[%s5683_s10 + $0x188] sm:$0xff] }
  0x2f   : > { %5458 = vst [vmem:[#allocation2 + $0x18] sm:$0xff] %v5294_v36   ;;  %v483_v57 = vadd.f32 %v5710_v11, %v447_v53  ;;  %v5081_v26 = vld [vmem:[%s5683_s10 + $0x48] sm:$0xff]  ;;  %v5088_v28 = vld [vmem:[%s5683_s10 + $0x100] sm:$0xff]  ;;  %v5127_v36 = vld [vmem:[%s5683_s10 + $0x238] sm:$0xff] }
  0x30   : > { %vm514_vm12 = vcmp.ge.f32.partialorder %v481_v40, 0.0  ;;  %v547_v49 = vmul.f32 %v5718_v22, %v481_v40  ;;  %vm515_vm13 = vcmp.ge.f32.partialorder %v482_v44, 0.0  ;;  %v548_v52 = vmul.f32 %v5718_v22, %v482_v44  ;;  %v5072_v29 = vld [vmem:[%s5683_s10 + $0x180] sm:$0xff]  ;;  %v5152_v37 = vld [vmem:[%s5683_s10 + $0xf8] sm:$0xff]  ;;  %v5110_v41 = vld [vmem:[%s5683_s10 + $0xb0] sm:$0xff] }
  0x31   : > { %1030 = vmatpush.bf16.msra.mxu0 %v5056_v27  ;;  %5494 = vmatpush.bf16.msra.mxu2 %v5056_v27  ;;  %v484_v58 = vadd.f32 %v5710_v11, %v448_v54  ;;  %v549_v0 = vmul.f32 %v5718_v22, %v483_v57  ;;  %vm516_vm14 = vcmp.ge.f32.partialorder %v483_v57, 0.0  ;;  %v5097_v27 = vld [vmem:[%s5683_s10 + $0x1c8] sm:$0xff]  ;;  %v5080_v30 = vld [vmem:[%s5683_s10 + $0x40] sm:$0xff]  ;;  %v5126_v45 = vld [vmem:[%s5683_s10 + $0x230] sm:$0xff] }
  0x32   : > { %1133 = vmatpush.bf16.msra.mxu1 %v5047_v31  ;;  %5502 = vmatpush.bf16.msra.mxu3 %v5047_v31  ;;  %v579_v55 = vsel %vm514_vm12, %v481_v40, %v547_v49  ;;  %v580_v56 = vsel %vm515_vm13, %v482_v44, %v548_v52  ;;  %v5813_v15 = vld [vmem:[#allocation2 + $0x10] sm:$0xff]  ;;  %v5096_v31 = vld [vmem:[%s5683_s10 + $0x1c0] sm:$0xff]  ;;  %v5117_v49 = vld [vmem:[%s5683_s10 + $0x168] sm:$0xff] }
  0x33   : > { %v5314_v61 = vpack.c.bf16 %v580_v56, %v579_v55  ;;  %v550_v1 = vmul.f32 %v5718_v22, %v484_v58  ;;  %vm517_vm15 = vcmp.ge.f32.partialorder %v484_v58, 0.0  ;;  %v581_v2 = vsel %vm516_vm14, %v483_v57, %v549_v0  ;;  %v5118_v44 = vld [vmem:[%s5683_s10 + $0x170] sm:$0xff]  ;;  %v5108_v53 = vld [vmem:[%s5683_s10 + $0xa0] sm:$0xff] }
  0x34   : > { %1031 = vmatmul.bf16.vlgmr.msra.gmra.mxu0 %v5774_v38  ;;  %1051 = vmatmul.bf16.vlgmr.msra.gmra.mxu2 %v5776_v39  ;;  %v5815_v16 = vld [vmem:[#allocation2 + $0x30] sm:$0xff]  ;;  %v5116_v54 = vld [vmem:[%s5683_s10 + $0x160] sm:$0xff] }
  0x35   : > { %1304 = vmatpush.bf16.msrb.mxu2 %v5079_v35  ;;  %1134 = vmatmul.bf16.vlgmr.msra.gmra.mxu1 %v5780_v42  ;;  %5462 = vst [vmem:[#allocation2 + $0x38] sm:$0xff] %v5314_v61   ;;  %v582_v3 = vsel %vm517_vm15, %v484_v58, %v550_v1  ;;  %v5119_v35 = vld [vmem:[%s5683_s10 + $0x178] sm:$0xff]  ;;  %v5151_v46 = vld [vmem:[%s5683_s10 + $0xf0] sm:$0xff]  ;;  %v5124_v55 = vld [vmem:[%s5683_s10 + $0x220] sm:$0xff] }
  0x36   : > { %1564 = vmatpush.bf16.msrb.mxu3 %v5095_v34  ;;  %1661 = vmatpush.bf16.msrb.mxu0 %v5087_v47  ;;  %v5319_v7 = vpack.c.bf16 %v582_v3, %v581_v2  ;;  %v5835_v32 = vld [vmem:[#allocation2 + $0x18] sm:$0xff]  ;;  %v5857_v47 = vld [vmem:[#allocation2 + $0x10] sm:$0xff]  ;;  %v5149_v56 = vld [vmem:[%s5683_s10 + $0xe0] sm:$0xff] }
  0x37   : > { %1154 = vmatmul.bf16.vlgmr.msra.gmra.mxu3 %v5782_v43  ;;  %1775 = vmatpush.bf16.msrb.mxu1 %v5103_v48  ;;  %v5111_v34 = vld [vmem:[%s5683_s10 + $0xb8] sm:$0xff]  ;;  %v5109_v48 = vld [vmem:[%s5683_s10 + $0xa8] sm:$0xff]  ;;  %v5877_v57 = vld [vmem:[#allocation2 + $0x20] sm:$0xff] }
  0x38   : > { %5463 = vst [vmem:[#allocation2 + $0x40] sm:$0xff] %v5319_v7   ;;  %v5867_v52 = vld [vmem:[#allocation2 + $0x18] sm:$0xff]  ;;  %v5114_v0 = vld [vmem:[%s5683_s10 + $0x150] sm:$0xff] }
  0x39   : > { %1305 = vmatpush.bf16.msrb.mxu2 %v5078_v51  ;;  %v5150_v51 = vld [vmem:[%s5683_s10 + $0xe8] sm:$0xff]  ;;  %v5107_v58 = vld [vmem:[%s5683_s10 + $0x98] sm:$0xff]  ;;  %v5122_v1 = vld [vmem:[%s5683_s10 + $0x210] sm:$0xff] }
  0x3a   : > { %1565 = vmatpush.bf16.msrb.mxu3 %v5094_v50  ;;  %1662 = vmatpush.bf16.msrb.mxu0 %v5086_v59  ;;  %v5125_v50 = vld [vmem:[%s5683_s10 + $0x228] sm:$0xff]  ;;  %v5115_v59 = vld [vmem:[%s5683_s10 + $0x158] sm:$0xff]  ;;  %v5147_v2 = vld [vmem:[%s5683_s10 + $0xd0] sm:$0xff] }
  0x3b   : > { %1776 = vmatpush.bf16.msrb.mxu1 %v5102_v60  ;;  %v5123_v60 = vld [vmem:[%s5683_s10 + $0x218] sm:$0xff]  ;;  %v5897_v3 = vld [vmem:[#allocation2 + $0x30] sm:$0xff] }
  0x3c   : > { %v5837_v33 = vld [vmem:[#allocation2 + $0x38] sm:$0xff] }
  0x3d   : > { %1306 = vmatpush.bf16.msrb.mxu2 %v5077_v63  ;;  %v5148_v61 = vld [vmem:[%s5683_s10 + $0xd8] sm:$0xff]  ;;  %v5106_v63 = vld [vmem:[%s5683_s10 + $0x90] sm:$0xff] }
  0x3e   : > { %1566 = vmatpush.bf16.msrb.mxu3 %v5093_v62  ;;  %1663 = vmatpush.bf16.msrb.mxu0 %v5085_v4  ;;  %v5887_v62 = vld [vmem:[#allocation2 + $0x28] sm:$0xff]  ;;  %v5448_v4 = vld [vmem:[%s5696_s16 + $0x40] sm:$0xff]  }
  0x3f   : > { %1777 = vmatpush.bf16.msrb.mxu1 %v5101_v6  ;;  %v5847_v40 = vld [vmem:[#allocation2 + $0x40] sm:$0xff]  ;;  %v5251_v7 = vunpack.c.l.bf16 %v5448_v4 }
  0x41   : > { %1307 = vmatpush.bf16.msrb.mxu2 %v5076_v9 }
  0x42   : > { %1567 = vmatpush.bf16.msrb.mxu3 %v5092_v8  ;;  %1664 = vmatpush.bf16.msrb.mxu0 %v5084_v10  ;;  %v5252_v8 = vunpack.c.h.bf16 %v5448_v4 }
  0x43   : > { %1778 = vmatpush.bf16.msrb.mxu1 %v5100_v12  ;;  %v449_v12 = vmul.f32 %v5702_v5, %v5251_v7 }
  0x44   : > { %1036 = vmatmul.bf16.gmra.mxu0 %v5813_v15  ;;  %1056 = vmatmul.bf16.gmra.mxu2 %v5815_v16 }
  0x45   : > { %1308 = vmatpush.bf16.msrb.mxu2 %v5075_v14  ;;  %1139 = vmatmul.bf16.gmra.mxu1 %v5774_v38  ;;  %v5105_v14 = vld [vmem:[%s5683_s10 + $0x88] sm:$0xff] }
  0x46   : > { %1568 = vmatpush.bf16.msrb.mxu3 %v5091_v13  ;;  %1665 = vmatpush.bf16.msrb.mxu0 %v5083_v17  ;;  %v450_v13 = vmul.f32 %v5702_v5, %v5252_v8  ;;  %v485_v17 = vadd.f32 %v5710_v11, %v449_v12 }
  0x47   : > { %1159 = vmatmul.bf16.gmra.mxu3 %v5776_v39  ;;  %1779 = vmatpush.bf16.msrb.mxu1 %v5099_v18 }
  0x48   : > { %v486_v18 = vadd.f32 %v5710_v11, %v450_v13  ;;  %vm518_vm0 = vcmp.ge.f32.partialorder %v485_v17, 0.0  ;;  %v5168_v13 = vld [vmem:[%s5683_s10 + $0x1b8] sm:$0xff] }
  0x49   : > { %1309 = vmatpush.bf16.msrb.mxu2 %v5074_v20  ;;  %v551_v20 = vmul.f32 %v5718_v22, %v485_v17 }
  0x4a   : > { %1569 = vmatpush.bf16.msrb.mxu3 %v5090_v19  ;;  %1666 = vmatpush.bf16.msrb.mxu0 %v5082_v21  ;;  %v552_v21 = vmul.f32 %v5718_v22, %v486_v18  ;;  %vm519_vm1 = vcmp.ge.f32.partialorder %v486_v18, 0.0 }
  0x4b   : > { %1780 = vmatpush.bf16.msrb.mxu1 %v5098_v23 }
  0x4d   : > { %1310 = vmatpush.bf16.msrb.mxu2 %v5073_v25 }
  0x4e   : > { %1570 = vmatpush.bf16.msrb.mxu3 %v5089_v24  ;;  %1667 = vmatpush.bf16.msrb.mxu0 %v5081_v26  ;;  %v583_v26 = vsel %vm518_vm0, %v485_v17, %v551_v20 }
  0x4f   : > { %1781 = vmatpush.bf16.msrb.mxu1 %v5097_v27  ;;  %v584_v27 = vsel %vm519_vm1, %v486_v18, %v552_v21 }
  0x51   : > { %1311 = vmatpush.bf16.msrb.mxu2 %v5072_v29  ;;  %v5324_v29 = vpack.c.bf16 %v584_v27, %v583_v26 }
  0x52   : > { %1571 = vmatpush.bf16.msrb.mxu3 %v5088_v28  ;;  %1668 = vmatpush.bf16.msrb.mxu0 %v5080_v30 }
  0x53   : > { %1782 = vmatpush.bf16.msrb.mxu1 %v5096_v31  ;;  %v5113_v31 = vld [vmem:[%s5683_s10 + $0x148] sm:$0xff]  ;;  %5464 = vst [vmem:[#allocation2 + $0x48] sm:$0xff] %v5324_v29  }
  0x54   : > { %1041 = vmatmul.bf16.gmra.mxu0 %v5835_v32  ;;  %1061 = vmatmul.bf16.gmra.mxu2 %v5837_v33 }
  0x55   : > { %1144 = vmatmul.bf16.gmra.mxu1 %v5813_v15  ;;  %1938 = vmatpush.bf16.msra.mxu2 %v5119_v35  ;;  %v5146_v35 = vld [vmem:[%s5683_s10 + $0xc8] sm:$0xff] }
  0x56   : > { %2035 = vmatpush.bf16.msra.mxu3 %v5111_v34  ;;  %2149 = vmatpush.bf16.msra.mxu0 %v5127_v36  ;;  %v5121_v34 = vld [vmem:[%s5683_s10 + $0x208] sm:$0xff] }
  0x57   : > { %1164 = vmatmul.bf16.gmra.mxu3 %v5815_v16  ;;  %2565 = vmatpush.bf16.msra.mxu1 %v5152_v37 }
  0x59   : > { %1939 = vmatpush.bf16.msra.mxu2 %v5118_v44 }
  0x5a   : > { %2036 = vmatpush.bf16.msra.mxu3 %v5110_v41  ;;  %2150 = vmatpush.bf16.msra.mxu0 %v5126_v45  ;;  %v5920_v41 = vld [vmem:[#allocation2 + $0x38] sm:$0xff] }
  0x5b   : > { %2566 = vmatpush.bf16.msra.mxu1 %v5151_v46 }
  0x5d   : > { %1940 = vmatpush.bf16.msra.mxu2 %v5117_v49  ;;  %v5104_v49 = vld [vmem:[%s5683_s10 + $0x80] sm:$0xff] }
  0x5e   : > { %2037 = vmatpush.bf16.msra.mxu3 %v5109_v48  ;;  %2151 = vmatpush.bf16.msra.mxu0 %v5125_v50 }
  0x5f   : > { %2567 = vmatpush.bf16.msra.mxu1 %v5150_v51 }
  0x61   : > { %1941 = vmatpush.bf16.msra.mxu2 %v5116_v54 }
  0x62   : > { %2038 = vmatpush.bf16.msra.mxu3 %v5108_v53  ;;  %2152 = vmatpush.bf16.msra.mxu0 %v5124_v55 }
  0x63   : > { %2568 = vmatpush.bf16.msra.mxu1 %v5149_v56 }
  0x64   : > { %1046 = vmatmul.bf16.gmra.mxu0 %v5782_v43  ;;  %1066 = vmatmul.bf16.gmra.mxu2 %v5847_v40 }
  0x65   : > { %1149 = vmatmul.bf16.gmra.mxu1 %v5835_v32  ;;  %1942 = vmatpush.bf16.msra.mxu2 %v5115_v59  ;;  %v5120_v59 = vld [vmem:[%s5683_s10 + $0x200] sm:$0xff] }
  0x66   : > { %2039 = vmatpush.bf16.msra.mxu3 %v5107_v58  ;;  %2153 = vmatpush.bf16.msra.mxu0 %v5123_v60  ;;  %v5112_v58 = vld [vmem:[%s5683_s10 + $0x140] sm:$0xff] }
  0x67   : > { %1169 = vmatmul.bf16.gmra.mxu3 %v5837_v33  ;;  %2569 = vmatpush.bf16.msra.mxu1 %v5148_v61  ;;  %v5145_v60 = vld [vmem:[%s5683_s10 + $0xc0] sm:$0xff] }
  0x69   : > { %1943 = vmatpush.bf16.msra.mxu2 %v5114_v0  ;;  %v5449_v0 = vld [vmem:[%s5696_s16 + $0x48] sm:$0xff]  }
  0x6a   : > { %2040 = vmatpush.bf16.msra.mxu3 %v5106_v63  ;;  %2154 = vmatpush.bf16.msra.mxu0 %v5122_v1  ;;  %v5938_v63 = vld [vmem:[#allocation2 + $0x40] sm:$0xff]  ;;  %v5255_v4 = vunpack.c.l.bf16 %v5449_v0 }
  0x6b   : > { %2570 = vmatpush.bf16.msra.mxu1 %v5147_v2 }
  0x6d   : > { %1944 = vmatpush.bf16.msra.mxu2 %v5113_v31  ;;  %v5143_v31 = vld [vmem:[%s5683_s10 + $0x38] sm:$0xff] }
  0x6e   : > { %2041 = vmatpush.bf16.msra.mxu3 %v5105_v14  ;;  %2155 = vmatpush.bf16.msra.mxu0 %v5121_v34  ;;  %v5184_v34 = vld [vmem:[%s5683_s10 + $0x138] sm:$0xff] }
  0x6f   : > { %2571 = vmatpush.bf16.msra.mxu1 %v5146_v35  ;;  %v5176_v35 = vld [vmem:[%s5683_s10 + $0x78] sm:$0xff] }
  0x71   : > { %1945 = vmatpush.bf16.msra.mxu2 %v5112_v58 }
  0x72   : > { %2042 = vmatpush.bf16.msra.mxu3 %v5104_v49  ;;  %2156 = vmatpush.bf16.msra.mxu0 %v5120_v59 }
  0x73   : > { %2572 = vmatpush.bf16.msra.mxu1 %v5145_v60 }
  0x74   : > { %1312 = vmatmul.bf16.vlgmr.msrb.gmra.mxu2 %v5857_v47  ;;  %1669 = vmatmul.bf16.vlgmr.msrb.gmra.mxu0 %v5780_v42 }
  0x75   : > { %1783 = vmatmul.bf16.vlgmr.msrb.gmra.mxu1 %v5857_v47  ;;  %2668 = vmatpush.bf16.msrb.mxu2 %v5143_v31 }
  0x76   : > { %3054 = vmatpush.bf16.msrb.mxu0 %v5184_v34 }
  0x77   : > { %1572 = vmatmul.bf16.vlgmr.msrb.gmra.mxu3 %v5774_v38  ;;  %3151 = vmatpush.bf16.msrb.mxu1 %v5176_v35 }
  0x78   : > { %2845 = vmatpush.bf16.msrb.mxu3 %v5168_v13 }
  0x84   : > { %1317 = vmatmul.bf16.gmra.mxu2 %v5867_v52  ;;  %1674 = vmatmul.bf16.gmra.mxu0 %v5774_v38 }
  0x85   : > { %1788 = vmatmul.bf16.gmra.mxu1 %v5867_v52 }
  0x87   : > { %1577 = vmatmul.bf16.gmra.mxu3 %v5813_v15 }
  0x94   : > { %1322 = vmatmul.bf16.gmra.mxu2 %v5877_v57  ;;  %1679 = vmatmul.bf16.gmra.mxu0 %v5813_v15 }
  0x95   : > { %1793 = vmatmul.bf16.gmra.mxu1 %v5877_v57 }
  0x97   : > { %1582 = vmatmul.bf16.gmra.mxu3 %v5835_v32 }
  0xa4   : > { %1327 = vmatmul.bf16.gmra.mxu2 %v5887_v62  ;;  %1684 = vmatmul.bf16.gmra.mxu0 %v5835_v32 }
  0xa5   : > { %1798 = vmatmul.bf16.gmra.mxu1 %v5887_v62 }
  0xa7   : > { %1587 = vmatmul.bf16.gmra.mxu3 %v5782_v43 }
  0xb1   : > { %v1032_v6 = vpop.f32.mrf.mxu0 }
  0xb2   : > { %v1135_v9 = vpop.f32.mrf.mxu1 }
  0xb3   : > { %v5900_v10 = vadd.f32 %v1135_v9, %v1032_v6  ;;  %v5256_v6 = vunpack.c.h.bf16 %v5449_v0  ;;  %v451_v9 = vmul.f32 %v5702_v5, %v5255_v4 }
  0xb4   : > { %1332 = vmatmul.bf16.gmra.mxu2 %v5897_v3  ;;  %1689 = vmatmul.bf16.gmra.mxu0 %v5782_v43 }
  0xb5   : > { %1803 = vmatmul.bf16.gmra.mxu1 %v5897_v3  ;;  %v452_v12 = vmul.f32 %v5702_v5, %v5256_v6  ;;  %v487_v14 = vadd.f32 %v5710_v11, %v451_v9 }
  0xb7   : > { %1592 = vmatmul.bf16.gmra.mxu3 %v5776_v39  ;;  %v1052_v19 = vpop.f32.mrf.mxu2  ;;  %v488_v17 = vadd.f32 %v5710_v11, %v452_v12  ;;  %vm520_vm2 = vcmp.ge.f32.partialorder %v487_v14, 0.0 }
  0xb9   : > { %v1034_v25 = vpop.f32.mrf.mxu0  ;;  %v554_v20 = vmul.f32 %v5718_v22, %v488_v17  ;;  %vm521_vm3 = vcmp.ge.f32.partialorder %v488_v17, 0.0 }
  0xba   : > { %v1155_v23 = vpop.f32.mrf.mxu3  ;;  %v1137_v28 = vpop.f32.mrf.mxu1 }
  0xbb   : > { %v5913_v24 = vadd.f32 %v1155_v23, %v1052_v19  ;;  %v5915_v30 = vadd.f32 %v1137_v28, %v1034_v25  ;;  %v553_v19 = vmul.f32 %v5718_v22, %v487_v14  ;;  %v586_v26 = vsel %vm521_vm3, %v488_v17, %v554_v20  ;;  %v5175_v20 = vld [vmem:[%s5683_s10 + $0x70] sm:$0xff] }
  0xbc   : > { %3152 = vmatpush.bf16.msrb.mxu1 %v5175_v20 }
  0xbd   : > { %v585_v25 = vsel %vm520_vm2, %v487_v14, %v553_v19  ;;  %v5183_v19 = vld [vmem:[%s5683_s10 + $0x130] sm:$0xff] }
  0xbe   : > { %v5329_v28 = vpack.c.bf16 %v586_v26, %v585_v25  ;;  %3055 = vmatpush.bf16.msrb.mxu0 %v5183_v19  ;;  %v5451_v25 = vld [vmem:[%s5696_s16 + $0x58] sm:$0xff]  }
  0xbf   : > { %v1054_v36 = vpop.f32.mrf.mxu2  ;;  %v5263_v31 = vunpack.c.l.bf16 %v5451_v25  ;;  %v5264_v34 = vunpack.c.h.bf16 %v5451_v25 }
  0xc0   : > { %5465 = vst [vmem:[#allocation2 + $0x50] sm:$0xff] %v5329_v28   ;;  %v5991_v28 = vld [vmem:[#allocation2 + $0x48] sm:$0xff] }
  0xc1   : > { %v1037_v45 = vpop.f32.mrf.mxu0 }
  0xc2   : > { %v1157_v37 = vpop.f32.mrf.mxu3  ;;  %v1140_v46 = vpop.f32.mrf.mxu1 }
  0xc3   : > { %v5922_v44 = vadd.f32 %v1157_v37, %v1054_v36  ;;  %v5924_v48 = vadd.f32 %v1140_v46, %v1037_v45  ;;  %v5963_v45 = vld [vmem:[#allocation2 + $0x48] sm:$0xff]  ;;  %v5450_v46 = vld [vmem:[%s5696_s16 + $0x50] sm:$0xff]  }
  0xc4   : > { %1337 = vmatmul.bf16.gmra.mxu2 %v5920_v41  ;;  %1694 = vmatmul.bf16.gmra.mxu0 %v5776_v39 }
  0xc5   : > { %1808 = vmatmul.bf16.gmra.mxu1 %v5920_v41 }
  0xc7   : > { %1597 = vmatmul.bf16.gmra.mxu3 %v5815_v16  ;;  %v1057_v50 = vpop.f32.mrf.mxu2  ;;  %v6017_v20 = vld [vmem:[#allocation2 + $0x50] sm:$0xff] }
  0xc9   : > { %v1039_v54 = vpop.f32.mrf.mxu0 }
  0xca   : > { %v1160_v51 = vpop.f32.mrf.mxu3  ;;  %v1142_v55 = vpop.f32.mrf.mxu1 }
  0xcb   : > { %v5931_v53 = vadd.f32 %v1160_v51, %v1057_v50  ;;  %v5933_v56 = vadd.f32 %v1142_v55, %v1039_v54  ;;  %v5259_v51 = vunpack.c.l.bf16 %v5450_v46  ;;  %v5260_v54 = vunpack.c.h.bf16 %v5450_v46  ;;  %v5166_v46 = vld [vmem:[%s5683_s10 + $0x1a8] sm:$0xff] }
  0xcd   : > { %v453_v59 = vmul.f32 %v5702_v5, %v5259_v51  ;;  %v454_v60 = vmul.f32 %v5702_v5, %v5260_v54 }
  0xcf   : > { %v1059_v39 = vpop.f32.mrf.mxu2  ;;  %v490_v0 = vadd.f32 %v5710_v11, %v454_v60 }
  0xd1   : > { %v1042_v2 = vpop.f32.mrf.mxu0  ;;  %v556_v6 = vmul.f32 %v5718_v22, %v490_v0  ;;  %vm523_vm5 = vcmp.ge.f32.partialorder %v490_v0, 0.0 }
  0xd2   : > { %v1162_v61 = vpop.f32.mrf.mxu3  ;;  %v1145_v7 = vpop.f32.mrf.mxu1 }
  0xd3   : > { %v5941_v1 = vadd.f32 %v1162_v61, %v1059_v39  ;;  %v5943_v8 = vadd.f32 %v1145_v7, %v1042_v2  ;;  %v5167_v39 = vld [vmem:[%s5683_s10 + $0x1b0] sm:$0xff]  ;;  %v489_v61 = vadd.f32 %v5710_v11, %v453_v59  ;;  %v588_v12 = vsel %vm523_vm5, %v490_v0, %v556_v6 }
  0xd4   : > { %1342 = vmatmul.bf16.gmra.mxu2 %v5938_v63  ;;  %1699 = vmatmul.bf16.gmra.mxu0 %v5815_v16 }
  0xd5   : > { %1813 = vmatmul.bf16.gmra.mxu1 %v5938_v63  ;;  %2846 = vmatpush.bf16.msrb.mxu3 %v5167_v39  ;;  %v555_v4 = vmul.f32 %v5718_v22, %v489_v61  ;;  %vm522_vm4 = vcmp.ge.f32.partialorder %v489_v61, 0.0  ;;  %v667_v39 = vlaneseq }
  0xd7   : > { %1602 = vmatmul.bf16.gmra.mxu3 %v5837_v33  ;;  %v1062_v18 = vpop.f32.mrf.mxu2  ;;  %v587_v9 = vsel %vm522_vm4, %v489_v61, %v555_v4  ;;  %v6009_v6 = vshrl.u32 %v667_v39, 7 }
  0xd8   : > { %v5334_v14 = vpack.c.bf16 %v588_v12, %v587_v9 }
  0xd9   : > { %v1044_v23 = vpop.f32.mrf.mxu0  ;;  %2847 = vmatpush.bf16.msrb.mxu3 %v5166_v46  ;;  %vm6767_vm8 = vcmp.lt.s32.totalorder %v6009_v6, 1 }
  0xda   : > { %v1165_v21 = vpop.f32.mrf.mxu3  ;;  %v1147_v27 = vpop.f32.mrf.mxu1  ;;  %5466 = vst [vmem:[#allocation2 + $0x58] sm:$0xff] %v5334_v14   ;;  %v5452_v14 = vld [vmem:[%s5696_s16 + $0x60] sm:$0xff]  }
  0xdb   : > { %v5956_v16 = vadd.f32 %v1165_v21, %v1062_v18  ;;  %v5958_v29 = vadd.f32 %v1147_v27, %v1044_v23  ;;  %v5142_v18 = vld [vmem:[%s5683_s10 + $0x30] sm:$0xff] }
  0xdc   : > { %2669 = vmatpush.bf16.msrb.mxu2 %v5142_v18 }
  0xdf   : > { %v1064_v36 = vpop.f32.mrf.mxu2 }
  0xe1   : > { %v1047_v50 = vpop.f32.mrf.mxu0 }
  0xe2   : > { %v1167_v37 = vpop.f32.mrf.mxu3  ;;  %v1150_v55 = vpop.f32.mrf.mxu1 }
  0xe3   : > { %v5966_v49 = vadd.f32 %v1167_v37, %v1064_v36  ;;  %v5968_v58 = vadd.f32 %v1150_v55, %v1047_v50  ;;  %v455_v36 = vmul.f32 %v5702_v5, %v5263_v31  ;;  %v456_v37 = vmul.f32 %v5702_v5, %v5264_v34 }
  0xe4   : > { %1347 = vmatmul.bf16.gmra.mxu2 %v5963_v45  ;;  %1704 = vmatmul.bf16.gmra.mxu0 %v5837_v33 }
  0xe5   : > { %1818 = vmatmul.bf16.gmra.mxu1 %v5963_v45  ;;  %v491_v50 = vadd.f32 %v5710_v11, %v455_v36  ;;  %v492_v51 = vadd.f32 %v5710_v11, %v456_v37 }
  0xe7   : > { %1607 = vmatmul.bf16.gmra.mxu3 %v5847_v40  ;;  %v1067_v2 = vpop.f32.mrf.mxu2  ;;  %v557_v55 = vmul.f32 %v5718_v22, %v491_v50  ;;  %v558_v5 = vmul.f32 %v5718_v22, %v492_v51  ;;  %vm524_vm6 = vcmp.ge.f32.partialorder %v491_v50, 0.0  ;;  %vm525_vm7 = vcmp.ge.f32.partialorder %v492_v51, 0.0 }
  0xe9   : > { %v1049_v40 = vpop.f32.mrf.mxu0  ;;  %v589_v11 = vsel %vm524_vm6, %v491_v50, %v557_v55  ;;  %v590_v61 = vsel %vm525_vm7, %v492_v51, %v558_v5  ;;  %v5165_v51 = vld [vmem:[%s5683_s10 + $0x1a0] sm:$0xff] }
  0xea   : > { %v1170_v7 = vpop.f32.mrf.mxu3  ;;  %v1152_v13 = vpop.f32.mrf.mxu1  ;;  %2848 = vmatpush.bf16.msrb.mxu3 %v5165_v51 }
  0xeb   : > { %v5981_v33 = vadd.f32 %v1170_v7, %v1067_v2  ;;  %v5983_v17 = vadd.f32 %v1152_v13, %v1049_v40  ;;  %v5339_v2 = vpack.c.bf16 %v590_v61, %v589_v11  ;;  %v5141_v7 = vld [vmem:[%s5683_s10 + $0x28] sm:$0xff] }
  0xec   : > { %v5174_v40 = vld [vmem:[%s5683_s10 + $0x68] sm:$0xff]  ;;  %2670 = vmatpush.bf16.msrb.mxu2 %v5141_v7 }
  0xed   : > { %5467 = vst [vmem:[#allocation2 + $0x60] sm:$0xff] %v5339_v2   ;;  %3153 = vmatpush.bf16.msrb.mxu1 %v5174_v40 }
  0xef   : > { %v1069_v21 = vpop.f32.mrf.mxu2 }
  0xf1   : > { %v1670_v27 = vpop.f32.mrf.mxu0 }
  0xf2   : > { %v1172_v23 = vpop.f32.mrf.mxu3  ;;  %v1784_v35 = vpop.f32.mrf.mxu1 }
  0xf3   : > { %v5989_v26 = vadd.f32 %v1172_v23, %v1069_v21  ;;  %v5267_v21 = vunpack.c.l.bf16 %v5452_v14  ;;  %v5268_v23 = vunpack.c.h.bf16 %v5452_v14 }
  0xf4   : > { %1946 = vmatmul.bf16.vlgmr.msra.gmra.mxu2 %v5774_v38  ;;  %2157 = vmatmul.bf16.vlgmr.msra.gmra.mxu0 %v5857_v47 }
  0xf5   : > { %2573 = vmatmul.bf16.vlgmr.msra.gmra.mxu1 %v5991_v28 }
  0xf7   : > { %2043 = vmatmul.bf16.vlgmr.msra.gmra.mxu3 %v5780_v42  ;;  %v1313_v54 = vpop.f32.mrf.mxu2 }
  0xf8   : > { %v6005_v59 = vadd.f32 %v1313_v54, %v5900_v10  ;;  %v5182_v10 = vld [vmem:[%s5683_s10 + $0x128] sm:$0xff]  ;;  %v6042_v54 = vld [vmem:[%s6761_s3] ss:$0 sm:$0xff] }
  0xf9   : > { %v1672_v60 = vpop.f32.mrf.mxu0  ;;  %3056 = vmatpush.bf16.msrb.mxu0 %v5182_v10 }
  0xfa   : > { %v1573_v42 = vpop.f32.mrf.mxu3  ;;  %v1786_v0 = vpop.f32.mrf.mxu1  ;;  %v1385_v25 = vrot.slane %v6005_v59, 7 }
  0xfb   : > { %v1671_v47 = vadd.f32 %v1670_v27, %v1573_v42 }
  0xfd   : > { %v6007_v4 = vadd.f32 %v1784_v35, %v1671_v47  ;;  %v6024_v35 = vld [vmem:[%s6760_s2] ss:$0 sm:$0xff] }
  0xfe   : > { %v457_v36 = vmul.f32 %v6024_v35, %v5267_v21  ;;  %v458_v37 = vmul.f32 %v6024_v35, %v5268_v23  ;;  %v5173_v21 = vld [vmem:[%s5683_s10 + $0x60] sm:$0xff] }
  0xff   : > { %v1315_v9 = vpop.f32.mrf.mxu2  ;;  %3154 = vmatpush.bf16.msrb.mxu1 %v5173_v21 }
 0x100   : > { %v1354_v12 = vadd.f32 %v1315_v9, %v5915_v30  ;;  %v670_v30 = vadd.s32 16, %v6009_v6  ;;  %v493_v55 = vadd.f32 %v6042_v54, %v457_v36  ;;  %v494_v5 = vadd.f32 %v6042_v54, %v458_v37  ;;  %v5453_v36 = vld [vmem:[%s5696_s16 + $0x68] sm:$0xff]  }
 0x101   : > { %v1675_v19 = vpop.f32.mrf.mxu0  ;;  %v5272_v51 = vunpack.c.h.bf16 %v5453_v36 }
 0x102   : > { %v1575_v13 = vpop.f32.mrf.mxu3  ;;  %v1386_v27 = vrot.slane %v1354_v12, 7  ;;  %v1789_v31 = vpop.f32.mrf.mxu1  ;;  %v702_v42 = vand.u32 15, %v670_v30  ;;  %vm526_vm9 = vcmp.ge.f32.partialorder %v493_v55, 0.0  ;;  %vm527_vm10 = vcmp.ge.f32.partialorder %v494_v5, 0.0 }
 0x103   : > { %v1673_v18 = vadd.f32 %v1672_v60, %v1575_v13  ;;  %v560_v60 = vmul.f32 %v5718_v22, %v494_v5 }
 0x104   : > { %v1416_v46 = vsel %vm6767_vm8, %v1385_v25, %v1386_v27  ;;  %1951 = vmatmul.bf16.gmra.mxu2 %v5813_v15  ;;  %2162 = vmatmul.bf16.gmra.mxu0 %v5867_v52  ;;  %v559_v52 = vmul.f32 %v5718_v22, %v493_v55  ;;  %vm6049_vm11 = vcmp.eq.s32.totalorder %v702_v42, 0  ;;  %v672_v42 = vadd.s32 32, %v6009_v6 }
 0x105   : > { %v1825_v34 = vadd.f32 %v1786_v0, %v1673_v18  ;;  %2578 = vmatmul.bf16.gmra.mxu1 %v6017_v20  ;;  %v592_v2 = vsel %vm527_vm10, %v494_v5, %v560_v60  ;;  %v5140_v18 = vld [vmem:[%s5683_s10 + $0x20] sm:$0xff]  ;;  %vm6769_vm10 = vcmp.lt.s32.totalorder %v6009_v6, 7 }
 0x106   : > { %v591_v0 = vsel %vm526_vm9, %v493_v55, %v559_v52  ;;  %2671 = vmatpush.bf16.msrb.mxu2 %v5140_v18 }
 0x107   : > { %v6034_v50 = vadd.f32 %v1825_v34, %v1416_v46  ;;  %2048 = vmatmul.bf16.gmra.mxu3 %v5774_v38  ;;  %v1318_v47 = vpop.f32.mrf.mxu2  ;;  %v5344_v9 = vpack.c.bf16 %v592_v2, %v591_v0  ;;  %v6064_v46 = vld [vmem:[#allocation2 + $0x58] sm:$0xff]  ;;  %v716_v0 = vand.u32 15, %v672_v42 }
 0x108   : > { %v1355_v38 = vadd.f32 %v1318_v47, %v5924_v48 }
 0x109   : > { %v1677_v61 = vpop.f32.mrf.mxu0  ;;  %5468 = vst [vmem:[#allocation2 + $0x68] sm:$0xff] %v5344_v9   ;;  %vm6083_vm14 = vcmp.eq.s32.totalorder %v716_v0, 0  ;;  %v674_v0 = vadd.s32 48, %v6009_v6 }
 0x10a   : > { %v1578_v39 = vpop.f32.mrf.mxu3  ;;  %v1387_v7 = vrot.slane %v1355_v38, 7  ;;  %v1791_v40 = vpop.f32.mrf.mxu1 }
 0x10b   : > { %v1676_v11 = vadd.f32 %v1675_v19, %v1578_v39  ;;  %v5181_v19 = vld [vmem:[%s5683_s10 + $0x120] sm:$0xff]  ;;  %v5164_v39 = vld [vmem:[%s5683_s10 + $0x198] sm:$0xff] }
 0x10c   : > { %v1415_v48 = vsel %vm6767_vm8, %v1386_v27, %v1387_v7  ;;  %3057 = vmatpush.bf16.msrb.mxu0 %v5181_v19  ;;  %v5271_v27 = vunpack.c.l.bf16 %v5453_v36  ;;  %2849 = vmatpush.bf16.msrb.mxu3 %v5164_v39 }
 0x10d   : > { %v1826_v12 = vadd.f32 %v1789_v31, %v1676_v11  ;;  %v1452_v13 = vsel %vm6049_vm11, 0.0, %v1415_v48 }
 0x10e   : > { %v459_v52 = vmul.f32 %v6024_v35, %v5271_v27  ;;  %v5172_v27 = vld [vmem:[%s5683_s10 + $0x58] sm:$0xff] }
 0x10f   : > { %v6057_v14 = vadd.f32 %v1826_v12, %v1452_v13  ;;  %v1320_v23 = vpop.f32.mrf.mxu2  ;;  %3155 = vmatpush.bf16.msrb.mxu1 %v5172_v27 }
 0x110   : > { %v1356_v30 = vadd.f32 %v1320_v23, %v5933_v56  ;;  %v460_v56 = vmul.f32 %v6024_v35, %v5272_v51  ;;  %v495_v11 = vadd.f32 %v6042_v54, %v459_v52  ;;  %v5454_v52 = vld [vmem:[%s5696_s16 + $0x70] sm:$0xff]  }
 0x111   : > { %v1680_v37 = vpop.f32.mrf.mxu0  ;;  %v5276_v39 = vunpack.c.h.bf16 %v5454_v52 }
 0x112   : > { %v1580_v34 = vpop.f32.mrf.mxu3  ;;  %v1388_v55 = vrot.slane %v1356_v30, 7  ;;  %v1794_v5 = vpop.f32.mrf.mxu1  ;;  %vm528_vm12 = vcmp.ge.f32.partialorder %v495_v11, 0.0 }
 0x113   : > { %v1678_v31 = vadd.f32 %v1677_v61, %v1580_v34  ;;  %v496_v61 = vadd.f32 %v6042_v54, %v460_v56 }
 0x114   : > { %v1414_v60 = vsel %vm6767_vm8, %v1387_v7, %v1388_v55  ;;  %1956 = vmatmul.bf16.gmra.mxu2 %v5835_v32  ;;  %2167 = vmatmul.bf16.gmra.mxu0 %v5877_v57  ;;  %v561_v7 = vmul.f32 %v5718_v22, %v495_v11 }
 0x115   : > { %v1827_v47 = vadd.f32 %v1791_v40, %v1678_v31  ;;  %2583 = vmatmul.bf16.gmra.mxu1 %v6064_v46  ;;  %v562_v40 = vmul.f32 %v5718_v22, %v496_v61  ;;  %vm529_vm13 = vcmp.ge.f32.partialorder %v496_v61, 0.0  ;;  %v5139_v31 = vld [vmem:[%s5683_s10 + $0x18] sm:$0xff] }
 0x116   : > { %v593_v48 = vsel %vm528_vm12, %v495_v11, %v561_v7  ;;  %2672 = vmatpush.bf16.msrb.mxu2 %v5139_v31 }
 0x117   : > { %v6073_v38 = vadd.f32 %v1827_v47, %v1414_v60  ;;  %2053 = vmatmul.bf16.gmra.mxu3 %v5813_v15  ;;  %v1323_v2 = vpop.f32.mrf.mxu2  ;;  %v594_v13 = vsel %vm529_vm13, %v496_v61, %v562_v40  ;;  %v6098_v60 = vld [vmem:[#allocation2 + $0x60] sm:$0xff] }
 0x118   : > { %v1357_v57 = vadd.f32 %v1323_v2, %v5943_v8  ;;  %v5349_v23 = vpack.c.bf16 %v594_v13, %v593_v48  ;;  %v730_v48 = vand.u32 15, %v674_v0 }
 0x119   : > { %v1682_v12 = vpop.f32.mrf.mxu0 }
 0x11a   : > { %v1583_v9 = vpop.f32.mrf.mxu3  ;;  %v1389_v18 = vrot.slane %v1357_v57, 7  ;;  %v1796_v21 = vpop.f32.mrf.mxu1  ;;  %5469 = vst [vmem:[#allocation2 + $0x70] sm:$0xff] %v5349_v23   ;;  %vm6117_vm1 = vcmp.eq.s32.totalorder %v730_v48, 0 }
 0x11b   : > { %v1681_v15 = vadd.f32 %v1680_v37, %v1583_v9  ;;  %v5180_v37 = vld [vmem:[%s5683_s10 + $0x118] sm:$0xff]  ;;  %v5163_v9 = vld [vmem:[%s5683_s10 + $0x190] sm:$0xff] }
 0x11c   : > { %v1413_v8 = vsel %vm6767_vm8, %v1388_v55, %v1389_v18  ;;  %3058 = vmatpush.bf16.msrb.mxu0 %v5180_v37  ;;  %v5275_v55 = vunpack.c.l.bf16 %v5454_v52  ;;  %2850 = vmatpush.bf16.msrb.mxu3 %v5163_v9  ;;  %v5138_v52 = vld [vmem:[%s5683_s10 + $0x10] sm:$0xff] }
 0x11d   : > { %v1828_v30 = vadd.f32 %v1794_v5, %v1681_v15  ;;  %v1454_v34 = vsel %vm6083_vm14, 0.0, %v1413_v8  ;;  %2673 = vmatpush.bf16.msrb.mxu2 %v5138_v52 }
 0x11e   : > { %v461_v7 = vmul.f32 %v6024_v35, %v5275_v55 }
 0x11f   : > { %v6091_v36 = vadd.f32 %v1828_v30, %v1454_v34  ;;  %v1325_v51 = vpop.f32.mrf.mxu2 }
 0x120   : > { %v1358_v42 = vadd.f32 %v1325_v51, %v5958_v29  ;;  %v462_v29 = vmul.f32 %v6024_v35, %v5276_v39  ;;  %v497_v15 = vadd.f32 %v6042_v54, %v461_v7 }
 0x121   : > { %v1685_v56 = vpop.f32.mrf.mxu0 }
 0x122   : > { %v1585_v47 = vpop.f32.mrf.mxu3  ;;  %v1390_v11 = vrot.slane %v1358_v42, 7  ;;  %v1799_v61 = vpop.f32.mrf.mxu1  ;;  %vm530_vm15 = vcmp.ge.f32.partialorder %v497_v15, 0.0 }
 0x123   : > { %v1683_v5 = vadd.f32 %v1682_v12, %v1585_v47  ;;  %v498_v12 = vadd.f32 %v6042_v54, %v462_v29  ;;  %v6132_v29 = vld [vmem:[#allocation2 + $0x68] sm:$0xff] }
 0x124   : > { %v1412_v40 = vsel %vm6767_vm8, %v1389_v18, %v1390_v11  ;;  %1961 = vmatmul.bf16.gmra.mxu2 %v5782_v43  ;;  %2172 = vmatmul.bf16.gmra.mxu0 %v5887_v62  ;;  %v563_v18 = vmul.f32 %v5718_v22, %v497_v15 }
 0x125   : > { %v1829_v2 = vadd.f32 %v1796_v21, %v1683_v5  ;;  %2588 = vmatmul.bf16.gmra.mxu1 %v6098_v60  ;;  %v564_v43 = vmul.f32 %v5718_v22, %v498_v12  ;;  %vm531_vm0 = vcmp.ge.f32.partialorder %v498_v12, 0.0  ;;  %v5179_v5 = vld [vmem:[%s5683_s10 + $0x110] sm:$0xff] }
 0x126   : > { %v595_v30 = vsel %vm530_vm15, %v497_v15, %v563_v18  ;;  %3059 = vmatpush.bf16.msrb.mxu0 %v5179_v5 }
 0x127   : > { %v6107_v57 = vadd.f32 %v1829_v2, %v1412_v40  ;;  %2058 = vmatmul.bf16.gmra.mxu3 %v5835_v32  ;;  %v1328_v13 = vpop.f32.mrf.mxu2  ;;  %v596_v8 = vsel %vm531_vm0, %v498_v12, %v564_v43  ;;  %v5455_v2 = vld [vmem:[%s5696_s16 + $0x78] sm:$0xff]   ;;  %v676_v12 = vadd.s32 64, %v6009_v6  ;;  %v5551_v43 = vld [vmem:[#allocation2 + $0x28] sm:$0xff] }
 0x128   : > { %v1359_v62 = vadd.f32 %v1328_v13, %v5968_v58  ;;  %v5354_v27 = vpack.c.bf16 %v596_v8, %v595_v30  ;;  %v5280_v40 = vunpack.c.h.bf16 %v5455_v2 }
 0x129   : > { %v1687_v23 = vpop.f32.mrf.mxu0  ;;  %v744_v8 = vand.u32 15, %v676_v12 }
 0x12a   : > { %v1588_v21 = vpop.f32.mrf.mxu3  ;;  %v1391_v34 = vrot.slane %v1359_v62, 7  ;;  %v1801_v37 = vpop.f32.mrf.mxu1  ;;  %5470 = vst [vmem:[#allocation2 + $0x78] sm:$0xff] %v5354_v27  }
 0x12b   : > { %v1686_v32 = vadd.f32 %v1685_v56, %v1588_v21  ;;  %v5171_v56 = vld [vmem:[%s5683_s10 + $0x50] sm:$0xff]  ;;  %v5552_v21 = vld [vmem:[#allocation2 + $0x20] sm:$0xff]  ;;  %vm6149_vm4 = vcmp.eq.s32.totalorder %v744_v8, 0 }
 0x12c   : > { %v1411_v58 = vsel %vm6767_vm8, %v1390_v11, %v1391_v34  ;;  %3156 = vmatpush.bf16.msrb.mxu1 %v5171_v56  ;;  %v5279_v11 = vunpack.c.l.bf16 %v5455_v2  ;;  %v5137_v2 = vld [vmem:[%s5683_s10 + $0x8] sm:$0xff] }
 0x12d   : > { %v1830_v51 = vadd.f32 %v1799_v61, %v1686_v32  ;;  %v1456_v42 = vsel %vm6117_vm1, 0.0, %v1411_v58  ;;  %v5162_v32 = vld [vmem:[%s5683_s10 + $0x188] sm:$0xff]  ;;  %2674 = vmatpush.bf16.msrb.mxu2 %v5137_v2 }
 0x12e   : > { %v463_v13 = vmul.f32 %v6024_v35, %v5279_v11  ;;  %2851 = vmatpush.bf16.msrb.mxu3 %v5162_v32 }
 0x12f   : > { %v6125_v47 = vadd.f32 %v1830_v51, %v1456_v42  ;;  %v1330_v55 = vpop.f32.mrf.mxu2 }
 0x130   : > { %v1360_v39 = vadd.f32 %v1330_v55, %v5983_v17  ;;  %v464_v17 = vmul.f32 %v6024_v35, %v5280_v40 }
 0x131   : > { %v1690_v7 = vpop.f32.mrf.mxu0 }
 0x132   : > { %v1590_v0 = vpop.f32.mrf.mxu3  ;;  %v1392_v9 = vrot.slane %v1360_v39, 7  ;;  %v1804_v15 = vpop.f32.mrf.mxu1  ;;  %v500_v30 = vadd.f32 %v6042_v54, %v464_v17 }
 0x133   : > { %v1688_v61 = vadd.f32 %v1687_v23, %v1590_v0  ;;  %v499_v23 = vadd.f32 %v6042_v54, %v463_v13  ;;  %v6163_v13 = vld [vmem:[#allocation2 + $0x70] sm:$0xff] }
 0x134   : > { %v1410_v18 = vsel %vm6767_vm8, %v1391_v34, %v1392_v9  ;;  %1966 = vmatmul.bf16.gmra.mxu2 %v5551_v43  ;;  %2177 = vmatmul.bf16.gmra.mxu0 %v5897_v3  ;;  %vm533_vm3 = vcmp.ge.f32.partialorder %v500_v30, 0.0 }
 0x135   : > { %v1831_v48 = vadd.f32 %v1801_v37, %v1688_v61  ;;  %2593 = vmatmul.bf16.gmra.mxu1 %v6132_v29  ;;  %v565_v34 = vmul.f32 %v5718_v22, %v499_v23  ;;  %v566_v37 = vmul.f32 %v5718_v22, %v500_v30  ;;  %vm532_vm2 = vcmp.ge.f32.partialorder %v499_v23, 0.0  ;;  %v5178_v61 = vld [vmem:[%s5683_s10 + $0x108] sm:$0xff] }
 0x136   : > { %3060 = vmatpush.bf16.msrb.mxu0 %v5178_v61 }
 0x137   : > { %v6140_v62 = vadd.f32 %v1831_v48, %v1410_v18  ;;  %2063 = vmatmul.bf16.gmra.mxu3 %v5552_v21  ;;  %v1333_v35 = vpop.f32.mrf.mxu2  ;;  %v597_v42 = vsel %vm532_vm2, %v499_v23, %v565_v34  ;;  %v598_v52 = vsel %vm533_vm3, %v500_v30, %v566_v37  ;;  %v678_v18 = vadd.s32 80, %v6009_v6  ;;  %v5553_v23 = vld [vmem:[#allocation2 + $0x30] sm:$0xff]  ;;  %v5161_v30 = vld [vmem:[%s5683_s10 + $0x180] sm:$0xff] }
 0x138   : > { %v1361_v3 = vadd.f32 %v1333_v35, %v5913_v24  ;;  %v5359_v55 = vpack.c.bf16 %v598_v52, %v597_v42  ;;  %2852 = vmatpush.bf16.msrb.mxu3 %v5161_v30 }
 0x139   : > { %v1692_v58 = vpop.f32.mrf.mxu0  ;;  %v758_v8 = vand.u32 15, %v678_v18 }
 0x13a   : > { %v1593_v27 = vpop.f32.mrf.mxu3  ;;  %v1393_v54 = vrot.slane %v1361_v3, 7  ;;  %v1806_v56 = vpop.f32.mrf.mxu1  ;;  %5471 = vst [vmem:[#allocation2 + $0x80] sm:$0xff] %v5359_v55   ;;  %v5169_v55 = vld [vmem:[%s5683_s10 + $0x40] sm:$0xff] }
 0x13b   : > { %v1691_v51 = vadd.f32 %v1690_v7, %v1593_v27  ;;  %v5170_v7 = vld [vmem:[%s5683_s10 + $0x48] sm:$0xff]  ;;  %vm6174_vm5 = vcmp.eq.s32.totalorder %v758_v8, 0 }
 0x13c   : > { %v1409_v24 = vsel %vm6767_vm8, %v1392_v9, %v1393_v54  ;;  %3157 = vmatpush.bf16.msrb.mxu1 %v5170_v7  ;;  %v6188_v7 = vld [vmem:[#allocation2 + $0x78] sm:$0xff] }
 0x13d   : > { %v1832_v22 = vadd.f32 %v1804_v15, %v1691_v51  ;;  %v1458_v39 = vsel %vm6149_vm4, 0.0, %v1409_v24 }
 0x13f   : > { %v6157_v0 = vadd.f32 %v1832_v22, %v1458_v39  ;;  %v1335_v11 = vpop.f32.mrf.mxu2 }
 0x140   : > { %v1362_v40 = vadd.f32 %v1335_v11, %v5922_v44  ;;  %3158 = vmatpush.bf16.msrb.mxu1 %v5169_v55 }
 0x141   : > { %v1695_v48 = vpop.f32.mrf.mxu0 }
 0x142   : > { %v1595_v12 = vpop.f32.mrf.mxu3  ;;  %v1394_v9 = vrot.slane %v1362_v40, 7  ;;  %v1809_v17 = vpop.f32.mrf.mxu1 }
 0x143   : > { %v1693_v15 = vadd.f32 %v1692_v58, %v1595_v12  ;;  %v680_v12 = vadd.s32 96, %v6009_v6 }
 0x144   : > { %v1408_v32 = vsel %vm6767_vm8, %v1393_v54, %v1394_v9  ;;  %1971 = vmatmul.bf16.gmra.mxu2 %v5553_v23  ;;  %2182 = vmatmul.bf16.gmra.mxu0 %v5920_v41 }
 0x145   : > { %v1833_v21 = vadd.f32 %v1806_v56, %v1693_v15  ;;  %2598 = vmatmul.bf16.gmra.mxu1 %v6163_v13  ;;  %v5136_v56 = vld [vmem:[%s5683_s10] sm:$0xff]  ;;  %v772_v18 = vand.u32 15, %v680_v12 }
 0x146   : > { %2675 = vmatpush.bf16.msrb.mxu2 %v5136_v56 }
 0x147   : > { %v6169_v44 = vadd.f32 %v1833_v21, %v1408_v32  ;;  %2068 = vmatmul.bf16.gmra.mxu3 %v5551_v43  ;;  %v1338_v35 = vpop.f32.mrf.mxu2  ;;  %vm6199_vm6 = vcmp.eq.s32.totalorder %v772_v18, 0 }
 0x148   : > { %v1363_v34 = vadd.f32 %v1338_v35, %v5931_v53  ;;  %v5177_v53 = vld [vmem:[%s5683_s10 + $0x100] sm:$0xff] }
 0x149   : > { %v1697_v27 = vpop.f32.mrf.mxu0  ;;  %3061 = vmatpush.bf16.msrb.mxu0 %v5177_v53 }
 0x14a   : > { %v1598_v37 = vpop.f32.mrf.mxu3  ;;  %v1395_v51 = vrot.slane %v1363_v34, 7  ;;  %v1811_v43 = vpop.f32.mrf.mxu1 }
 0x14b   : > { %v1696_v3 = vadd.f32 %v1695_v48, %v1598_v37 }
 0x14c   : > { %v1407_v42 = vsel %vm6767_vm8, %v1394_v9, %v1395_v51  ;;  %v5554_v9 = vld [vmem:[#allocation2 + $0x38] sm:$0xff] }
 0x14d   : > { %v1834_v58 = vadd.f32 %v1809_v17, %v1696_v3  ;;  %v1460_v52 = vsel %vm6174_vm5, 0.0, %v1407_v42  ;;  %v5208_v17 = vld [vmem:[%s5683_s10 + $0x178] sm:$0xff] }
 0x14e   : > { %3425 = vmatpush.bf16.msra.mxu3 %v5208_v17 }
 0x14f   : > { %v6182_v54 = vadd.f32 %v1834_v58, %v1460_v52  ;;  %v1340_v22 = vpop.f32.mrf.mxu2  ;;  %v5216_v58 = vld [vmem:[%s5683_s10 + $0x238] sm:$0xff] }
 0x150   : > { %v1364_v24 = vadd.f32 %v1340_v22, %v5941_v1  ;;  %3635 = vmatpush.bf16.msra.mxu1 %v5216_v58  ;;  %v6213_v22 = vld [vmem:[#allocation2 + $0x80] sm:$0xff] }
 0x151   : > { %v1700_v61 = vpop.f32.mrf.mxu0 }
 0x152   : > { %v1600_v39 = vpop.f32.mrf.mxu3  ;;  %v1396_v11 = vrot.slane %v1364_v24, 7  ;;  %v1814_v40 = vpop.f32.mrf.mxu1 }
 0x153   : > { %v1698_v2 = vadd.f32 %v1697_v27, %v1600_v39 }
 0x154   : > { %v1406_v48 = vsel %vm6767_vm8, %v1395_v51, %v1396_v11  ;;  %1976 = vmatmul.bf16.gmra.mxu2 %v5554_v9  ;;  %2187 = vmatmul.bf16.gmra.mxu0 %v5938_v63  ;;  %v5192_v51 = vld [vmem:[%s5683_s10 + $0x1f8] sm:$0xff] }
 0x155   : > { %v1835_v15 = vadd.f32 %v1811_v43, %v1698_v2  ;;  %2603 = vmatmul.bf16.gmra.mxu1 %v6188_v7  ;;  %v5200_v43 = vld [vmem:[%s5683_s10 + $0xb8] sm:$0xff]  ;;  %3264 = vmatpush.bf16.msra.mxu2 %v5192_v51  ;;  %v682_v2 = vadd.s32 112, %v6009_v6  ;;  %v6236_v51 = vld [vmem:[#allocation2 + $0x40] sm:$0xff] }
 0x156   : > { %3522 = vmatpush.bf16.msra.mxu0 %v5200_v43 }
 0x157   : > { %v6194_v1 = vadd.f32 %v1835_v15, %v1406_v48  ;;  %2073 = vmatmul.bf16.gmra.mxu3 %v5553_v23  ;;  %v1343_v21 = vpop.f32.mrf.mxu2  ;;  %v786_v12 = vand.u32 15, %v682_v2  ;;  %v5207_v48 = vld [vmem:[%s5683_s10 + $0x170] sm:$0xff] }
 0x158   : > { %v1365_v32 = vadd.f32 %v1343_v21, %v5956_v16  ;;  %3426 = vmatpush.bf16.msra.mxu3 %v5207_v48  ;;  %v5215_v2 = vld [vmem:[%s5683_s10 + $0x230] sm:$0xff] }
 0x159   : > { %v1702_v35 = vpop.f32.mrf.mxu0  ;;  %vm6224_vm7 = vcmp.eq.s32.totalorder %v786_v12, 0  ;;  %3636 = vmatpush.bf16.msra.mxu1 %v5215_v2 }
 0x15a   : > { %v1603_v30 = vpop.f32.mrf.mxu3  ;;  %v1397_v34 = vrot.slane %v1365_v32, 7  ;;  %v1816_v23 = vpop.f32.mrf.mxu1 }
 0x15b   : > { %v1701_v8 = vadd.f32 %v1700_v61, %v1603_v30 }
 0x15c   : > { %v1405_v3 = vsel %vm6767_vm8, %v1396_v11, %v1397_v34 }
 0x15d   : > { %v1836_v37 = vadd.f32 %v1814_v40, %v1701_v8  ;;  %v1462_v27 = vsel %vm6199_vm6, 0.0, %v1405_v3  ;;  %v5555_v40 = vld [vmem:[#allocation2 + $0x40] sm:$0xff]  ;;  %v6789_v8 = vmov 0 }
 0x15e   : > { %v6790_v8 = vsel %vm6224_vm7, 4294967295, %v6789_v8 }
 0x15f   : > { %v6210_v16 = vadd.f32 %v1836_v37, %v1462_v27  ;;  %v1345_v42 = vpop.f32.mrf.mxu2  ;;  %6791 = vst [vmem:[#allocation4_spill] sm:$0xff] %v6790_v8 }
 0x160   : > { %v1366_v52 = vadd.f32 %v1345_v42, %v5966_v49  ;;  %v6238_v42 = vld [vmem:[#allocation2 + $0x50] sm:$0xff] }
 0x161   : > { %v1705_v55 = vpop.f32.mrf.mxu0 }
 0x162   : > { %v1605_v56 = vpop.f32.mrf.mxu3  ;;  %v1398_v24 = vrot.slane %v1366_v52, 7  ;;  %v1819_v39 = vpop.f32.mrf.mxu1 }
 0x163   : > { %v1703_v53 = vadd.f32 %v1702_v35, %v1605_v56 }
 0x164   : > { %v1404_v11 = vsel %vm6767_vm8, %v1397_v34, %v1398_v24  ;;  %1981 = vmatmul.bf16.gmra.mxu2 %v5555_v40  ;;  %2192 = vmatmul.bf16.gmra.mxu0 %v5963_v45 }
 0x165   : > { %v1837_v61 = vadd.f32 %v1816_v23, %v1703_v53  ;;  %2608 = vmatmul.bf16.gmra.mxu1 %v6213_v22  ;;  %v688_v23 = vand.u32 15, %v6009_v6 }
 0x167   : > { %v6219_v49 = vadd.f32 %v1837_v61, %v1404_v11  ;;  %2078 = vmatmul.bf16.gmra.mxu3 %v5554_v9  ;;  %v1348_v15 = vpop.f32.mrf.mxu2  ;;  %vm6242_vm9 = vcmp.eq.s32.totalorder %v688_v23, 0  ;;  %v669_v23 = vadd.s32 8, %v6009_v6 }
 0x168   : > { %v1367_v17 = vadd.f32 %v1348_v15, %v5981_v33 }
 0x169   : > { %v1707_v32 = vpop.f32.mrf.mxu0 }
 0x16a   : > { %v1608_v18 = vpop.f32.mrf.mxu3  ;;  %v1399_v30 = vrot.slane %v1367_v17, 7  ;;  %v1821_v45 = vpop.f32.mrf.mxu1 }
 0x16b   : > { %v1706_v21 = vadd.f32 %v1705_v55, %v1608_v18 }
 0x16c   : > { %v1403_v9 = vsel %vm6767_vm8, %v1398_v24, %v1399_v30  ;;  %v5191_v24 = vld [vmem:[%s5683_s10 + $0x1f0] sm:$0xff] }
 0x16d   : > { %v1838_v35 = vadd.f32 %v1819_v39, %v1706_v21  ;;  %v1464_v34 = vsel %vm6224_vm7, 0.0, %v1403_v9  ;;  %v5199_v39 = vld [vmem:[%s5683_s10 + $0xb0] sm:$0xff]  ;;  %3265 = vmatpush.bf16.msra.mxu2 %v5191_v24  ;;  %v695_v24 = vand.u32 15, %v669_v23  ;;  %v6299_v23 = vld [vmem:[#allocation2 + $0x60] sm:$0xff] }
 0x16e   : > { %3523 = vmatpush.bf16.msra.mxu0 %v5199_v39 }
 0x16f   : > { %v6232_v33 = vadd.f32 %v1838_v35, %v1464_v34  ;;  %v1350_v37 = vpop.f32.mrf.mxu2  ;;  %v6267_v35 = vld [vmem:[#allocation2 + $0x58] sm:$0xff]  ;;  %vm6290_vm12 = vcmp.eq.s32.totalorder %v695_v24, 15  ;;  %v5189_v24 = vld [vmem:[%s5683_s10 + $0x1e0] sm:$0xff] }
 0x170   : > { %v1368_v3 = vadd.f32 %v1350_v37, %v5989_v26  ;;  %v5190_v37 = vld [vmem:[%s5683_s10 + $0x1e8] sm:$0xff] }
 0x171   : > { %v2158_v58 = vpop.f32.mrf.mxu0  ;;  %3266 = vmatpush.bf16.msra.mxu2 %v5190_v37 }
 0x172   : > { %v1610_v27 = vpop.f32.mrf.mxu3  ;;  %v1400_v52 = vrot.slane %v1368_v3, 7  ;;  %v6240_v56 = vpop.f32.mrf.mxu1  ;;  %v5198_v3 = vld [vmem:[%s5683_s10 + $0xa8] sm:$0xff] }
 0x173   : > { %v1708_v43 = vadd.f32 %v1707_v32, %v1610_v27  ;;  %v5214_v27 = vld [vmem:[%s5683_s10 + $0x228] sm:$0xff]  ;;  %3524 = vmatpush.bf16.msra.mxu0 %v5198_v3 }
 0x174   : > { %v1402_v26 = vsel %vm6767_vm8, %v1399_v30, %v1400_v52  ;;  %2676 = vmatmul.bf16.vlgmr.msrb.gmra.mxu2 %v6236_v51  ;;  %3062 = vmatmul.bf16.vlgmr.msrb.gmra.mxu0 %v5991_v28  ;;  %v1417_v61 = vsel %vm6767_vm8, %v1400_v52, %v1385_v25  ;;  %v5206_v25 = vld [vmem:[%s5683_s10 + $0x168] sm:$0xff] }
 0x175   : > { %v1839_v55 = vadd.f32 %v1821_v45, %v1708_v43  ;;  %3159 = vmatmul.bf16.vlgmr.msrb.gmra.mxu1 %v6236_v51  ;;  %v1450_v40 = vsel %vm6242_vm9, 0.0, %v1417_v61  ;;  %3427 = vmatpush.bf16.msra.mxu3 %v5206_v25 }
 0x176   : > { %v1840_v12 = vadd.f32 %v6007_v4, %v1450_v40  ;;  %3637 = vmatpush.bf16.msra.mxu1 %v5214_v27  ;;  %3267 = vmatpush.bf16.msra.mxu2 %v5189_v24 }
 0x177   : > { %v6257_v11 = vadd.f32 %v1839_v55, %v1402_v26  ;;  %2853 = vmatmul.bf16.vlgmr.msrb.gmra.mxu3 %v6238_v42  ;;  %v1947_v15 = vpop.f32.mrf.mxu2  ;;  %v5205_v26 = vld [vmem:[%s5683_s10 + $0x160] sm:$0xff] }
 0x179   : > { %v2160_v59 = vpop.f32.mrf.mxu0  ;;  %3428 = vmatpush.bf16.msra.mxu3 %v5205_v26  ;;  %v5213_v26 = vld [vmem:[%s5683_s10 + $0x220] sm:$0xff] }
 0x17a   : > { %v2044_v48 = vpop.f32.mrf.mxu3  ;;  %v6264_v17 = vpop.f32.mrf.mxu1  ;;  %3638 = vmatpush.bf16.msra.mxu1 %v5213_v26 }
 0x17b   : > { %v2045_v32 = vadd.f32 %v2044_v48, %v1947_v15 }
 0x17d   : > { %v6273_v34 = vadd.f32 %v2158_v58, %v2045_v32 }
 0x17f   : > { %v1949_v18 = vpop.f32.mrf.mxu2  ;;  %v6765_v58 = vrot.slane %v6273_v34, 1 }
 0x181   : > { %v2163_v45 = vpop.f32.mrf.mxu0 }
 0x182   : > { %v2046_v21 = vpop.f32.mrf.mxu3  ;;  %v6269_v9 = vpop.f32.mrf.mxu1 }
 0x183   : > { %v2047_v30 = vadd.f32 %v2046_v21, %v1949_v18 }
 0x184   : > { %2681 = vmatmul.bf16.gmra.mxu2 %v5991_v28  ;;  %3067 = vmatmul.bf16.gmra.mxu0 %v6017_v20 }
 0x185   : > { %v2199_v4 = vadd.f32 %v2160_v59, %v2047_v30  ;;  %3164 = vmatmul.bf16.gmra.mxu1 %v5991_v28 }
 0x187   : > { %2858 = vmatmul.bf16.gmra.mxu3 %v6267_v35  ;;  %v2231_v43 = vrot.slane %v2199_v4, 1  ;;  %v1952_v52 = vpop.f32.mrf.mxu2 }
 0x189   : > { %v2165_v2 = vpop.f32.mrf.mxu0  ;;  %v2261_v61 = vsel %vm6769_vm10, %v6765_v58, %v2231_v43 }
 0x18a   : > { %v2049_v55 = vpop.f32.mrf.mxu3  ;;  %v6283_v28 = vpop.f32.mrf.mxu1  ;;  %v2311_v59 = vadd.f32 %v2261_v61, %v1840_v12 }
 0x18b   : > { %v2050_v39 = vadd.f32 %v2049_v55, %v1952_v52  ;;  %v671_v55 = vadd.s32 24, %v6009_v6 }
 0x18c   : > { %v2381_v12 = vmul.f32 %v2311_v59, %v2311_v59 }
 0x18d   : > { %v2200_v40 = vadd.f32 %v2163_v45, %v2050_v39  ;;  %v5197_v39 = vld [vmem:[%s5683_s10 + $0xa0] sm:$0xff] }
 0x18e   : > { %3525 = vmatpush.bf16.msra.mxu0 %v5197_v39 }
 0x18f   : > { %v2232_v48 = vrot.slane %v2200_v40, 1  ;;  %v1954_v18 = vpop.f32.mrf.mxu2 }
 0x191   : > { %v2260_v25 = vsel %vm6769_vm10, %v2231_v43, %v2232_v48  ;;  %v2168_v45 = vpop.f32.mrf.mxu0 }
 0x192   : > { %v2296_v21 = vsel %vm6290_vm12, 0.0, %v2260_v25  ;;  %v2051_v32 = vpop.f32.mrf.mxu3  ;;  %v6301_v37 = vpop.f32.mrf.mxu1 }
 0x193   : > { %v2312_v30 = vadd.f32 %v2296_v21, %v6034_v50  ;;  %v2052_v4 = vadd.f32 %v2051_v32, %v1954_v18  ;;  %v709_v18 = vand.u32 15, %v671_v55 }
 0x194   : > { %2686 = vmatmul.bf16.gmra.mxu2 %v6017_v20  ;;  %3072 = vmatmul.bf16.gmra.mxu0 %v6064_v46 }
 0x195   : > { %v2382_v3 = vmul.f32 %v2312_v30, %v2312_v30  ;;  %v2201_v27 = vadd.f32 %v2165_v2, %v2052_v4  ;;  %v5364_v50 = vpack.c.bf16 %v2312_v30, %v2311_v59  ;;  %v2359_v43 = vadd.f32 %v2312_v30, %v2311_v59  ;;  %3169 = vmatmul.bf16.gmra.mxu1 %v6017_v20  ;;  %v5204_v4 = vld [vmem:[%s5683_s10 + $0x158] sm:$0xff] }
 0x196   : > { %3429 = vmatpush.bf16.msra.mxu3 %v5204_v4  ;;  %vm6325_vm13 = vcmp.eq.s32.totalorder %v709_v18, 15  ;;  %v5196_v4 = vld [vmem:[%s5683_s10 + $0x98] sm:$0xff] }
 0x197   : > { %v2233_v52 = vrot.slane %v2201_v27, 1  ;;  %2863 = vmatmul.bf16.gmra.mxu3 %v6299_v23  ;;  %5365 = vst [vmem:[%s6308_s9] sm:$0xff] %v5364_v50   ;;  %v2397_v61 = vadd.f32 %v2382_v3, %v2381_v12  ;;  %v1957_v40 = vpop.f32.mrf.mxu2  ;;  %3526 = vmatpush.bf16.msra.mxu0 %v5196_v4 }
 0x199   : > { %v2259_v2 = vsel %vm6769_vm10, %v2232_v48, %v2233_v52  ;;  %v2170_v21 = vpop.f32.mrf.mxu0 }
 0x19a   : > { %v2313_v59 = vadd.f32 %v2259_v2, %v6057_v14  ;;  %v2054_v25 = vpop.f32.mrf.mxu3  ;;  %v6322_v30 = vpop.f32.mrf.mxu1 }
 0x19b   : > { %v2055_v20 = vadd.f32 %v2054_v25, %v1957_v40 }
 0x19c   : > { %v2383_v32 = vmul.f32 %v2313_v59, %v2313_v59  ;;  %v2360_v27 = vadd.f32 %v2359_v43, %v2313_v59 }
 0x19d   : > { %v2202_v50 = vadd.f32 %v2168_v45, %v2055_v20 }
 0x19e   : > { %v2398_v12 = vadd.f32 %v2397_v61, %v2383_v32  ;;  %v6334_v61 = vld [vmem:[#allocation2 + $0x68] sm:$0xff]  ;;  %v5188_v32 = vld [vmem:[%s5683_s10 + $0x1d8] sm:$0xff] }
 0x19f   : > { %v2234_v3 = vrot.slane %v2202_v50, 1  ;;  %v1959_v55 = vpop.f32.mrf.mxu2  ;;  %v5212_v50 = vld [vmem:[%s5683_s10 + $0x218] sm:$0xff]  ;;  %3268 = vmatpush.bf16.msra.mxu2 %v5188_v32 }
 0x1a0   : > { %3639 = vmatpush.bf16.msra.mxu1 %v5212_v50 }
 0x1a1   : > { %v2258_v14 = vsel %vm6769_vm10, %v2233_v52, %v2234_v3  ;;  %v2173_v43 = vpop.f32.mrf.mxu0 }
 0x1a2   : > { %v2298_v24 = vsel %vm6325_vm13, 0.0, %v2258_v14  ;;  %v2056_v39 = vpop.f32.mrf.mxu3  ;;  %v6336_v2 = vpop.f32.mrf.mxu1 }
 0x1a3   : > { %v2314_v26 = vadd.f32 %v2298_v24, %v6073_v38  ;;  %v2057_v45 = vadd.f32 %v2056_v39, %v1959_v55  ;;  %v673_v38 = vadd.s32 40, %v6009_v6 }
 0x1a4   : > { %2691 = vmatmul.bf16.gmra.mxu2 %v6064_v46  ;;  %3077 = vmatmul.bf16.gmra.mxu0 %v6098_v60 }
 0x1a5   : > { %v5369_v40 = vpack.c.bf16 %v2314_v26, %v2313_v59  ;;  %v2384_v25 = vmul.f32 %v2314_v26, %v2314_v26  ;;  %v2203_v18 = vadd.f32 %v2170_v21, %v2057_v45  ;;  %v2361_v52 = vadd.f32 %v2360_v27, %v2314_v26  ;;  %3174 = vmatmul.bf16.gmra.mxu1 %v6064_v46 }
 0x1a6   : > { %v723_v24 = vand.u32 15, %v673_v38 }
 0x1a7   : > { %5472 = vst [vmem:[%s6308_s9 + $0x8] sm:$0xff] %v5369_v40   ;;  %v2235_v20 = vrot.slane %v2203_v18, 1  ;;  %2868 = vmatmul.bf16.gmra.mxu3 %v6334_v61  ;;  %v2399_v59 = vadd.f32 %v2398_v12, %v2384_v25  ;;  %v1962_v27 = vpop.f32.mrf.mxu2  ;;  %v5203_v40 = vld [vmem:[%s5683_s10 + $0x150] sm:$0xff] }
 0x1a8   : > { %3430 = vmatpush.bf16.msra.mxu3 %v5203_v40  ;;  %vm6353_vm15 = vcmp.eq.s32.totalorder %v723_v24, 15  ;;  %v5211_v40 = vld [vmem:[%s5683_s10 + $0x210] sm:$0xff] }
 0x1a9   : > { %v2257_v21 = vsel %vm6769_vm10, %v2234_v3, %v2235_v20  ;;  %v2175_v46 = vpop.f32.mrf.mxu0  ;;  %3640 = vmatpush.bf16.msra.mxu1 %v5211_v40 }
 0x1aa   : > { %v2315_v14 = vadd.f32 %v2257_v21, %v6091_v36  ;;  %v2059_v55 = vpop.f32.mrf.mxu3  ;;  %v6350_v45 = vpop.f32.mrf.mxu1 }
 0x1ab   : > { %v2060_v39 = vadd.f32 %v2059_v55, %v1962_v27 }
 0x1ac   : > { %v2385_v26 = vmul.f32 %v2315_v14, %v2315_v14  ;;  %v2362_v18 = vadd.f32 %v2361_v52, %v2315_v14 }
 0x1ad   : > { %v2204_v58 = vadd.f32 %v2173_v43, %v2060_v39  ;;  %v5187_v39 = vld [vmem:[%s5683_s10 + $0x1d0] sm:$0xff] }
 0x1ae   : > { %v2400_v12 = vadd.f32 %v2399_v59, %v2385_v26  ;;  %v6362_v59 = vld [vmem:[#allocation2 + $0x70] sm:$0xff]  ;;  %3269 = vmatpush.bf16.msra.mxu2 %v5187_v39 }
 0x1af   : > { %v2236_v25 = vrot.slane %v2204_v58, 1  ;;  %v1964_v38 = vpop.f32.mrf.mxu2  ;;  %v5195_v26 = vld [vmem:[%s5683_s10 + $0x90] sm:$0xff] }
 0x1b0   : > { %3527 = vmatpush.bf16.msra.mxu0 %v5195_v26 }
 0x1b1   : > { %v2256_v36 = vsel %vm6769_vm10, %v2235_v20, %v2236_v25  ;;  %v2178_v52 = vpop.f32.mrf.mxu0 }
 0x1b2   : > { %v2300_v32 = vsel %vm6353_vm15, 0.0, %v2256_v36  ;;  %v2061_v4 = vpop.f32.mrf.mxu3  ;;  %v6364_v21 = vpop.f32.mrf.mxu1 }
 0x1b3   : > { %v2316_v50 = vadd.f32 %v2300_v32, %v6107_v57  ;;  %v2062_v43 = vadd.f32 %v2061_v4, %v1964_v38  ;;  %v675_v57 = vadd.s32 56, %v6009_v6 }
 0x1b4   : > { %2696 = vmatmul.bf16.gmra.mxu2 %v6098_v60  ;;  %3082 = vmatmul.bf16.gmra.mxu0 %v6132_v29 }
 0x1b5   : > { %v5374_v58 = vpack.c.bf16 %v2316_v50, %v2315_v14  ;;  %v2386_v27 = vmul.f32 %v2316_v50, %v2316_v50  ;;  %v2205_v55 = vadd.f32 %v2175_v46, %v2062_v43  ;;  %v2363_v20 = vadd.f32 %v2362_v18, %v2316_v50  ;;  %3179 = vmatmul.bf16.gmra.mxu1 %v6098_v60 }
 0x1b6   : > { %v737_v32 = vand.u32 15, %v675_v57 }
 0x1b7   : > { %5473 = vst [vmem:[%s6308_s9 + $0x10] sm:$0xff] %v5374_v58   ;;  %v2237_v24 = vrot.slane %v2205_v55, 1  ;;  %2873 = vmatmul.bf16.gmra.mxu3 %v6362_v59  ;;  %v2401_v14 = vadd.f32 %v2400_v12, %v2386_v27  ;;  %v1967_v18 = vpop.f32.mrf.mxu2  ;;  %v5202_v58 = vld [vmem:[%s5683_s10 + $0x148] sm:$0xff] }
 0x1b8   : > { %3431 = vmatpush.bf16.msra.mxu3 %v5202_v58  ;;  %vm6381_vm0 = vcmp.eq.s32.totalorder %v737_v32, 15  ;;  %v5210_v58 = vld [vmem:[%s5683_s10 + $0x208] sm:$0xff] }
 0x1b9   : > { %v2255_v46 = vsel %vm6769_vm10, %v2236_v25, %v2237_v24  ;;  %v2180_v60 = vpop.f32.mrf.mxu0  ;;  %3641 = vmatpush.bf16.msra.mxu1 %v5210_v58 }
 0x1ba   : > { %v2317_v36 = vadd.f32 %v2255_v46, %v6125_v47  ;;  %v2064_v38 = vpop.f32.mrf.mxu3  ;;  %v6378_v43 = vpop.f32.mrf.mxu1 }
 0x1bb   : > { %v2065_v4 = vadd.f32 %v2064_v38, %v1967_v18 }
 0x1bc   : > { %v2387_v50 = vmul.f32 %v2317_v36, %v2317_v36  ;;  %v2364_v55 = vadd.f32 %v2363_v20, %v2317_v36 }
 0x1bd   : > { %v2206_v8 = vadd.f32 %v2178_v52, %v2065_v4  ;;  %v5186_v4 = vld [vmem:[%s5683_s10 + $0x1c8] sm:$0xff] }
 0x1be   : > { %v2402_v12 = vadd.f32 %v2401_v14, %v2387_v50  ;;  %v6390_v14 = vld [vmem:[#allocation2 + $0x78] sm:$0xff]  ;;  %v5194_v50 = vld [vmem:[%s5683_s10 + $0x88] sm:$0xff]  ;;  %3270 = vmatpush.bf16.msra.mxu2 %v5186_v4 }
 0x1bf   : > { %v2238_v27 = vrot.slane %v2206_v8, 1  ;;  %v1969_v57 = vpop.f32.mrf.mxu2  ;;  %3528 = vmatpush.bf16.msra.mxu0 %v5194_v50 }
 0x1c1   : > { %v2254_v47 = vsel %vm6769_vm10, %v2237_v24, %v2238_v27  ;;  %v2183_v20 = vpop.f32.mrf.mxu0 }
 0x1c2   : > { %v2302_v39 = vsel %vm6381_vm0, 0.0, %v2254_v47  ;;  %v2066_v26 = vpop.f32.mrf.mxu3  ;;  %v6392_v46 = vpop.f32.mrf.mxu1 }
 0x1c3   : > { %v2318_v40 = vadd.f32 %v2302_v39, %v6140_v62  ;;  %v2067_v52 = vadd.f32 %v2066_v26, %v1969_v57  ;;  %v677_v62 = vadd.s32 72, %v6009_v6 }
 0x1c4   : > { %2701 = vmatmul.bf16.gmra.mxu2 %v6132_v29  ;;  %3087 = vmatmul.bf16.gmra.mxu0 %v6163_v13 }
 0x1c5   : > { %v5379_v8 = vpack.c.bf16 %v2318_v40, %v2317_v36  ;;  %v2388_v18 = vmul.f32 %v2318_v40, %v2318_v40  ;;  %v2207_v38 = vadd.f32 %v2180_v60, %v2067_v52  ;;  %v2365_v24 = vadd.f32 %v2364_v55, %v2318_v40  ;;  %3184 = vmatmul.bf16.gmra.mxu1 %v6132_v29 }
 0x1c6   : > { %v751_v39 = vand.u32 15, %v677_v62 }
 0x1c7   : > { %5474 = vst [vmem:[%s6308_s9 + $0x18] sm:$0xff] %v5379_v8   ;;  %v2239_v32 = vrot.slane %v2207_v38, 1  ;;  %2878 = vmatmul.bf16.gmra.mxu3 %v6390_v14  ;;  %v2403_v36 = vadd.f32 %v2402_v12, %v2388_v18  ;;  %v1972_v55 = vpop.f32.mrf.mxu2  ;;  %v5201_v12 = vld [vmem:[%s5683_s10 + $0x140] sm:$0xff] }
 0x1c8   : > { %3432 = vmatpush.bf16.msra.mxu3 %v5201_v12  ;;  %vm6409_vm2 = vcmp.eq.s32.totalorder %v751_v39, 15  ;;  %v6421_v39 = vld [vmem:[#allocation2 + $0x80] sm:$0xff] }
 0x1c9   : > { %v2253_v60 = vsel %vm6769_vm10, %v2238_v27, %v2239_v32  ;;  %v2185_v26 = vpop.f32.mrf.mxu0 }
 0x1ca   : > { %v2319_v47 = vadd.f32 %v2253_v60, %v6157_v0  ;;  %v2069_v57 = vpop.f32.mrf.mxu3  ;;  %v6406_v52 = vpop.f32.mrf.mxu1  ;;  %v5185_v60 = vld [vmem:[%s5683_s10 + $0x1c0] sm:$0xff] }
 0x1cb   : > { %v2070_v29 = vadd.f32 %v2069_v57, %v1972_v55  ;;  %v5193_v55 = vld [vmem:[%s5683_s10 + $0x80] sm:$0xff]  ;;  %3271 = vmatpush.bf16.msra.mxu2 %v5185_v60 }
 0x1cc   : > { %v2389_v40 = vmul.f32 %v2319_v47, %v2319_v47  ;;  %v2366_v8 = vadd.f32 %v2365_v24, %v2319_v47  ;;  %v5209_v24 = vld [vmem:[%s5683_s10 + $0x200] sm:$0xff]  ;;  %3529 = vmatpush.bf16.msra.mxu0 %v5193_v55  ;;  %s5505_s10 = smul.u32 5, %s6867_s23 }
 0x1cd   : > { %v2208_v18 = vadd.f32 %v2183_v20, %v2070_v29  ;;  %3642 = vmatpush.bf16.msra.mxu1 %v5209_v24 }
 0x1ce   : > { %v2404_v27 = vadd.f32 %v2403_v36, %v2389_v40  ;;  %s361_s11 = sadd.s32 %s5505_s10, %s6865_s24 }
 0x1cf   : > { %v2240_v0 = vrot.slane %v2208_v18, 1  ;;  %v1974_v4 = vpop.f32.mrf.mxu2  ;;  %s4052_s12 = sshll.u32 %s361_s11, 1 }
 0x1d0   : > { %s363_s23 = scalar_lea.vmem %s6764_s6, %s4052_s12 }
 0x1d1   : > { %v2252_v62 = vsel %vm6769_vm10, %v2239_v32, %v2240_v0  ;;  %v2188_v57 = vpop.f32.mrf.mxu0 }
 0x1d2   : > { %v2304_v50 = vsel %vm6409_vm2, 0.0, %v2252_v62  ;;  %v2071_v58 = vpop.f32.mrf.mxu3  ;;  %v6423_v29 = vpop.f32.mrf.mxu1 }
 0x1d3   : > { %v2320_v20 = vadd.f32 %v2304_v50, %v6169_v44  ;;  %v2072_v36 = vadd.f32 %v2071_v58, %v1974_v4  ;;  %v679_v44 = vadd.s32 88, %v6009_v6 }
 0x1d4   : > { %2706 = vmatmul.bf16.gmra.mxu2 %v6163_v13  ;;  %3092 = vmatmul.bf16.gmra.mxu0 %v6188_v7 }
 0x1d5   : > { %v5384_v32 = vpack.c.bf16 %v2320_v20, %v2319_v47  ;;  %v2390_v40 = vmul.f32 %v2320_v20, %v2320_v20  ;;  %v2209_v12 = vadd.f32 %v2185_v26, %v2072_v36  ;;  %v2367_v18 = vadd.f32 %v2366_v8, %v2320_v20  ;;  %3189 = vmatmul.bf16.gmra.mxu1 %v6163_v13 }
 0x1d6   : > { %v765_v58 = vand.u32 15, %v679_v44 }
 0x1d7   : > { %5475 = vst [vmem:[%s6308_s9 + $0x20] sm:$0xff] %v5384_v32   ;;  %v2241_v62 = vrot.slane %v2209_v12, 1  ;;  %2883 = vmatmul.bf16.gmra.mxu3 %v6421_v39  ;;  %v2405_v4 = vadd.f32 %v2404_v27, %v2390_v40  ;;  %v1977_v50 = vpop.f32.mrf.mxu2 }
 0x1d8   : > { %vm6436_vm3 = vcmp.eq.s32.totalorder %v765_v58, 15 }
 0x1d9   : > { %v2251_v47 = vsel %vm6769_vm10, %v2240_v0, %v2241_v62  ;;  %v2190_v55 = vpop.f32.mrf.mxu0 }
 0x1da   : > { %v2321_v26 = vadd.f32 %v2251_v47, %v6182_v54  ;;  %v2074_v8 = vpop.f32.mrf.mxu3  ;;  %v6434_v20 = vpop.f32.mrf.mxu1 }
 0x1db   : > { %v2075_v60 = vadd.f32 %v2074_v8, %v1977_v50 }
 0x1dc   : > { %v2391_v24 = vmul.f32 %v2321_v26, %v2321_v26  ;;  %v2368_v36 = vadd.f32 %v2367_v18, %v2321_v26 }
 0x1dd   : > { %v2210_v32 = vadd.f32 %v2188_v57, %v2075_v60  ;;  %v6445_v57 = vld [vmem:[#allocation2 + $0x88] sm:$0xff] }
 0x1de   : > { %v2406_v12 = vadd.f32 %v2405_v4, %v2391_v24 }
 0x1df   : > { %v2242_v27 = vrot.slane %v2210_v32, 1  ;;  %v1979_v54 = vpop.f32.mrf.mxu2 }
 0x1e1   : > { %v2250_v0 = vsel %vm6769_vm10, %v2241_v62, %v2242_v27  ;;  %v2193_v18 = vpop.f32.mrf.mxu0 }
 0x1e2   : > { %v2306_v40 = vsel %vm6436_vm3, 0.0, %v2250_v0  ;;  %v2076_v44 = vpop.f32.mrf.mxu3  ;;  %v6447_v4 = vpop.f32.mrf.mxu1 }
 0x1e3   : > { %v2322_v47 = vadd.f32 %v2306_v40, %v6194_v1  ;;  %v2077_v50 = vadd.f32 %v2076_v44, %v1979_v54  ;;  %v681_v1 = vadd.s32 104, %v6009_v6 }
 0x1e4   : > { %2711 = vmatmul.bf16.gmra.mxu2 %v6188_v7  ;;  %3097 = vmatmul.bf16.gmra.mxu0 %v6213_v22 }
 0x1e5   : > { %v5389_v8 = vpack.c.bf16 %v2322_v47, %v2321_v26  ;;  %v2392_v58 = vmul.f32 %v2322_v47, %v2322_v47  ;;  %v2211_v60 = vadd.f32 %v2190_v55, %v2077_v50  ;;  %v2369_v24 = vadd.f32 %v2368_v36, %v2322_v47  ;;  %3194 = vmatmul.bf16.gmra.mxu1 %v6188_v7 }
 0x1e6   : > { %v779_v54 = vand.u32 15, %v681_v1  ;;  %v6806_v7 = vmov 0 }
 0x1e7   : > { %5476 = vst [vmem:[%s6308_s9 + $0x28] sm:$0xff] %v5389_v8   ;;  %v2243_v62 = vrot.slane %v2211_v60, 1  ;;  %2888 = vmatmul.bf16.gmra.mxu3 %v6445_v57  ;;  %v2407_v32 = vadd.f32 %v2406_v12, %v2392_v58  ;;  %v1982_v26 = vpop.f32.mrf.mxu2 }
 0x1e8   : > { %vm6460_vm8 = vcmp.eq.s32.totalorder %v779_v54, 15 }
 0x1e9   : > { %v2249_v0 = vsel %vm6769_vm10, %v2242_v27, %v2243_v62  ;;  %v2195_v44 = vpop.f32.mrf.mxu0  ;;  %v6807_v7 = vsel %vm6460_vm8, 4294967295, %v6806_v7  ;;  %v683_v27 = vadd.s32 120, %v6009_v6 }
 0x1ea   : > { %v2323_v55 = vadd.f32 %v2249_v0, %v6210_v16  ;;  %v2079_v36 = vpop.f32.mrf.mxu3  ;;  %v6458_v47 = vpop.f32.mrf.mxu1  ;;  %6808 = vst [vmem:[#allocation5_spill] sm:$0xff] %v6807_v7 }
 0x1eb   : > { %v2080_v40 = vadd.f32 %v2079_v36, %v1982_v26  ;;  %v793_v26 = vand.u32 15, %v683_v27  ;;  %v6809_v27 = vmov 0 }
 0x1ec   : > { %v2393_v22 = vmul.f32 %v2323_v55, %v2323_v55  ;;  %v2370_v50 = vadd.f32 %v2369_v24, %v2323_v55 }
 0x1ed   : > { %v2212_v8 = vadd.f32 %v2193_v18, %v2080_v40 }
 0x1ee   : > { %v2408_v60 = vadd.f32 %v2407_v32, %v2393_v22 }
 0x1ef   : > { %v2244_v12 = vrot.slane %v2212_v8, 1  ;;  %v1984_v58 = vpop.f32.mrf.mxu2 }
 0x1f1   : > { %v2248_v16 = vsel %vm6769_vm10, %v2243_v62, %v2244_v12  ;;  %v3063_v32 = vpop.f32.mrf.mxu0  ;;  %vm6476_vm10 = vcmp.eq.s32.totalorder %v793_v26, 15 }
 0x1f2   : > { %v2308_v1 = vsel %vm6460_vm8, 0.0, %v2248_v16  ;;  %v2081_v0 = vpop.f32.mrf.mxu3  ;;  %v3160_v36 = vpop.f32.mrf.mxu1  ;;  %v5556_v16 = vld [vmem:[#allocation2 + $0x48] sm:$0xff]  ;;  %v6810_v27 = vsel %vm6476_vm10, 4294967295, %v6809_v27  ;;  %vm6812_vm8 = vcmp.lt.s32.totalorder %v6009_v6, 7 }
 0x1f3   : > { %v2324_v24 = vadd.f32 %v2308_v1, %v6219_v49  ;;  %v2082_v18 = vadd.f32 %v2081_v0, %v1984_v58  ;;  %v6470_v8 = vadd.f32 %v3160_v36, %v3063_v32  ;;  %6811 = vst [vmem:[#allocation6_spill] sm:$0xff] %v6810_v27  ;;  %vm6814_vm7 = vmmov %vm6812_vm8 }
 0x1f4   : > { %3272 = vmatmul.bf16.vlgmr.msra.gmra.mxu2 %v6238_v42  ;;  %3530 = vmatmul.bf16.vlgmr.msra.gmra.mxu0 %v6236_v51 }
 0x1f5   : > { %v5394_v54 = vpack.c.bf16 %v2324_v24, %v2323_v55  ;;  %v2394_v40 = vmul.f32 %v2324_v24, %v2324_v24  ;;  %v2213_v22 = vadd.f32 %v2195_v44, %v2082_v18  ;;  %v2371_v62 = vadd.f32 %v2370_v50, %v2324_v24  ;;  %3643 = vmatmul.bf16.vlgmr.msra.gmra.mxu1 %v6238_v42 }
 0x1f6   : > { %v6813_v44 = vrot.slane %v6273_v34, 1 }
 0x1f7   : > { %5477 = vst [vmem:[%s6308_s9 + $0x30] sm:$0xff] %v5394_v54   ;;  %v2245_v7 = vrot.slane %v2213_v22, 1  ;;  %3433 = vmatmul.bf16.vlgmr.msra.gmra.mxu3 %v5556_v16  ;;  %v2409_v49 = vadd.f32 %v2408_v60, %v2394_v40  ;;  %v2677_v50 = vpop.f32.mrf.mxu2 }
 0x1f8   : > { %v2678_v1 = vadd.f32 %v2677_v50, %v6240_v56 }
 0x1f9   : > { %v2247_v55 = vsel %vm6812_vm8, %v2244_v12, %v2245_v7  ;;  %v2262_v51 = vsel %vm6814_vm7, %v2245_v7, %v6813_v44  ;;  %v3065_v0 = vpop.f32.mrf.mxu0  ;;  %vm6817_vm8 = vcmp.lt.s32.totalorder %v6009_v6, 1 }
 0x1fa   : > { %v2325_v58 = vadd.f32 %v2247_v55, %v6232_v33  ;;  %v2854_v42 = vpop.f32.mrf.mxu3  ;;  %v2310_v60 = vsel %vm6476_vm10, 0.0, %v2262_v51  ;;  %v3162_v34 = vpop.f32.mrf.mxu1  ;;  %vm6818_vm7 = vmmov %vm6817_vm8 }
 0x1fb   : > { %v2326_v24 = vadd.f32 %v2310_v60, %v6257_v11  ;;  %v6491_v12 = vadd.f32 %v2854_v42, %v2678_v1  ;;  %v6493_v26 = vadd.f32 %v3162_v34, %v3065_v0  ;;  %vm6827_vm10 = vmmov %vm6818_vm7 }
 0x1fc   : > { %v2395_v18 = vmul.f32 %v2325_v58, %v2325_v58  ;;  %v2372_v32 = vadd.f32 %v2371_v62, %v2325_v58 }
 0x1fd   : > { %v5399_v7 = vpack.c.bf16 %v2326_v24, %v2325_v58  ;;  %v2396_v36 = vmul.f32 %v2326_v24, %v2326_v24  ;;  %v6772_v62 = vrot.slane %v6491_v12, 7 }
 0x1fe   : > { %v2410_v54 = vadd.f32 %v2409_v49, %v2395_v18  ;;  %v6495_v33 = vadd.f32 %v2372_v32, %v2326_v24  ;;  %v5557_v49 = vld [vmem:[#allocation2 + $0x50] sm:$0xff] }
 0x1ff   : > { %5478 = vst [vmem:[%s6308_s9 + $0x38] sm:$0xff] %v5399_v7   ;;  %v2679_v40 = vpop.f32.mrf.mxu2 }
 0x200   : > { %6815 = vst [vmem:[#allocation7_spill] sm:$0xff] %v6495_v33  ;;  %v6498_v56 = vadd.f32 %v2410_v54, %v2396_v36  ;;  %v2680_v22 = vadd.f32 %v2679_v40, %v6264_v17 }
 0x201   : > { %v3068_v11 = vpop.f32.mrf.mxu0 }
 0x202   : > { %6816 = vst [vmem:[#allocation8_spill] sm:$0xff] %v6498_v56  ;;  %v2856_v55 = vpop.f32.mrf.mxu3  ;;  %v3165_v51 = vpop.f32.mrf.mxu1 }
 0x203   : > { %v2895_v44 = vadd.f32 %v2856_v55, %v2680_v22  ;;  %v6501_v50 = vadd.f32 %v3165_v51, %v3068_v11  ;;  %v5558_v11 = vld [vmem:[#allocation2 + $0x58] sm:$0xff] }
 0x204   : > { %3277 = vmatmul.bf16.gmra.mxu2 %v6267_v35  ;;  %3535 = vmatmul.bf16.gmra.mxu0 %v5556_v16 }
 0x205   : > { %v2911_v1 = vrot.slane %v2895_v44, 7  ;;  %3648 = vmatmul.bf16.gmra.mxu1 %v6267_v35 }
 0x207   : > { %3438 = vmatmul.bf16.gmra.mxu3 %v5557_v49  ;;  %v6510_v17 = vsel %vm6817_vm8, %v6772_v62, %v2911_v1  ;;  %v2682_v58 = vpop.f32.mrf.mxu2  ;;  %vm6819_vm8 = vmmov %vm6818_vm7 }
 0x208   : > { %v2683_v42 = vadd.f32 %v2682_v58, %v6269_v9 }
 0x209   : > { %v3070_v0 = vpop.f32.mrf.mxu0 }
 0x20a   : > { %v2859_v60 = vpop.f32.mrf.mxu3  ;;  %v3167_v18 = vpop.f32.mrf.mxu1 }
 0x20b   : > { %v2896_v24 = vadd.f32 %v2859_v60, %v2683_v42  ;;  %v6513_v34 = vadd.f32 %v3167_v18, %v3070_v0 }
 0x20d   : > { %v2912_v16 = vrot.slane %v2896_v24, 7 }
 0x20f   : > { %v6517_v32 = vsel %vm6818_vm7, %v2911_v1, %v2912_v16  ;;  %v2684_v35 = vpop.f32.mrf.mxu2 }
 0x210   : > { %v2685_v7 = vadd.f32 %v2684_v35, %v6283_v28 }
 0x211   : > { %v3073_v54 = vpop.f32.mrf.mxu0 }
 0x212   : > { %v2861_v36 = vpop.f32.mrf.mxu3  ;;  %v3170_v22 = vpop.f32.mrf.mxu1 }
 0x213   : > { %v2897_v40 = vadd.f32 %v2861_v36, %v2685_v7  ;;  %v6520_v55 = vadd.f32 %v3170_v22, %v3073_v54 }
 0x214   : > { %3282 = vmatmul.bf16.gmra.mxu2 %v6299_v23  ;;  %3540 = vmatmul.bf16.gmra.mxu0 %v5557_v49 }
 0x215   : > { %v2913_v9 = vrot.slane %v2897_v40, 7  ;;  %3653 = vmatmul.bf16.gmra.mxu1 %v6299_v23  ;;  %v5559_v40 = vld [vmem:[#allocation2 + $0x60] sm:$0xff] }
 0x217   : > { %3443 = vmatmul.bf16.gmra.mxu3 %v5558_v11  ;;  %v6526_v44 = vsel %vm6819_vm8, %v2912_v16, %v2913_v9  ;;  %v2687_v51 = vpop.f32.mrf.mxu2  ;;  %vm6820_vm8 = vmmov %vm6818_vm7 }
 0x218   : > { %v2688_v28 = vadd.f32 %v2687_v51, %v6301_v37 }
 0x219   : > { %v3075_v58 = vpop.f32.mrf.mxu0 }
 0x21a   : > { %v2864_v1 = vpop.f32.mrf.mxu3  ;;  %v3172_v60 = vpop.f32.mrf.mxu1 }
 0x21b   : > { %v2898_v42 = vadd.f32 %v2864_v1, %v2688_v28  ;;  %v6529_v0 = vadd.f32 %v3172_v60, %v3075_v58 }
 0x21d   : > { %v2914_v24 = vrot.slane %v2898_v42, 7 }
 0x21f   : > { %v6533_v49 = vsel %vm6818_vm7, %v2913_v9, %v2914_v24  ;;  %v2689_v18 = vpop.f32.mrf.mxu2 }
 0x220   : > { %v2690_v23 = vadd.f32 %v2689_v18, %v6322_v30 }
 0x221   : > { %v3078_v16 = vpop.f32.mrf.mxu0 }
 0x222   : > { %v2866_v35 = vpop.f32.mrf.mxu3  ;;  %v3175_v36 = vpop.f32.mrf.mxu1 }
 0x223   : > { %v2899_v7 = vadd.f32 %v2866_v35, %v2690_v23  ;;  %v6536_v54 = vadd.f32 %v3175_v36, %v3078_v16  ;;  %v5560_v36 = vld [vmem:[#allocation2 + $0x68] sm:$0xff] }
 0x224   : > { %3287 = vmatmul.bf16.gmra.mxu2 %v6334_v61  ;;  %3545 = vmatmul.bf16.gmra.mxu0 %v5558_v11 }
 0x225   : > { %v2915_v37 = vrot.slane %v2899_v7, 7  ;;  %3658 = vmatmul.bf16.gmra.mxu1 %v6334_v61 }
 0x227   : > { %3448 = vmatmul.bf16.gmra.mxu3 %v5559_v40  ;;  %v6542_v22 = vsel %vm6820_vm8, %v2914_v24, %v2915_v37  ;;  %v2692_v9 = vpop.f32.mrf.mxu2  ;;  %vm6821_vm8 = vmmov %vm6818_vm7 }
 0x228   : > { %v2693_v30 = vadd.f32 %v2692_v9, %v6336_v2 }
 0x229   : > { %v3080_v28 = vpop.f32.mrf.mxu0 }
 0x22a   : > { %v2869_v51 = vpop.f32.mrf.mxu3  ;;  %v3177_v58 = vpop.f32.mrf.mxu1 }
 0x22b   : > { %v2900_v1 = vadd.f32 %v2869_v51, %v2693_v30  ;;  %v6545_v42 = vadd.f32 %v3177_v58, %v3080_v28 }
 0x22d   : > { %v2916_v60 = vrot.slane %v2900_v1, 7 }
 0x22f   : > { %v6549_v11 = vsel %vm6818_vm7, %v2915_v37, %v2916_v60  ;;  %v2694_v18 = vpop.f32.mrf.mxu2 }
 0x230   : > { %v2695_v61 = vadd.f32 %v2694_v18, %v6350_v45 }
 0x231   : > { %v3083_v24 = vpop.f32.mrf.mxu0 }
 0x232   : > { %v2871_v23 = vpop.f32.mrf.mxu3  ;;  %v3180_v16 = vpop.f32.mrf.mxu1 }
 0x233   : > { %v2901_v35 = vadd.f32 %v2871_v23, %v2695_v61  ;;  %v6552_v7 = vadd.f32 %v3180_v16, %v3083_v24 }
 0x234   : > { %3292 = vmatmul.bf16.gmra.mxu2 %v6362_v59  ;;  %3550 = vmatmul.bf16.gmra.mxu0 %v5559_v40 }
 0x235   : > { %v2917_v2 = vrot.slane %v2901_v35, 7  ;;  %3663 = vmatmul.bf16.gmra.mxu1 %v6362_v59 }
 0x237   : > { %3453 = vmatmul.bf16.gmra.mxu3 %v5560_v36  ;;  %v6558_v37 = vsel %vm6821_vm8, %v2916_v60, %v2917_v2  ;;  %v2697_v9 = vpop.f32.mrf.mxu2  ;;  %vm6822_vm8 = vmmov %vm6818_vm7 }
 0x238   : > { %v2698_v45 = vadd.f32 %v2697_v9, %v6364_v21  ;;  %v5561_v9 = vld [vmem:[#allocation2 + $0x70] sm:$0xff] }
 0x239   : > { %v3085_v51 = vpop.f32.mrf.mxu0 }
 0x23a   : > { %v2874_v30 = vpop.f32.mrf.mxu3  ;;  %v3182_v1 = vpop.f32.mrf.mxu1 }
 0x23b   : > { %v2902_v28 = vadd.f32 %v2874_v30, %v2698_v45  ;;  %v6561_v58 = vadd.f32 %v3182_v1, %v3085_v51 }
 0x23d   : > { %v2918_v18 = vrot.slane %v2902_v28, 7 }
 0x23f   : > { %v6565_v40 = vsel %vm6818_vm7, %v2917_v2, %v2918_v18  ;;  %v2699_v61 = vpop.f32.mrf.mxu2 }
 0x240   : > { %v2700_v59 = vadd.f32 %v2699_v61, %v6378_v43 }
 0x241   : > { %v3088_v60 = vpop.f32.mrf.mxu0 }
 0x242   : > { %v2876_v23 = vpop.f32.mrf.mxu3  ;;  %v3185_v35 = vpop.f32.mrf.mxu1 }
 0x243   : > { %v2903_v24 = vadd.f32 %v2876_v23, %v2700_v59  ;;  %v6568_v16 = vadd.f32 %v3185_v35, %v3088_v60 }
 0x244   : > { %3297 = vmatmul.bf16.gmra.mxu2 %v6390_v14  ;;  %3555 = vmatmul.bf16.gmra.mxu0 %v5560_v36 }
 0x245   : > { %v2919_v21 = vrot.slane %v2903_v24, 7  ;;  %3668 = vmatmul.bf16.gmra.mxu1 %v6390_v14 }
 0x247   : > { %3458 = vmatmul.bf16.gmra.mxu3 %v5561_v9  ;;  %v6574_v2 = vsel %vm6822_vm8, %v2918_v18, %v2919_v21  ;;  %v2702_v45 = vpop.f32.mrf.mxu2  ;;  %vm6823_vm8 = vmmov %vm6818_vm7 }
 0x248   : > { %v2703_v43 = vadd.f32 %v2702_v45, %v6392_v46  ;;  %v5562_v45 = vld [vmem:[#allocation2 + $0x78] sm:$0xff] }
 0x249   : > { %v3090_v51 = vpop.f32.mrf.mxu0 }
 0x24a   : > { %v2879_v30 = vpop.f32.mrf.mxu3  ;;  %v3187_v1 = vpop.f32.mrf.mxu1 }
 0x24b   : > { %v2904_v28 = vadd.f32 %v2879_v30, %v2703_v43  ;;  %v6577_v61 = vadd.f32 %v3187_v1, %v3090_v51 }
 0x24d   : > { %v2920_v59 = vrot.slane %v2904_v28, 7 }
 0x24f   : > { %v6581_v36 = vsel %vm6818_vm7, %v2919_v21, %v2920_v59  ;;  %v2704_v23 = vpop.f32.mrf.mxu2 }
 0x250   : > { %v2705_v14 = vadd.f32 %v2704_v23, %v6406_v52 }
 0x251   : > { %v3093_v18 = vpop.f32.mrf.mxu0 }
 0x252   : > { %v2881_v60 = vpop.f32.mrf.mxu3  ;;  %v3190_v35 = vpop.f32.mrf.mxu1 }
 0x253   : > { %v2905_v24 = vadd.f32 %v2881_v60, %v2705_v14  ;;  %v6584_v62 = vadd.f32 %v3190_v35, %v3093_v18 }
 0x254   : > { %3302 = vmatmul.bf16.gmra.mxu2 %v6421_v39  ;;  %3560 = vmatmul.bf16.gmra.mxu0 %v5561_v9 }
 0x255   : > { %v2921_v46 = vrot.slane %v2905_v24, 7  ;;  %3673 = vmatmul.bf16.gmra.mxu1 %v6421_v39 }
 0x257   : > { %3463 = vmatmul.bf16.gmra.mxu3 %v5562_v45  ;;  %v6590_v21 = vsel %vm6823_vm8, %v2920_v59, %v2921_v46  ;;  %v2707_v43 = vpop.f32.mrf.mxu2  ;;  %vm6824_vm8 = vmmov %vm6818_vm7 }
 0x258   : > { %v2708_v52 = vadd.f32 %v2707_v43, %v6423_v29  ;;  %v5563_v43 = vld [vmem:[#allocation2 + $0x80] sm:$0xff] }
 0x259   : > { %v3095_v51 = vpop.f32.mrf.mxu0 }
 0x25a   : > { %v2884_v30 = vpop.f32.mrf.mxu3  ;;  %v3192_v1 = vpop.f32.mrf.mxu1 }
 0x25b   : > { %v2906_v28 = vadd.f32 %v2884_v30, %v2708_v52  ;;  %v6593_v23 = vadd.f32 %v3192_v1, %v3095_v51 }
 0x25d   : > { %v2922_v14 = vrot.slane %v2906_v28, 7 }
 0x25f   : > { %v6597_v9 = vsel %vm6818_vm7, %v2921_v46, %v2922_v14  ;;  %v2709_v60 = vpop.f32.mrf.mxu2 }
 0x260   : > { %v2710_v39 = vadd.f32 %v2709_v60, %v6434_v20 }
 0x261   : > { %v3098_v59 = vpop.f32.mrf.mxu0 }
 0x262   : > { %v2886_v18 = vpop.f32.mrf.mxu3  ;;  %v3195_v35 = vpop.f32.mrf.mxu1 }
 0x263   : > { %v2907_v24 = vadd.f32 %v2886_v18, %v2710_v39  ;;  %v6600_v27 = vadd.f32 %v3195_v35, %v3098_v59 }
 0x264   : > { %3307 = vmatmul.bf16.gmra.mxu2 %v6445_v57  ;;  %3565 = vmatmul.bf16.gmra.mxu0 %v5562_v45 }
 0x265   : > { %v2923_v29 = vrot.slane %v2907_v24, 7  ;;  %3678 = vmatmul.bf16.gmra.mxu1 %v6445_v57 }
 0x267   : > { %3468 = vmatmul.bf16.gmra.mxu3 %v5563_v43  ;;  %v6606_v46 = vsel %vm6824_vm8, %v2922_v14, %v2923_v29  ;;  %v2712_v52 = vpop.f32.mrf.mxu2  ;;  %vm6826_vm8 = vmmov %vm6818_vm7 }
 0x268   : > { %v2713_v20 = vadd.f32 %v2712_v52, %v6447_v4  ;;  %v6825_v4 = vrot.slane %v6491_v12, 7 }
 0x269   : > { %v3100_v51 = vpop.f32.mrf.mxu0 }
 0x26a   : > { %v2889_v30 = vpop.f32.mrf.mxu3  ;;  %v3197_v1 = vpop.f32.mrf.mxu1 }
 0x26b   : > { %v2908_v28 = vadd.f32 %v2889_v30, %v2713_v20  ;;  %v6609_v60 = vadd.f32 %v3197_v1, %v3100_v51 }
 0x26d   : > { %v2924_v39 = vrot.slane %v2908_v28, 7 }
 0x26f   : > { %v6613_v45 = vsel %vm6818_vm7, %v2923_v29, %v2924_v39  ;;  %v2714_v18 = vpop.f32.mrf.mxu2 }
 0x270   : > { %v2715_v57 = vadd.f32 %v2714_v18, %v6458_v47 }
 0x271   : > { %v3531_v14 = vpop.f32.mrf.mxu0 }
 0x272   : > { %v2891_v59 = vpop.f32.mrf.mxu3  ;;  %v3644_v35 = vpop.f32.mrf.mxu1 }
 0x273   : > { %v2909_v24 = vadd.f32 %v2891_v59, %v2715_v57 }
 0x275   : > { %v2925_v43 = vrot.slane %v2909_v24, 7 }
 0x277   : > { %v2941_v52 = vsel %vm6826_vm8, %v2925_v43, %v6825_v4  ;;  %v6622_v20 = vsel %vm6827_vm10, %v2924_v39, %v2925_v43  ;;  %v3273_v30 = vpop.f32.mrf.mxu2 }
 0x278   : > { %6828 = vst [vmem:[#allocation9_spill] sm:$0xff] %v6622_v20  ;;  %v3313_v29 = vadd.f32 %v3273_v30, %v6470_v8  ;;  %v2942_v47 = vsel %vm6242_vm9, 0.0, %v2941_v52  ;;  %vm6829_vm9 = vcmp.lt.s32.totalorder %v6009_v6, 7 }
 0x279   : > { %v3533_v28 = vpop.f32.mrf.mxu0  ;;  %vm6830_vm10 = vmmov %vm6829_vm9 }
 0x27a   : > { %v3434_v51 = vpop.f32.mrf.mxu3  ;;  %v3329_v1 = vadd.f32 %v3313_v29, %v2942_v47  ;;  %v3646_v18 = vpop.f32.mrf.mxu1 }
 0x27b   : > { %v3532_v24 = vadd.f32 %v3531_v14, %v3434_v51 }
 0x27d   : > { %v6629_v20 = vadd.f32 %v3644_v35, %v3532_v24 }
 0x27f   : > { %v3275_v57 = vpop.f32.mrf.mxu2  ;;  %v3700_v29 = vrot.slane %v6629_v20, 1 }
 0x280   : > { %v3314_v12 = vadd.f32 %v3275_v57, %v6493_v26  ;;  %v2944_v26 = vsel %vm6049_vm11, 0.0, %v6517_v32  ;;  %vm6831_vm11 = vmmov %vm6829_vm9 }
 0x281   : > { %v3536_v56 = vpop.f32.mrf.mxu0 }
 0x282   : > { %v3436_v59 = vpop.f32.mrf.mxu3  ;;  %v3330_v39 = vadd.f32 %v3314_v12, %v6510_v17  ;;  %v3649_v43 = vpop.f32.mrf.mxu1 }
 0x283   : > { %v3534_v4 = vadd.f32 %v3533_v28, %v3436_v59 }
 0x285   : > { %v3685_v33 = vadd.f32 %v3646_v18, %v3534_v4 }
 0x287   : > { %v3701_v8 = vrot.slane %v3685_v33, 1  ;;  %v3278_v30 = vpop.f32.mrf.mxu2 }
 0x288   : > { %v3315_v53 = vadd.f32 %v3278_v30, %v6501_v50 }
 0x289   : > { %v3538_v51 = vpop.f32.mrf.mxu0  ;;  %v3730_v17 = vsel %vm6829_vm9, %v3700_v29, %v3701_v8 }
 0x28a   : > { %v3439_v52 = vpop.f32.mrf.mxu3  ;;  %v3331_v47 = vadd.f32 %v3315_v53, %v2944_v26  ;;  %v3651_v28 = vpop.f32.mrf.mxu1  ;;  %v3748_v18 = vadd.f32 %v3730_v17, %v3329_v1 }
 0x28b   : > { %v3537_v14 = vadd.f32 %v3536_v56, %v3439_v52 }
 0x28c   : > { %v3819_v4 = vmul.f32 %v3748_v18, %v3748_v18 }
 0x28d   : > { %v3686_v33 = vadd.f32 %v3649_v43, %v3537_v14 }
 0x28f   : > { %v3702_v35 = vrot.slane %v3686_v33, 1  ;;  %v3280_v57 = vpop.f32.mrf.mxu2 }
 0x290   : > { %v3316_v56 = vadd.f32 %v3280_v57, %v6513_v34 }
 0x291   : > { %v3729_v50 = vsel %vm6830_vm10, %v3701_v8, %v3702_v35  ;;  %v3541_v24 = vpop.f32.mrf.mxu0 }
 0x292   : > { %v3733_v10 = vsel %vm6290_vm12, 0.0, %v3729_v50  ;;  %v3441_v32 = vpop.f32.mrf.mxu3  ;;  %v3332_v30 = vadd.f32 %v3316_v56, %v6526_v44  ;;  %v3654_v43 = vpop.f32.mrf.mxu1  ;;  %v2946_v44 = vsel %vm6083_vm14, 0.0, %v6533_v49  ;;  %vm6832_vm12 = vmmov %vm6829_vm9 }
 0x293   : > { %v3749_v12 = vadd.f32 %v3733_v10, %v3330_v39  ;;  %v3539_v59 = vadd.f32 %v3538_v51, %v3441_v32  ;;  %vm6833_vm14 = vmmov %vm6829_vm9 }
 0x295   : > { %v5404_v53 = vpack.c.bf16 %v3749_v12, %v3748_v18  ;;  %v3797_v1 = vadd.f32 %v3749_v12, %v3748_v18  ;;  %v3820_v52 = vmul.f32 %v3749_v12, %v3749_v12  ;;  %v3687_v26 = vadd.f32 %v3651_v28, %v3539_v59 }
 0x297   : > { %5479 = vst [vmem:[%s6308_s9 + $0x40] sm:$0xff] %v5404_v53   ;;  %v3835_v8 = vadd.f32 %v3820_v52, %v3819_v4  ;;  %v3703_v14 = vrot.slane %v3687_v26, 1  ;;  %v3283_v17 = vpop.f32.mrf.mxu2 }
 0x298   : > { %v3317_v39 = vadd.f32 %v3283_v17, %v6520_v55 }
 0x299   : > { %v3728_v15 = vsel %vm6831_vm11, %v3702_v35, %v3703_v14  ;;  %v3543_v50 = vpop.f32.mrf.mxu0 }
 0x29a   : > { %v3750_v34 = vadd.f32 %v3728_v15, %v3331_v47  ;;  %v3444_v51 = vpop.f32.mrf.mxu3  ;;  %v3333_v28 = vadd.f32 %v3317_v39, %v2946_v44  ;;  %v3656_v10 = vpop.f32.mrf.mxu1 }
 0x29b   : > { %v3542_v33 = vadd.f32 %v3541_v24, %v3444_v51 }
 0x29c   : > { %v3798_v18 = vadd.f32 %v3797_v1, %v3750_v34  ;;  %v3821_v57 = vmul.f32 %v3750_v34, %v3750_v34 }
 0x29d   : > { %v3688_v56 = vadd.f32 %v3654_v43, %v3542_v33 }
 0x29e   : > { %v3836_v32 = vadd.f32 %v3835_v8, %v3821_v57 }
 0x29f   : > { %v3704_v12 = vrot.slane %v3688_v56, 1  ;;  %v3285_v35 = vpop.f32.mrf.mxu2 }
 0x2a0   : > { %v3318_v19 = vadd.f32 %v3285_v35, %v6529_v0 }
 0x2a1   : > { %v3727_v47 = vsel %vm6832_vm12, %v3703_v14, %v3704_v12  ;;  %v3546_v4 = vpop.f32.mrf.mxu0 }
 0x2a2   : > { %v3735_v55 = vsel %vm6325_vm13, 0.0, %v3727_v47  ;;  %v3446_v49 = vpop.f32.mrf.mxu3  ;;  %v3334_v53 = vadd.f32 %v3318_v19, %v6542_v22  ;;  %v3659_v1 = vpop.f32.mrf.mxu1  ;;  %v2948_v22 = vsel %vm6117_vm1, 0.0, %v6549_v11  ;;  %vm6834_vm13 = vmmov %vm6829_vm9 }
 0x2a3   : > { %v3751_v59 = vadd.f32 %v3735_v55, %v3332_v30  ;;  %v3544_v24 = vadd.f32 %v3543_v50, %v3446_v49  ;;  %vm6835_vm1 = vmmov %vm6829_vm9 }
 0x2a5   : > { %v5409_v43 = vpack.c.bf16 %v3751_v59, %v3750_v34  ;;  %v3799_v52 = vadd.f32 %v3798_v18, %v3751_v59  ;;  %v3822_v26 = vmul.f32 %v3751_v59, %v3751_v59  ;;  %v3689_v8 = vadd.f32 %v3656_v10, %v3544_v24 }
 0x2a7   : > { %5480 = vst [vmem:[%s6308_s9 + $0x48] sm:$0xff] %v5409_v43   ;;  %v3837_v15 = vadd.f32 %v3836_v32, %v3822_v26  ;;  %v3705_v14 = vrot.slane %v3689_v8, 1  ;;  %v3288_v17 = vpop.f32.mrf.mxu2 }
 0x2a8   : > { %v3319_v0 = vadd.f32 %v3288_v17, %v6536_v54 }
 0x2a9   : > { %v3726_v48 = vsel %vm6833_vm14, %v3704_v12, %v3705_v14  ;;  %v3548_v34 = vpop.f32.mrf.mxu0 }
 0x2aa   : > { %v3752_v39 = vadd.f32 %v3726_v48, %v3333_v28  ;;  %v3449_v30 = vpop.f32.mrf.mxu3  ;;  %v3335_v50 = vadd.f32 %v3319_v0, %v2948_v22  ;;  %v3661_v18 = vpop.f32.mrf.mxu1 }
 0x2ab   : > { %v3547_v51 = vadd.f32 %v3546_v4, %v3449_v30 }
 0x2ac   : > { %v3800_v44 = vadd.f32 %v3799_v52, %v3752_v39  ;;  %v3823_v33 = vmul.f32 %v3752_v39, %v3752_v39 }
 0x2ad   : > { %v3690_v57 = vadd.f32 %v3659_v1, %v3547_v51 }
 0x2ae   : > { %v3838_v10 = vadd.f32 %v3837_v15, %v3823_v33 }
 0x2af   : > { %v3706_v56 = vrot.slane %v3690_v57, 1  ;;  %v3290_v32 = vpop.f32.mrf.mxu2 }
 0x2b0   : > { %v3320_v31 = vadd.f32 %v3290_v32, %v6545_v42 }
 0x2b1   : > { %v3725_v28 = vsel %vm6834_vm13, %v3705_v14, %v3706_v56  ;;  %v3551_v35 = vpop.f32.mrf.mxu0 }
 0x2b2   : > { %v3737_v54 = vsel %vm6353_vm15, 0.0, %v3725_v28  ;;  %v3451_v11 = vpop.f32.mrf.mxu3  ;;  %v3336_v55 = vadd.f32 %v3320_v31, %v6558_v37  ;;  %v3664_v19 = vpop.f32.mrf.mxu1  ;;  %v2950_v37 = vsel %vm6149_vm4, 0.0, %v6565_v40  ;;  %vm6836_vm15 = vmmov %vm6835_vm1 }
 0x2b3   : > { %v3753_v12 = vadd.f32 %v3737_v54, %v3334_v53  ;;  %v3549_v47 = vadd.f32 %v3548_v34, %v3451_v11  ;;  %vm6837_vm4 = vmmov %vm6835_vm1 }
 0x2b5   : > { %v5414_v49 = vpack.c.bf16 %v3753_v12, %v3752_v39  ;;  %v3801_v59 = vadd.f32 %v3800_v44, %v3753_v12  ;;  %v3824_v24 = vmul.f32 %v3753_v12, %v3753_v12  ;;  %v3691_v4 = vadd.f32 %v3661_v18, %v3549_v47 }
 0x2b7   : > { %5481 = vst [vmem:[%s6308_s9 + $0x50] sm:$0xff] %v5414_v49   ;;  %v3839_v1 = vadd.f32 %v3838_v10, %v3824_v24  ;;  %v3707_v43 = vrot.slane %v3691_v4, 1  ;;  %v3293_v52 = vpop.f32.mrf.mxu2 }
 0x2b8   : > { %v3321_v42 = vadd.f32 %v3293_v52, %v6552_v7 }
 0x2b9   : > { %v3724_v3 = vsel %vm6835_vm1, %v3706_v56, %v3707_v43  ;;  %v3553_v15 = vpop.f32.mrf.mxu0 }
 0x2ba   : > { %v3754_v26 = vadd.f32 %v3724_v3, %v3335_v50  ;;  %v3454_v53 = vpop.f32.mrf.mxu3  ;;  %v3337_v17 = vadd.f32 %v3321_v42, %v2950_v37  ;;  %v3666_v39 = vpop.f32.mrf.mxu1 }
 0x2bb   : > { %v3552_v8 = vadd.f32 %v3551_v35, %v3454_v53 }
 0x2bc   : > { %v3802_v14 = vadd.f32 %v3801_v59, %v3754_v26  ;;  %v3825_v48 = vmul.f32 %v3754_v26, %v3754_v26 }
 0x2bd   : > { %v3692_v0 = vadd.f32 %v3664_v19, %v3552_v8 }
 0x2be   : > { %v3840_v30 = vadd.f32 %v3839_v1, %v3825_v48 }
 0x2bf   : > { %v3708_v22 = vrot.slane %v3692_v0, 1  ;;  %v3295_v34 = vpop.f32.mrf.mxu2 }
 0x2c0   : > { %v3322_v5 = vadd.f32 %v3295_v34, %v6561_v58 }
 0x2c1   : > { %v3723_v51 = vsel %vm6836_vm15, %v3707_v43, %v3708_v22  ;;  %v3556_v50 = vpop.f32.mrf.mxu0 }
 0x2c2   : > { %v3739_v7 = vsel %vm6381_vm0, 0.0, %v3723_v51  ;;  %v3456_v40 = vpop.f32.mrf.mxu3  ;;  %v3338_v18 = vadd.f32 %v3322_v5, %v6574_v2  ;;  %v3669_v57 = vpop.f32.mrf.mxu1  ;;  %v2952_v2 = vsel %vm6174_vm5, 0.0, %v6581_v36  ;;  %vm6838_vm0 = vmmov %vm6835_vm1 }
 0x2c3   : > { %v3755_v44 = vadd.f32 %v3739_v7, %v3336_v55  ;;  %v3554_v33 = vadd.f32 %v3553_v15, %v3456_v40  ;;  %vm6839_vm5 = vmmov %vm6838_vm0 }
 0x2c4   : > { %vm6844_vm7 = vmmov %vm6838_vm0 }
 0x2c5   : > { %v5419_v10 = vpack.c.bf16 %v3755_v44, %v3754_v26  ;;  %v3803_v56 = vadd.f32 %v3802_v14, %v3755_v44  ;;  %v3826_v28 = vmul.f32 %v3755_v44, %v3755_v44  ;;  %v3693_v32 = vadd.f32 %v3666_v39, %v3554_v33  ;;  %vm6850_vm9 = vmmov %vm6838_vm0 }
 0x2c6   : > { %vm6851_vm10 = vmmov %vm6838_vm0 }
 0x2c7   : > { %5482 = vst [vmem:[%s6308_s9 + $0x58] sm:$0xff] %v5419_v10   ;;  %v3841_v54 = vadd.f32 %v3840_v30, %v3826_v28  ;;  %v3709_v31 = vrot.slane %v3693_v32, 1  ;;  %v3298_v11 = vpop.f32.mrf.mxu2 }
 0x2c8   : > { %v3323_v58 = vadd.f32 %v3298_v11, %v6568_v16 }
 0x2c9   : > { %v3722_v25 = vsel %vm6837_vm4, %v3708_v22, %v3709_v31  ;;  %v3558_v55 = vpop.f32.mrf.mxu0 }
 0x2ca   : > { %v3756_v12 = vadd.f32 %v3722_v25, %v3337_v17  ;;  %v3459_v47 = vpop.f32.mrf.mxu3  ;;  %v3339_v59 = vadd.f32 %v3323_v58, %v2952_v2  ;;  %v3671_v24 = vpop.f32.mrf.mxu1 }
 0x2cb   : > { %v3557_v35 = vadd.f32 %v3556_v50, %v3459_v47 }
 0x2cc   : > { %v3804_v19 = vadd.f32 %v3803_v56, %v3756_v12  ;;  %v3827_v49 = vmul.f32 %v3756_v12, %v3756_v12 }
 0x2cd   : > { %v3694_v4 = vadd.f32 %v3669_v57, %v3557_v35 }
 0x2ce   : > { %v3842_v1 = vadd.f32 %v3841_v54, %v3827_v49 }
 0x2cf   : > { %v3710_v43 = vrot.slane %v3694_v4, 1  ;;  %v3300_v52 = vpop.f32.mrf.mxu2 }
 0x2d0   : > { %v3324_v41 = vadd.f32 %v3300_v52, %v6577_v61 }
 0x2d1   : > { %v3721_v3 = vsel %vm6838_vm0, %v3709_v31, %v3710_v43  ;;  %v3561_v37 = vpop.f32.mrf.mxu0 }
 0x2d2   : > { %v3741_v16 = vsel %vm6409_vm2, 0.0, %v3721_v3  ;;  %v3461_v36 = vpop.f32.mrf.mxu3  ;;  %v3340_v53 = vadd.f32 %v3324_v41, %v6590_v21  ;;  %v3674_v17 = vpop.f32.mrf.mxu1  ;;  %v2954_v21 = vsel %vm6199_vm6, 0.0, %v6597_v9  ;;  %vm6840_vm2 = vmmov %vm6838_vm0 }
 0x2d3   : > { %v3757_v26 = vadd.f32 %v3741_v16, %v3338_v18  ;;  %v3559_v42 = vadd.f32 %v3558_v55, %v3461_v36  ;;  %vm6841_vm6 = vmmov %vm6838_vm0 }
 0x2d5   : > { %v5424_v8 = vpack.c.bf16 %v3757_v26, %v3756_v12  ;;  %v3805_v15 = vadd.f32 %v3804_v19, %v3757_v26  ;;  %v3828_v14 = vmul.f32 %v3757_v26, %v3757_v26  ;;  %v3695_v48 = vadd.f32 %v3671_v24, %v3559_v42  ;;  %v6845_v26 = vld [vmem:[#allocation5_spill] sm:$0xff] }
 0x2d6   : > { %vm6846_vm8 = vnez %v6845_v26 }
 0x2d7   : > { %5483 = vst [vmem:[%s6308_s9 + $0x60] sm:$0xff] %v5424_v8   ;;  %v3843_v39 = vadd.f32 %v3842_v1, %v3828_v14  ;;  %v3711_v0 = vrot.slane %v3695_v48, 1  ;;  %v3303_v30 = vpop.f32.mrf.mxu2  ;;  %v6847_v14 = vld [vmem:[#allocation9_spill] sm:$0xff] }
 0x2d8   : > { %v3325_v61 = vadd.f32 %v3303_v30, %v6584_v62  ;;  %v6848_v30 = vld [vmem:[#allocation7_spill] sm:$0xff] }
 0x2d9   : > { %v3720_v38 = vsel %vm6839_vm5, %v3710_v43, %v3711_v0  ;;  %v3563_v50 = vpop.f32.mrf.mxu0 }
 0x2da   : > { %v3758_v22 = vadd.f32 %v3720_v38, %v3339_v59  ;;  %v3464_v51 = vpop.f32.mrf.mxu3  ;;  %v3341_v40 = vadd.f32 %v3325_v61, %v2954_v21  ;;  %v3676_v57 = vpop.f32.mrf.mxu1  ;;  %v6842_v59 = vld [vmem:[#allocation4_spill] sm:$0xff] }
 0x2db   : > { %v3562_v34 = vadd.f32 %v3561_v37, %v3464_v51  ;;  %v6849_v21 = vld [vmem:[#allocation8_spill] sm:$0xff] }
 0x2dc   : > { %v3806_v7 = vadd.f32 %v3805_v15, %v3758_v22  ;;  %v3829_v5 = vmul.f32 %v3758_v22, %v3758_v22 }
 0x2dd   : > { %v3696_v44 = vadd.f32 %v3674_v17, %v3562_v34  ;;  %v2412_v34 = vrot.slane %v6849_v21, 4 }
 0x2de   : > { %v3844_v33 = vadd.f32 %v3843_v39, %v3829_v5 }
 0x2df   : > { %v3712_v18 = vrot.slane %v3696_v44, 1  ;;  %v3305_v56 = vpop.f32.mrf.mxu2 }
 0x2e0   : > { %v3326_v63 = vadd.f32 %v3305_v56, %v6593_v23 }
 0x2e1   : > { %v3719_v10 = vsel %vm6840_vm2, %v3711_v0, %v3712_v18  ;;  %v3566_v2 = vpop.f32.mrf.mxu0 }
 0x2e2   : > { %v3743_v62 = vsel %vm6436_vm3, 0.0, %v3719_v10  ;;  %v3466_v9 = vpop.f32.mrf.mxu3  ;;  %v3342_v54 = vadd.f32 %v3326_v63, %v6606_v46  ;;  %v3679_v19 = vpop.f32.mrf.mxu1  ;;  %vm6843_vm3 = vnez %v6842_v59 }
 0x2e3   : > { %v3759_v28 = vadd.f32 %v3743_v62, %v3340_v53  ;;  %v3564_v32 = vadd.f32 %v3563_v50, %v3466_v9  ;;  %v2956_v46 = vsel %vm6843_vm3, 0.0, %v6613_v45 }
 0x2e5   : > { %v5429_v31 = vpack.c.bf16 %v3759_v28, %v3758_v22  ;;  %v3807_v25 = vadd.f32 %v3806_v7, %v3759_v28  ;;  %v3830_v11 = vmul.f32 %v3759_v28, %v3759_v28  ;;  %v3697_v12 = vadd.f32 %v3676_v57, %v3564_v32 }
 0x2e6   : > { %v2374_v22 = vrot.slane %v6848_v30, 4 }
 0x2e7   : > { %5484 = vst [vmem:[%s6308_s9 + $0x68] sm:$0xff] %v5429_v31   ;;  %v3845_v58 = vadd.f32 %v3844_v33, %v3830_v11  ;;  %v3713_v47 = vrot.slane %v3697_v12, 1  ;;  %v3308_v13 = vpop.f32.mrf.mxu2 }
 0x2e8   : > { %v3327_v23 = vadd.f32 %v3308_v13, %v6600_v27  ;;  %v2375_v5 = vadd.f32 %v2374_v22, %v6848_v30 }
 0x2e9   : > { %v3718_v35 = vsel %vm6841_vm6, %v3712_v18, %v3713_v47  ;;  %v3568_v42 = vpop.f32.mrf.mxu0  ;;  %v2413_v18 = vadd.f32 %v2412_v34, %v6849_v21 }
 0x2ea   : > { %v3760_v55 = vadd.f32 %v3718_v35, %v3341_v40  ;;  %v3469_v49 = vpop.f32.mrf.mxu3  ;;  %v3343_v43 = vadd.f32 %v3327_v23, %v2956_v46  ;;  %v3681_v15 = vpop.f32.mrf.mxu1  ;;  %v6852_v40 = vld [vmem:[#allocation6_spill] sm:$0xff]  ;;  %v2376_v63 = vrot.slane %v2375_v5, 2 }
 0x2eb   : > { %v3567_v24 = vadd.f32 %v3566_v2, %v3469_v49  ;;  %vm6853_vm11 = vnez %v6852_v40  ;;  %v2414_v6 = vrot.slane %v2413_v18, 2 }
 0x2ec   : > { %v3808_v4 = vadd.f32 %v3807_v25, %v3760_v55  ;;  %v3831_v1 = vmul.f32 %v3760_v55, %v3760_v55  ;;  %v2377_v32 = vadd.f32 %v2376_v63, %v2375_v5 }
 0x2ed   : > { %v3698_v3 = vadd.f32 %v3679_v19, %v3567_v24  ;;  %v2415_v25 = vadd.f32 %v2414_v6, %v2413_v18 }
 0x2ee   : > { %v3846_v52 = vadd.f32 %v3845_v58, %v3831_v1  ;;  %v2378_v58 = vrot.slane %v2377_v32, 1 }
 0x2ef   : > { %v3714_v16 = vrot.slane %v3698_v3, 1  ;;  %v3310_v36 = vpop.f32.mrf.mxu2  ;;  %v2416_v35 = vrot.slane %v2415_v25, 1 }
 0x2f0   : > { %v3328_v53 = vadd.f32 %v3310_v36, %v6609_v60  ;;  %v2379_v19 = vadd.f32 %v2378_v58, %v2377_v32 }
 0x2f1   : > { %v3717_v41 = vsel %vm6844_vm7, %v3713_v47, %v3714_v16  ;;  %v2417_v59 = vadd.f32 %v2416_v35, %v2415_v25 }
 0x2f2   : > { %v3745_v27 = vsel %vm6846_vm8, 0.0, %v3717_v41  ;;  %v3471_v37 = vpop.f32.mrf.mxu3  ;;  %v3344_v48 = vadd.f32 %v3328_v53, %v6847_v14 }
 0x2f3   : > { %v3761_v45 = vadd.f32 %v3745_v27, %v3342_v54  ;;  %v3569_v8 = vadd.f32 %v3568_v42, %v3471_v37 }
 0x2f5   : > { %v5434_v17 = vpack.c.bf16 %v3761_v45, %v3760_v55  ;;  %v3809_v39 = vadd.f32 %v3808_v4, %v3761_v45  ;;  %v3832_v0 = vmul.f32 %v3761_v45, %v3761_v45  ;;  %v3699_v38 = vadd.f32 %v3681_v15, %v3569_v8 }
 0x2f7   : > { %5485 = vst [vmem:[%s6308_s9 + $0x70] sm:$0xff] %v5434_v17   ;;  %v3847_v61 = vadd.f32 %v3846_v52, %v3832_v0  ;;  %v3715_v51 = vrot.slane %v3699_v38, 1 }
 0x2f9   : > { %v3716_v60 = vsel %vm6850_vm9, %v3714_v16, %v3715_v51  ;;  %v3731_v7 = vsel %vm6851_vm10, %v3715_v51, %v3700_v29 }
 0x2fa   : > { %v3747_v44 = vsel %vm6853_vm11, 0.0, %v3731_v7  ;;  %v3762_v33 = vadd.f32 %v3716_v60, %v3343_v43 }
 0x2fb   : > { %v3763_v50 = vadd.f32 %v3747_v44, %v3344_v48 }
 0x2fc   : > { %v3810_v57 = vadd.f32 %v3809_v39, %v3762_v33  ;;  %v3833_v10 = vmul.f32 %v3762_v33, %v3762_v33 }
 0x2fd   : > { %v5439_v56 = vpack.c.bf16 %v3763_v50, %v3762_v33  ;;  %v3834_v62 = vmul.f32 %v3763_v50, %v3763_v50 }
 0x2fe   : > { %v3811_v20 = vadd.f32 %v3810_v57, %v3763_v50  ;;  %v3848_v9 = vadd.f32 %v3847_v61, %v3833_v10 }
 0x2ff   : > { %5486 = vst [vmem:[%s6308_s9 + $0x78] sm:$0xff] %v5439_v56  }
 0x300   : > { %v3812_v29 = vrot.slane %v3811_v20, 4  ;;  %v3849_v28 = vadd.f32 %v3848_v9, %v3834_v62 }
 0x302   : > { %v3813_v54 = vadd.f32 %v3812_v29, %v3811_v20  ;;  %v3850_v31 = vrot.slane %v3849_v28, 4 }
 0x304   : > { %v3814_v11 = vrot.slane %v3813_v54, 2  ;;  %v3851_v12 = vadd.f32 %v3850_v31, %v3849_v28 }
 0x306   : > { %v3815_v47 = vadd.f32 %v3814_v11, %v3813_v54  ;;  %v3852_v2 = vrot.slane %v3851_v12, 2 }
 0x308   : > { %v3816_v13 = vrot.slane %v3815_v47, 1  ;;  %v3853_v55 = vadd.f32 %v3852_v2, %v3851_v12 }
 0x30a   : > { %v3817_v23 = vadd.f32 %v3816_v13, %v3815_v47  ;;  %v3854_v49 = vrot.slane %v3853_v55, 1 }
 0x30c   : > { %v3818_v46 = vadd.f32 %v3817_v23, %v2379_v19  ;;  %v3855_v24 = vadd.f32 %v3854_v49, %v3853_v55 }
 0x30e   : > { %v3856_v4 = vadd.f32 %v3855_v24, %v2417_v59  ;;  %3857 = vst [vmem:[%s363_s23] sm:$0x1] %v3818_v46 }
 0x310   : > { %3858 = vst [vmem:[%s363_s23 + $0x1] sm:$0x1] %v3856_v4 }
 0x311 PF: > { %s18_s27 = sadd.s32 1, %s5602_s27   ;;  %s6854_s23 = smov %s5594_s25 }
 0x312   : > { %p15_p7 = scmp.ge.s32.totalorder %s18_s27, 12   ;;  %s6855_s24 = smov %s5598_s26 }
 0x313   : > { %s6856_s25 = smov %s6859_s4  ;;  %s6857_s26 = smov %s6863_s28 }
 0x314   :  { %17 = sbr.rel (!%p15_p7) target bundleno = 3 (0x3), region = 94 }

</bundles_post_ra>
